<compile_context>
chip_gen: v6e
topology: v6e:2x2x1
jax: 0.10.0
libtpu: 0.0.40
codegen_flags: <defaults>
</compile_context>

<pallas_src>
import math
import jax
import jax.numpy as jnp
from jax.experimental import pallas as pl
from jax.experimental.pallas import tpu as pltpu

# ---------------- model config (matches the nn.Module __init__ args) ----------------
EMB = 32          # emb_size
NHEAD = 4         # nhead
NUM_ENC = 2       # num_encoder_layers
NUM_DEC = 2       # num_decoder_layers
DROPOUT = 0.1     # unused at inference
ENC_VOC = 50      # enc_voc_size
DEC_VOC = 60      # dec_voc_size
FFN = EMB * 4     # dim_feedforward = emb_size * 4
LN_EPS = 1e-5
VOC_PAD = 128     # lane-dense padded prediction-head width (>= DEC_VOC)


# ---------------- in-kernel helpers (traced inside the fused kernels) ----------------
def _bf(x):
    return x.astype(jnp.bfloat16)


def _linear(x, w, b, relu=False):
    """y = x @ w + b.  x: f32 [M,K], w: bf16 [K,N] (VMEM-resident), b: f32 [1,N]."""
    y = jnp.dot(_bf(x), w, preferred_element_type=jnp.float32) + b
    if relu:
        y = jnp.maximum(y, 0.0)
    return y


def _layernorm(h, g, b):
    mean = jnp.mean(h, axis=-1, keepdims=True)
    c = h - mean
    var = jnp.mean(c * c, axis=-1, keepdims=True)
    return c * jax.lax.rsqrt(var + LN_EPS) * g + b


def _mha(q, k, v, add_mask, wo, bo, nhead, scale):
    """Multi-head attention + output projection, all heads in one invocation.
    q: [Lq,E], k/v: [Lk,E] (f32), add_mask broadcastable to [Lq,Lk], wo: bf16 [E,E], bo: f32 [1,E]."""
    E = q.shape[-1]
    Dh = E // nhead
    out = None
    for h in range(nhead):
        sl = slice(h * Dh, (h + 1) * Dh)
        qh, kh, vh = _bf(q[:, sl]), _bf(k[:, sl]), _bf(v[:, sl])
        # scores = qh @ kh^T (contract last dims; no explicit transpose materialized)
        s = jax.lax.dot_general(qh, kh, (((1,), (1,)), ((), ())),
                                preferred_element_type=jnp.float32) * scale + add_mask
        s = s - jnp.max(s, axis=-1, keepdims=True)
        p = jnp.exp(s)
        p = p * pl.reciprocal(jnp.sum(p, axis=-1, keepdims=True), approx=True)
        oh = jnp.dot(_bf(p), vh, preferred_element_type=jnp.float32)            # [Lq, Dh]
        c = jnp.dot(_bf(oh), wo[sl, :], preferred_element_type=jnp.float32)     # [Lq, E]
        out = c if out is None else out + c
    return out + bo


# ---------------- fused encoder-stack kernel ----------------
def encoder_kernel(x_ref, smask_ref, skb_ref,
                   wqkv_ref, bqkv_ref, wo_ref, bo_ref,
                   g1_ref, b1_ref,
                   w1_ref, bf1_ref, w2_ref, bf2_ref,
                   g2_ref, b2_ref,
                   gf_ref, bff_ref,
                   mem_ref):
    E = EMB
    scale = 1.0 / math.sqrt(E // NHEAD)
    x = x_ref[0]                                    # [S, E]
    mask = smask_ref[...] + skb_ref[0]              # [S, S] + [1, S] -> [S, S]
    for l in range(NUM_ENC):
        qkv = _linear(x, wqkv_ref[l], bqkv_ref[l])  # fused QKV: [S, 3E]
        q, k, v = qkv[:, :E], qkv[:, E:2 * E], qkv[:, 2 * E:]
        att = _mha(q, k, v, mask, wo_ref[l], bo_ref[l], NHEAD, scale)
        x = _layernorm(x + att, g1_ref[l], b1_ref[l])
        h = _linear(x, w1_ref[l], bf1_ref[l], relu=True)
        h = _linear(h, w2_ref[l], bf2_ref[l])
        x = _layernorm(x + h, g2_ref[l], b2_ref[l])
    mem_ref[0] = _layernorm(x, gf_ref[...], bff_ref[...])   # encoder final LayerNorm


# ---------------- fused decoder-stack (+ predict head) kernel ----------------
def decoder_kernel(y_ref, mem_ref, tmask_ref, tkb_ref, mkb_ref,
                   sa_wqkv_ref, sa_bqkv_ref, sa_wo_ref, sa_bo_ref,
                   g1_ref, b1_ref,
                   ca_wq_ref, ca_bq_ref, ca_wkv_ref, ca_bkv_ref, ca_wo_ref, ca_bo_ref,
                   g2_ref, b2_ref,
                   w1_ref, bf1_ref, w2_ref, bf2_ref,
                   g3_ref, b3_ref,
                   gf_ref, bff_ref,
                   pw_ref, pb_ref,
                   out_ref):
    E = EMB
    scale = 1.0 / math.sqrt(E // NHEAD)
    y = y_ref[0]                                    # [T, E]
    mem = mem_ref[0]                                # [S, E]
    sa_mask = tmask_ref[...] + tkb_ref[0]           # [T, T]
    ca_mask = mkb_ref[0]                            # [1, S] (broadcasts over query rows)
    for l in range(NUM_DEC):
        # self-attention (fused QKV)
        qkv = _linear(y, sa_wqkv_ref[l], sa_bqkv_ref[l])
        q, k, v = qkv[:, :E], qkv[:, E:2 * E], qkv[:, 2 * E:]
        att = _mha(q, k, v, sa_mask, sa_wo_ref[l], sa_bo_ref[l], NHEAD, scale)
        y = _layernorm(y + att, g1_ref[l], b1_ref[l])
        # cross-attention (Q from decoder, fused KV from memory)
        q = _linear(y, ca_wq_ref[l], ca_bq_ref[l])
        kv = _linear(mem, ca_wkv_ref[l], ca_bkv_ref[l])
        k, v = kv[:, :E], kv[:, E:]
        att = _mha(q, k, v, ca_mask, ca_wo_ref[l], ca_bo_ref[l], NHEAD, scale)
        y = _layernorm(y + att, g2_ref[l], b2_ref[l])
        # feed-forward
        h = _linear(y, w1_ref[l], bf1_ref[l], relu=True)
        h = _linear(h, w2_ref[l], bf2_ref[l])
        y = _layernorm(y + h, g3_ref[l], b3_ref[l])
    y = _layernorm(y, gf_ref[...], bff_ref[...])    # decoder final LayerNorm
    out_ref[0] = _linear(y, pw_ref[...], pb_ref[...])   # lane-dense [T, VOC_PAD] logits


# ---------------- pallas_call wrappers ----------------
def run_encoder(params, enc_x, src_mask, src_kb):
    B, S, E = enc_x.shape
    L, F = NUM_ENC, FFN
    p = params["enc"]

    def c3(shape):
        return pl.BlockSpec(shape, lambda b: (0, 0, 0))

    def c2(shape):
        return pl.BlockSpec(shape, lambda b: (0, 0))

    in_specs = [
        pl.BlockSpec((1, S, E), lambda b: (b, 0, 0)),      # enc_x
        c2((S, S)),                                        # src_mask (shared)
        pl.BlockSpec((1, 1, S), lambda b: (b, 0, 0)),      # src key-padding bias
        c3((L, E, 3 * E)), c3((L, 1, 3 * E)),              # wqkv, bqkv
        c3((L, E, E)), c3((L, 1, E)),                      # wo, bo
        c3((L, 1, E)), c3((L, 1, E)),                      # ln1 g, b
        c3((L, E, F)), c3((L, 1, F)),                      # ffn w1, b1
        c3((L, F, E)), c3((L, 1, E)),                      # ffn w2, b2
        c3((L, 1, E)), c3((L, 1, E)),                      # ln2 g, b
        c2((1, E)), c2((1, E)),                            # final norm g, b
    ]
    return pl.pallas_call(
        encoder_kernel,
        grid=(B,),
        out_shape=jax.ShapeDtypeStruct((B, S, E), jnp.float32),
        in_specs=in_specs,
        out_specs=pl.BlockSpec((1, S, E), lambda b: (b, 0, 0)),
        compiler_params=pltpu.CompilerParams(dimension_semantics=("parallel",)),
    )(enc_x, src_mask, src_kb,
      p["wqkv"], p["bqkv"], p["wo"], p["bo"],
      p["g1"], p["b1"],
      p["w1"], p["bf1"], p["w2"], p["bf2"],
      p["g2"], p["b2"],
      params["enc_norm_g"], params["enc_norm_b"])


def run_decoder(params, dec_x, memory, tgt_mask, tgt_kb, mem_kb):
    B, T, E = dec_x.shape
    S = memory.shape[1]
    L, F, VP = NUM_DEC, FFN, VOC_PAD
    p = params["dec"]

    def c3(shape):
        return pl.BlockSpec(shape, lambda b: (0, 0, 0))

    def c2(shape):
        return pl.BlockSpec(shape, lambda b: (0, 0))

    in_specs = [
        pl.BlockSpec((1, T, E), lambda b: (b, 0, 0)),      # dec_x
        pl.BlockSpec((1, S, E), lambda b: (b, 0, 0)),      # memory
        c2((T, T)),                                        # tgt_mask (shared, causal)
        pl.BlockSpec((1, 1, T), lambda b: (b, 0, 0)),      # tgt key-padding bias
        pl.BlockSpec((1, 1, S), lambda b: (b, 0, 0)),      # memory key-padding bias
        c3((L, E, 3 * E)), c3((L, 1, 3 * E)),              # self-attn wqkv, bqkv
        c3((L, E, E)), c3((L, 1, E)),                      # self-attn wo, bo
        c3((L, 1, E)), c3((L, 1, E)),                      # ln1 g, b
        c3((L, E, E)), c3((L, 1, E)),                      # cross-attn wq, bq
        c3((L, E, 2 * E)), c3((L, 1, 2 * E)),              # cross-attn wkv, bkv
        c3((L, E, E)), c3((L, 1, E)),                      # cross-attn wo, bo
        c3((L, 1, E)), c3((L, 1, E)),                      # ln2 g, b
        c3((L, E, F)), c3((L, 1, F)),                      # ffn w1, b1
        c3((L, F, E)), c3((L, 1, E)),                      # ffn w2, b2
        c3((L, 1, E)), c3((L, 1, E)),                      # ln3 g, b
        c2((1, E)), c2((1, E)),                            # final norm g, b
        c2((E, VP)), c2((1, VP)),                          # predict head (lane-padded)
    ]
    return pl.pallas_call(
        decoder_kernel,
        grid=(B,),
        out_shape=jax.ShapeDtypeStruct((B, T, VP), jnp.float32),
        in_specs=in_specs,
        out_specs=pl.BlockSpec((1, T, VP), lambda b: (b, 0, 0)),
        compiler_params=pltpu.CompilerParams(dimension_semantics=("parallel",)),
    )(dec_x, memory, tgt_mask, tgt_kb, mem_kb,
      p["sa_wqkv"], p["sa_bqkv"], p["sa_wo"], p["sa_bo"],
      p["g1"], p["b1"],
      p["ca_wq"], p["ca_bq"], p["ca_wkv"], p["ca_bkv"], p["ca_wo"], p["ca_bo"],
      p["g2"], p["b2"],
      p["w1"], p["bf1"], p["w2"], p["bf2"],
      p["g3"], p["b3"],
      params["dec_norm_g"], params["dec_norm_b"],
      params["pred_w"], params["pred_b"])


# ---------------- glue (plain JAX: embeddings, positional table, mask biases) ----------------
def position_encoding(seq_len, emb_size):
    pos = jnp.arange(seq_len, dtype=jnp.float32)[:, None]
    div = jnp.exp(
        jnp.arange(0, emb_size, 2, dtype=jnp.float32) * (-math.log(10000.0) / emb_size)
    )
    pe = jnp.zeros((seq_len, emb_size), jnp.float32)
    pe = pe.at[:, 0::2].set(jnp.sin(pos * div))
    pe = pe.at[:, 1::2].set(jnp.cos(pos * div))
    return pe


def seq2seq_transformer_forward(
    params, src, tgt, src_mask, tgt_mask,
    src_key_padding_mask, tgt_key_padding_mask, memory_key_padding_mask=None,
):
    E = EMB
    B, S = src.shape
    T = tgt.shape[1]

    # embeddings + positional encoding (dropout = identity at inference)
    enc_x = jnp.take(params["enc_emb"], src, axis=0) + position_encoding(S, E)[None]
    dec_x = jnp.take(params["dec_emb"], tgt, axis=0) + position_encoding(T, E)[None]

    # tiny additive key-padding biases (mask is finished inside the kernels)
    src_kb = jnp.where(src_key_padding_mask, -1e9, 0.0).astype(jnp.float32).reshape(B, 1, S)
    tgt_kb = jnp.where(tgt_key_padding_mask, -1e9, 0.0).astype(jnp.float32).reshape(B, 1, T)
    if memory_key_padding_mask is None:
        mem_kb = jnp.zeros((B, 1, S), jnp.float32)
    else:
        mem_kb = jnp.where(memory_key_padding_mask, -1e9, 0.0).astype(jnp.float32).reshape(B, 1, S)

    memory = run_encoder(params, enc_x, src_mask.astype(jnp.float32), src_kb)
    logits_pad = run_decoder(params, dec_x, memory, tgt_mask.astype(jnp.float32), tgt_kb, mem_kb)
    return logits_pad[:, :, :DEC_VOC]


# ---------------- deterministic parameter init ----------------
def init_params(key):
    keys = iter(jax.random.split(key, 128))
    E, F = EMB, FFN

    def w(shape, scale=0.02):
        return scale * jax.random.normal(next(keys), shape, dtype=jnp.float32)

    def wb(shape, scale=0.02):
        return w(shape, scale).astype(jnp.bfloat16)   # bf16 matmul weights, f32 accumulation

    def zeros(shape):
        return jnp.zeros(shape, jnp.float32)

    def ones(shape):
        return jnp.ones(shape, jnp.float32)

    enc = dict(
        wqkv=wb((NUM_ENC, E, 3 * E)), bqkv=zeros((NUM_ENC, 1, 3 * E)),
        wo=wb((NUM_ENC, E, E)), bo=zeros((NUM_ENC, 1, E)),
        g1=ones((NUM_ENC, 1, E)), b1=zeros((NUM_ENC, 1, E)),
        w1=wb((NUM_ENC, E, F)), bf1=zeros((NUM_ENC, 1, F)),
        w2=wb((NUM_ENC, F, E)), bf2=zeros((NUM_ENC, 1, E)),
        g2=ones((NUM_ENC, 1, E)), b2=zeros((NUM_ENC, 1, E)),
    )
    dec = dict(
        sa_wqkv=wb((NUM_DEC, E, 3 * E)), sa_bqkv=zeros((NUM_DEC, 1, 3 * E)),
        sa_wo=wb((NUM_DEC, E, E)), sa_bo=zeros((NUM_DEC, 1, E)),
        g1=ones((NUM_DEC, 1, E)), b1=zeros((NUM_DEC, 1, E)),
        ca_wq=wb((NUM_DEC, E, E)), ca_bq=zeros((NUM_DEC, 1, E)),
        ca_wkv=wb((NUM_DEC, E, 2 * E)), ca_bkv=zeros((NUM_DEC, 1, 2 * E)),
        ca_wo=wb((NUM_DEC, E, E)), ca_bo=zeros((NUM_DEC, 1, E)),
        g2=ones((NUM_DEC, 1, E)), b2=zeros((NUM_DEC, 1, E)),
        w1=wb((NUM_DEC, E, F)), bf1=zeros((NUM_DEC, 1, F)),
        w2=wb((NUM_DEC, F, E)), bf2=zeros((NUM_DEC, 1, E)),
        g3=ones((NUM_DEC, 1, E)), b3=zeros((NUM_DEC, 1, E)),
    )
    pred_w = jnp.zeros((E, VOC_PAD), jnp.float32).at[:, :DEC_VOC].set(
        w((E, DEC_VOC))).astype(jnp.bfloat16)
    pred_b = zeros((1, VOC_PAD))

    return dict(
        enc_emb=w((ENC_VOC, E), 1.0),
        dec_emb=w((DEC_VOC, E), 1.0),
        enc=enc, dec=dec,
        enc_norm_g=ones((1, E)), enc_norm_b=zeros((1, E)),
        dec_norm_g=ones((1, E)), dec_norm_b=zeros((1, E)),
        pred_w=pred_w, pred_b=pred_b,
    )


# ---------------- main ----------------
if __name__ == "__main__":
    key = jax.random.PRNGKey(0)
    pkey, skey, tkey = jax.random.split(key, 3)
    params = init_params(pkey)

    B, S, T = 2, 8, 8
    src = jax.random.randint(skey, (B, S), 0, ENC_VOC)
    tgt = jax.random.randint(tkey, (B, T), 0, DEC_VOC)

    src_mask = jnp.zeros((S, S), jnp.float32)                                   # no src masking
    tgt_mask = jnp.where(jnp.triu(jnp.ones((T, T), bool), k=1), -1e9, 0.0)      # causal
    tgt_mask = tgt_mask.astype(jnp.float32)
    src_key_padding_mask = jnp.array(
        [[False] * S, [False] * (S - 2) + [True] * 2], dtype=bool)
    tgt_key_padding_mask = jnp.array(
        [[False] * T, [False] * (T - 1) + [True] * 1], dtype=bool)
    memory_key_padding_mask = src_key_padding_mask

    fwd = jax.jit(seq2seq_transformer_forward)
    logits = fwd(
        params, src, tgt, src_mask, tgt_mask,
        src_key_padding_mask, tgt_key_padding_mask, memory_key_padding_mask,
    )
    jax.block_until_ready(logits)

    assert logits.shape == (B, T, DEC_VOC), logits.shape
    assert bool(jnp.all(jnp.isfinite(logits)))
    print("KERNEL_OK")
</pallas_src>

<mosaic_0001>
module attributes {stable_mosaic.version = 11 : i64} {
  func.func @encoder_kernel(%arg0: i32, %arg1: memref<1x8x32xf32, #tpu.memory_space<vmem>>, %arg2: memref<8x8xf32, #tpu.memory_space<vmem>>, %arg3: memref<1x1x8xf32, #tpu.memory_space<vmem>>, %arg4: memref<2x32x96xbf16, #tpu.memory_space<vmem>>, %arg5: memref<2x1x96xf32, #tpu.memory_space<vmem>>, %arg6: memref<2x32x32xbf16, #tpu.memory_space<vmem>>, %arg7: memref<2x1x32xf32, #tpu.memory_space<vmem>>, %arg8: memref<2x1x32xf32, #tpu.memory_space<vmem>>, %arg9: memref<2x1x32xf32, #tpu.memory_space<vmem>>, %arg10: memref<2x32x128xbf16, #tpu.memory_space<vmem>>, %arg11: memref<2x1x128xf32, #tpu.memory_space<vmem>>, %arg12: memref<2x128x32xbf16, #tpu.memory_space<vmem>>, %arg13: memref<2x1x32xf32, #tpu.memory_space<vmem>>, %arg14: memref<2x1x32xf32, #tpu.memory_space<vmem>>, %arg15: memref<2x1x32xf32, #tpu.memory_space<vmem>>, %arg16: memref<1x32xf32, #tpu.memory_space<vmem>>, %arg17: memref<1x32xf32, #tpu.memory_space<vmem>>, %arg18: memref<1x8x32xf32, #tpu.memory_space<vmem>>) attributes {dimension_semantics = [#tpu.dimension_semantics<parallel>], iteration_bounds = array<i64: 2>, scalar_prefetch = 0 : i64, scratch_operands = 0 : i64, tpu.core_type = #tpu.core_type<tc>, window_params = [{transform_indices = @transform_0, window_bounds = array<i64: 1, 8, 32>}, {pipeline_mode = #tpu.pipeline_mode<synchronous>, transform_indices = @transform_1, window_bounds = array<i64: 8, 8>}, {transform_indices = @transform_2, window_bounds = array<i64: 1, 1, 8>}, {pipeline_mode = #tpu.pipeline_mode<synchronous>, transform_indices = @transform_3, window_bounds = array<i64: 2, 32, 96>}, {pipeline_mode = #tpu.pipeline_mode<synchronous>, transform_indices = @transform_4, window_bounds = array<i64: 2, 1, 96>}, {pipeline_mode = #tpu.pipeline_mode<synchronous>, transform_indices = @transform_5, window_bounds = array<i64: 2, 32, 32>}, {pipeline_mode = #tpu.pipeline_mode<synchronous>, transform_indices = @transform_6, window_bounds = array<i64: 2, 1, 32>}, {pipeline_mode = #tpu.pipeline_mode<synchronous>, transform_indices = @transform_7, window_bounds = array<i64: 2, 1, 32>}, {pipeline_mode = #tpu.pipeline_mode<synchronous>, transform_indices = @transform_8, window_bounds = array<i64: 2, 1, 32>}, {pipeline_mode = #tpu.pipeline_mode<synchronous>, transform_indices = @transform_9, window_bounds = array<i64: 2, 32, 128>}, {pipeline_mode = #tpu.pipeline_mode<synchronous>, transform_indices = @transform_10, window_bounds = array<i64: 2, 1, 128>}, {pipeline_mode = #tpu.pipeline_mode<synchronous>, transform_indices = @transform_11, window_bounds = array<i64: 2, 128, 32>}, {pipeline_mode = #tpu.pipeline_mode<synchronous>, transform_indices = @transform_12, window_bounds = array<i64: 2, 1, 32>}, {pipeline_mode = #tpu.pipeline_mode<synchronous>, transform_indices = @transform_13, window_bounds = array<i64: 2, 1, 32>}, {pipeline_mode = #tpu.pipeline_mode<synchronous>, transform_indices = @transform_14, window_bounds = array<i64: 2, 1, 32>}, {pipeline_mode = #tpu.pipeline_mode<synchronous>, transform_indices = @transform_15, window_bounds = array<i64: 1, 32>}, {pipeline_mode = #tpu.pipeline_mode<synchronous>, transform_indices = @transform_16, window_bounds = array<i64: 1, 32>}, {transform_indices = @transform_17, window_bounds = array<i64: 1, 8, 32>}]} {
    %c0 = arith.constant 0 : index
    %c0_0 = arith.constant 0 : index
    %c0_1 = arith.constant 0 : index
    %0 = vector.load %arg1[%c0, %c0_0, %c0_1] : memref<1x8x32xf32, #tpu.memory_space<vmem>>, vector<1x8x32xf32>
    %1 = vector.shape_cast %0 : vector<1x8x32xf32> to vector<8x32xf32>
    %c0_2 = arith.constant 0 : index
    %c0_3 = arith.constant 0 : index
    %2 = vector.load %arg2[%c0_2, %c0_3] : memref<8x8xf32, #tpu.memory_space<vmem>>, vector<8x8xf32>
    %c0_4 = arith.constant 0 : index
    %c0_5 = arith.constant 0 : index
    %c0_6 = arith.constant 0 : index
    %3 = vector.load %arg3[%c0_4, %c0_5, %c0_6] : memref<1x1x8xf32, #tpu.memory_space<vmem>>, vector<1x1x8xf32>
    %4 = vector.shape_cast %3 : vector<1x1x8xf32> to vector<1x8xf32>
    %5 = vector.broadcast %4 : vector<1x8xf32> to vector<8x8xf32>
    %6 = arith.addf %2, %5 : vector<8x8xf32>
    %c0_7 = arith.constant 0 : index
    %c0_8 = arith.constant 0 : index
    %c0_9 = arith.constant 0 : index
    %7 = vector.load %arg4[%c0_7, %c0_8, %c0_9] : memref<2x32x96xbf16, #tpu.memory_space<vmem>>, vector<1x32x96xbf16>
    %8 = vector.shape_cast %7 : vector<1x32x96xbf16> to vector<32x96xbf16>
    %c0_10 = arith.constant 0 : index
    %c0_11 = arith.constant 0 : index
    %c0_12 = arith.constant 0 : index
    %9 = vector.load %arg5[%c0_10, %c0_11, %c0_12] : memref<2x1x96xf32, #tpu.memory_space<vmem>>, vector<1x1x96xf32>
    %10 = vector.shape_cast %9 : vector<1x1x96xf32> to vector<1x96xf32>
    %11 = arith.truncf %1 : vector<8x32xf32> to vector<8x32xbf16>
    %cst = arith.constant dense<0.000000e+00> : vector<8x96xf32>
    %12 = tpu.matmul %11, %8, %cst {dimension_numbers = #tpu.dot_dimension_numbers<[1], [0], [0], [1], [0, 0, 1, 1], [], []>} : vector<8x32xbf16>, vector<32x96xbf16>, vector<8x96xf32> -> vector<8x96xf32>
    %13 = vector.broadcast %10 : vector<1x96xf32> to vector<8x96xf32>
    %14 = arith.addf %12, %13 : vector<8x96xf32>
    %15 = vector.extract_strided_slice %14 {offsets = [0, 0], sizes = [8, 32], strides = [1, 1]} : vector<8x96xf32> to vector<8x32xf32>
    %16 = vector.extract_strided_slice %14 {offsets = [0, 32], sizes = [8, 32], strides = [1, 1]} : vector<8x96xf32> to vector<8x32xf32>
    %17 = vector.extract_strided_slice %14 {offsets = [0, 64], sizes = [8, 32], strides = [1, 1]} : vector<8x96xf32> to vector<8x32xf32>
    %c0_13 = arith.constant 0 : index
    %c0_14 = arith.constant 0 : index
    %c0_15 = arith.constant 0 : index
    %18 = vector.load %arg6[%c0_13, %c0_14, %c0_15] : memref<2x32x32xbf16, #tpu.memory_space<vmem>>, vector<1x32x32xbf16>
    %19 = vector.shape_cast %18 : vector<1x32x32xbf16> to vector<32x32xbf16>
    %c0_16 = arith.constant 0 : index
    %c0_17 = arith.constant 0 : index
    %c0_18 = arith.constant 0 : index
    %20 = vector.load %arg7[%c0_16, %c0_17, %c0_18] : memref<2x1x32xf32, #tpu.memory_space<vmem>>, vector<1x1x32xf32>
    %21 = vector.shape_cast %20 : vector<1x1x32xf32> to vector<1x32xf32>
    %22 = vector.extract_strided_slice %15 {offsets = [0, 0], sizes = [8, 8], strides = [1, 1]} : vector<8x32xf32> to vector<8x8xf32>
    %23 = arith.truncf %22 : vector<8x8xf32> to vector<8x8xbf16>
    %24 = vector.extract_strided_slice %16 {offsets = [0, 0], sizes = [8, 8], strides = [1, 1]} : vector<8x32xf32> to vector<8x8xf32>
    %25 = arith.truncf %24 : vector<8x8xf32> to vector<8x8xbf16>
    %26 = vector.extract_strided_slice %17 {offsets = [0, 0], sizes = [8, 8], strides = [1, 1]} : vector<8x32xf32> to vector<8x8xf32>
    %27 = arith.truncf %26 : vector<8x8xf32> to vector<8x8xbf16>
    %cst_19 = arith.constant dense<0.000000e+00> : vector<8x8xf32>
    %28 = tpu.matmul %23, %25, %cst_19 {dimension_numbers = #tpu.dot_dimension_numbers<[1], [1], [0], [0], [0, 0, 1, 0], [], []>} : vector<8x8xbf16>, vector<8x8xbf16>, vector<8x8xf32> -> vector<8x8xf32>
    %cst_20 = arith.constant 0.353553385 : f32
    %29 = vector.broadcast %cst_20 : f32 to vector<8x8xf32>
    %30 = arith.mulf %28, %29 : vector<8x8xf32>
    %31 = arith.addf %30, %6 : vector<8x8xf32>
    %cst_21 = arith.constant dense<0xFF800000> : vector<8xf32>
    %32 = vector.multi_reduction <maximumf>, %31, %cst_21 [1] : vector<8x8xf32> to vector<8xf32>
    %33 = vector.shape_cast %32 : vector<8xf32> to vector<8x1xf32>
    %34 = vector.broadcast %33 : vector<8x1xf32> to vector<8x8xf32>
    %35 = arith.subf %31, %34 : vector<8x8xf32>
    %36 = math.exp %35 : vector<8x8xf32>
    %cst_22 = arith.constant dense<0.000000e+00> : vector<8xf32>
    %37 = vector.multi_reduction <add>, %36, %cst_22 [1] : vector<8x8xf32> to vector<8xf32>
    %38 = vector.shape_cast %37 : vector<8xf32> to vector<8x1xf32>
    %39 = tpu.reciprocal %38 {approx = true} : vector<8x1xf32> -> vector<8x1xf32>
    %40 = vector.broadcast %39 : vector<8x1xf32> to vector<8x8xf32>
    %41 = arith.mulf %36, %40 : vector<8x8xf32>
    %42 = arith.truncf %41 : vector<8x8xf32> to vector<8x8xbf16>
    %cst_23 = arith.constant dense<0.000000e+00> : vector<8x8xf32>
    %43 = tpu.matmul %42, %27, %cst_23 {dimension_numbers = #tpu.dot_dimension_numbers<[1], [0], [0], [1], [0, 0, 1, 1], [], []>} : vector<8x8xbf16>, vector<8x8xbf16>, vector<8x8xf32> -> vector<8x8xf32>
    %44 = arith.truncf %43 : vector<8x8xf32> to vector<8x8xbf16>
    %45 = vector.extract_strided_slice %19 {offsets = [0, 0], sizes = [8, 32], strides = [1, 1]} : vector<32x32xbf16> to vector<8x32xbf16>
    %cst_24 = arith.constant dense<0.000000e+00> : vector<8x32xf32>
    %46 = tpu.matmul %44, %45, %cst_24 {dimension_numbers = #tpu.dot_dimension_numbers<[1], [0], [0], [1], [0, 0, 1, 1], [], []>} : vector<8x8xbf16>, vector<8x32xbf16>, vector<8x32xf32> -> vector<8x32xf32>
    %47 = vector.extract_strided_slice %15 {offsets = [0, 8], sizes = [8, 8], strides = [1, 1]} : vector<8x32xf32> to vector<8x8xf32>
    %48 = arith.truncf %47 : vector<8x8xf32> to vector<8x8xbf16>
    %49 = vector.extract_strided_slice %16 {offsets = [0, 8], sizes = [8, 8], strides = [1, 1]} : vector<8x32xf32> to vector<8x8xf32>
    %50 = arith.truncf %49 : vector<8x8xf32> to vector<8x8xbf16>
    %51 = vector.extract_strided_slice %17 {offsets = [0, 8], sizes = [8, 8], strides = [1, 1]} : vector<8x32xf32> to vector<8x8xf32>
    %52 = arith.truncf %51 : vector<8x8xf32> to vector<8x8xbf16>
    %cst_25 = arith.constant dense<0.000000e+00> : vector<8x8xf32>
    %53 = tpu.matmul %48, %50, %cst_25 {dimension_numbers = #tpu.dot_dimension_numbers<[1], [1], [0], [0], [0, 0, 1, 0], [], []>} : vector<8x8xbf16>, vector<8x8xbf16>, vector<8x8xf32> -> vector<8x8xf32>
    %cst_26 = arith.constant 0.353553385 : f32
    %54 = vector.broadcast %cst_26 : f32 to vector<8x8xf32>
    %55 = arith.mulf %53, %54 : vector<8x8xf32>
    %56 = arith.addf %55, %6 : vector<8x8xf32>
    %cst_27 = arith.constant dense<0xFF800000> : vector<8xf32>
    %57 = vector.multi_reduction <maximumf>, %56, %cst_27 [1] : vector<8x8xf32> to vector<8xf32>
    %58 = vector.shape_cast %57 : vector<8xf32> to vector<8x1xf32>
    %59 = vector.broadcast %58 : vector<8x1xf32> to vector<8x8xf32>
    %60 = arith.subf %56, %59 : vector<8x8xf32>
    %61 = math.exp %60 : vector<8x8xf32>
    %cst_28 = arith.constant dense<0.000000e+00> : vector<8xf32>
    %62 = vector.multi_reduction <add>, %61, %cst_28 [1] : vector<8x8xf32> to vector<8xf32>
    %63 = vector.shape_cast %62 : vector<8xf32> to vector<8x1xf32>
    %64 = tpu.reciprocal %63 {approx = true} : vector<8x1xf32> -> vector<8x1xf32>
    %65 = vector.broadcast %64 : vector<8x1xf32> to vector<8x8xf32>
    %66 = arith.mulf %61, %65 : vector<8x8xf32>
    %67 = arith.truncf %66 : vector<8x8xf32> to vector<8x8xbf16>
    %cst_29 = arith.constant dense<0.000000e+00> : vector<8x8xf32>
    %68 = tpu.matmul %67, %52, %cst_29 {dimension_numbers = #tpu.dot_dimension_numbers<[1], [0], [0], [1], [0, 0, 1, 1], [], []>} : vector<8x8xbf16>, vector<8x8xbf16>, vector<8x8xf32> -> vector<8x8xf32>
    %69 = arith.truncf %68 : vector<8x8xf32> to vector<8x8xbf16>
    %70 = vector.extract_strided_slice %19 {offsets = [8, 0], sizes = [8, 32], strides = [1, 1]} : vector<32x32xbf16> to vector<8x32xbf16>
    %cst_30 = arith.constant dense<0.000000e+00> : vector<8x32xf32>
    %71 = tpu.matmul %69, %70, %cst_30 {dimension_numbers = #tpu.dot_dimension_numbers<[1], [0], [0], [1], [0, 0, 1, 1], [], []>} : vector<8x8xbf16>, vector<8x32xbf16>, vector<8x32xf32> -> vector<8x32xf32>
    %72 = arith.addf %46, %71 : vector<8x32xf32>
    %73 = vector.extract_strided_slice %15 {offsets = [0, 16], sizes = [8, 8], strides = [1, 1]} : vector<8x32xf32> to vector<8x8xf32>
    %74 = arith.truncf %73 : vector<8x8xf32> to vector<8x8xbf16>
    %75 = vector.extract_strided_slice %16 {offsets = [0, 16], sizes = [8, 8], strides = [1, 1]} : vector<8x32xf32> to vector<8x8xf32>
    %76 = arith.truncf %75 : vector<8x8xf32> to vector<8x8xbf16>
    %77 = vector.extract_strided_slice %17 {offsets = [0, 16], sizes = [8, 8], strides = [1, 1]} : vector<8x32xf32> to vector<8x8xf32>
    %78 = arith.truncf %77 : vector<8x8xf32> to vector<8x8xbf16>
    %cst_31 = arith.constant dense<0.000000e+00> : vector<8x8xf32>
    %79 = tpu.matmul %74, %76, %cst_31 {dimension_numbers = #tpu.dot_dimension_numbers<[1], [1], [0], [0], [0, 0, 1, 0], [], []>} : vector<8x8xbf16>, vector<8x8xbf16>, vector<8x8xf32> -> vector<8x8xf32>
    %cst_32 = arith.constant 0.353553385 : f32
    %80 = vector.broadcast %cst_32 : f32 to vector<8x8xf32>
    %81 = arith.mulf %79, %80 : vector<8x8xf32>
    %82 = arith.addf %81, %6 : vector<8x8xf32>
    %cst_33 = arith.constant dense<0xFF800000> : vector<8xf32>
    %83 = vector.multi_reduction <maximumf>, %82, %cst_33 [1] : vector<8x8xf32> to vector<8xf32>
    %84 = vector.shape_cast %83 : vector<8xf32> to vector<8x1xf32>
    %85 = vector.broadcast %84 : vector<8x1xf32> to vector<8x8xf32>
    %86 = arith.subf %82, %85 : vector<8x8xf32>
    %87 = math.exp %86 : vector<8x8xf32>
    %cst_34 = arith.constant dense<0.000000e+00> : vector<8xf32>
    %88 = vector.multi_reduction <add>, %87, %cst_34 [1] : vector<8x8xf32> to vector<8xf32>
    %89 = vector.shape_cast %88 : vector<8xf32> to vector<8x1xf32>
    %90 = tpu.reciprocal %89 {approx = true} : vector<8x1xf32> -> vector<8x1xf32>
    %91 = vector.broadcast %90 : vector<8x1xf32> to vector<8x8xf32>
    %92 = arith.mulf %87, %91 : vector<8x8xf32>
    %93 = arith.truncf %92 : vector<8x8xf32> to vector<8x8xbf16>
    %cst_35 = arith.constant dense<0.000000e+00> : vector<8x8xf32>
    %94 = tpu.matmul %93, %78, %cst_35 {dimension_numbers = #tpu.dot_dimension_numbers<[1], [0], [0], [1], [0, 0, 1, 1], [], []>} : vector<8x8xbf16>, vector<8x8xbf16>, vector<8x8xf32> -> vector<8x8xf32>
    %95 = arith.truncf %94 : vector<8x8xf32> to vector<8x8xbf16>
    %96 = vector.extract_strided_slice %19 {offsets = [16, 0], sizes = [8, 32], strides = [1, 1]} : vector<32x32xbf16> to vector<8x32xbf16>
    %cst_36 = arith.constant dense<0.000000e+00> : vector<8x32xf32>
    %97 = tpu.matmul %95, %96, %cst_36 {dimension_numbers = #tpu.dot_dimension_numbers<[1], [0], [0], [1], [0, 0, 1, 1], [], []>} : vector<8x8xbf16>, vector<8x32xbf16>, vector<8x32xf32> -> vector<8x32xf32>
    %98 = arith.addf %72, %97 : vector<8x32xf32>
    %99 = vector.extract_strided_slice %15 {offsets = [0, 24], sizes = [8, 8], strides = [1, 1]} : vector<8x32xf32> to vector<8x8xf32>
    %100 = arith.truncf %99 : vector<8x8xf32> to vector<8x8xbf16>
    %101 = vector.extract_strided_slice %16 {offsets = [0, 24], sizes = [8, 8], strides = [1, 1]} : vector<8x32xf32> to vector<8x8xf32>
    %102 = arith.truncf %101 : vector<8x8xf32> to vector<8x8xbf16>
    %103 = vector.extract_strided_slice %17 {offsets = [0, 24], sizes = [8, 8], strides = [1, 1]} : vector<8x32xf32> to vector<8x8xf32>
    %104 = arith.truncf %103 : vector<8x8xf32> to vector<8x8xbf16>
    %cst_37 = arith.constant dense<0.000000e+00> : vector<8x8xf32>
    %105 = tpu.matmul %100, %102, %cst_37 {dimension_numbers = #tpu.dot_dimension_numbers<[1], [1], [0], [0], [0, 0, 1, 0], [], []>} : vector<8x8xbf16>, vector<8x8xbf16>, vector<8x8xf32> -> vector<8x8xf32>
    %cst_38 = arith.constant 0.353553385 : f32
    %106 = vector.broadcast %cst_38 : f32 to vector<8x8xf32>
    %107 = arith.mulf %105, %106 : vector<8x8xf32>
    %108 = arith.addf %107, %6 : vector<8x8xf32>
    %cst_39 = arith.constant dense<0xFF800000> : vector<8xf32>
    %109 = vector.multi_reduction <maximumf>, %108, %cst_39 [1] : vector<8x8xf32> to vector<8xf32>
    %110 = vector.shape_cast %109 : vector<8xf32> to vector<8x1xf32>
    %111 = vector.broadcast %110 : vector<8x1xf32> to vector<8x8xf32>
    %112 = arith.subf %108, %111 : vector<8x8xf32>
    %113 = math.exp %112 : vector<8x8xf32>
    %cst_40 = arith.constant dense<0.000000e+00> : vector<8xf32>
    %114 = vector.multi_reduction <add>, %113, %cst_40 [1] : vector<8x8xf32> to vector<8xf32>
    %115 = vector.shape_cast %114 : vector<8xf32> to vector<8x1xf32>
    %116 = tpu.reciprocal %115 {approx = true} : vector<8x1xf32> -> vector<8x1xf32>
    %117 = vector.broadcast %116 : vector<8x1xf32> to vector<8x8xf32>
    %118 = arith.mulf %113, %117 : vector<8x8xf32>
    %119 = arith.truncf %118 : vector<8x8xf32> to vector<8x8xbf16>
    %cst_41 = arith.constant dense<0.000000e+00> : vector<8x8xf32>
    %120 = tpu.matmul %119, %104, %cst_41 {dimension_numbers = #tpu.dot_dimension_numbers<[1], [0], [0], [1], [0, 0, 1, 1], [], []>} : vector<8x8xbf16>, vector<8x8xbf16>, vector<8x8xf32> -> vector<8x8xf32>
    %121 = arith.truncf %120 : vector<8x8xf32> to vector<8x8xbf16>
    %122 = vector.extract_strided_slice %19 {offsets = [24, 0], sizes = [8, 32], strides = [1, 1]} : vector<32x32xbf16> to vector<8x32xbf16>
    %cst_42 = arith.constant dense<0.000000e+00> : vector<8x32xf32>
    %123 = tpu.matmul %121, %122, %cst_42 {dimension_numbers = #tpu.dot_dimension_numbers<[1], [0], [0], [1], [0, 0, 1, 1], [], []>} : vector<8x8xbf16>, vector<8x32xbf16>, vector<8x32xf32> -> vector<8x32xf32>
    %124 = arith.addf %98, %123 : vector<8x32xf32>
    %125 = vector.broadcast %21 : vector<1x32xf32> to vector<8x32xf32>
    %126 = arith.addf %124, %125 : vector<8x32xf32>
    %127 = arith.addf %1, %126 : vector<8x32xf32>
    %c0_43 = arith.constant 0 : index
    %c0_44 = arith.constant 0 : index
    %c0_45 = arith.constant 0 : index
    %128 = vector.load %arg8[%c0_43, %c0_44, %c0_45] : memref<2x1x32xf32, #tpu.memory_space<vmem>>, vector<1x1x32xf32>
    %129 = vector.shape_cast %128 : vector<1x1x32xf32> to vector<1x32xf32>
    %c0_46 = arith.constant 0 : index
    %c0_47 = arith.constant 0 : index
    %c0_48 = arith.constant 0 : index
    %130 = vector.load %arg9[%c0_46, %c0_47, %c0_48] : memref<2x1x32xf32, #tpu.memory_space<vmem>>, vector<1x1x32xf32>
    %131 = vector.shape_cast %130 : vector<1x1x32xf32> to vector<1x32xf32>
    %cst_49 = arith.constant dense<0.000000e+00> : vector<8xf32>
    %132 = vector.multi_reduction <add>, %127, %cst_49 [1] : vector<8x32xf32> to vector<8xf32>
    %133 = vector.shape_cast %132 : vector<8xf32> to vector<8x1xf32>
    %cst_50 = arith.constant 3.200000e+01 : f32
    %134 = vector.broadcast %cst_50 : f32 to vector<8x1xf32>
    %135 = arith.divf %133, %134 : vector<8x1xf32>
    %136 = vector.broadcast %135 : vector<8x1xf32> to vector<8x32xf32>
    %137 = arith.subf %127, %136 : vector<8x32xf32>
    %138 = arith.mulf %137, %137 : vector<8x32xf32>
    %cst_51 = arith.constant dense<0.000000e+00> : vector<8xf32>
    %139 = vector.multi_reduction <add>, %138, %cst_51 [1] : vector<8x32xf32> to vector<8xf32>
    %140 = vector.shape_cast %139 : vector<8xf32> to vector<8x1xf32>
    %cst_52 = arith.constant 3.200000e+01 : f32
    %141 = vector.broadcast %cst_52 : f32 to vector<8x1xf32>
    %142 = arith.divf %140, %141 : vector<8x1xf32>
    %cst_53 = arith.constant 9.99999974E-6 : f32
    %143 = vector.broadcast %cst_53 : f32 to vector<8x1xf32>
    %144 = arith.addf %142, %143 : vector<8x1xf32>
    %145 = math.rsqrt %144 : vector<8x1xf32>
    %146 = vector.broadcast %145 : vector<8x1xf32> to vector<8x32xf32>
    %147 = arith.mulf %137, %146 : vector<8x32xf32>
    %148 = vector.broadcast %129 : vector<1x32xf32> to vector<8x32xf32>
    %149 = arith.mulf %147, %148 : vector<8x32xf32>
    %150 = vector.broadcast %131 : vector<1x32xf32> to vector<8x32xf32>
    %151 = arith.addf %149, %150 : vector<8x32xf32>
    %c0_54 = arith.constant 0 : index
    %c0_55 = arith.constant 0 : index
    %c0_56 = arith.constant 0 : index
    %152 = vector.load %arg10[%c0_54, %c0_55, %c0_56] : memref<2x32x128xbf16, #tpu.memory_space<vmem>>, vector<1x32x128xbf16>
    %153 = vector.shape_cast %152 : vector<1x32x128xbf16> to vector<32x128xbf16>
    %c0_57 = arith.constant 0 : index
    %c0_58 = arith.constant 0 : index
    %c0_59 = arith.constant 0 : index
    %154 = vector.load %arg11[%c0_57, %c0_58, %c0_59] : memref<2x1x128xf32, #tpu.memory_space<vmem>>, vector<1x1x128xf32>
    %155 = vector.shape_cast %154 : vector<1x1x128xf32> to vector<1x128xf32>
    %156 = arith.truncf %151 : vector<8x32xf32> to vector<8x32xbf16>
    %cst_60 = arith.constant dense<0.000000e+00> : vector<8x128xf32>
    %157 = tpu.matmul %156, %153, %cst_60 {dimension_numbers = #tpu.dot_dimension_numbers<[1], [0], [0], [1], [0, 0, 1, 1], [], []>} : vector<8x32xbf16>, vector<32x128xbf16>, vector<8x128xf32> -> vector<8x128xf32>
    %158 = vector.broadcast %155 : vector<1x128xf32> to vector<8x128xf32>
    %159 = arith.addf %157, %158 : vector<8x128xf32>
    %cst_61 = arith.constant 0.000000e+00 : f32
    %160 = vector.broadcast %cst_61 : f32 to vector<8x128xf32>
    %161 = arith.maximumf %159, %160 : vector<8x128xf32>
    %c0_62 = arith.constant 0 : index
    %c0_63 = arith.constant 0 : index
    %c0_64 = arith.constant 0 : index
    %162 = vector.load %arg12[%c0_62, %c0_63, %c0_64] : memref<2x128x32xbf16, #tpu.memory_space<vmem>>, vector<1x128x32xbf16>
    %163 = vector.shape_cast %162 : vector<1x128x32xbf16> to vector<128x32xbf16>
    %c0_65 = arith.constant 0 : index
    %c0_66 = arith.constant 0 : index
    %c0_67 = arith.constant 0 : index
    %164 = vector.load %arg13[%c0_65, %c0_66, %c0_67] : memref<2x1x32xf32, #tpu.memory_space<vmem>>, vector<1x1x32xf32>
    %165 = vector.shape_cast %164 : vector<1x1x32xf32> to vector<1x32xf32>
    %166 = arith.truncf %161 : vector<8x128xf32> to vector<8x128xbf16>
    %cst_68 = arith.constant dense<0.000000e+00> : vector<8x32xf32>
    %167 = tpu.matmul %166, %163, %cst_68 {dimension_numbers = #tpu.dot_dimension_numbers<[1], [0], [0], [1], [0, 0, 1, 1], [], []>} : vector<8x128xbf16>, vector<128x32xbf16>, vector<8x32xf32> -> vector<8x32xf32>
    %168 = vector.broadcast %165 : vector<1x32xf32> to vector<8x32xf32>
    %169 = arith.addf %167, %168 : vector<8x32xf32>
    %170 = arith.addf %151, %169 : vector<8x32xf32>
    %c0_69 = arith.constant 0 : index
    %c0_70 = arith.constant 0 : index
    %c0_71 = arith.constant 0 : index
    %171 = vector.load %arg14[%c0_69, %c0_70, %c0_71] : memref<2x1x32xf32, #tpu.memory_space<vmem>>, vector<1x1x32xf32>
    %172 = vector.shape_cast %171 : vector<1x1x32xf32> to vector<1x32xf32>
    %c0_72 = arith.constant 0 : index
    %c0_73 = arith.constant 0 : index
    %c0_74 = arith.constant 0 : index
    %173 = vector.load %arg15[%c0_72, %c0_73, %c0_74] : memref<2x1x32xf32, #tpu.memory_space<vmem>>, vector<1x1x32xf32>
    %174 = vector.shape_cast %173 : vector<1x1x32xf32> to vector<1x32xf32>
    %cst_75 = arith.constant dense<0.000000e+00> : vector<8xf32>
    %175 = vector.multi_reduction <add>, %170, %cst_75 [1] : vector<8x32xf32> to vector<8xf32>
    %176 = vector.shape_cast %175 : vector<8xf32> to vector<8x1xf32>
    %cst_76 = arith.constant 3.200000e+01 : f32
    %177 = vector.broadcast %cst_76 : f32 to vector<8x1xf32>
    %178 = arith.divf %176, %177 : vector<8x1xf32>
    %179 = vector.broadcast %178 : vector<8x1xf32> to vector<8x32xf32>
    %180 = arith.subf %170, %179 : vector<8x32xf32>
    %181 = arith.mulf %180, %180 : vector<8x32xf32>
    %cst_77 = arith.constant dense<0.000000e+00> : vector<8xf32>
    %182 = vector.multi_reduction <add>, %181, %cst_77 [1] : vector<8x32xf32> to vector<8xf32>
    %183 = vector.shape_cast %182 : vector<8xf32> to vector<8x1xf32>
    %cst_78 = arith.constant 3.200000e+01 : f32
    %184 = vector.broadcast %cst_78 : f32 to vector<8x1xf32>
    %185 = arith.divf %183, %184 : vector<8x1xf32>
    %cst_79 = arith.constant 9.99999974E-6 : f32
    %186 = vector.broadcast %cst_79 : f32 to vector<8x1xf32>
    %187 = arith.addf %185, %186 : vector<8x1xf32>
    %188 = math.rsqrt %187 : vector<8x1xf32>
    %189 = vector.broadcast %188 : vector<8x1xf32> to vector<8x32xf32>
    %190 = arith.mulf %180, %189 : vector<8x32xf32>
    %191 = vector.broadcast %172 : vector<1x32xf32> to vector<8x32xf32>
    %192 = arith.mulf %190, %191 : vector<8x32xf32>
    %193 = vector.broadcast %174 : vector<1x32xf32> to vector<8x32xf32>
    %194 = arith.addf %192, %193 : vector<8x32xf32>
    %c1 = arith.constant 1 : index
    %c0_80 = arith.constant 0 : index
    %c0_81 = arith.constant 0 : index
    %195 = vector.load %arg4[%c1, %c0_80, %c0_81] : memref<2x32x96xbf16, #tpu.memory_space<vmem>>, vector<1x32x96xbf16>
    %196 = vector.shape_cast %195 : vector<1x32x96xbf16> to vector<32x96xbf16>
    %c1_82 = arith.constant 1 : index
    %c0_83 = arith.constant 0 : index
    %c0_84 = arith.constant 0 : index
    %197 = vector.load %arg5[%c1_82, %c0_83, %c0_84] : memref<2x1x96xf32, #tpu.memory_space<vmem>>, vector<1x1x96xf32>
    %198 = vector.shape_cast %197 : vector<1x1x96xf32> to vector<1x96xf32>
    %199 = arith.truncf %194 : vector<8x32xf32> to vector<8x32xbf16>
    %cst_85 = arith.constant dense<0.000000e+00> : vector<8x96xf32>
    %200 = tpu.matmul %199, %196, %cst_85 {dimension_numbers = #tpu.dot_dimension_numbers<[1], [0], [0], [1], [0, 0, 1, 1], [], []>} : vector<8x32xbf16>, vector<32x96xbf16>, vector<8x96xf32> -> vector<8x96xf32>
    %201 = vector.broadcast %198 : vector<1x96xf32> to vector<8x96xf32>
    %202 = arith.addf %200, %201 : vector<8x96xf32>
    %203 = vector.extract_strided_slice %202 {offsets = [0, 0], sizes = [8, 32], strides = [1, 1]} : vector<8x96xf32> to vector<8x32xf32>
    %204 = vector.extract_strided_slice %202 {offsets = [0, 32], sizes = [8, 32], strides = [1, 1]} : vector<8x96xf32> to vector<8x32xf32>
    %205 = vector.extract_strided_slice %202 {offsets = [0, 64], sizes = [8, 32], strides = [1, 1]} : vector<8x96xf32> to vector<8x32xf32>
    %c1_86 = arith.constant 1 : index
    %c0_87 = arith.constant 0 : index
    %c0_88 = arith.constant 0 : index
    %206 = vector.load %arg6[%c1_86, %c0_87, %c0_88] : memref<2x32x32xbf16, #tpu.memory_space<vmem>>, vector<1x32x32xbf16>
    %207 = vector.shape_cast %206 : vector<1x32x32xbf16> to vector<32x32xbf16>
    %c1_89 = arith.constant 1 : index
    %c0_90 = arith.constant 0 : index
    %c0_91 = arith.constant 0 : index
    %208 = vector.load %arg7[%c1_89, %c0_90, %c0_91] : memref<2x1x32xf32, #tpu.memory_space<vmem>>, vector<1x1x32xf32>
    %209 = vector.shape_cast %208 : vector<1x1x32xf32> to vector<1x32xf32>
    %210 = vector.extract_strided_slice %203 {offsets = [0, 0], sizes = [8, 8], strides = [1, 1]} : vector<8x32xf32> to vector<8x8xf32>
    %211 = arith.truncf %210 : vector<8x8xf32> to vector<8x8xbf16>
    %212 = vector.extract_strided_slice %204 {offsets = [0, 0], sizes = [8, 8], strides = [1, 1]} : vector<8x32xf32> to vector<8x8xf32>
    %213 = arith.truncf %212 : vector<8x8xf32> to vector<8x8xbf16>
    %214 = vector.extract_strided_slice %205 {offsets = [0, 0], sizes = [8, 8], strides = [1, 1]} : vector<8x32xf32> to vector<8x8xf32>
    %215 = arith.truncf %214 : vector<8x8xf32> to vector<8x8xbf16>
    %cst_92 = arith.constant dense<0.000000e+00> : vector<8x8xf32>
    %216 = tpu.matmul %211, %213, %cst_92 {dimension_numbers = #tpu.dot_dimension_numbers<[1], [1], [0], [0], [0, 0, 1, 0], [], []>} : vector<8x8xbf16>, vector<8x8xbf16>, vector<8x8xf32> -> vector<8x8xf32>
    %cst_93 = arith.constant 0.353553385 : f32
    %217 = vector.broadcast %cst_93 : f32 to vector<8x8xf32>
    %218 = arith.mulf %216, %217 : vector<8x8xf32>
    %219 = arith.addf %218, %6 : vector<8x8xf32>
    %cst_94 = arith.constant dense<0xFF800000> : vector<8xf32>
    %220 = vector.multi_reduction <maximumf>, %219, %cst_94 [1] : vector<8x8xf32> to vector<8xf32>
    %221 = vector.shape_cast %220 : vector<8xf32> to vector<8x1xf32>
    %222 = vector.broadcast %221 : vector<8x1xf32> to vector<8x8xf32>
    %223 = arith.subf %219, %222 : vector<8x8xf32>
    %224 = math.exp %223 : vector<8x8xf32>
    %cst_95 = arith.constant dense<0.000000e+00> : vector<8xf32>
    %225 = vector.multi_reduction <add>, %224, %cst_95 [1] : vector<8x8xf32> to vector<8xf32>
    %226 = vector.shape_cast %225 : vector<8xf32> to vector<8x1xf32>
    %227 = tpu.reciprocal %226 {approx = true} : vector<8x1xf32> -> vector<8x1xf32>
    %228 = vector.broadcast %227 : vector<8x1xf32> to vector<8x8xf32>
    %229 = arith.mulf %224, %228 : vector<8x8xf32>
    %230 = arith.truncf %229 : vector<8x8xf32> to vector<8x8xbf16>
    %cst_96 = arith.constant dense<0.000000e+00> : vector<8x8xf32>
    %231 = tpu.matmul %230, %215, %cst_96 {dimension_numbers = #tpu.dot_dimension_numbers<[1], [0], [0], [1], [0, 0, 1, 1], [], []>} : vector<8x8xbf16>, vector<8x8xbf16>, vector<8x8xf32> -> vector<8x8xf32>
    %232 = arith.truncf %231 : vector<8x8xf32> to vector<8x8xbf16>
    %233 = vector.extract_strided_slice %207 {offsets = [0, 0], sizes = [8, 32], strides = [1, 1]} : vector<32x32xbf16> to vector<8x32xbf16>
    %cst_97 = arith.constant dense<0.000000e+00> : vector<8x32xf32>
    %234 = tpu.matmul %232, %233, %cst_97 {dimension_numbers = #tpu.dot_dimension_numbers<[1], [0], [0], [1], [0, 0, 1, 1], [], []>} : vector<8x8xbf16>, vector<8x32xbf16>, vector<8x32xf32> -> vector<8x32xf32>
    %235 = vector.extract_strided_slice %203 {offsets = [0, 8], sizes = [8, 8], strides = [1, 1]} : vector<8x32xf32> to vector<8x8xf32>
    %236 = arith.truncf %235 : vector<8x8xf32> to vector<8x8xbf16>
    %237 = vector.extract_strided_slice %204 {offsets = [0, 8], sizes = [8, 8], strides = [1, 1]} : vector<8x32xf32> to vector<8x8xf32>
    %238 = arith.truncf %237 : vector<8x8xf32> to vector<8x8xbf16>
    %239 = vector.extract_strided_slice %205 {offsets = [0, 8], sizes = [8, 8], strides = [1, 1]} : vector<8x32xf32> to vector<8x8xf32>
    %240 = arith.truncf %239 : vector<8x8xf32> to vector<8x8xbf16>
    %cst_98 = arith.constant dense<0.000000e+00> : vector<8x8xf32>
    %241 = tpu.matmul %236, %238, %cst_98 {dimension_numbers = #tpu.dot_dimension_numbers<[1], [1], [0], [0], [0, 0, 1, 0], [], []>} : vector<8x8xbf16>, vector<8x8xbf16>, vector<8x8xf32> -> vector<8x8xf32>
    %cst_99 = arith.constant 0.353553385 : f32
    %242 = vector.broadcast %cst_99 : f32 to vector<8x8xf32>
    %243 = arith.mulf %241, %242 : vector<8x8xf32>
    %244 = arith.addf %243, %6 : vector<8x8xf32>
    %cst_100 = arith.constant dense<0xFF800000> : vector<8xf32>
    %245 = vector.multi_reduction <maximumf>, %244, %cst_100 [1] : vector<8x8xf32> to vector<8xf32>
    %246 = vector.shape_cast %245 : vector<8xf32> to vector<8x1xf32>
    %247 = vector.broadcast %246 : vector<8x1xf32> to vector<8x8xf32>
    %248 = arith.subf %244, %247 : vector<8x8xf32>
    %249 = math.exp %248 : vector<8x8xf32>
    %cst_101 = arith.constant dense<0.000000e+00> : vector<8xf32>
    %250 = vector.multi_reduction <add>, %249, %cst_101 [1] : vector<8x8xf32> to vector<8xf32>
    %251 = vector.shape_cast %250 : vector<8xf32> to vector<8x1xf32>
    %252 = tpu.reciprocal %251 {approx = true} : vector<8x1xf32> -> vector<8x1xf32>
    %253 = vector.broadcast %252 : vector<8x1xf32> to vector<8x8xf32>
    %254 = arith.mulf %249, %253 : vector<8x8xf32>
    %255 = arith.truncf %254 : vector<8x8xf32> to vector<8x8xbf16>
    %cst_102 = arith.constant dense<0.000000e+00> : vector<8x8xf32>
    %256 = tpu.matmul %255, %240, %cst_102 {dimension_numbers = #tpu.dot_dimension_numbers<[1], [0], [0], [1], [0, 0, 1, 1], [], []>} : vector<8x8xbf16>, vector<8x8xbf16>, vector<8x8xf32> -> vector<8x8xf32>
    %257 = arith.truncf %256 : vector<8x8xf32> to vector<8x8xbf16>
    %258 = vector.extract_strided_slice %207 {offsets = [8, 0], sizes = [8, 32], strides = [1, 1]} : vector<32x32xbf16> to vector<8x32xbf16>
    %cst_103 = arith.constant dense<0.000000e+00> : vector<8x32xf32>
    %259 = tpu.matmul %257, %258, %cst_103 {dimension_numbers = #tpu.dot_dimension_numbers<[1], [0], [0], [1], [0, 0, 1, 1], [], []>} : vector<8x8xbf16>, vector<8x32xbf16>, vector<8x32xf32> -> vector<8x32xf32>
    %260 = arith.addf %234, %259 : vector<8x32xf32>
    %261 = vector.extract_strided_slice %203 {offsets = [0, 16], sizes = [8, 8], strides = [1, 1]} : vector<8x32xf32> to vector<8x8xf32>
    %262 = arith.truncf %261 : vector<8x8xf32> to vector<8x8xbf16>
    %263 = vector.extract_strided_slice %204 {offsets = [0, 16], sizes = [8, 8], strides = [1, 1]} : vector<8x32xf32> to vector<8x8xf32>
    %264 = arith.truncf %263 : vector<8x8xf32> to vector<8x8xbf16>
    %265 = vector.extract_strided_slice %205 {offsets = [0, 16], sizes = [8, 8], strides = [1, 1]} : vector<8x32xf32> to vector<8x8xf32>
    %266 = arith.truncf %265 : vector<8x8xf32> to vector<8x8xbf16>
    %cst_104 = arith.constant dense<0.000000e+00> : vector<8x8xf32>
    %267 = tpu.matmul %262, %264, %cst_104 {dimension_numbers = #tpu.dot_dimension_numbers<[1], [1], [0], [0], [0, 0, 1, 0], [], []>} : vector<8x8xbf16>, vector<8x8xbf16>, vector<8x8xf32> -> vector<8x8xf32>
    %cst_105 = arith.constant 0.353553385 : f32
    %268 = vector.broadcast %cst_105 : f32 to vector<8x8xf32>
    %269 = arith.mulf %267, %268 : vector<8x8xf32>
    %270 = arith.addf %269, %6 : vector<8x8xf32>
    %cst_106 = arith.constant dense<0xFF800000> : vector<8xf32>
    %271 = vector.multi_reduction <maximumf>, %270, %cst_106 [1] : vector<8x8xf32> to vector<8xf32>
    %272 = vector.shape_cast %271 : vector<8xf32> to vector<8x1xf32>
    %273 = vector.broadcast %272 : vector<8x1xf32> to vector<8x8xf32>
    %274 = arith.subf %270, %273 : vector<8x8xf32>
    %275 = math.exp %274 : vector<8x8xf32>
    %cst_107 = arith.constant dense<0.000000e+00> : vector<8xf32>
    %276 = vector.multi_reduction <add>, %275, %cst_107 [1] : vector<8x8xf32> to vector<8xf32>
    %277 = vector.shape_cast %276 : vector<8xf32> to vector<8x1xf32>
    %278 = tpu.reciprocal %277 {approx = true} : vector<8x1xf32> -> vector<8x1xf32>
    %279 = vector.broadcast %278 : vector<8x1xf32> to vector<8x8xf32>
    %280 = arith.mulf %275, %279 : vector<8x8xf32>
    %281 = arith.truncf %280 : vector<8x8xf32> to vector<8x8xbf16>
    %cst_108 = arith.constant dense<0.000000e+00> : vector<8x8xf32>
    %282 = tpu.matmul %281, %266, %cst_108 {dimension_numbers = #tpu.dot_dimension_numbers<[1], [0], [0], [1], [0, 0, 1, 1], [], []>} : vector<8x8xbf16>, vector<8x8xbf16>, vector<8x8xf32> -> vector<8x8xf32>
    %283 = arith.truncf %282 : vector<8x8xf32> to vector<8x8xbf16>
    %284 = vector.extract_strided_slice %207 {offsets = [16, 0], sizes = [8, 32], strides = [1, 1]} : vector<32x32xbf16> to vector<8x32xbf16>
    %cst_109 = arith.constant dense<0.000000e+00> : vector<8x32xf32>
    %285 = tpu.matmul %283, %284, %cst_109 {dimension_numbers = #tpu.dot_dimension_numbers<[1], [0], [0], [1], [0, 0, 1, 1], [], []>} : vector<8x8xbf16>, vector<8x32xbf16>, vector<8x32xf32> -> vector<8x32xf32>
    %286 = arith.addf %260, %285 : vector<8x32xf32>
    %287 = vector.extract_strided_slice %203 {offsets = [0, 24], sizes = [8, 8], strides = [1, 1]} : vector<8x32xf32> to vector<8x8xf32>
    %288 = arith.truncf %287 : vector<8x8xf32> to vector<8x8xbf16>
    %289 = vector.extract_strided_slice %204 {offsets = [0, 24], sizes = [8, 8], strides = [1, 1]} : vector<8x32xf32> to vector<8x8xf32>
    %290 = arith.truncf %289 : vector<8x8xf32> to vector<8x8xbf16>
    %291 = vector.extract_strided_slice %205 {offsets = [0, 24], sizes = [8, 8], strides = [1, 1]} : vector<8x32xf32> to vector<8x8xf32>
    %292 = arith.truncf %291 : vector<8x8xf32> to vector<8x8xbf16>
    %cst_110 = arith.constant dense<0.000000e+00> : vector<8x8xf32>
    %293 = tpu.matmul %288, %290, %cst_110 {dimension_numbers = #tpu.dot_dimension_numbers<[1], [1], [0], [0], [0, 0, 1, 0], [], []>} : vector<8x8xbf16>, vector<8x8xbf16>, vector<8x8xf32> -> vector<8x8xf32>
    %cst_111 = arith.constant 0.353553385 : f32
    %294 = vector.broadcast %cst_111 : f32 to vector<8x8xf32>
    %295 = arith.mulf %293, %294 : vector<8x8xf32>
    %296 = arith.addf %295, %6 : vector<8x8xf32>
    %cst_112 = arith.constant dense<0xFF800000> : vector<8xf32>
    %297 = vector.multi_reduction <maximumf>, %296, %cst_112 [1] : vector<8x8xf32> to vector<8xf32>
    %298 = vector.shape_cast %297 : vector<8xf32> to vector<8x1xf32>
    %299 = vector.broadcast %298 : vector<8x1xf32> to vector<8x8xf32>
    %300 = arith.subf %296, %299 : vector<8x8xf32>
    %301 = math.exp %300 : vector<8x8xf32>
    %cst_113 = arith.constant dense<0.000000e+00> : vector<8xf32>
    %302 = vector.multi_reduction <add>, %301, %cst_113 [1] : vector<8x8xf32> to vector<8xf32>
    %303 = vector.shape_cast %302 : vector<8xf32> to vector<8x1xf32>
    %304 = tpu.reciprocal %303 {approx = true} : vector<8x1xf32> -> vector<8x1xf32>
    %305 = vector.broadcast %304 : vector<8x1xf32> to vector<8x8xf32>
    %306 = arith.mulf %301, %305 : vector<8x8xf32>
    %307 = arith.truncf %306 : vector<8x8xf32> to vector<8x8xbf16>
    %cst_114 = arith.constant dense<0.000000e+00> : vector<8x8xf32>
    %308 = tpu.matmul %307, %292, %cst_114 {dimension_numbers = #tpu.dot_dimension_numbers<[1], [0], [0], [1], [0, 0, 1, 1], [], []>} : vector<8x8xbf16>, vector<8x8xbf16>, vector<8x8xf32> -> vector<8x8xf32>
    %309 = arith.truncf %308 : vector<8x8xf32> to vector<8x8xbf16>
    %310 = vector.extract_strided_slice %207 {offsets = [24, 0], sizes = [8, 32], strides = [1, 1]} : vector<32x32xbf16> to vector<8x32xbf16>
    %cst_115 = arith.constant dense<0.000000e+00> : vector<8x32xf32>
    %311 = tpu.matmul %309, %310, %cst_115 {dimension_numbers = #tpu.dot_dimension_numbers<[1], [0], [0], [1], [0, 0, 1, 1], [], []>} : vector<8x8xbf16>, vector<8x32xbf16>, vector<8x32xf32> -> vector<8x32xf32>
    %312 = arith.addf %286, %311 : vector<8x32xf32>
    %313 = vector.broadcast %209 : vector<1x32xf32> to vector<8x32xf32>
    %314 = arith.addf %312, %313 : vector<8x32xf32>
    %315 = arith.addf %194, %314 : vector<8x32xf32>
    %c1_116 = arith.constant 1 : index
    %c0_117 = arith.constant 0 : index
    %c0_118 = arith.constant 0 : index
    %316 = vector.load %arg8[%c1_116, %c0_117, %c0_118] : memref<2x1x32xf32, #tpu.memory_space<vmem>>, vector<1x1x32xf32>
    %317 = vector.shape_cast %316 : vector<1x1x32xf32> to vector<1x32xf32>
    %c1_119 = arith.constant 1 : index
    %c0_120 = arith.constant 0 : index
    %c0_121 = arith.constant 0 : index
    %318 = vector.load %arg9[%c1_119, %c0_120, %c0_121] : memref<2x1x32xf32, #tpu.memory_space<vmem>>, vector<1x1x32xf32>
    %319 = vector.shape_cast %318 : vector<1x1x32xf32> to vector<1x32xf32>
    %cst_122 = arith.constant dense<0.000000e+00> : vector<8xf32>
    %320 = vector.multi_reduction <add>, %315, %cst_122 [1] : vector<8x32xf32> to vector<8xf32>
    %321 = vector.shape_cast %320 : vector<8xf32> to vector<8x1xf32>
    %cst_123 = arith.constant 3.200000e+01 : f32
    %322 = vector.broadcast %cst_123 : f32 to vector<8x1xf32>
    %323 = arith.divf %321, %322 : vector<8x1xf32>
    %324 = vector.broadcast %323 : vector<8x1xf32> to vector<8x32xf32>
    %325 = arith.subf %315, %324 : vector<8x32xf32>
    %326 = arith.mulf %325, %325 : vector<8x32xf32>
    %cst_124 = arith.constant dense<0.000000e+00> : vector<8xf32>
    %327 = vector.multi_reduction <add>, %326, %cst_124 [1] : vector<8x32xf32> to vector<8xf32>
    %328 = vector.shape_cast %327 : vector<8xf32> to vector<8x1xf32>
    %cst_125 = arith.constant 3.200000e+01 : f32
    %329 = vector.broadcast %cst_125 : f32 to vector<8x1xf32>
    %330 = arith.divf %328, %329 : vector<8x1xf32>
    %cst_126 = arith.constant 9.99999974E-6 : f32
    %331 = vector.broadcast %cst_126 : f32 to vector<8x1xf32>
    %332 = arith.addf %330, %331 : vector<8x1xf32>
    %333 = math.rsqrt %332 : vector<8x1xf32>
    %334 = vector.broadcast %333 : vector<8x1xf32> to vector<8x32xf32>
    %335 = arith.mulf %325, %334 : vector<8x32xf32>
    %336 = vector.broadcast %317 : vector<1x32xf32> to vector<8x32xf32>
    %337 = arith.mulf %335, %336 : vector<8x32xf32>
    %338 = vector.broadcast %319 : vector<1x32xf32> to vector<8x32xf32>
    %339 = arith.addf %337, %338 : vector<8x32xf32>
    %c1_127 = arith.constant 1 : index
    %c0_128 = arith.constant 0 : index
    %c0_129 = arith.constant 0 : index
    %340 = vector.load %arg10[%c1_127, %c0_128, %c0_129] : memref<2x32x128xbf16, #tpu.memory_space<vmem>>, vector<1x32x128xbf16>
    %341 = vector.shape_cast %340 : vector<1x32x128xbf16> to vector<32x128xbf16>
    %c1_130 = arith.constant 1 : index
    %c0_131 = arith.constant 0 : index
    %c0_132 = arith.constant 0 : index
    %342 = vector.load %arg11[%c1_130, %c0_131, %c0_132] : memref<2x1x128xf32, #tpu.memory_space<vmem>>, vector<1x1x128xf32>
    %343 = vector.shape_cast %342 : vector<1x1x128xf32> to vector<1x128xf32>
    %344 = arith.truncf %339 : vector<8x32xf32> to vector<8x32xbf16>
    %cst_133 = arith.constant dense<0.000000e+00> : vector<8x128xf32>
    %345 = tpu.matmul %344, %341, %cst_133 {dimension_numbers = #tpu.dot_dimension_numbers<[1], [0], [0], [1], [0, 0, 1, 1], [], []>} : vector<8x32xbf16>, vector<32x128xbf16>, vector<8x128xf32> -> vector<8x128xf32>
    %346 = vector.broadcast %343 : vector<1x128xf32> to vector<8x128xf32>
    %347 = arith.addf %345, %346 : vector<8x128xf32>
    %cst_134 = arith.constant 0.000000e+00 : f32
    %348 = vector.broadcast %cst_134 : f32 to vector<8x128xf32>
    %349 = arith.maximumf %347, %348 : vector<8x128xf32>
    %c1_135 = arith.constant 1 : index
    %c0_136 = arith.constant 0 : index
    %c0_137 = arith.constant 0 : index
    %350 = vector.load %arg12[%c1_135, %c0_136, %c0_137] : memref<2x128x32xbf16, #tpu.memory_space<vmem>>, vector<1x128x32xbf16>
    %351 = vector.shape_cast %350 : vector<1x128x32xbf16> to vector<128x32xbf16>
    %c1_138 = arith.constant 1 : index
    %c0_139 = arith.constant 0 : index
    %c0_140 = arith.constant 0 : index
    %352 = vector.load %arg13[%c1_138, %c0_139, %c0_140] : memref<2x1x32xf32, #tpu.memory_space<vmem>>, vector<1x1x32xf32>
    %353 = vector.shape_cast %352 : vector<1x1x32xf32> to vector<1x32xf32>
    %354 = arith.truncf %349 : vector<8x128xf32> to vector<8x128xbf16>
    %cst_141 = arith.constant dense<0.000000e+00> : vector<8x32xf32>
    %355 = tpu.matmul %354, %351, %cst_141 {dimension_numbers = #tpu.dot_dimension_numbers<[1], [0], [0], [1], [0, 0, 1, 1], [], []>} : vector<8x128xbf16>, vector<128x32xbf16>, vector<8x32xf32> -> vector<8x32xf32>
    %356 = vector.broadcast %353 : vector<1x32xf32> to vector<8x32xf32>
    %357 = arith.addf %355, %356 : vector<8x32xf32>
    %358 = arith.addf %339, %357 : vector<8x32xf32>
    %c1_142 = arith.constant 1 : index
    %c0_143 = arith.constant 0 : index
    %c0_144 = arith.constant 0 : index
    %359 = vector.load %arg14[%c1_142, %c0_143, %c0_144] : memref<2x1x32xf32, #tpu.memory_space<vmem>>, vector<1x1x32xf32>
    %360 = vector.shape_cast %359 : vector<1x1x32xf32> to vector<1x32xf32>
    %c1_145 = arith.constant 1 : index
    %c0_146 = arith.constant 0 : index
    %c0_147 = arith.constant 0 : index
    %361 = vector.load %arg15[%c1_145, %c0_146, %c0_147] : memref<2x1x32xf32, #tpu.memory_space<vmem>>, vector<1x1x32xf32>
    %362 = vector.shape_cast %361 : vector<1x1x32xf32> to vector<1x32xf32>
    %cst_148 = arith.constant dense<0.000000e+00> : vector<8xf32>
    %363 = vector.multi_reduction <add>, %358, %cst_148 [1] : vector<8x32xf32> to vector<8xf32>
    %364 = vector.shape_cast %363 : vector<8xf32> to vector<8x1xf32>
    %cst_149 = arith.constant 3.200000e+01 : f32
    %365 = vector.broadcast %cst_149 : f32 to vector<8x1xf32>
    %366 = arith.divf %364, %365 : vector<8x1xf32>
    %367 = vector.broadcast %366 : vector<8x1xf32> to vector<8x32xf32>
    %368 = arith.subf %358, %367 : vector<8x32xf32>
    %369 = arith.mulf %368, %368 : vector<8x32xf32>
    %cst_150 = arith.constant dense<0.000000e+00> : vector<8xf32>
    %370 = vector.multi_reduction <add>, %369, %cst_150 [1] : vector<8x32xf32> to vector<8xf32>
    %371 = vector.shape_cast %370 : vector<8xf32> to vector<8x1xf32>
    %cst_151 = arith.constant 3.200000e+01 : f32
    %372 = vector.broadcast %cst_151 : f32 to vector<8x1xf32>
    %373 = arith.divf %371, %372 : vector<8x1xf32>
    %cst_152 = arith.constant 9.99999974E-6 : f32
    %374 = vector.broadcast %cst_152 : f32 to vector<8x1xf32>
    %375 = arith.addf %373, %374 : vector<8x1xf32>
    %376 = math.rsqrt %375 : vector<8x1xf32>
    %377 = vector.broadcast %376 : vector<8x1xf32> to vector<8x32xf32>
    %378 = arith.mulf %368, %377 : vector<8x32xf32>
    %379 = vector.broadcast %360 : vector<1x32xf32> to vector<8x32xf32>
    %380 = arith.mulf %378, %379 : vector<8x32xf32>
    %381 = vector.broadcast %362 : vector<1x32xf32> to vector<8x32xf32>
    %382 = arith.addf %380, %381 : vector<8x32xf32>
    %c0_153 = arith.constant 0 : index
    %c0_154 = arith.constant 0 : index
    %383 = vector.load %arg16[%c0_153, %c0_154] : memref<1x32xf32, #tpu.memory_space<vmem>>, vector<1x32xf32>
    %c0_155 = arith.constant 0 : index
    %c0_156 = arith.constant 0 : index
    %384 = vector.load %arg17[%c0_155, %c0_156] : memref<1x32xf32, #tpu.memory_space<vmem>>, vector<1x32xf32>
    %cst_157 = arith.constant dense<0.000000e+00> : vector<8xf32>
    %385 = vector.multi_reduction <add>, %382, %cst_157 [1] : vector<8x32xf32> to vector<8xf32>
    %386 = vector.shape_cast %385 : vector<8xf32> to vector<8x1xf32>
    %cst_158 = arith.constant 3.200000e+01 : f32
    %387 = vector.broadcast %cst_158 : f32 to vector<8x1xf32>
    %388 = arith.divf %386, %387 : vector<8x1xf32>
    %389 = vector.broadcast %388 : vector<8x1xf32> to vector<8x32xf32>
    %390 = arith.subf %382, %389 : vector<8x32xf32>
    %391 = arith.mulf %390, %390 : vector<8x32xf32>
    %cst_159 = arith.constant dense<0.000000e+00> : vector<8xf32>
    %392 = vector.multi_reduction <add>, %391, %cst_159 [1] : vector<8x32xf32> to vector<8xf32>
    %393 = vector.shape_cast %392 : vector<8xf32> to vector<8x1xf32>
    %cst_160 = arith.constant 3.200000e+01 : f32
    %394 = vector.broadcast %cst_160 : f32 to vector<8x1xf32>
    %395 = arith.divf %393, %394 : vector<8x1xf32>
    %cst_161 = arith.constant 9.99999974E-6 : f32
    %396 = vector.broadcast %cst_161 : f32 to vector<8x1xf32>
    %397 = arith.addf %395, %396 : vector<8x1xf32>
    %398 = math.rsqrt %397 : vector<8x1xf32>
    %399 = vector.broadcast %398 : vector<8x1xf32> to vector<8x32xf32>
    %400 = arith.mulf %390, %399 : vector<8x32xf32>
    %401 = vector.broadcast %383 : vector<1x32xf32> to vector<8x32xf32>
    %402 = arith.mulf %400, %401 : vector<8x32xf32>
    %403 = vector.broadcast %384 : vector<1x32xf32> to vector<8x32xf32>
    %404 = arith.addf %402, %403 : vector<8x32xf32>
    %c0_162 = arith.constant 0 : index
    %c0_163 = arith.constant 0 : index
    %c0_164 = arith.constant 0 : index
    %405 = vector.load %arg18[%c0_162, %c0_163, %c0_164] : memref<1x8x32xf32, #tpu.memory_space<vmem>>, vector<1x8x32xf32>
    %406 = vector.shape_cast %405 : vector<1x8x32xf32> to vector<8x32xf32>
    %407 = vector.shape_cast %404 : vector<8x32xf32> to vector<1x8x32xf32>
    tpu.vector_store %arg18[%c0_162, %c0_163, %c0_164], %407 {strides = array<i32>} : memref<1x8x32xf32, #tpu.memory_space<vmem>>, vector<1x8x32xf32>,
    return
  }
  func.func @transform_0(%arg0: i32) -> (i32, i32, i32) {
    %c0_i32 = arith.constant 0 : i32
    %c0_i32_0 = arith.constant 0 : i32
    %c0_i32_1 = arith.constant 0 : i32
    return %arg0, %c0_i32, %c0_i32_0 : i32, i32, i32
  }
  func.func @transform_1(%arg0: i32) -> (i32, i32) {
    %c0_i32 = arith.constant 0 : i32
    %c0_i32_0 = arith.constant 0 : i32
    %c0_i32_1 = arith.constant 0 : i32
    return %c0_i32, %c0_i32_0 : i32, i32
  }
  func.func @transform_2(%arg0: i32) -> (i32, i32, i32) {
    %c0_i32 = arith.constant 0 : i32
    %c0_i32_0 = arith.constant 0 : i32
    %c0_i32_1 = arith.constant 0 : i32
    return %arg0, %c0_i32, %c0_i32_0 : i32, i32, i32
  }
  func.func @transform_3(%arg0: i32) -> (i32, i32, i32) {
    %c0_i32 = arith.constant 0 : i32
    %c0_i32_0 = arith.constant 0 : i32
    %c0_i32_1 = arith.constant 0 : i32
    %c0_i32_2 = arith.constant 0 : i32
    return %c0_i32, %c0_i32_0, %c0_i32_1 : i32, i32, i32
  }
  func.func @transform_4(%arg0: i32) -> (i32, i32, i32) {
    %c0_i32 = arith.constant 0 : i32
    %c0_i32_0 = arith.constant 0 : i32
    %c0_i32_1 = arith.constant 0 : i32
    %c0_i32_2 = arith.constant 0 : i32
    return %c0_i32, %c0_i32_0, %c0_i32_1 : i32, i32, i32
  }
  func.func @transform_5(%arg0: i32) -> (i32, i32, i32) {
    %c0_i32 = arith.constant 0 : i32
    %c0_i32_0 = arith.constant 0 : i32
    %c0_i32_1 = arith.constant 0 : i32
    %c0_i32_2 = arith.constant 0 : i32
    return %c0_i32, %c0_i32_0, %c0_i32_1 : i32, i32, i32
  }
  func.func @transform_6(%arg0: i32) -> (i32, i32, i32) {
    %c0_i32 = arith.constant 0 : i32
    %c0_i32_0 = arith.constant 0 : i32
    %c0_i32_1 = arith.constant 0 : i32
    %c0_i32_2 = arith.constant 0 : i32
    return %c0_i32, %c0_i32_0, %c0_i32_1 : i32, i32, i32
  }
  func.func @transform_7(%arg0: i32) -> (i32, i32, i32) {
    %c0_i32 = arith.constant 0 : i32
    %c0_i32_0 = arith.constant 0 : i32
    %c0_i32_1 = arith.constant 0 : i32
    %c0_i32_2 = arith.constant 0 : i32
    return %c0_i32, %c0_i32_0, %c0_i32_1 : i32, i32, i32
  }
  func.func @transform_8(%arg0: i32) -> (i32, i32, i32) {
    %c0_i32 = arith.constant 0 : i32
    %c0_i32_0 = arith.constant 0 : i32
    %c0_i32_1 = arith.constant 0 : i32
    %c0_i32_2 = arith.constant 0 : i32
    return %c0_i32, %c0_i32_0, %c0_i32_1 : i32, i32, i32
  }
  func.func @transform_9(%arg0: i32) -> (i32, i32, i32) {
    %c0_i32 = arith.constant 0 : i32
    %c0_i32_0 = arith.constant 0 : i32
    %c0_i32_1 = arith.constant 0 : i32
    %c0_i32_2 = arith.constant 0 : i32
    return %c0_i32, %c0_i32_0, %c0_i32_1 : i32, i32, i32
  }
  func.func @transform_10(%arg0: i32) -> (i32, i32, i32) {
    %c0_i32 = arith.constant 0 : i32
    %c0_i32_0 = arith.constant 0 : i32
    %c0_i32_1 = arith.constant 0 : i32
    %c0_i32_2 = arith.constant 0 : i32
    return %c0_i32, %c0_i32_0, %c0_i32_1 : i32, i32, i32
  }
  func.func @transform_11(%arg0: i32) -> (i32, i32, i32) {
    %c0_i32 = arith.constant 0 : i32
    %c0_i32_0 = arith.constant 0 : i32
    %c0_i32_1 = arith.constant 0 : i32
    %c0_i32_2 = arith.constant 0 : i32
    return %c0_i32, %c0_i32_0, %c0_i32_1 : i32, i32, i32
  }
  func.func @transform_12(%arg0: i32) -> (i32, i32, i32) {
    %c0_i32 = arith.constant 0 : i32
    %c0_i32_0 = arith.constant 0 : i32
    %c0_i32_1 = arith.constant 0 : i32
    %c0_i32_2 = arith.constant 0 : i32
    return %c0_i32, %c0_i32_0, %c0_i32_1 : i32, i32, i32
  }
  func.func @transform_13(%arg0: i32) -> (i32, i32, i32) {
    %c0_i32 = arith.constant 0 : i32
    %c0_i32_0 = arith.constant 0 : i32
    %c0_i32_1 = arith.constant 0 : i32
    %c0_i32_2 = arith.constant 0 : i32
    return %c0_i32, %c0_i32_0, %c0_i32_1 : i32, i32, i32
  }
  func.func @transform_14(%arg0: i32) -> (i32, i32, i32) {
    %c0_i32 = arith.constant 0 : i32
    %c0_i32_0 = arith.constant 0 : i32
    %c0_i32_1 = arith.constant 0 : i32
    %c0_i32_2 = arith.constant 0 : i32
    return %c0_i32, %c0_i32_0, %c0_i32_1 : i32, i32, i32
  }
  func.func @transform_15(%arg0: i32) -> (i32, i32) {
    %c0_i32 = arith.constant 0 : i32
    %c0_i32_0 = arith.constant 0 : i32
    %c0_i32_1 = arith.constant 0 : i32
    return %c0_i32, %c0_i32_0 : i32, i32
  }
  func.func @transform_16(%arg0: i32) -> (i32, i32) {
    %c0_i32 = arith.constant 0 : i32
    %c0_i32_0 = arith.constant 0 : i32
    %c0_i32_1 = arith.constant 0 : i32
    return %c0_i32, %c0_i32_0 : i32, i32
  }
  func.func @transform_17(%arg0: i32) -> (i32, i32, i32) {
    %c0_i32 = arith.constant 0 : i32
    %c0_i32_0 = arith.constant 0 : i32
    %c0_i32_1 = arith.constant 0 : i32
    return %arg0, %c0_i32, %c0_i32_0 : i32, i32, i32
  }
}

module attributes {stable_mosaic.version = 11 : i64} {
  func.func @decoder_kernel(%arg0: i32, %arg1: memref<1x8x32xf32, #tpu.memory_space<vmem>>, %arg2: memref<1x8x32xf32, #tpu.memory_space<vmem>>, %arg3: memref<8x8xf32, #tpu.memory_space<vmem>>, %arg4: memref<1x1x8xf32, #tpu.memory_space<vmem>>, %arg5: memref<1x1x8xf32, #tpu.memory_space<vmem>>, %arg6: memref<2x32x96xbf16, #tpu.memory_space<vmem>>, %arg7: memref<2x1x96xf32, #tpu.memory_space<vmem>>, %arg8: memref<2x32x32xbf16, #tpu.memory_space<vmem>>, %arg9: memref<2x1x32xf32, #tpu.memory_space<vmem>>, %arg10: memref<2x1x32xf32, #tpu.memory_space<vmem>>, %arg11: memref<2x1x32xf32, #tpu.memory_space<vmem>>, %arg12: memref<2x32x32xbf16, #tpu.memory_space<vmem>>, %arg13: memref<2x1x32xf32, #tpu.memory_space<vmem>>, %arg14: memref<2x32x64xbf16, #tpu.memory_space<vmem>>, %arg15: memref<2x1x64xf32, #tpu.memory_space<vmem>>, %arg16: memref<2x32x32xbf16, #tpu.memory_space<vmem>>, %arg17: memref<2x1x32xf32, #tpu.memory_space<vmem>>, %arg18: memref<2x1x32xf32, #tpu.memory_space<vmem>>, %arg19: memref<2x1x32xf32, #tpu.memory_space<vmem>>, %arg20: memref<2x32x128xbf16, #tpu.memory_space<vmem>>, %arg21: memref<2x1x128xf32, #tpu.memory_space<vmem>>, %arg22: memref<2x128x32xbf16, #tpu.memory_space<vmem>>, %arg23: memref<2x1x32xf32, #tpu.memory_space<vmem>>, %arg24: memref<2x1x32xf32, #tpu.memory_space<vmem>>, %arg25: memref<2x1x32xf32, #tpu.memory_space<vmem>>, %arg26: memref<1x32xf32, #tpu.memory_space<vmem>>, %arg27: memref<1x32xf32, #tpu.memory_space<vmem>>, %arg28: memref<32x128xbf16, #tpu.memory_space<vmem>>, %arg29: memref<1x128xf32, #tpu.memory_space<vmem>>, %arg30: memref<1x8x128xf32, #tpu.memory_space<vmem>>) attributes {dimension_semantics = [#tpu.dimension_semantics<parallel>], iteration_bounds = array<i64: 2>, scalar_prefetch = 0 : i64, scratch_operands = 0 : i64, tpu.core_type = #tpu.core_type<tc>, window_params = [{transform_indices = @transform_0, window_bounds = array<i64: 1, 8, 32>}, {transform_indices = @transform_1, window_bounds = array<i64: 1, 8, 32>}, {pipeline_mode = #tpu.pipeline_mode<synchronous>, transform_indices = @transform_2, window_bounds = array<i64: 8, 8>}, {transform_indices = @transform_3, window_bounds = array<i64: 1, 1, 8>}, {transform_indices = @transform_4, window_bounds = array<i64: 1, 1, 8>}, {pipeline_mode = #tpu.pipeline_mode<synchronous>, transform_indices = @transform_5, window_bounds = array<i64: 2, 32, 96>}, {pipeline_mode = #tpu.pipeline_mode<synchronous>, transform_indices = @transform_6, window_bounds = array<i64: 2, 1, 96>}, {pipeline_mode = #tpu.pipeline_mode<synchronous>, transform_indices = @transform_7, window_bounds = array<i64: 2, 32, 32>}, {pipeline_mode = #tpu.pipeline_mode<synchronous>, transform_indices = @transform_8, window_bounds = array<i64: 2, 1, 32>}, {pipeline_mode = #tpu.pipeline_mode<synchronous>, transform_indices = @transform_9, window_bounds = array<i64: 2, 1, 32>}, {pipeline_mode = #tpu.pipeline_mode<synchronous>, transform_indices = @transform_10, window_bounds = array<i64: 2, 1, 32>}, {pipeline_mode = #tpu.pipeline_mode<synchronous>, transform_indices = @transform_11, window_bounds = array<i64: 2, 32, 32>}, {pipeline_mode = #tpu.pipeline_mode<synchronous>, transform_indices = @transform_12, window_bounds = array<i64: 2, 1, 32>}, {pipeline_mode = #tpu.pipeline_mode<synchronous>, transform_indices = @transform_13, window_bounds = array<i64: 2, 32, 64>}, {pipeline_mode = #tpu.pipeline_mode<synchronous>, transform_indices = @transform_14, window_bounds = array<i64: 2, 1, 64>}, {pipeline_mode = #tpu.pipeline_mode<synchronous>, transform_indices = @transform_15, window_bounds = array<i64: 2, 32, 32>}, {pipeline_mode = #tpu.pipeline_mode<synchronous>, transform_indices = @transform_16, window_bounds = array<i64: 2, 1, 32>}, {pipeline_mode = #tpu.pipeline_mode<synchronous>, transform_indices = @transform_17, window_bounds = array<i64: 2, 1, 32>}, {pipeline_mode = #tpu.pipeline_mode<synchronous>, transform_indices = @transform_18, window_bounds = array<i64: 2, 1, 32>}, {pipeline_mode = #tpu.pipeline_mode<synchronous>, transform_indices = @transform_19, window_bounds = array<i64: 2, 32, 128>}, {pipeline_mode = #tpu.pipeline_mode<synchronous>, transform_indices = @transform_20, window_bounds = array<i64: 2, 1, 128>}, {pipeline_mode = #tpu.pipeline_mode<synchronous>, transform_indices = @transform_21, window_bounds = array<i64: 2, 128, 32>}, {pipeline_mode = #tpu.pipeline_mode<synchronous>, transform_indices = @transform_22, window_bounds = array<i64: 2, 1, 32>}, {pipeline_mode = #tpu.pipeline_mode<synchronous>, transform_indices = @transform_23, window_bounds = array<i64: 2, 1, 32>}, {pipeline_mode = #tpu.pipeline_mode<synchronous>, transform_indices = @transform_24, window_bounds = array<i64: 2, 1, 32>}, {pipeline_mode = #tpu.pipeline_mode<synchronous>, transform_indices = @transform_25, window_bounds = array<i64: 1, 32>}, {pipeline_mode = #tpu.pipeline_mode<synchronous>, transform_indices = @transform_26, window_bounds = array<i64: 1, 32>}, {pipeline_mode = #tpu.pipeline_mode<synchronous>, transform_indices = @transform_27, window_bounds = array<i64: 32, 128>}, {pipeline_mode = #tpu.pipeline_mode<synchronous>, transform_indices = @transform_28, window_bounds = array<i64: 1, 128>}, {transform_indices = @transform_29, window_bounds = array<i64: 1, 8, 128>}]} {
    %c0 = arith.constant 0 : index
    %c0_0 = arith.constant 0 : index
    %c0_1 = arith.constant 0 : index
    %0 = vector.load %arg1[%c0, %c0_0, %c0_1] : memref<1x8x32xf32, #tpu.memory_space<vmem>>, vector<1x8x32xf32>
    %1 = vector.shape_cast %0 : vector<1x8x32xf32> to vector<8x32xf32>
    %c0_2 = arith.constant 0 : index
    %c0_3 = arith.constant 0 : index
    %c0_4 = arith.constant 0 : index
    %2 = vector.load %arg2[%c0_2, %c0_3, %c0_4] : memref<1x8x32xf32, #tpu.memory_space<vmem>>, vector<1x8x32xf32>
    %3 = vector.shape_cast %2 : vector<1x8x32xf32> to vector<8x32xf32>
    %c0_5 = arith.constant 0 : index
    %c0_6 = arith.constant 0 : index
    %4 = vector.load %arg3[%c0_5, %c0_6] : memref<8x8xf32, #tpu.memory_space<vmem>>, vector<8x8xf32>
    %c0_7 = arith.constant 0 : index
    %c0_8 = arith.constant 0 : index
    %c0_9 = arith.constant 0 : index
    %5 = vector.load %arg4[%c0_7, %c0_8, %c0_9] : memref<1x1x8xf32, #tpu.memory_space<vmem>>, vector<1x1x8xf32>
    %6 = vector.shape_cast %5 : vector<1x1x8xf32> to vector<1x8xf32>
    %7 = vector.broadcast %6 : vector<1x8xf32> to vector<8x8xf32>
    %8 = arith.addf %4, %7 : vector<8x8xf32>
    %c0_10 = arith.constant 0 : index
    %c0_11 = arith.constant 0 : index
    %c0_12 = arith.constant 0 : index
    %9 = vector.load %arg5[%c0_10, %c0_11, %c0_12] : memref<1x1x8xf32, #tpu.memory_space<vmem>>, vector<1x1x8xf32>
    %10 = vector.shape_cast %9 : vector<1x1x8xf32> to vector<1x8xf32>
    %c0_13 = arith.constant 0 : index
    %c0_14 = arith.constant 0 : index
    %c0_15 = arith.constant 0 : index
    %11 = vector.load %arg6[%c0_13, %c0_14, %c0_15] : memref<2x32x96xbf16, #tpu.memory_space<vmem>>, vector<1x32x96xbf16>
    %12 = vector.shape_cast %11 : vector<1x32x96xbf16> to vector<32x96xbf16>
    %c0_16 = arith.constant 0 : index
    %c0_17 = arith.constant 0 : index
    %c0_18 = arith.constant 0 : index
    %13 = vector.load %arg7[%c0_16, %c0_17, %c0_18] : memref<2x1x96xf32, #tpu.memory_space<vmem>>, vector<1x1x96xf32>
    %14 = vector.shape_cast %13 : vector<1x1x96xf32> to vector<1x96xf32>
    %15 = arith.truncf %1 : vector<8x32xf32> to vector<8x32xbf16>
    %cst = arith.constant dense<0.000000e+00> : vector<8x96xf32>
    %16 = tpu.matmul %15, %12, %cst {dimension_numbers = #tpu.dot_dimension_numbers<[1], [0], [0], [1], [0, 0, 1, 1], [], []>} : vector<8x32xbf16>, vector<32x96xbf16>, vector<8x96xf32> -> vector<8x96xf32>
    %17 = vector.broadcast %14 : vector<1x96xf32> to vector<8x96xf32>
    %18 = arith.addf %16, %17 : vector<8x96xf32>
    %19 = vector.extract_strided_slice %18 {offsets = [0, 0], sizes = [8, 32], strides = [1, 1]} : vector<8x96xf32> to vector<8x32xf32>
    %20 = vector.extract_strided_slice %18 {offsets = [0, 32], sizes = [8, 32], strides = [1, 1]} : vector<8x96xf32> to vector<8x32xf32>
    %21 = vector.extract_strided_slice %18 {offsets = [0, 64], sizes = [8, 32], strides = [1, 1]} : vector<8x96xf32> to vector<8x32xf32>
    %c0_19 = arith.constant 0 : index
    %c0_20 = arith.constant 0 : index
    %c0_21 = arith.constant 0 : index
    %22 = vector.load %arg8[%c0_19, %c0_20, %c0_21] : memref<2x32x32xbf16, #tpu.memory_space<vmem>>, vector<1x32x32xbf16>
    %23 = vector.shape_cast %22 : vector<1x32x32xbf16> to vector<32x32xbf16>
    %c0_22 = arith.constant 0 : index
    %c0_23 = arith.constant 0 : index
    %c0_24 = arith.constant 0 : index
    %24 = vector.load %arg9[%c0_22, %c0_23, %c0_24] : memref<2x1x32xf32, #tpu.memory_space<vmem>>, vector<1x1x32xf32>
    %25 = vector.shape_cast %24 : vector<1x1x32xf32> to vector<1x32xf32>
    %26 = vector.extract_strided_slice %19 {offsets = [0, 0], sizes = [8, 8], strides = [1, 1]} : vector<8x32xf32> to vector<8x8xf32>
    %27 = arith.truncf %26 : vector<8x8xf32> to vector<8x8xbf16>
    %28 = vector.extract_strided_slice %20 {offsets = [0, 0], sizes = [8, 8], strides = [1, 1]} : vector<8x32xf32> to vector<8x8xf32>
    %29 = arith.truncf %28 : vector<8x8xf32> to vector<8x8xbf16>
    %30 = vector.extract_strided_slice %21 {offsets = [0, 0], sizes = [8, 8], strides = [1, 1]} : vector<8x32xf32> to vector<8x8xf32>
    %31 = arith.truncf %30 : vector<8x8xf32> to vector<8x8xbf16>
    %cst_25 = arith.constant dense<0.000000e+00> : vector<8x8xf32>
    %32 = tpu.matmul %27, %29, %cst_25 {dimension_numbers = #tpu.dot_dimension_numbers<[1], [1], [0], [0], [0, 0, 1, 0], [], []>} : vector<8x8xbf16>, vector<8x8xbf16>, vector<8x8xf32> -> vector<8x8xf32>
    %cst_26 = arith.constant 0.353553385 : f32
    %33 = vector.broadcast %cst_26 : f32 to vector<8x8xf32>
    %34 = arith.mulf %32, %33 : vector<8x8xf32>
    %35 = arith.addf %34, %8 : vector<8x8xf32>
    %cst_27 = arith.constant dense<0xFF800000> : vector<8xf32>
    %36 = vector.multi_reduction <maximumf>, %35, %cst_27 [1] : vector<8x8xf32> to vector<8xf32>
    %37 = vector.shape_cast %36 : vector<8xf32> to vector<8x1xf32>
    %38 = vector.broadcast %37 : vector<8x1xf32> to vector<8x8xf32>
    %39 = arith.subf %35, %38 : vector<8x8xf32>
    %40 = math.exp %39 : vector<8x8xf32>
    %cst_28 = arith.constant dense<0.000000e+00> : vector<8xf32>
    %41 = vector.multi_reduction <add>, %40, %cst_28 [1] : vector<8x8xf32> to vector<8xf32>
    %42 = vector.shape_cast %41 : vector<8xf32> to vector<8x1xf32>
    %43 = tpu.reciprocal %42 {approx = true} : vector<8x1xf32> -> vector<8x1xf32>
    %44 = vector.broadcast %43 : vector<8x1xf32> to vector<8x8xf32>
    %45 = arith.mulf %40, %44 : vector<8x8xf32>
    %46 = arith.truncf %45 : vector<8x8xf32> to vector<8x8xbf16>
    %cst_29 = arith.constant dense<0.000000e+00> : vector<8x8xf32>
    %47 = tpu.matmul %46, %31, %cst_29 {dimension_numbers = #tpu.dot_dimension_numbers<[1], [0], [0], [1], [0, 0, 1, 1], [], []>} : vector<8x8xbf16>, vector<8x8xbf16>, vector<8x8xf32> -> vector<8x8xf32>
    %48 = arith.truncf %47 : vector<8x8xf32> to vector<8x8xbf16>
    %49 = vector.extract_strided_slice %23 {offsets = [0, 0], sizes = [8, 32], strides = [1, 1]} : vector<32x32xbf16> to vector<8x32xbf16>
    %cst_30 = arith.constant dense<0.000000e+00> : vector<8x32xf32>
    %50 = tpu.matmul %48, %49, %cst_30 {dimension_numbers = #tpu.dot_dimension_numbers<[1], [0], [0], [1], [0, 0, 1, 1], [], []>} : vector<8x8xbf16>, vector<8x32xbf16>, vector<8x32xf32> -> vector<8x32xf32>
    %51 = vector.extract_strided_slice %19 {offsets = [0, 8], sizes = [8, 8], strides = [1, 1]} : vector<8x32xf32> to vector<8x8xf32>
    %52 = arith.truncf %51 : vector<8x8xf32> to vector<8x8xbf16>
    %53 = vector.extract_strided_slice %20 {offsets = [0, 8], sizes = [8, 8], strides = [1, 1]} : vector<8x32xf32> to vector<8x8xf32>
    %54 = arith.truncf %53 : vector<8x8xf32> to vector<8x8xbf16>
    %55 = vector.extract_strided_slice %21 {offsets = [0, 8], sizes = [8, 8], strides = [1, 1]} : vector<8x32xf32> to vector<8x8xf32>
    %56 = arith.truncf %55 : vector<8x8xf32> to vector<8x8xbf16>
    %cst_31 = arith.constant dense<0.000000e+00> : vector<8x8xf32>
    %57 = tpu.matmul %52, %54, %cst_31 {dimension_numbers = #tpu.dot_dimension_numbers<[1], [1], [0], [0], [0, 0, 1, 0], [], []>} : vector<8x8xbf16>, vector<8x8xbf16>, vector<8x8xf32> -> vector<8x8xf32>
    %cst_32 = arith.constant 0.353553385 : f32
    %58 = vector.broadcast %cst_32 : f32 to vector<8x8xf32>
    %59 = arith.mulf %57, %58 : vector<8x8xf32>
    %60 = arith.addf %59, %8 : vector<8x8xf32>
    %cst_33 = arith.constant dense<0xFF800000> : vector<8xf32>
    %61 = vector.multi_reduction <maximumf>, %60, %cst_33 [1] : vector<8x8xf32> to vector<8xf32>
    %62 = vector.shape_cast %61 : vector<8xf32> to vector<8x1xf32>
    %63 = vector.broadcast %62 : vector<8x1xf32> to vector<8x8xf32>
    %64 = arith.subf %60, %63 : vector<8x8xf32>
    %65 = math.exp %64 : vector<8x8xf32>
    %cst_34 = arith.constant dense<0.000000e+00> : vector<8xf32>
    %66 = vector.multi_reduction <add>, %65, %cst_34 [1] : vector<8x8xf32> to vector<8xf32>
    %67 = vector.shape_cast %66 : vector<8xf32> to vector<8x1xf32>
    %68 = tpu.reciprocal %67 {approx = true} : vector<8x1xf32> -> vector<8x1xf32>
    %69 = vector.broadcast %68 : vector<8x1xf32> to vector<8x8xf32>
    %70 = arith.mulf %65, %69 : vector<8x8xf32>
    %71 = arith.truncf %70 : vector<8x8xf32> to vector<8x8xbf16>
    %cst_35 = arith.constant dense<0.000000e+00> : vector<8x8xf32>
    %72 = tpu.matmul %71, %56, %cst_35 {dimension_numbers = #tpu.dot_dimension_numbers<[1], [0], [0], [1], [0, 0, 1, 1], [], []>} : vector<8x8xbf16>, vector<8x8xbf16>, vector<8x8xf32> -> vector<8x8xf32>
    %73 = arith.truncf %72 : vector<8x8xf32> to vector<8x8xbf16>
    %74 = vector.extract_strided_slice %23 {offsets = [8, 0], sizes = [8, 32], strides = [1, 1]} : vector<32x32xbf16> to vector<8x32xbf16>
    %cst_36 = arith.constant dense<0.000000e+00> : vector<8x32xf32>
    %75 = tpu.matmul %73, %74, %cst_36 {dimension_numbers = #tpu.dot_dimension_numbers<[1], [0], [0], [1], [0, 0, 1, 1], [], []>} : vector<8x8xbf16>, vector<8x32xbf16>, vector<8x32xf32> -> vector<8x32xf32>
    %76 = arith.addf %50, %75 : vector<8x32xf32>
    %77 = vector.extract_strided_slice %19 {offsets = [0, 16], sizes = [8, 8], strides = [1, 1]} : vector<8x32xf32> to vector<8x8xf32>
    %78 = arith.truncf %77 : vector<8x8xf32> to vector<8x8xbf16>
    %79 = vector.extract_strided_slice %20 {offsets = [0, 16], sizes = [8, 8], strides = [1, 1]} : vector<8x32xf32> to vector<8x8xf32>
    %80 = arith.truncf %79 : vector<8x8xf32> to vector<8x8xbf16>
    %81 = vector.extract_strided_slice %21 {offsets = [0, 16], sizes = [8, 8], strides = [1, 1]} : vector<8x32xf32> to vector<8x8xf32>
    %82 = arith.truncf %81 : vector<8x8xf32> to vector<8x8xbf16>
    %cst_37 = arith.constant dense<0.000000e+00> : vector<8x8xf32>
    %83 = tpu.matmul %78, %80, %cst_37 {dimension_numbers = #tpu.dot_dimension_numbers<[1], [1], [0], [0], [0, 0, 1, 0], [], []>} : vector<8x8xbf16>, vector<8x8xbf16>, vector<8x8xf32> -> vector<8x8xf32>
    %cst_38 = arith.constant 0.353553385 : f32
    %84 = vector.broadcast %cst_38 : f32 to vector<8x8xf32>
    %85 = arith.mulf %83, %84 : vector<8x8xf32>
    %86 = arith.addf %85, %8 : vector<8x8xf32>
    %cst_39 = arith.constant dense<0xFF800000> : vector<8xf32>
    %87 = vector.multi_reduction <maximumf>, %86, %cst_39 [1] : vector<8x8xf32> to vector<8xf32>
    %88 = vector.shape_cast %87 : vector<8xf32> to vector<8x1xf32>
    %89 = vector.broadcast %88 : vector<8x1xf32> to vector<8x8xf32>
    %90 = arith.subf %86, %89 : vector<8x8xf32>
    %91 = math.exp %90 : vector<8x8xf32>
    %cst_40 = arith.constant dense<0.000000e+00> : vector<8xf32>
    %92 = vector.multi_reduction <add>, %91, %cst_40 [1] : vector<8x8xf32> to vector<8xf32>
    %93 = vector.shape_cast %92 : vector<8xf32> to vector<8x1xf32>
    %94 = tpu.reciprocal %93 {approx = true} : vector<8x1xf32> -> vector<8x1xf32>
    %95 = vector.broadcast %94 : vector<8x1xf32> to vector<8x8xf32>
    %96 = arith.mulf %91, %95 : vector<8x8xf32>
    %97 = arith.truncf %96 : vector<8x8xf32> to vector<8x8xbf16>
    %cst_41 = arith.constant dense<0.000000e+00> : vector<8x8xf32>
    %98 = tpu.matmul %97, %82, %cst_41 {dimension_numbers = #tpu.dot_dimension_numbers<[1], [0], [0], [1], [0, 0, 1, 1], [], []>} : vector<8x8xbf16>, vector<8x8xbf16>, vector<8x8xf32> -> vector<8x8xf32>
    %99 = arith.truncf %98 : vector<8x8xf32> to vector<8x8xbf16>
    %100 = vector.extract_strided_slice %23 {offsets = [16, 0], sizes = [8, 32], strides = [1, 1]} : vector<32x32xbf16> to vector<8x32xbf16>
    %cst_42 = arith.constant dense<0.000000e+00> : vector<8x32xf32>
    %101 = tpu.matmul %99, %100, %cst_42 {dimension_numbers = #tpu.dot_dimension_numbers<[1], [0], [0], [1], [0, 0, 1, 1], [], []>} : vector<8x8xbf16>, vector<8x32xbf16>, vector<8x32xf32> -> vector<8x32xf32>
    %102 = arith.addf %76, %101 : vector<8x32xf32>
    %103 = vector.extract_strided_slice %19 {offsets = [0, 24], sizes = [8, 8], strides = [1, 1]} : vector<8x32xf32> to vector<8x8xf32>
    %104 = arith.truncf %103 : vector<8x8xf32> to vector<8x8xbf16>
    %105 = vector.extract_strided_slice %20 {offsets = [0, 24], sizes = [8, 8], strides = [1, 1]} : vector<8x32xf32> to vector<8x8xf32>
    %106 = arith.truncf %105 : vector<8x8xf32> to vector<8x8xbf16>
    %107 = vector.extract_strided_slice %21 {offsets = [0, 24], sizes = [8, 8], strides = [1, 1]} : vector<8x32xf32> to vector<8x8xf32>
    %108 = arith.truncf %107 : vector<8x8xf32> to vector<8x8xbf16>
    %cst_43 = arith.constant dense<0.000000e+00> : vector<8x8xf32>
    %109 = tpu.matmul %104, %106, %cst_43 {dimension_numbers = #tpu.dot_dimension_numbers<[1], [1], [0], [0], [0, 0, 1, 0], [], []>} : vector<8x8xbf16>, vector<8x8xbf16>, vector<8x8xf32> -> vector<8x8xf32>
    %cst_44 = arith.constant 0.353553385 : f32
    %110 = vector.broadcast %cst_44 : f32 to vector<8x8xf32>
    %111 = arith.mulf %109, %110 : vector<8x8xf32>
    %112 = arith.addf %111, %8 : vector<8x8xf32>
    %cst_45 = arith.constant dense<0xFF800000> : vector<8xf32>
    %113 = vector.multi_reduction <maximumf>, %112, %cst_45 [1] : vector<8x8xf32> to vector<8xf32>
    %114 = vector.shape_cast %113 : vector<8xf32> to vector<8x1xf32>
    %115 = vector.broadcast %114 : vector<8x1xf32> to vector<8x8xf32>
    %116 = arith.subf %112, %115 : vector<8x8xf32>
    %117 = math.exp %116 : vector<8x8xf32>
    %cst_46 = arith.constant dense<0.000000e+00> : vector<8xf32>
    %118 = vector.multi_reduction <add>, %117, %cst_46 [1] : vector<8x8xf32> to vector<8xf32>
    %119 = vector.shape_cast %118 : vector<8xf32> to vector<8x1xf32>
    %120 = tpu.reciprocal %119 {approx = true} : vector<8x1xf32> -> vector<8x1xf32>
    %121 = vector.broadcast %120 : vector<8x1xf32> to vector<8x8xf32>
    %122 = arith.mulf %117, %121 : vector<8x8xf32>
    %123 = arith.truncf %122 : vector<8x8xf32> to vector<8x8xbf16>
    %cst_47 = arith.constant dense<0.000000e+00> : vector<8x8xf32>
    %124 = tpu.matmul %123, %108, %cst_47 {dimension_numbers = #tpu.dot_dimension_numbers<[1], [0], [0], [1], [0, 0, 1, 1], [], []>} : vector<8x8xbf16>, vector<8x8xbf16>, vector<8x8xf32> -> vector<8x8xf32>
    %125 = arith.truncf %124 : vector<8x8xf32> to vector<8x8xbf16>
    %126 = vector.extract_strided_slice %23 {offsets = [24, 0], sizes = [8, 32], strides = [1, 1]} : vector<32x32xbf16> to vector<8x32xbf16>
    %cst_48 = arith.constant dense<0.000000e+00> : vector<8x32xf32>
    %127 = tpu.matmul %125, %126, %cst_48 {dimension_numbers = #tpu.dot_dimension_numbers<[1], [0], [0], [1], [0, 0, 1, 1], [], []>} : vector<8x8xbf16>, vector<8x32xbf16>, vector<8x32xf32> -> vector<8x32xf32>
    %128 = arith.addf %102, %127 : vector<8x32xf32>
    %129 = vector.broadcast %25 : vector<1x32xf32> to vector<8x32xf32>
    %130 = arith.addf %128, %129 : vector<8x32xf32>
    %131 = arith.addf %1, %130 : vector<8x32xf32>
    %c0_49 = arith.constant 0 : index
    %c0_50 = arith.constant 0 : index
    %c0_51 = arith.constant 0 : index
    %132 = vector.load %arg10[%c0_49, %c0_50, %c0_51] : memref<2x1x32xf32, #tpu.memory_space<vmem>>, vector<1x1x32xf32>
    %133 = vector.shape_cast %132 : vector<1x1x32xf32> to vector<1x32xf32>
    %c0_52 = arith.constant 0 : index
    %c0_53 = arith.constant 0 : index
    %c0_54 = arith.constant 0 : index
    %134 = vector.load %arg11[%c0_52, %c0_53, %c0_54] : memref<2x1x32xf32, #tpu.memory_space<vmem>>, vector<1x1x32xf32>
    %135 = vector.shape_cast %134 : vector<1x1x32xf32> to vector<1x32xf32>
    %cst_55 = arith.constant dense<0.000000e+00> : vector<8xf32>
    %136 = vector.multi_reduction <add>, %131, %cst_55 [1] : vector<8x32xf32> to vector<8xf32>
    %137 = vector.shape_cast %136 : vector<8xf32> to vector<8x1xf32>
    %cst_56 = arith.constant 3.200000e+01 : f32
    %138 = vector.broadcast %cst_56 : f32 to vector<8x1xf32>
    %139 = arith.divf %137, %138 : vector<8x1xf32>
    %140 = vector.broadcast %139 : vector<8x1xf32> to vector<8x32xf32>
    %141 = arith.subf %131, %140 : vector<8x32xf32>
    %142 = arith.mulf %141, %141 : vector<8x32xf32>
    %cst_57 = arith.constant dense<0.000000e+00> : vector<8xf32>
    %143 = vector.multi_reduction <add>, %142, %cst_57 [1] : vector<8x32xf32> to vector<8xf32>
    %144 = vector.shape_cast %143 : vector<8xf32> to vector<8x1xf32>
    %cst_58 = arith.constant 3.200000e+01 : f32
    %145 = vector.broadcast %cst_58 : f32 to vector<8x1xf32>
    %146 = arith.divf %144, %145 : vector<8x1xf32>
    %cst_59 = arith.constant 9.99999974E-6 : f32
    %147 = vector.broadcast %cst_59 : f32 to vector<8x1xf32>
    %148 = arith.addf %146, %147 : vector<8x1xf32>
    %149 = math.rsqrt %148 : vector<8x1xf32>
    %150 = vector.broadcast %149 : vector<8x1xf32> to vector<8x32xf32>
    %151 = arith.mulf %141, %150 : vector<8x32xf32>
    %152 = vector.broadcast %133 : vector<1x32xf32> to vector<8x32xf32>
    %153 = arith.mulf %151, %152 : vector<8x32xf32>
    %154 = vector.broadcast %135 : vector<1x32xf32> to vector<8x32xf32>
    %155 = arith.addf %153, %154 : vector<8x32xf32>
    %c0_60 = arith.constant 0 : index
    %c0_61 = arith.constant 0 : index
    %c0_62 = arith.constant 0 : index
    %156 = vector.load %arg12[%c0_60, %c0_61, %c0_62] : memref<2x32x32xbf16, #tpu.memory_space<vmem>>, vector<1x32x32xbf16>
    %157 = vector.shape_cast %156 : vector<1x32x32xbf16> to vector<32x32xbf16>
    %c0_63 = arith.constant 0 : index
    %c0_64 = arith.constant 0 : index
    %c0_65 = arith.constant 0 : index
    %158 = vector.load %arg13[%c0_63, %c0_64, %c0_65] : memref<2x1x32xf32, #tpu.memory_space<vmem>>, vector<1x1x32xf32>
    %159 = vector.shape_cast %158 : vector<1x1x32xf32> to vector<1x32xf32>
    %160 = arith.truncf %155 : vector<8x32xf32> to vector<8x32xbf16>
    %cst_66 = arith.constant dense<0.000000e+00> : vector<8x32xf32>
    %161 = tpu.matmul %160, %157, %cst_66 {dimension_numbers = #tpu.dot_dimension_numbers<[1], [0], [0], [1], [0, 0, 1, 1], [], []>} : vector<8x32xbf16>, vector<32x32xbf16>, vector<8x32xf32> -> vector<8x32xf32>
    %162 = vector.broadcast %159 : vector<1x32xf32> to vector<8x32xf32>
    %163 = arith.addf %161, %162 : vector<8x32xf32>
    %c0_67 = arith.constant 0 : index
    %c0_68 = arith.constant 0 : index
    %c0_69 = arith.constant 0 : index
    %164 = vector.load %arg14[%c0_67, %c0_68, %c0_69] : memref<2x32x64xbf16, #tpu.memory_space<vmem>>, vector<1x32x64xbf16>
    %165 = vector.shape_cast %164 : vector<1x32x64xbf16> to vector<32x64xbf16>
    %c0_70 = arith.constant 0 : index
    %c0_71 = arith.constant 0 : index
    %c0_72 = arith.constant 0 : index
    %166 = vector.load %arg15[%c0_70, %c0_71, %c0_72] : memref<2x1x64xf32, #tpu.memory_space<vmem>>, vector<1x1x64xf32>
    %167 = vector.shape_cast %166 : vector<1x1x64xf32> to vector<1x64xf32>
    %168 = arith.truncf %3 : vector<8x32xf32> to vector<8x32xbf16>
    %cst_73 = arith.constant dense<0.000000e+00> : vector<8x64xf32>
    %169 = tpu.matmul %168, %165, %cst_73 {dimension_numbers = #tpu.dot_dimension_numbers<[1], [0], [0], [1], [0, 0, 1, 1], [], []>} : vector<8x32xbf16>, vector<32x64xbf16>, vector<8x64xf32> -> vector<8x64xf32>
    %170 = vector.broadcast %167 : vector<1x64xf32> to vector<8x64xf32>
    %171 = arith.addf %169, %170 : vector<8x64xf32>
    %172 = vector.extract_strided_slice %171 {offsets = [0, 0], sizes = [8, 32], strides = [1, 1]} : vector<8x64xf32> to vector<8x32xf32>
    %173 = vector.extract_strided_slice %171 {offsets = [0, 32], sizes = [8, 32], strides = [1, 1]} : vector<8x64xf32> to vector<8x32xf32>
    %c0_74 = arith.constant 0 : index
    %c0_75 = arith.constant 0 : index
    %c0_76 = arith.constant 0 : index
    %174 = vector.load %arg16[%c0_74, %c0_75, %c0_76] : memref<2x32x32xbf16, #tpu.memory_space<vmem>>, vector<1x32x32xbf16>
    %175 = vector.shape_cast %174 : vector<1x32x32xbf16> to vector<32x32xbf16>
    %c0_77 = arith.constant 0 : index
    %c0_78 = arith.constant 0 : index
    %c0_79 = arith.constant 0 : index
    %176 = vector.load %arg17[%c0_77, %c0_78, %c0_79] : memref<2x1x32xf32, #tpu.memory_space<vmem>>, vector<1x1x32xf32>
    %177 = vector.shape_cast %176 : vector<1x1x32xf32> to vector<1x32xf32>
    %178 = vector.extract_strided_slice %163 {offsets = [0, 0], sizes = [8, 8], strides = [1, 1]} : vector<8x32xf32> to vector<8x8xf32>
    %179 = arith.truncf %178 : vector<8x8xf32> to vector<8x8xbf16>
    %180 = vector.extract_strided_slice %172 {offsets = [0, 0], sizes = [8, 8], strides = [1, 1]} : vector<8x32xf32> to vector<8x8xf32>
    %181 = arith.truncf %180 : vector<8x8xf32> to vector<8x8xbf16>
    %182 = vector.extract_strided_slice %173 {offsets = [0, 0], sizes = [8, 8], strides = [1, 1]} : vector<8x32xf32> to vector<8x8xf32>
    %183 = arith.truncf %182 : vector<8x8xf32> to vector<8x8xbf16>
    %cst_80 = arith.constant dense<0.000000e+00> : vector<8x8xf32>
    %184 = tpu.matmul %179, %181, %cst_80 {dimension_numbers = #tpu.dot_dimension_numbers<[1], [1], [0], [0], [0, 0, 1, 0], [], []>} : vector<8x8xbf16>, vector<8x8xbf16>, vector<8x8xf32> -> vector<8x8xf32>
    %cst_81 = arith.constant 0.353553385 : f32
    %185 = vector.broadcast %cst_81 : f32 to vector<8x8xf32>
    %186 = arith.mulf %184, %185 : vector<8x8xf32>
    %187 = vector.broadcast %10 : vector<1x8xf32> to vector<8x8xf32>
    %188 = arith.addf %186, %187 : vector<8x8xf32>
    %cst_82 = arith.constant dense<0xFF800000> : vector<8xf32>
    %189 = vector.multi_reduction <maximumf>, %188, %cst_82 [1] : vector<8x8xf32> to vector<8xf32>
    %190 = vector.shape_cast %189 : vector<8xf32> to vector<8x1xf32>
    %191 = vector.broadcast %190 : vector<8x1xf32> to vector<8x8xf32>
    %192 = arith.subf %188, %191 : vector<8x8xf32>
    %193 = math.exp %192 : vector<8x8xf32>
    %cst_83 = arith.constant dense<0.000000e+00> : vector<8xf32>
    %194 = vector.multi_reduction <add>, %193, %cst_83 [1] : vector<8x8xf32> to vector<8xf32>
    %195 = vector.shape_cast %194 : vector<8xf32> to vector<8x1xf32>
    %196 = tpu.reciprocal %195 {approx = true} : vector<8x1xf32> -> vector<8x1xf32>
    %197 = vector.broadcast %196 : vector<8x1xf32> to vector<8x8xf32>
    %198 = arith.mulf %193, %197 : vector<8x8xf32>
    %199 = arith.truncf %198 : vector<8x8xf32> to vector<8x8xbf16>
    %cst_84 = arith.constant dense<0.000000e+00> : vector<8x8xf32>
    %200 = tpu.matmul %199, %183, %cst_84 {dimension_numbers = #tpu.dot_dimension_numbers<[1], [0], [0], [1], [0, 0, 1, 1], [], []>} : vector<8x8xbf16>, vector<8x8xbf16>, vector<8x8xf32> -> vector<8x8xf32>
    %201 = arith.truncf %200 : vector<8x8xf32> to vector<8x8xbf16>
    %202 = vector.extract_strided_slice %175 {offsets = [0, 0], sizes = [8, 32], strides = [1, 1]} : vector<32x32xbf16> to vector<8x32xbf16>
    %cst_85 = arith.constant dense<0.000000e+00> : vector<8x32xf32>
    %203 = tpu.matmul %201, %202, %cst_85 {dimension_numbers = #tpu.dot_dimension_numbers<[1], [0], [0], [1], [0, 0, 1, 1], [], []>} : vector<8x8xbf16>, vector<8x32xbf16>, vector<8x32xf32> -> vector<8x32xf32>
    %204 = vector.extract_strided_slice %163 {offsets = [0, 8], sizes = [8, 8], strides = [1, 1]} : vector<8x32xf32> to vector<8x8xf32>
    %205 = arith.truncf %204 : vector<8x8xf32> to vector<8x8xbf16>
    %206 = vector.extract_strided_slice %172 {offsets = [0, 8], sizes = [8, 8], strides = [1, 1]} : vector<8x32xf32> to vector<8x8xf32>
    %207 = arith.truncf %206 : vector<8x8xf32> to vector<8x8xbf16>
    %208 = vector.extract_strided_slice %173 {offsets = [0, 8], sizes = [8, 8], strides = [1, 1]} : vector<8x32xf32> to vector<8x8xf32>
    %209 = arith.truncf %208 : vector<8x8xf32> to vector<8x8xbf16>
    %cst_86 = arith.constant dense<0.000000e+00> : vector<8x8xf32>
    %210 = tpu.matmul %205, %207, %cst_86 {dimension_numbers = #tpu.dot_dimension_numbers<[1], [1], [0], [0], [0, 0, 1, 0], [], []>} : vector<8x8xbf16>, vector<8x8xbf16>, vector<8x8xf32> -> vector<8x8xf32>
    %cst_87 = arith.constant 0.353553385 : f32
    %211 = vector.broadcast %cst_87 : f32 to vector<8x8xf32>
    %212 = arith.mulf %210, %211 : vector<8x8xf32>
    %213 = vector.broadcast %10 : vector<1x8xf32> to vector<8x8xf32>
    %214 = arith.addf %212, %213 : vector<8x8xf32>
    %cst_88 = arith.constant dense<0xFF800000> : vector<8xf32>
    %215 = vector.multi_reduction <maximumf>, %214, %cst_88 [1] : vector<8x8xf32> to vector<8xf32>
    %216 = vector.shape_cast %215 : vector<8xf32> to vector<8x1xf32>
    %217 = vector.broadcast %216 : vector<8x1xf32> to vector<8x8xf32>
    %218 = arith.subf %214, %217 : vector<8x8xf32>
    %219 = math.exp %218 : vector<8x8xf32>
    %cst_89 = arith.constant dense<0.000000e+00> : vector<8xf32>
    %220 = vector.multi_reduction <add>, %219, %cst_89 [1] : vector<8x8xf32> to vector<8xf32>
    %221 = vector.shape_cast %220 : vector<8xf32> to vector<8x1xf32>
    %222 = tpu.reciprocal %221 {approx = true} : vector<8x1xf32> -> vector<8x1xf32>
    %223 = vector.broadcast %222 : vector<8x1xf32> to vector<8x8xf32>
    %224 = arith.mulf %219, %223 : vector<8x8xf32>
    %225 = arith.truncf %224 : vector<8x8xf32> to vector<8x8xbf16>
    %cst_90 = arith.constant dense<0.000000e+00> : vector<8x8xf32>
    %226 = tpu.matmul %225, %209, %cst_90 {dimension_numbers = #tpu.dot_dimension_numbers<[1], [0], [0], [1], [0, 0, 1, 1], [], []>} : vector<8x8xbf16>, vector<8x8xbf16>, vector<8x8xf32> -> vector<8x8xf32>
    %227 = arith.truncf %226 : vector<8x8xf32> to vector<8x8xbf16>
    %228 = vector.extract_strided_slice %175 {offsets = [8, 0], sizes = [8, 32], strides = [1, 1]} : vector<32x32xbf16> to vector<8x32xbf16>
    %cst_91 = arith.constant dense<0.000000e+00> : vector<8x32xf32>
    %229 = tpu.matmul %227, %228, %cst_91 {dimension_numbers = #tpu.dot_dimension_numbers<[1], [0], [0], [1], [0, 0, 1, 1], [], []>} : vector<8x8xbf16>, vector<8x32xbf16>, vector<8x32xf32> -> vector<8x32xf32>
    %230 = arith.addf %203, %229 : vector<8x32xf32>
    %231 = vector.extract_strided_slice %163 {offsets = [0, 16], sizes = [8, 8], strides = [1, 1]} : vector<8x32xf32> to vector<8x8xf32>
    %232 = arith.truncf %231 : vector<8x8xf32> to vector<8x8xbf16>
    %233 = vector.extract_strided_slice %172 {offsets = [0, 16], sizes = [8, 8], strides = [1, 1]} : vector<8x32xf32> to vector<8x8xf32>
    %234 = arith.truncf %233 : vector<8x8xf32> to vector<8x8xbf16>
    %235 = vector.extract_strided_slice %173 {offsets = [0, 16], sizes = [8, 8], strides = [1, 1]} : vector<8x32xf32> to vector<8x8xf32>
    %236 = arith.truncf %235 : vector<8x8xf32> to vector<8x8xbf16>
    %cst_92 = arith.constant dense<0.000000e+00> : vector<8x8xf32>
    %237 = tpu.matmul %232, %234, %cst_92 {dimension_numbers = #tpu.dot_dimension_numbers<[1], [1], [0], [0], [0, 0, 1, 0], [], []>} : vector<8x8xbf16>, vector<8x8xbf16>, vector<8x8xf32> -> vector<8x8xf32>
    %cst_93 = arith.constant 0.353553385 : f32
    %238 = vector.broadcast %cst_93 : f32 to vector<8x8xf32>
    %239 = arith.mulf %237, %238 : vector<8x8xf32>
    %240 = vector.broadcast %10 : vector<1x8xf32> to vector<8x8xf32>
    %241 = arith.addf %239, %240 : vector<8x8xf32>
    %cst_94 = arith.constant dense<0xFF800000> : vector<8xf32>
    %242 = vector.multi_reduction <maximumf>, %241, %cst_94 [1] : vector<8x8xf32> to vector<8xf32>
    %243 = vector.shape_cast %242 : vector<8xf32> to vector<8x1xf32>
    %244 = vector.broadcast %243 : vector<8x1xf32> to vector<8x8xf32>
    %245 = arith.subf %241, %244 : vector<8x8xf32>
    %246 = math.exp %245 : vector<8x8xf32>
    %cst_95 = arith.constant dense<0.000000e+00> : vector<8xf32>
    %247 = vector.multi_reduction <add>, %246, %cst_95 [1] : vector<8x8xf32> to vector<8xf32>
    %248 = vector.shape_cast %247 : vector<8xf32> to vector<8x1xf32>
    %249 = tpu.reciprocal %248 {approx = true} : vector<8x1xf32> -> vector<8x1xf32>
    %250 = vector.broadcast %249 : vector<8x1xf32> to vector<8x8xf32>
    %251 = arith.mulf %246, %250 : vector<8x8xf32>
    %252 = arith.truncf %251 : vector<8x8xf32> to vector<8x8xbf16>
    %cst_96 = arith.constant dense<0.000000e+00> : vector<8x8xf32>
    %253 = tpu.matmul %252, %236, %cst_96 {dimension_numbers = #tpu.dot_dimension_numbers<[1], [0], [0], [1], [0, 0, 1, 1], [], []>} : vector<8x8xbf16>, vector<8x8xbf16>, vector<8x8xf32> -> vector<8x8xf32>
    %254 = arith.truncf %253 : vector<8x8xf32> to vector<8x8xbf16>
    %255 = vector.extract_strided_slice %175 {offsets = [16, 0], sizes = [8, 32], strides = [1, 1]} : vector<32x32xbf16> to vector<8x32xbf16>
    %cst_97 = arith.constant dense<0.000000e+00> : vector<8x32xf32>
    %256 = tpu.matmul %254, %255, %cst_97 {dimension_numbers = #tpu.dot_dimension_numbers<[1], [0], [0], [1], [0, 0, 1, 1], [], []>} : vector<8x8xbf16>, vector<8x32xbf16>, vector<8x32xf32> -> vector<8x32xf32>
    %257 = arith.addf %230, %256 : vector<8x32xf32>
    %258 = vector.extract_strided_slice %163 {offsets = [0, 24], sizes = [8, 8], strides = [1, 1]} : vector<8x32xf32> to vector<8x8xf32>
    %259 = arith.truncf %258 : vector<8x8xf32> to vector<8x8xbf16>
    %260 = vector.extract_strided_slice %172 {offsets = [0, 24], sizes = [8, 8], strides = [1, 1]} : vector<8x32xf32> to vector<8x8xf32>
    %261 = arith.truncf %260 : vector<8x8xf32> to vector<8x8xbf16>
    %262 = vector.extract_strided_slice %173 {offsets = [0, 24], sizes = [8, 8], strides = [1, 1]} : vector<8x32xf32> to vector<8x8xf32>
    %263 = arith.truncf %262 : vector<8x8xf32> to vector<8x8xbf16>
    %cst_98 = arith.constant dense<0.000000e+00> : vector<8x8xf32>
    %264 = tpu.matmul %259, %261, %cst_98 {dimension_numbers = #tpu.dot_dimension_numbers<[1], [1], [0], [0], [0, 0, 1, 0], [], []>} : vector<8x8xbf16>, vector<8x8xbf16>, vector<8x8xf32> -> vector<8x8xf32>
    %cst_99 = arith.constant 0.353553385 : f32
    %265 = vector.broadcast %cst_99 : f32 to vector<8x8xf32>
    %266 = arith.mulf %264, %265 : vector<8x8xf32>
    %267 = vector.broadcast %10 : vector<1x8xf32> to vector<8x8xf32>
    %268 = arith.addf %266, %267 : vector<8x8xf32>
    %cst_100 = arith.constant dense<0xFF800000> : vector<8xf32>
    %269 = vector.multi_reduction <maximumf>, %268, %cst_100 [1] : vector<8x8xf32> to vector<8xf32>
    %270 = vector.shape_cast %269 : vector<8xf32> to vector<8x1xf32>
    %271 = vector.broadcast %270 : vector<8x1xf32> to vector<8x8xf32>
    %272 = arith.subf %268, %271 : vector<8x8xf32>
    %273 = math.exp %272 : vector<8x8xf32>
    %cst_101 = arith.constant dense<0.000000e+00> : vector<8xf32>
    %274 = vector.multi_reduction <add>, %273, %cst_101 [1] : vector<8x8xf32> to vector<8xf32>
    %275 = vector.shape_cast %274 : vector<8xf32> to vector<8x1xf32>
    %276 = tpu.reciprocal %275 {approx = true} : vector<8x1xf32> -> vector<8x1xf32>
    %277 = vector.broadcast %276 : vector<8x1xf32> to vector<8x8xf32>
    %278 = arith.mulf %273, %277 : vector<8x8xf32>
    %279 = arith.truncf %278 : vector<8x8xf32> to vector<8x8xbf16>
    %cst_102 = arith.constant dense<0.000000e+00> : vector<8x8xf32>
    %280 = tpu.matmul %279, %263, %cst_102 {dimension_numbers = #tpu.dot_dimension_numbers<[1], [0], [0], [1], [0, 0, 1, 1], [], []>} : vector<8x8xbf16>, vector<8x8xbf16>, vector<8x8xf32> -> vector<8x8xf32>
    %281 = arith.truncf %280 : vector<8x8xf32> to vector<8x8xbf16>
    %282 = vector.extract_strided_slice %175 {offsets = [24, 0], sizes = [8, 32], strides = [1, 1]} : vector<32x32xbf16> to vector<8x32xbf16>
    %cst_103 = arith.constant dense<0.000000e+00> : vector<8x32xf32>
    %283 = tpu.matmul %281, %282, %cst_103 {dimension_numbers = #tpu.dot_dimension_numbers<[1], [0], [0], [1], [0, 0, 1, 1], [], []>} : vector<8x8xbf16>, vector<8x32xbf16>, vector<8x32xf32> -> vector<8x32xf32>
    %284 = arith.addf %257, %283 : vector<8x32xf32>
    %285 = vector.broadcast %177 : vector<1x32xf32> to vector<8x32xf32>
    %286 = arith.addf %284, %285 : vector<8x32xf32>
    %287 = arith.addf %155, %286 : vector<8x32xf32>
    %c0_104 = arith.constant 0 : index
    %c0_105 = arith.constant 0 : index
    %c0_106 = arith.constant 0 : index
    %288 = vector.load %arg18[%c0_104, %c0_105, %c0_106] : memref<2x1x32xf32, #tpu.memory_space<vmem>>, vector<1x1x32xf32>
    %289 = vector.shape_cast %288 : vector<1x1x32xf32> to vector<1x32xf32>
    %c0_107 = arith.constant 0 : index
    %c0_108 = arith.constant 0 : index
    %c0_109 = arith.constant 0 : index
    %290 = vector.load %arg19[%c0_107, %c0_108, %c0_109] : memref<2x1x32xf32, #tpu.memory_space<vmem>>, vector<1x1x32xf32>
    %291 = vector.shape_cast %290 : vector<1x1x32xf32> to vector<1x32xf32>
    %cst_110 = arith.constant dense<0.000000e+00> : vector<8xf32>
    %292 = vector.multi_reduction <add>, %287, %cst_110 [1] : vector<8x32xf32> to vector<8xf32>
    %293 = vector.shape_cast %292 : vector<8xf32> to vector<8x1xf32>
    %cst_111 = arith.constant 3.200000e+01 : f32
    %294 = vector.broadcast %cst_111 : f32 to vector<8x1xf32>
    %295 = arith.divf %293, %294 : vector<8x1xf32>
    %296 = vector.broadcast %295 : vector<8x1xf32> to vector<8x32xf32>
    %297 = arith.subf %287, %296 : vector<8x32xf32>
    %298 = arith.mulf %297, %297 : vector<8x32xf32>
    %cst_112 = arith.constant dense<0.000000e+00> : vector<8xf32>
    %299 = vector.multi_reduction <add>, %298, %cst_112 [1] : vector<8x32xf32> to vector<8xf32>
    %300 = vector.shape_cast %299 : vector<8xf32> to vector<8x1xf32>
    %cst_113 = arith.constant 3.200000e+01 : f32
    %301 = vector.broadcast %cst_113 : f32 to vector<8x1xf32>
    %302 = arith.divf %300, %301 : vector<8x1xf32>
    %cst_114 = arith.constant 9.99999974E-6 : f32
    %303 = vector.broadcast %cst_114 : f32 to vector<8x1xf32>
    %304 = arith.addf %302, %303 : vector<8x1xf32>
    %305 = math.rsqrt %304 : vector<8x1xf32>
    %306 = vector.broadcast %305 : vector<8x1xf32> to vector<8x32xf32>
    %307 = arith.mulf %297, %306 : vector<8x32xf32>
    %308 = vector.broadcast %289 : vector<1x32xf32> to vector<8x32xf32>
    %309 = arith.mulf %307, %308 : vector<8x32xf32>
    %310 = vector.broadcast %291 : vector<1x32xf32> to vector<8x32xf32>
    %311 = arith.addf %309, %310 : vector<8x32xf32>
    %c0_115 = arith.constant 0 : index
    %c0_116 = arith.constant 0 : index
    %c0_117 = arith.constant 0 : index
    %312 = vector.load %arg20[%c0_115, %c0_116, %c0_117] : memref<2x32x128xbf16, #tpu.memory_space<vmem>>, vector<1x32x128xbf16>
    %313 = vector.shape_cast %312 : vector<1x32x128xbf16> to vector<32x128xbf16>
    %c0_118 = arith.constant 0 : index
    %c0_119 = arith.constant 0 : index
    %c0_120 = arith.constant 0 : index
    %314 = vector.load %arg21[%c0_118, %c0_119, %c0_120] : memref<2x1x128xf32, #tpu.memory_space<vmem>>, vector<1x1x128xf32>
    %315 = vector.shape_cast %314 : vector<1x1x128xf32> to vector<1x128xf32>
    %316 = arith.truncf %311 : vector<8x32xf32> to vector<8x32xbf16>
    %cst_121 = arith.constant dense<0.000000e+00> : vector<8x128xf32>
    %317 = tpu.matmul %316, %313, %cst_121 {dimension_numbers = #tpu.dot_dimension_numbers<[1], [0], [0], [1], [0, 0, 1, 1], [], []>} : vector<8x32xbf16>, vector<32x128xbf16>, vector<8x128xf32> -> vector<8x128xf32>
    %318 = vector.broadcast %315 : vector<1x128xf32> to vector<8x128xf32>
    %319 = arith.addf %317, %318 : vector<8x128xf32>
    %cst_122 = arith.constant 0.000000e+00 : f32
    %320 = vector.broadcast %cst_122 : f32 to vector<8x128xf32>
    %321 = arith.maximumf %319, %320 : vector<8x128xf32>
    %c0_123 = arith.constant 0 : index
    %c0_124 = arith.constant 0 : index
    %c0_125 = arith.constant 0 : index
    %322 = vector.load %arg22[%c0_123, %c0_124, %c0_125] : memref<2x128x32xbf16, #tpu.memory_space<vmem>>, vector<1x128x32xbf16>
    %323 = vector.shape_cast %322 : vector<1x128x32xbf16> to vector<128x32xbf16>
    %c0_126 = arith.constant 0 : index
    %c0_127 = arith.constant 0 : index
    %c0_128 = arith.constant 0 : index
    %324 = vector.load %arg23[%c0_126, %c0_127, %c0_128] : memref<2x1x32xf32, #tpu.memory_space<vmem>>, vector<1x1x32xf32>
    %325 = vector.shape_cast %324 : vector<1x1x32xf32> to vector<1x32xf32>
    %326 = arith.truncf %321 : vector<8x128xf32> to vector<8x128xbf16>
    %cst_129 = arith.constant dense<0.000000e+00> : vector<8x32xf32>
    %327 = tpu.matmul %326, %323, %cst_129 {dimension_numbers = #tpu.dot_dimension_numbers<[1], [0], [0], [1], [0, 0, 1, 1], [], []>} : vector<8x128xbf16>, vector<128x32xbf16>, vector<8x32xf32> -> vector<8x32xf32>
    %328 = vector.broadcast %325 : vector<1x32xf32> to vector<8x32xf32>
    %329 = arith.addf %327, %328 : vector<8x32xf32>
    %330 = arith.addf %311, %329 : vector<8x32xf32>
    %c0_130 = arith.constant 0 : index
    %c0_131 = arith.constant 0 : index
    %c0_132 = arith.constant 0 : index
    %331 = vector.load %arg24[%c0_130, %c0_131, %c0_132] : memref<2x1x32xf32, #tpu.memory_space<vmem>>, vector<1x1x32xf32>
    %332 = vector.shape_cast %331 : vector<1x1x32xf32> to vector<1x32xf32>
    %c0_133 = arith.constant 0 : index
    %c0_134 = arith.constant 0 : index
    %c0_135 = arith.constant 0 : index
    %333 = vector.load %arg25[%c0_133, %c0_134, %c0_135] : memref<2x1x32xf32, #tpu.memory_space<vmem>>, vector<1x1x32xf32>
    %334 = vector.shape_cast %333 : vector<1x1x32xf32> to vector<1x32xf32>
    %cst_136 = arith.constant dense<0.000000e+00> : vector<8xf32>
    %335 = vector.multi_reduction <add>, %330, %cst_136 [1] : vector<8x32xf32> to vector<8xf32>
    %336 = vector.shape_cast %335 : vector<8xf32> to vector<8x1xf32>
    %cst_137 = arith.constant 3.200000e+01 : f32
    %337 = vector.broadcast %cst_137 : f32 to vector<8x1xf32>
    %338 = arith.divf %336, %337 : vector<8x1xf32>
    %339 = vector.broadcast %338 : vector<8x1xf32> to vector<8x32xf32>
    %340 = arith.subf %330, %339 : vector<8x32xf32>
    %341 = arith.mulf %340, %340 : vector<8x32xf32>
    %cst_138 = arith.constant dense<0.000000e+00> : vector<8xf32>
    %342 = vector.multi_reduction <add>, %341, %cst_138 [1] : vector<8x32xf32> to vector<8xf32>
    %343 = vector.shape_cast %342 : vector<8xf32> to vector<8x1xf32>
    %cst_139 = arith.constant 3.200000e+01 : f32
    %344 = vector.broadcast %cst_139 : f32 to vector<8x1xf32>
    %345 = arith.divf %343, %344 : vector<8x1xf32>
    %cst_140 = arith.constant 9.99999974E-6 : f32
    %346 = vector.broadcast %cst_140 : f32 to vector<8x1xf32>
    %347 = arith.addf %345, %346 : vector<8x1xf32>
    %348 = math.rsqrt %347 : vector<8x1xf32>
    %349 = vector.broadcast %348 : vector<8x1xf32> to vector<8x32xf32>
    %350 = arith.mulf %340, %349 : vector<8x32xf32>
    %351 = vector.broadcast %332 : vector<1x32xf32> to vector<8x32xf32>
    %352 = arith.mulf %350, %351 : vector<8x32xf32>
    %353 = vector.broadcast %334 : vector<1x32xf32> to vector<8x32xf32>
    %354 = arith.addf %352, %353 : vector<8x32xf32>
    %c1 = arith.constant 1 : index
    %c0_141 = arith.constant 0 : index
    %c0_142 = arith.constant 0 : index
    %355 = vector.load %arg6[%c1, %c0_141, %c0_142] : memref<2x32x96xbf16, #tpu.memory_space<vmem>>, vector<1x32x96xbf16>
    %356 = vector.shape_cast %355 : vector<1x32x96xbf16> to vector<32x96xbf16>
    %c1_143 = arith.constant 1 : index
    %c0_144 = arith.constant 0 : index
    %c0_145 = arith.constant 0 : index
    %357 = vector.load %arg7[%c1_143, %c0_144, %c0_145] : memref<2x1x96xf32, #tpu.memory_space<vmem>>, vector<1x1x96xf32>
    %358 = vector.shape_cast %357 : vector<1x1x96xf32> to vector<1x96xf32>
    %359 = arith.truncf %354 : vector<8x32xf32> to vector<8x32xbf16>
    %cst_146 = arith.constant dense<0.000000e+00> : vector<8x96xf32>
    %360 = tpu.matmul %359, %356, %cst_146 {dimension_numbers = #tpu.dot_dimension_numbers<[1], [0], [0], [1], [0, 0, 1, 1], [], []>} : vector<8x32xbf16>, vector<32x96xbf16>, vector<8x96xf32> -> vector<8x96xf32>
    %361 = vector.broadcast %358 : vector<1x96xf32> to vector<8x96xf32>
    %362 = arith.addf %360, %361 : vector<8x96xf32>
    %363 = vector.extract_strided_slice %362 {offsets = [0, 0], sizes = [8, 32], strides = [1, 1]} : vector<8x96xf32> to vector<8x32xf32>
    %364 = vector.extract_strided_slice %362 {offsets = [0, 32], sizes = [8, 32], strides = [1, 1]} : vector<8x96xf32> to vector<8x32xf32>
    %365 = vector.extract_strided_slice %362 {offsets = [0, 64], sizes = [8, 32], strides = [1, 1]} : vector<8x96xf32> to vector<8x32xf32>
    %c1_147 = arith.constant 1 : index
    %c0_148 = arith.constant 0 : index
    %c0_149 = arith.constant 0 : index
    %366 = vector.load %arg8[%c1_147, %c0_148, %c0_149] : memref<2x32x32xbf16, #tpu.memory_space<vmem>>, vector<1x32x32xbf16>
    %367 = vector.shape_cast %366 : vector<1x32x32xbf16> to vector<32x32xbf16>
    %c1_150 = arith.constant 1 : index
    %c0_151 = arith.constant 0 : index
    %c0_152 = arith.constant 0 : index
    %368 = vector.load %arg9[%c1_150, %c0_151, %c0_152] : memref<2x1x32xf32, #tpu.memory_space<vmem>>, vector<1x1x32xf32>
    %369 = vector.shape_cast %368 : vector<1x1x32xf32> to vector<1x32xf32>
    %370 = vector.extract_strided_slice %363 {offsets = [0, 0], sizes = [8, 8], strides = [1, 1]} : vector<8x32xf32> to vector<8x8xf32>
    %371 = arith.truncf %370 : vector<8x8xf32> to vector<8x8xbf16>
    %372 = vector.extract_strided_slice %364 {offsets = [0, 0], sizes = [8, 8], strides = [1, 1]} : vector<8x32xf32> to vector<8x8xf32>
    %373 = arith.truncf %372 : vector<8x8xf32> to vector<8x8xbf16>
    %374 = vector.extract_strided_slice %365 {offsets = [0, 0], sizes = [8, 8], strides = [1, 1]} : vector<8x32xf32> to vector<8x8xf32>
    %375 = arith.truncf %374 : vector<8x8xf32> to vector<8x8xbf16>
    %cst_153 = arith.constant dense<0.000000e+00> : vector<8x8xf32>
    %376 = tpu.matmul %371, %373, %cst_153 {dimension_numbers = #tpu.dot_dimension_numbers<[1], [1], [0], [0], [0, 0, 1, 0], [], []>} : vector<8x8xbf16>, vector<8x8xbf16>, vector<8x8xf32> -> vector<8x8xf32>
    %cst_154 = arith.constant 0.353553385 : f32
    %377 = vector.broadcast %cst_154 : f32 to vector<8x8xf32>
    %378 = arith.mulf %376, %377 : vector<8x8xf32>
    %379 = arith.addf %378, %8 : vector<8x8xf32>
    %cst_155 = arith.constant dense<0xFF800000> : vector<8xf32>
    %380 = vector.multi_reduction <maximumf>, %379, %cst_155 [1] : vector<8x8xf32> to vector<8xf32>
    %381 = vector.shape_cast %380 : vector<8xf32> to vector<8x1xf32>
    %382 = vector.broadcast %381 : vector<8x1xf32> to vector<8x8xf32>
    %383 = arith.subf %379, %382 : vector<8x8xf32>
    %384 = math.exp %383 : vector<8x8xf32>
    %cst_156 = arith.constant dense<0.000000e+00> : vector<8xf32>
    %385 = vector.multi_reduction <add>, %384, %cst_156 [1] : vector<8x8xf32> to vector<8xf32>
    %386 = vector.shape_cast %385 : vector<8xf32> to vector<8x1xf32>
    %387 = tpu.reciprocal %386 {approx = true} : vector<8x1xf32> -> vector<8x1xf32>
    %388 = vector.broadcast %387 : vector<8x1xf32> to vector<8x8xf32>
    %389 = arith.mulf %384, %388 : vector<8x8xf32>
    %390 = arith.truncf %389 : vector<8x8xf32> to vector<8x8xbf16>
    %cst_157 = arith.constant dense<0.000000e+00> : vector<8x8xf32>
    %391 = tpu.matmul %390, %375, %cst_157 {dimension_numbers = #tpu.dot_dimension_numbers<[1], [0], [0], [1], [0, 0, 1, 1], [], []>} : vector<8x8xbf16>, vector<8x8xbf16>, vector<8x8xf32> -> vector<8x8xf32>
    %392 = arith.truncf %391 : vector<8x8xf32> to vector<8x8xbf16>
    %393 = vector.extract_strided_slice %367 {offsets = [0, 0], sizes = [8, 32], strides = [1, 1]} : vector<32x32xbf16> to vector<8x32xbf16>
    %cst_158 = arith.constant dense<0.000000e+00> : vector<8x32xf32>
    %394 = tpu.matmul %392, %393, %cst_158 {dimension_numbers = #tpu.dot_dimension_numbers<[1], [0], [0], [1], [0, 0, 1, 1], [], []>} : vector<8x8xbf16>, vector<8x32xbf16>, vector<8x32xf32> -> vector<8x32xf32>
    %395 = vector.extract_strided_slice %363 {offsets = [0, 8], sizes = [8, 8], strides = [1, 1]} : vector<8x32xf32> to vector<8x8xf32>
    %396 = arith.truncf %395 : vector<8x8xf32> to vector<8x8xbf16>
    %397 = vector.extract_strided_slice %364 {offsets = [0, 8], sizes = [8, 8], strides = [1, 1]} : vector<8x32xf32> to vector<8x8xf32>
    %398 = arith.truncf %397 : vector<8x8xf32> to vector<8x8xbf16>
    %399 = vector.extract_strided_slice %365 {offsets = [0, 8], sizes = [8, 8], strides = [1, 1]} : vector<8x32xf32> to vector<8x8xf32>
    %400 = arith.truncf %399 : vector<8x8xf32> to vector<8x8xbf16>
    %cst_159 = arith.constant dense<0.000000e+00> : vector<8x8xf32>
    %401 = tpu.matmul %396, %398, %cst_159 {dimension_numbers = #tpu.dot_dimension_numbers<[1], [1], [0], [0], [0, 0, 1, 0], [], []>} : vector<8x8xbf16>, vector<8x8xbf16>, vector<8x8xf32> -> vector<8x8xf32>
    %cst_160 = arith.constant 0.353553385 : f32
    %402 = vector.broadcast %cst_160 : f32 to vector<8x8xf32>
    %403 = arith.mulf %401, %402 : vector<8x8xf32>
    %404 = arith.addf %403, %8 : vector<8x8xf32>
    %cst_161 = arith.constant dense<0xFF800000> : vector<8xf32>
    %405 = vector.multi_reduction <maximumf>, %404, %cst_161 [1] : vector<8x8xf32> to vector<8xf32>
    %406 = vector.shape_cast %405 : vector<8xf32> to vector<8x1xf32>
    %407 = vector.broadcast %406 : vector<8x1xf32> to vector<8x8xf32>
    %408 = arith.subf %404, %407 : vector<8x8xf32>
    %409 = math.exp %408 : vector<8x8xf32>
    %cst_162 = arith.constant dense<0.000000e+00> : vector<8xf32>
    %410 = vector.multi_reduction <add>, %409, %cst_162 [1] : vector<8x8xf32> to vector<8xf32>
    %411 = vector.shape_cast %410 : vector<8xf32> to vector<8x1xf32>
    %412 = tpu.reciprocal %411 {approx = true} : vector<8x1xf32> -> vector<8x1xf32>
    %413 = vector.broadcast %412 : vector<8x1xf32> to vector<8x8xf32>
    %414 = arith.mulf %409, %413 : vector<8x8xf32>
    %415 = arith.truncf %414 : vector<8x8xf32> to vector<8x8xbf16>
    %cst_163 = arith.constant dense<0.000000e+00> : vector<8x8xf32>
    %416 = tpu.matmul %415, %400, %cst_163 {dimension_numbers = #tpu.dot_dimension_numbers<[1], [0], [0], [1], [0, 0, 1, 1], [], []>} : vector<8x8xbf16>, vector<8x8xbf16>, vector<8x8xf32> -> vector<8x8xf32>
    %417 = arith.truncf %416 : vector<8x8xf32> to vector<8x8xbf16>
    %418 = vector.extract_strided_slice %367 {offsets = [8, 0], sizes = [8, 32], strides = [1, 1]} : vector<32x32xbf16> to vector<8x32xbf16>
    %cst_164 = arith.constant dense<0.000000e+00> : vector<8x32xf32>
    %419 = tpu.matmul %417, %418, %cst_164 {dimension_numbers = #tpu.dot_dimension_numbers<[1], [0], [0], [1], [0, 0, 1, 1], [], []>} : vector<8x8xbf16>, vector<8x32xbf16>, vector<8x32xf32> -> vector<8x32xf32>
    %420 = arith.addf %394, %419 : vector<8x32xf32>
    %421 = vector.extract_strided_slice %363 {offsets = [0, 16], sizes = [8, 8], strides = [1, 1]} : vector<8x32xf32> to vector<8x8xf32>
    %422 = arith.truncf %421 : vector<8x8xf32> to vector<8x8xbf16>
    %423 = vector.extract_strided_slice %364 {offsets = [0, 16], sizes = [8, 8], strides = [1, 1]} : vector<8x32xf32> to vector<8x8xf32>
    %424 = arith.truncf %423 : vector<8x8xf32> to vector<8x8xbf16>
    %425 = vector.extract_strided_slice %365 {offsets = [0, 16], sizes = [8, 8], strides = [1, 1]} : vector<8x32xf32> to vector<8x8xf32>
    %426 = arith.truncf %425 : vector<8x8xf32> to vector<8x8xbf16>
    %cst_165 = arith.constant dense<0.000000e+00> : vector<8x8xf32>
    %427 = tpu.matmul %422, %424, %cst_165 {dimension_numbers = #tpu.dot_dimension_numbers<[1], [1], [0], [0], [0, 0, 1, 0], [], []>} : vector<8x8xbf16>, vector<8x8xbf16>, vector<8x8xf32> -> vector<8x8xf32>
    %cst_166 = arith.constant 0.353553385 : f32
    %428 = vector.broadcast %cst_166 : f32 to vector<8x8xf32>
    %429 = arith.mulf %427, %428 : vector<8x8xf32>
    %430 = arith.addf %429, %8 : vector<8x8xf32>
    %cst_167 = arith.constant dense<0xFF800000> : vector<8xf32>
    %431 = vector.multi_reduction <maximumf>, %430, %cst_167 [1] : vector<8x8xf32> to vector<8xf32>
    %432 = vector.shape_cast %431 : vector<8xf32> to vector<8x1xf32>
    %433 = vector.broadcast %432 : vector<8x1xf32> to vector<8x8xf32>
    %434 = arith.subf %430, %433 : vector<8x8xf32>
    %435 = math.exp %434 : vector<8x8xf32>
    %cst_168 = arith.constant dense<0.000000e+00> : vector<8xf32>
    %436 = vector.multi_reduction <add>, %435, %cst_168 [1] : vector<8x8xf32> to vector<8xf32>
    %437 = vector.shape_cast %436 : vector<8xf32> to vector<8x1xf32>
    %438 = tpu.reciprocal %437 {approx = true} : vector<8x1xf32> -> vector<8x1xf32>
    %439 = vector.broadcast %438 : vector<8x1xf32> to vector<8x8xf32>
    %440 = arith.mulf %435, %439 : vector<8x8xf32>
    %441 = arith.truncf %440 : vector<8x8xf32> to vector<8x8xbf16>
    %cst_169 = arith.constant dense<0.000000e+00> : vector<8x8xf32>
    %442 = tpu.matmul %441, %426, %cst_169 {dimension_numbers = #tpu.dot_dimension_numbers<[1], [0], [0], [1], [0, 0, 1, 1], [], []>} : vector<8x8xbf16>, vector<8x8xbf16>, vector<8x8xf32> -> vector<8x8xf32>
    %443 = arith.truncf %442 : vector<8x8xf32> to vector<8x8xbf16>
    %444 = vector.extract_strided_slice %367 {offsets = [16, 0], sizes = [8, 32], strides = [1, 1]} : vector<32x32xbf16> to vector<8x32xbf16>
    %cst_170 = arith.constant dense<0.000000e+00> : vector<8x32xf32>
    %445 = tpu.matmul %443, %444, %cst_170 {dimension_numbers = #tpu.dot_dimension_numbers<[1], [0], [0], [1], [0, 0, 1, 1], [], []>} : vector<8x8xbf16>, vector<8x32xbf16>, vector<8x32xf32> -> vector<8x32xf32>
    %446 = arith.addf %420, %445 : vector<8x32xf32>
    %447 = vector.extract_strided_slice %363 {offsets = [0, 24], sizes = [8, 8], strides = [1, 1]} : vector<8x32xf32> to vector<8x8xf32>
    %448 = arith.truncf %447 : vector<8x8xf32> to vector<8x8xbf16>
    %449 = vector.extract_strided_slice %364 {offsets = [0, 24], sizes = [8, 8], strides = [1, 1]} : vector<8x32xf32> to vector<8x8xf32>
    %450 = arith.truncf %449 : vector<8x8xf32> to vector<8x8xbf16>
    %451 = vector.extract_strided_slice %365 {offsets = [0, 24], sizes = [8, 8], strides = [1, 1]} : vector<8x32xf32> to vector<8x8xf32>
    %452 = arith.truncf %451 : vector<8x8xf32> to vector<8x8xbf16>
    %cst_171 = arith.constant dense<0.000000e+00> : vector<8x8xf32>
    %453 = tpu.matmul %448, %450, %cst_171 {dimension_numbers = #tpu.dot_dimension_numbers<[1], [1], [0], [0], [0, 0, 1, 0], [], []>} : vector<8x8xbf16>, vector<8x8xbf16>, vector<8x8xf32> -> vector<8x8xf32>
    %cst_172 = arith.constant 0.353553385 : f32
    %454 = vector.broadcast %cst_172 : f32 to vector<8x8xf32>
    %455 = arith.mulf %453, %454 : vector<8x8xf32>
    %456 = arith.addf %455, %8 : vector<8x8xf32>
    %cst_173 = arith.constant dense<0xFF800000> : vector<8xf32>
    %457 = vector.multi_reduction <maximumf>, %456, %cst_173 [1] : vector<8x8xf32> to vector<8xf32>
    %458 = vector.shape_cast %457 : vector<8xf32> to vector<8x1xf32>
    %459 = vector.broadcast %458 : vector<8x1xf32> to vector<8x8xf32>
    %460 = arith.subf %456, %459 : vector<8x8xf32>
    %461 = math.exp %460 : vector<8x8xf32>
    %cst_174 = arith.constant dense<0.000000e+00> : vector<8xf32>
    %462 = vector.multi_reduction <add>, %461, %cst_174 [1] : vector<8x8xf32> to vector<8xf32>
    %463 = vector.shape_cast %462 : vector<8xf32> to vector<8x1xf32>
    %464 = tpu.reciprocal %463 {approx = true} : vector<8x1xf32> -> vector<8x1xf32>
    %465 = vector.broadcast %464 : vector<8x1xf32> to vector<8x8xf32>
    %466 = arith.mulf %461, %465 : vector<8x8xf32>
    %467 = arith.truncf %466 : vector<8x8xf32> to vector<8x8xbf16>
    %cst_175 = arith.constant dense<0.000000e+00> : vector<8x8xf32>
    %468 = tpu.matmul %467, %452, %cst_175 {dimension_numbers = #tpu.dot_dimension_numbers<[1], [0], [0], [1], [0, 0, 1, 1], [], []>} : vector<8x8xbf16>, vector<8x8xbf16>, vector<8x8xf32> -> vector<8x8xf32>
    %469 = arith.truncf %468 : vector<8x8xf32> to vector<8x8xbf16>
    %470 = vector.extract_strided_slice %367 {offsets = [24, 0], sizes = [8, 32], strides = [1, 1]} : vector<32x32xbf16> to vector<8x32xbf16>
    %cst_176 = arith.constant dense<0.000000e+00> : vector<8x32xf32>
    %471 = tpu.matmul %469, %470, %cst_176 {dimension_numbers = #tpu.dot_dimension_numbers<[1], [0], [0], [1], [0, 0, 1, 1], [], []>} : vector<8x8xbf16>, vector<8x32xbf16>, vector<8x32xf32> -> vector<8x32xf32>
    %472 = arith.addf %446, %471 : vector<8x32xf32>
    %473 = vector.broadcast %369 : vector<1x32xf32> to vector<8x32xf32>
    %474 = arith.addf %472, %473 : vector<8x32xf32>
    %475 = arith.addf %354, %474 : vector<8x32xf32>
    %c1_177 = arith.constant 1 : index
    %c0_178 = arith.constant 0 : index
    %c0_179 = arith.constant 0 : index
    %476 = vector.load %arg10[%c1_177, %c0_178, %c0_179] : memref<2x1x32xf32, #tpu.memory_space<vmem>>, vector<1x1x32xf32>
    %477 = vector.shape_cast %476 : vector<1x1x32xf32> to vector<1x32xf32>
    %c1_180 = arith.constant 1 : index
    %c0_181 = arith.constant 0 : index
    %c0_182 = arith.constant 0 : index
    %478 = vector.load %arg11[%c1_180, %c0_181, %c0_182] : memref<2x1x32xf32, #tpu.memory_space<vmem>>, vector<1x1x32xf32>
    %479 = vector.shape_cast %478 : vector<1x1x32xf32> to vector<1x32xf32>
    %cst_183 = arith.constant dense<0.000000e+00> : vector<8xf32>
    %480 = vector.multi_reduction <add>, %475, %cst_183 [1] : vector<8x32xf32> to vector<8xf32>
    %481 = vector.shape_cast %480 : vector<8xf32> to vector<8x1xf32>
    %cst_184 = arith.constant 3.200000e+01 : f32
    %482 = vector.broadcast %cst_184 : f32 to vector<8x1xf32>
    %483 = arith.divf %481, %482 : vector<8x1xf32>
    %484 = vector.broadcast %483 : vector<8x1xf32> to vector<8x32xf32>
    %485 = arith.subf %475, %484 : vector<8x32xf32>
    %486 = arith.mulf %485, %485 : vector<8x32xf32>
    %cst_185 = arith.constant dense<0.000000e+00> : vector<8xf32>
    %487 = vector.multi_reduction <add>, %486, %cst_185 [1] : vector<8x32xf32> to vector<8xf32>
    %488 = vector.shape_cast %487 : vector<8xf32> to vector<8x1xf32>
    %cst_186 = arith.constant 3.200000e+01 : f32
    %489 = vector.broadcast %cst_186 : f32 to vector<8x1xf32>
    %490 = arith.divf %488, %489 : vector<8x1xf32>
    %cst_187 = arith.constant 9.99999974E-6 : f32
    %491 = vector.broadcast %cst_187 : f32 to vector<8x1xf32>
    %492 = arith.addf %490, %491 : vector<8x1xf32>
    %493 = math.rsqrt %492 : vector<8x1xf32>
    %494 = vector.broadcast %493 : vector<8x1xf32> to vector<8x32xf32>
    %495 = arith.mulf %485, %494 : vector<8x32xf32>
    %496 = vector.broadcast %477 : vector<1x32xf32> to vector<8x32xf32>
    %497 = arith.mulf %495, %496 : vector<8x32xf32>
    %498 = vector.broadcast %479 : vector<1x32xf32> to vector<8x32xf32>
    %499 = arith.addf %497, %498 : vector<8x32xf32>
    %c1_188 = arith.constant 1 : index
    %c0_189 = arith.constant 0 : index
    %c0_190 = arith.constant 0 : index
    %500 = vector.load %arg12[%c1_188, %c0_189, %c0_190] : memref<2x32x32xbf16, #tpu.memory_space<vmem>>, vector<1x32x32xbf16>
    %501 = vector.shape_cast %500 : vector<1x32x32xbf16> to vector<32x32xbf16>
    %c1_191 = arith.constant 1 : index
    %c0_192 = arith.constant 0 : index
    %c0_193 = arith.constant 0 : index
    %502 = vector.load %arg13[%c1_191, %c0_192, %c0_193] : memref<2x1x32xf32, #tpu.memory_space<vmem>>, vector<1x1x32xf32>
    %503 = vector.shape_cast %502 : vector<1x1x32xf32> to vector<1x32xf32>
    %504 = arith.truncf %499 : vector<8x32xf32> to vector<8x32xbf16>
    %cst_194 = arith.constant dense<0.000000e+00> : vector<8x32xf32>
    %505 = tpu.matmul %504, %501, %cst_194 {dimension_numbers = #tpu.dot_dimension_numbers<[1], [0], [0], [1], [0, 0, 1, 1], [], []>} : vector<8x32xbf16>, vector<32x32xbf16>, vector<8x32xf32> -> vector<8x32xf32>
    %506 = vector.broadcast %503 : vector<1x32xf32> to vector<8x32xf32>
    %507 = arith.addf %505, %506 : vector<8x32xf32>
    %c1_195 = arith.constant 1 : index
    %c0_196 = arith.constant 0 : index
    %c0_197 = arith.constant 0 : index
    %508 = vector.load %arg14[%c1_195, %c0_196, %c0_197] : memref<2x32x64xbf16, #tpu.memory_space<vmem>>, vector<1x32x64xbf16>
    %509 = vector.shape_cast %508 : vector<1x32x64xbf16> to vector<32x64xbf16>
    %c1_198 = arith.constant 1 : index
    %c0_199 = arith.constant 0 : index
    %c0_200 = arith.constant 0 : index
    %510 = vector.load %arg15[%c1_198, %c0_199, %c0_200] : memref<2x1x64xf32, #tpu.memory_space<vmem>>, vector<1x1x64xf32>
    %511 = vector.shape_cast %510 : vector<1x1x64xf32> to vector<1x64xf32>
    %512 = arith.truncf %3 : vector<8x32xf32> to vector<8x32xbf16>
    %cst_201 = arith.constant dense<0.000000e+00> : vector<8x64xf32>
    %513 = tpu.matmul %512, %509, %cst_201 {dimension_numbers = #tpu.dot_dimension_numbers<[1], [0], [0], [1], [0, 0, 1, 1], [], []>} : vector<8x32xbf16>, vector<32x64xbf16>, vector<8x64xf32> -> vector<8x64xf32>
    %514 = vector.broadcast %511 : vector<1x64xf32> to vector<8x64xf32>
    %515 = arith.addf %513, %514 : vector<8x64xf32>
    %516 = vector.extract_strided_slice %515 {offsets = [0, 0], sizes = [8, 32], strides = [1, 1]} : vector<8x64xf32> to vector<8x32xf32>
    %517 = vector.extract_strided_slice %515 {offsets = [0, 32], sizes = [8, 32], strides = [1, 1]} : vector<8x64xf32> to vector<8x32xf32>
    %c1_202 = arith.constant 1 : index
    %c0_203 = arith.constant 0 : index
    %c0_204 = arith.constant 0 : index
    %518 = vector.load %arg16[%c1_202, %c0_203, %c0_204] : memref<2x32x32xbf16, #tpu.memory_space<vmem>>, vector<1x32x32xbf16>
    %519 = vector.shape_cast %518 : vector<1x32x32xbf16> to vector<32x32xbf16>
    %c1_205 = arith.constant 1 : index
    %c0_206 = arith.constant 0 : index
    %c0_207 = arith.constant 0 : index
    %520 = vector.load %arg17[%c1_205, %c0_206, %c0_207] : memref<2x1x32xf32, #tpu.memory_space<vmem>>, vector<1x1x32xf32>
    %521 = vector.shape_cast %520 : vector<1x1x32xf32> to vector<1x32xf32>
    %522 = vector.extract_strided_slice %507 {offsets = [0, 0], sizes = [8, 8], strides = [1, 1]} : vector<8x32xf32> to vector<8x8xf32>
    %523 = arith.truncf %522 : vector<8x8xf32> to vector<8x8xbf16>
    %524 = vector.extract_strided_slice %516 {offsets = [0, 0], sizes = [8, 8], strides = [1, 1]} : vector<8x32xf32> to vector<8x8xf32>
    %525 = arith.truncf %524 : vector<8x8xf32> to vector<8x8xbf16>
    %526 = vector.extract_strided_slice %517 {offsets = [0, 0], sizes = [8, 8], strides = [1, 1]} : vector<8x32xf32> to vector<8x8xf32>
    %527 = arith.truncf %526 : vector<8x8xf32> to vector<8x8xbf16>
    %cst_208 = arith.constant dense<0.000000e+00> : vector<8x8xf32>
    %528 = tpu.matmul %523, %525, %cst_208 {dimension_numbers = #tpu.dot_dimension_numbers<[1], [1], [0], [0], [0, 0, 1, 0], [], []>} : vector<8x8xbf16>, vector<8x8xbf16>, vector<8x8xf32> -> vector<8x8xf32>
    %cst_209 = arith.constant 0.353553385 : f32
    %529 = vector.broadcast %cst_209 : f32 to vector<8x8xf32>
    %530 = arith.mulf %528, %529 : vector<8x8xf32>
    %531 = vector.broadcast %10 : vector<1x8xf32> to vector<8x8xf32>
    %532 = arith.addf %530, %531 : vector<8x8xf32>
    %cst_210 = arith.constant dense<0xFF800000> : vector<8xf32>
    %533 = vector.multi_reduction <maximumf>, %532, %cst_210 [1] : vector<8x8xf32> to vector<8xf32>
    %534 = vector.shape_cast %533 : vector<8xf32> to vector<8x1xf32>
    %535 = vector.broadcast %534 : vector<8x1xf32> to vector<8x8xf32>
    %536 = arith.subf %532, %535 : vector<8x8xf32>
    %537 = math.exp %536 : vector<8x8xf32>
    %cst_211 = arith.constant dense<0.000000e+00> : vector<8xf32>
    %538 = vector.multi_reduction <add>, %537, %cst_211 [1] : vector<8x8xf32> to vector<8xf32>
    %539 = vector.shape_cast %538 : vector<8xf32> to vector<8x1xf32>
    %540 = tpu.reciprocal %539 {approx = true} : vector<8x1xf32> -> vector<8x1xf32>
    %541 = vector.broadcast %540 : vector<8x1xf32> to vector<8x8xf32>
    %542 = arith.mulf %537, %541 : vector<8x8xf32>
    %543 = arith.truncf %542 : vector<8x8xf32> to vector<8x8xbf16>
    %cst_212 = arith.constant dense<0.000000e+00> : vector<8x8xf32>
    %544 = tpu.matmul %543, %527, %cst_212 {dimension_numbers = #tpu.dot_dimension_numbers<[1], [0], [0], [1], [0, 0, 1, 1], [], []>} : vector<8x8xbf16>, vector<8x8xbf16>, vector<8x8xf32> -> vector<8x8xf32>
    %545 = arith.truncf %544 : vector<8x8xf32> to vector<8x8xbf16>
    %546 = vector.extract_strided_slice %519 {offsets = [0, 0], sizes = [8, 32], strides = [1, 1]} : vector<32x32xbf16> to vector<8x32xbf16>
    %cst_213 = arith.constant dense<0.000000e+00> : vector<8x32xf32>
    %547 = tpu.matmul %545, %546, %cst_213 {dimension_numbers = #tpu.dot_dimension_numbers<[1], [0], [0], [1], [0, 0, 1, 1], [], []>} : vector<8x8xbf16>, vector<8x32xbf16>, vector<8x32xf32> -> vector<8x32xf32>
    %548 = vector.extract_strided_slice %507 {offsets = [0, 8], sizes = [8, 8], strides = [1, 1]} : vector<8x32xf32> to vector<8x8xf32>
    %549 = arith.truncf %548 : vector<8x8xf32> to vector<8x8xbf16>
    %550 = vector.extract_strided_slice %516 {offsets = [0, 8], sizes = [8, 8], strides = [1, 1]} : vector<8x32xf32> to vector<8x8xf32>
    %551 = arith.truncf %550 : vector<8x8xf32> to vector<8x8xbf16>
    %552 = vector.extract_strided_slice %517 {offsets = [0, 8], sizes = [8, 8], strides = [1, 1]} : vector<8x32xf32> to vector<8x8xf32>
    %553 = arith.truncf %552 : vector<8x8xf32> to vector<8x8xbf16>
    %cst_214 = arith.constant dense<0.000000e+00> : vector<8x8xf32>
    %554 = tpu.matmul %549, %551, %cst_214 {dimension_numbers = #tpu.dot_dimension_numbers<[1], [1], [0], [0], [0, 0, 1, 0], [], []>} : vector<8x8xbf16>, vector<8x8xbf16>, vector<8x8xf32> -> vector<8x8xf32>
    %cst_215 = arith.constant 0.353553385 : f32
    %555 = vector.broadcast %cst_215 : f32 to vector<8x8xf32>
    %556 = arith.mulf %554, %555 : vector<8x8xf32>
    %557 = vector.broadcast %10 : vector<1x8xf32> to vector<8x8xf32>
    %558 = arith.addf %556, %557 : vector<8x8xf32>
    %cst_216 = arith.constant dense<0xFF800000> : vector<8xf32>
    %559 = vector.multi_reduction <maximumf>, %558, %cst_216 [1] : vector<8x8xf32> to vector<8xf32>
    %560 = vector.shape_cast %559 : vector<8xf32> to vector<8x1xf32>
    %561 = vector.broadcast %560 : vector<8x1xf32> to vector<8x8xf32>
    %562 = arith.subf %558, %561 : vector<8x8xf32>
    %563 = math.exp %562 : vector<8x8xf32>
    %cst_217 = arith.constant dense<0.000000e+00> : vector<8xf32>
    %564 = vector.multi_reduction <add>, %563, %cst_217 [1] : vector<8x8xf32> to vector<8xf32>
    %565 = vector.shape_cast %564 : vector<8xf32> to vector<8x1xf32>
    %566 = tpu.reciprocal %565 {approx = true} : vector<8x1xf32> -> vector<8x1xf32>
    %567 = vector.broadcast %566 : vector<8x1xf32> to vector<8x8xf32>
    %568 = arith.mulf %563, %567 : vector<8x8xf32>
    %569 = arith.truncf %568 : vector<8x8xf32> to vector<8x8xbf16>
    %cst_218 = arith.constant dense<0.000000e+00> : vector<8x8xf32>
    %570 = tpu.matmul %569, %553, %cst_218 {dimension_numbers = #tpu.dot_dimension_numbers<[1], [0], [0], [1], [0, 0, 1, 1], [], []>} : vector<8x8xbf16>, vector<8x8xbf16>, vector<8x8xf32> -> vector<8x8xf32>
    %571 = arith.truncf %570 : vector<8x8xf32> to vector<8x8xbf16>
    %572 = vector.extract_strided_slice %519 {offsets = [8, 0], sizes = [8, 32], strides = [1, 1]} : vector<32x32xbf16> to vector<8x32xbf16>
    %cst_219 = arith.constant dense<0.000000e+00> : vector<8x32xf32>
    %573 = tpu.matmul %571, %572, %cst_219 {dimension_numbers = #tpu.dot_dimension_numbers<[1], [0], [0], [1], [0, 0, 1, 1], [], []>} : vector<8x8xbf16>, vector<8x32xbf16>, vector<8x32xf32> -> vector<8x32xf32>
    %574 = arith.addf %547, %573 : vector<8x32xf32>
    %575 = vector.extract_strided_slice %507 {offsets = [0, 16], sizes = [8, 8], strides = [1, 1]} : vector<8x32xf32> to vector<8x8xf32>
    %576 = arith.truncf %575 : vector<8x8xf32> to vector<8x8xbf16>
    %577 = vector.extract_strided_slice %516 {offsets = [0, 16], sizes = [8, 8], strides = [1, 1]} : vector<8x32xf32> to vector<8x8xf32>
    %578 = arith.truncf %577 : vector<8x8xf32> to vector<8x8xbf16>
    %579 = vector.extract_strided_slice %517 {offsets = [0, 16], sizes = [8, 8], strides = [1, 1]} : vector<8x32xf32> to vector<8x8xf32>
    %580 = arith.truncf %579 : vector<8x8xf32> to vector<8x8xbf16>
    %cst_220 = arith.constant dense<0.000000e+00> : vector<8x8xf32>
    %581 = tpu.matmul %576, %578, %cst_220 {dimension_numbers = #tpu.dot_dimension_numbers<[1], [1], [0], [0], [0, 0, 1, 0], [], []>} : vector<8x8xbf16>, vector<8x8xbf16>, vector<8x8xf32> -> vector<8x8xf32>
    %cst_221 = arith.constant 0.353553385 : f32
    %582 = vector.broadcast %cst_221 : f32 to vector<8x8xf32>
    %583 = arith.mulf %581, %582 : vector<8x8xf32>
    %584 = vector.broadcast %10 : vector<1x8xf32> to vector<8x8xf32>
    %585 = arith.addf %583, %584 : vector<8x8xf32>
    %cst_222 = arith.constant dense<0xFF800000> : vector<8xf32>
    %586 = vector.multi_reduction <maximumf>, %585, %cst_222 [1] : vector<8x8xf32> to vector<8xf32>
    %587 = vector.shape_cast %586 : vector<8xf32> to vector<8x1xf32>
    %588 = vector.broadcast %587 : vector<8x1xf32> to vector<8x8xf32>
    %589 = arith.subf %585, %588 : vector<8x8xf32>
    %590 = math.exp %589 : vector<8x8xf32>
    %cst_223 = arith.constant dense<0.000000e+00> : vector<8xf32>
    %591 = vector.multi_reduction <add>, %590, %cst_223 [1] : vector<8x8xf32> to vector<8xf32>
    %592 = vector.shape_cast %591 : vector<8xf32> to vector<8x1xf32>
    %593 = tpu.reciprocal %592 {approx = true} : vector<8x1xf32> -> vector<8x1xf32>
    %594 = vector.broadcast %593 : vector<8x1xf32> to vector<8x8xf32>
    %595 = arith.mulf %590, %594 : vector<8x8xf32>
    %596 = arith.truncf %595 : vector<8x8xf32> to vector<8x8xbf16>
    %cst_224 = arith.constant dense<0.000000e+00> : vector<8x8xf32>
    %597 = tpu.matmul %596, %580, %cst_224 {dimension_numbers = #tpu.dot_dimension_numbers<[1], [0], [0], [1], [0, 0, 1, 1], [], []>} : vector<8x8xbf16>, vector<8x8xbf16>, vector<8x8xf32> -> vector<8x8xf32>
    %598 = arith.truncf %597 : vector<8x8xf32> to vector<8x8xbf16>
    %599 = vector.extract_strided_slice %519 {offsets = [16, 0], sizes = [8, 32], strides = [1, 1]} : vector<32x32xbf16> to vector<8x32xbf16>
    %cst_225 = arith.constant dense<0.000000e+00> : vector<8x32xf32>
    %600 = tpu.matmul %598, %599, %cst_225 {dimension_numbers = #tpu.dot_dimension_numbers<[1], [0], [0], [1], [0, 0, 1, 1], [], []>} : vector<8x8xbf16>, vector<8x32xbf16>, vector<8x32xf32> -> vector<8x32xf32>
    %601 = arith.addf %574, %600 : vector<8x32xf32>
    %602 = vector.extract_strided_slice %507 {offsets = [0, 24], sizes = [8, 8], strides = [1, 1]} : vector<8x32xf32> to vector<8x8xf32>
    %603 = arith.truncf %602 : vector<8x8xf32> to vector<8x8xbf16>
    %604 = vector.extract_strided_slice %516 {offsets = [0, 24], sizes = [8, 8], strides = [1, 1]} : vector<8x32xf32> to vector<8x8xf32>
    %605 = arith.truncf %604 : vector<8x8xf32> to vector<8x8xbf16>
    %606 = vector.extract_strided_slice %517 {offsets = [0, 24], sizes = [8, 8], strides = [1, 1]} : vector<8x32xf32> to vector<8x8xf32>
    %607 = arith.truncf %606 : vector<8x8xf32> to vector<8x8xbf16>
    %cst_226 = arith.constant dense<0.000000e+00> : vector<8x8xf32>
    %608 = tpu.matmul %603, %605, %cst_226 {dimension_numbers = #tpu.dot_dimension_numbers<[1], [1], [0], [0], [0, 0, 1, 0], [], []>} : vector<8x8xbf16>, vector<8x8xbf16>, vector<8x8xf32> -> vector<8x8xf32>
    %cst_227 = arith.constant 0.353553385 : f32
    %609 = vector.broadcast %cst_227 : f32 to vector<8x8xf32>
    %610 = arith.mulf %608, %609 : vector<8x8xf32>
    %611 = vector.broadcast %10 : vector<1x8xf32> to vector<8x8xf32>
    %612 = arith.addf %610, %611 : vector<8x8xf32>
    %cst_228 = arith.constant dense<0xFF800000> : vector<8xf32>
    %613 = vector.multi_reduction <maximumf>, %612, %cst_228 [1] : vector<8x8xf32> to vector<8xf32>
    %614 = vector.shape_cast %613 : vector<8xf32> to vector<8x1xf32>
    %615 = vector.broadcast %614 : vector<8x1xf32> to vector<8x8xf32>
    %616 = arith.subf %612, %615 : vector<8x8xf32>
    %617 = math.exp %616 : vector<8x8xf32>
    %cst_229 = arith.constant dense<0.000000e+00> : vector<8xf32>
    %618 = vector.multi_reduction <add>, %617, %cst_229 [1] : vector<8x8xf32> to vector<8xf32>
    %619 = vector.shape_cast %618 : vector<8xf32> to vector<8x1xf32>
    %620 = tpu.reciprocal %619 {approx = true} : vector<8x1xf32> -> vector<8x1xf32>
    %621 = vector.broadcast %620 : vector<8x1xf32> to vector<8x8xf32>
    %622 = arith.mulf %617, %621 : vector<8x8xf32>
    %623 = arith.truncf %622 : vector<8x8xf32> to vector<8x8xbf16>
    %cst_230 = arith.constant dense<0.000000e+00> : vector<8x8xf32>
    %624 = tpu.matmul %623, %607, %cst_230 {dimension_numbers = #tpu.dot_dimension_numbers<[1], [0], [0], [1], [0, 0, 1, 1], [], []>} : vector<8x8xbf16>, vector<8x8xbf16>, vector<8x8xf32> -> vector<8x8xf32>
    %625 = arith.truncf %624 : vector<8x8xf32> to vector<8x8xbf16>
    %626 = vector.extract_strided_slice %519 {offsets = [24, 0], sizes = [8, 32], strides = [1, 1]} : vector<32x32xbf16> to vector<8x32xbf16>
    %cst_231 = arith.constant dense<0.000000e+00> : vector<8x32xf32>
    %627 = tpu.matmul %625, %626, %cst_231 {dimension_numbers = #tpu.dot_dimension_numbers<[1], [0], [0], [1], [0, 0, 1, 1], [], []>} : vector<8x8xbf16>, vector<8x32xbf16>, vector<8x32xf32> -> vector<8x32xf32>
    %628 = arith.addf %601, %627 : vector<8x32xf32>
    %629 = vector.broadcast %521 : vector<1x32xf32> to vector<8x32xf32>
    %630 = arith.addf %628, %629 : vector<8x32xf32>
    %631 = arith.addf %499, %630 : vector<8x32xf32>
    %c1_232 = arith.constant 1 : index
    %c0_233 = arith.constant 0 : index
    %c0_234 = arith.constant 0 : index
    %632 = vector.load %arg18[%c1_232, %c0_233, %c0_234] : memref<2x1x32xf32, #tpu.memory_space<vmem>>, vector<1x1x32xf32>
    %633 = vector.shape_cast %632 : vector<1x1x32xf32> to vector<1x32xf32>
    %c1_235 = arith.constant 1 : index
    %c0_236 = arith.constant 0 : index
    %c0_237 = arith.constant 0 : index
    %634 = vector.load %arg19[%c1_235, %c0_236, %c0_237] : memref<2x1x32xf32, #tpu.memory_space<vmem>>, vector<1x1x32xf32>
    %635 = vector.shape_cast %634 : vector<1x1x32xf32> to vector<1x32xf32>
    %cst_238 = arith.constant dense<0.000000e+00> : vector<8xf32>
    %636 = vector.multi_reduction <add>, %631, %cst_238 [1] : vector<8x32xf32> to vector<8xf32>
    %637 = vector.shape_cast %636 : vector<8xf32> to vector<8x1xf32>
    %cst_239 = arith.constant 3.200000e+01 : f32
    %638 = vector.broadcast %cst_239 : f32 to vector<8x1xf32>
    %639 = arith.divf %637, %638 : vector<8x1xf32>
    %640 = vector.broadcast %639 : vector<8x1xf32> to vector<8x32xf32>
    %641 = arith.subf %631, %640 : vector<8x32xf32>
    %642 = arith.mulf %641, %641 : vector<8x32xf32>
    %cst_240 = arith.constant dense<0.000000e+00> : vector<8xf32>
    %643 = vector.multi_reduction <add>, %642, %cst_240 [1] : vector<8x32xf32> to vector<8xf32>
    %644 = vector.shape_cast %643 : vector<8xf32> to vector<8x1xf32>
    %cst_241 = arith.constant 3.200000e+01 : f32
    %645 = vector.broadcast %cst_241 : f32 to vector<8x1xf32>
    %646 = arith.divf %644, %645 : vector<8x1xf32>
    %cst_242 = arith.constant 9.99999974E-6 : f32
    %647 = vector.broadcast %cst_242 : f32 to vector<8x1xf32>
    %648 = arith.addf %646, %647 : vector<8x1xf32>
    %649 = math.rsqrt %648 : vector<8x1xf32>
    %650 = vector.broadcast %649 : vector<8x1xf32> to vector<8x32xf32>
    %651 = arith.mulf %641, %650 : vector<8x32xf32>
    %652 = vector.broadcast %633 : vector<1x32xf32> to vector<8x32xf32>
    %653 = arith.mulf %651, %652 : vector<8x32xf32>
    %654 = vector.broadcast %635 : vector<1x32xf32> to vector<8x32xf32>
    %655 = arith.addf %653, %654 : vector<8x32xf32>
    %c1_243 = arith.constant 1 : index
    %c0_244 = arith.constant 0 : index
    %c0_245 = arith.constant 0 : index
    %656 = vector.load %arg20[%c1_243, %c0_244, %c0_245] : memref<2x32x128xbf16, #tpu.memory_space<vmem>>, vector<1x32x128xbf16>
    %657 = vector.shape_cast %656 : vector<1x32x128xbf16> to vector<32x128xbf16>
    %c1_246 = arith.constant 1 : index
    %c0_247 = arith.constant 0 : index
    %c0_248 = arith.constant 0 : index
    %658 = vector.load %arg21[%c1_246, %c0_247, %c0_248] : memref<2x1x128xf32, #tpu.memory_space<vmem>>, vector<1x1x128xf32>
    %659 = vector.shape_cast %658 : vector<1x1x128xf32> to vector<1x128xf32>
    %660 = arith.truncf %655 : vector<8x32xf32> to vector<8x32xbf16>
    %cst_249 = arith.constant dense<0.000000e+00> : vector<8x128xf32>
    %661 = tpu.matmul %660, %657, %cst_249 {dimension_numbers = #tpu.dot_dimension_numbers<[1], [0], [0], [1], [0, 0, 1, 1], [], []>} : vector<8x32xbf16>, vector<32x128xbf16>, vector<8x128xf32> -> vector<8x128xf32>
    %662 = vector.broadcast %659 : vector<1x128xf32> to vector<8x128xf32>
    %663 = arith.addf %661, %662 : vector<8x128xf32>
    %cst_250 = arith.constant 0.000000e+00 : f32
    %664 = vector.broadcast %cst_250 : f32 to vector<8x128xf32>
    %665 = arith.maximumf %663, %664 : vector<8x128xf32>
    %c1_251 = arith.constant 1 : index
    %c0_252 = arith.constant 0 : index
    %c0_253 = arith.constant 0 : index
    %666 = vector.load %arg22[%c1_251, %c0_252, %c0_253] : memref<2x128x32xbf16, #tpu.memory_space<vmem>>, vector<1x128x32xbf16>
    %667 = vector.shape_cast %666 : vector<1x128x32xbf16> to vector<128x32xbf16>
    %c1_254 = arith.constant 1 : index
    %c0_255 = arith.constant 0 : index
    %c0_256 = arith.constant 0 : index
    %668 = vector.load %arg23[%c1_254, %c0_255, %c0_256] : memref<2x1x32xf32, #tpu.memory_space<vmem>>, vector<1x1x32xf32>
    %669 = vector.shape_cast %668 : vector<1x1x32xf32> to vector<1x32xf32>
    %670 = arith.truncf %665 : vector<8x128xf32> to vector<8x128xbf16>
    %cst_257 = arith.constant dense<0.000000e+00> : vector<8x32xf32>
    %671 = tpu.matmul %670, %667, %cst_257 {dimension_numbers = #tpu.dot_dimension_numbers<[1], [0], [0], [1], [0, 0, 1, 1], [], []>} : vector<8x128xbf16>, vector<128x32xbf16>, vector<8x32xf32> -> vector<8x32xf32>
    %672 = vector.broadcast %669 : vector<1x32xf32> to vector<8x32xf32>
    %673 = arith.addf %671, %672 : vector<8x32xf32>
    %674 = arith.addf %655, %673 : vector<8x32xf32>
    %c1_258 = arith.constant 1 : index
    %c0_259 = arith.constant 0 : index
    %c0_260 = arith.constant 0 : index
    %675 = vector.load %arg24[%c1_258, %c0_259, %c0_260] : memref<2x1x32xf32, #tpu.memory_space<vmem>>, vector<1x1x32xf32>
    %676 = vector.shape_cast %675 : vector<1x1x32xf32> to vector<1x32xf32>
    %c1_261 = arith.constant 1 : index
    %c0_262 = arith.constant 0 : index
    %c0_263 = arith.constant 0 : index
    %677 = vector.load %arg25[%c1_261, %c0_262, %c0_263] : memref<2x1x32xf32, #tpu.memory_space<vmem>>, vector<1x1x32xf32>
    %678 = vector.shape_cast %677 : vector<1x1x32xf32> to vector<1x32xf32>
    %cst_264 = arith.constant dense<0.000000e+00> : vector<8xf32>
    %679 = vector.multi_reduction <add>, %674, %cst_264 [1] : vector<8x32xf32> to vector<8xf32>
    %680 = vector.shape_cast %679 : vector<8xf32> to vector<8x1xf32>
    %cst_265 = arith.constant 3.200000e+01 : f32
    %681 = vector.broadcast %cst_265 : f32 to vector<8x1xf32>
    %682 = arith.divf %680, %681 : vector<8x1xf32>
    %683 = vector.broadcast %682 : vector<8x1xf32> to vector<8x32xf32>
    %684 = arith.subf %674, %683 : vector<8x32xf32>
    %685 = arith.mulf %684, %684 : vector<8x32xf32>
    %cst_266 = arith.constant dense<0.000000e+00> : vector<8xf32>
    %686 = vector.multi_reduction <add>, %685, %cst_266 [1] : vector<8x32xf32> to vector<8xf32>
    %687 = vector.shape_cast %686 : vector<8xf32> to vector<8x1xf32>
    %cst_267 = arith.constant 3.200000e+01 : f32
    %688 = vector.broadcast %cst_267 : f32 to vector<8x1xf32>
    %689 = arith.divf %687, %688 : vector<8x1xf32>
    %cst_268 = arith.constant 9.99999974E-6 : f32
    %690 = vector.broadcast %cst_268 : f32 to vector<8x1xf32>
    %691 = arith.addf %689, %690 : vector<8x1xf32>
    %692 = math.rsqrt %691 : vector<8x1xf32>
    %693 = vector.broadcast %692 : vector<8x1xf32> to vector<8x32xf32>
    %694 = arith.mulf %684, %693 : vector<8x32xf32>
    %695 = vector.broadcast %676 : vector<1x32xf32> to vector<8x32xf32>
    %696 = arith.mulf %694, %695 : vector<8x32xf32>
    %697 = vector.broadcast %678 : vector<1x32xf32> to vector<8x32xf32>
    %698 = arith.addf %696, %697 : vector<8x32xf32>
    %c0_269 = arith.constant 0 : index
    %c0_270 = arith.constant 0 : index
    %699 = vector.load %arg26[%c0_269, %c0_270] : memref<1x32xf32, #tpu.memory_space<vmem>>, vector<1x32xf32>
    %c0_271 = arith.constant 0 : index
    %c0_272 = arith.constant 0 : index
    %700 = vector.load %arg27[%c0_271, %c0_272] : memref<1x32xf32, #tpu.memory_space<vmem>>, vector<1x32xf32>
    %cst_273 = arith.constant dense<0.000000e+00> : vector<8xf32>
    %701 = vector.multi_reduction <add>, %698, %cst_273 [1] : vector<8x32xf32> to vector<8xf32>
    %702 = vector.shape_cast %701 : vector<8xf32> to vector<8x1xf32>
    %cst_274 = arith.constant 3.200000e+01 : f32
    %703 = vector.broadcast %cst_274 : f32 to vector<8x1xf32>
    %704 = arith.divf %702, %703 : vector<8x1xf32>
    %705 = vector.broadcast %704 : vector<8x1xf32> to vector<8x32xf32>
    %706 = arith.subf %698, %705 : vector<8x32xf32>
    %707 = arith.mulf %706, %706 : vector<8x32xf32>
    %cst_275 = arith.constant dense<0.000000e+00> : vector<8xf32>
    %708 = vector.multi_reduction <add>, %707, %cst_275 [1] : vector<8x32xf32> to vector<8xf32>
    %709 = vector.shape_cast %708 : vector<8xf32> to vector<8x1xf32>
    %cst_276 = arith.constant 3.200000e+01 : f32
    %710 = vector.broadcast %cst_276 : f32 to vector<8x1xf32>
    %711 = arith.divf %709, %710 : vector<8x1xf32>
    %cst_277 = arith.constant 9.99999974E-6 : f32
    %712 = vector.broadcast %cst_277 : f32 to vector<8x1xf32>
    %713 = arith.addf %711, %712 : vector<8x1xf32>
    %714 = math.rsqrt %713 : vector<8x1xf32>
    %715 = vector.broadcast %714 : vector<8x1xf32> to vector<8x32xf32>
    %716 = arith.mulf %706, %715 : vector<8x32xf32>
    %717 = vector.broadcast %699 : vector<1x32xf32> to vector<8x32xf32>
    %718 = arith.mulf %716, %717 : vector<8x32xf32>
    %719 = vector.broadcast %700 : vector<1x32xf32> to vector<8x32xf32>
    %720 = arith.addf %718, %719 : vector<8x32xf32>
    %c0_278 = arith.constant 0 : index
    %c0_279 = arith.constant 0 : index
    %721 = vector.load %arg28[%c0_278, %c0_279] : memref<32x128xbf16, #tpu.memory_space<vmem>>, vector<32x128xbf16>
    %c0_280 = arith.constant 0 : index
    %c0_281 = arith.constant 0 : index
    %722 = vector.load %arg29[%c0_280, %c0_281] : memref<1x128xf32, #tpu.memory_space<vmem>>, vector<1x128xf32>
    %723 = arith.truncf %720 : vector<8x32xf32> to vector<8x32xbf16>
    %cst_282 = arith.constant dense<0.000000e+00> : vector<8x128xf32>
    %724 = tpu.matmul %723, %721, %cst_282 {dimension_numbers = #tpu.dot_dimension_numbers<[1], [0], [0], [1], [0, 0, 1, 1], [], []>} : vector<8x32xbf16>, vector<32x128xbf16>, vector<8x128xf32> -> vector<8x128xf32>
    %725 = vector.broadcast %722 : vector<1x128xf32> to vector<8x128xf32>
    %726 = arith.addf %724, %725 : vector<8x128xf32>
    %c0_283 = arith.constant 0 : index
    %c0_284 = arith.constant 0 : index
    %c0_285 = arith.constant 0 : index
    %727 = vector.load %arg30[%c0_283, %c0_284, %c0_285] : memref<1x8x128xf32, #tpu.memory_space<vmem>>, vector<1x8x128xf32>
    %728 = vector.shape_cast %727 : vector<1x8x128xf32> to vector<8x128xf32>
    %729 = vector.shape_cast %726 : vector<8x128xf32> to vector<1x8x128xf32>
    tpu.vector_store %arg30[%c0_283, %c0_284, %c0_285], %729 {strides = array<i32>} : memref<1x8x128xf32, #tpu.memory_space<vmem>>, vector<1x8x128xf32>,
    return
  }
  func.func @transform_0(%arg0: i32) -> (i32, i32, i32) {
    %c0_i32 = arith.constant 0 : i32
    %c0_i32_0 = arith.constant 0 : i32
    %c0_i32_1 = arith.constant 0 : i32
    return %arg0, %c0_i32, %c0_i32_0 : i32, i32, i32
  }
  func.func @transform_1(%arg0: i32) -> (i32, i32, i32) {
    %c0_i32 = arith.constant 0 : i32
    %c0_i32_0 = arith.constant 0 : i32
    %c0_i32_1 = arith.constant 0 : i32
    return %arg0, %c0_i32, %c0_i32_0 : i32, i32, i32
  }
  func.func @transform_2(%arg0: i32) -> (i32, i32) {
    %c0_i32 = arith.constant 0 : i32
    %c0_i32_0 = arith.constant 0 : i32
    %c0_i32_1 = arith.constant 0 : i32
    return %c0_i32, %c0_i32_0 : i32, i32
  }
  func.func @transform_3(%arg0: i32) -> (i32, i32, i32) {
    %c0_i32 = arith.constant 0 : i32
    %c0_i32_0 = arith.constant 0 : i32
    %c0_i32_1 = arith.constant 0 : i32
    return %arg0, %c0_i32, %c0_i32_0 : i32, i32, i32
  }
  func.func @transform_4(%arg0: i32) -> (i32, i32, i32) {
    %c0_i32 = arith.constant 0 : i32
    %c0_i32_0 = arith.constant 0 : i32
    %c0_i32_1 = arith.constant 0 : i32
    return %arg0, %c0_i32, %c0_i32_0 : i32, i32, i32
  }
  func.func @transform_5(%arg0: i32) -> (i32, i32, i32) {
    %c0_i32 = arith.constant 0 : i32
    %c0_i32_0 = arith.constant 0 : i32
    %c0_i32_1 = arith.constant 0 : i32
    %c0_i32_2 = arith.constant 0 : i32
    return %c0_i32, %c0_i32_0, %c0_i32_1 : i32, i32, i32
  }
  func.func @transform_6(%arg0: i32) -> (i32, i32, i32) {
    %c0_i32 = arith.constant 0 : i32
    %c0_i32_0 = arith.constant 0 : i32
    %c0_i32_1 = arith.constant 0 : i32
    %c0_i32_2 = arith.constant 0 : i32
    return %c0_i32, %c0_i32_0, %c0_i32_1 : i32, i32, i32
  }
  func.func @transform_7(%arg0: i32) -> (i32, i32, i32) {
    %c0_i32 = arith.constant 0 : i32
    %c0_i32_0 = arith.constant 0 : i32
    %c0_i32_1 = arith.constant 0 : i32
    %c0_i32_2 = arith.constant 0 : i32
    return %c0_i32, %c0_i32_0, %c0_i32_1 : i32, i32, i32
  }
  func.func @transform_8(%arg0: i32) -> (i32, i32, i32) {
    %c0_i32 = arith.constant 0 : i32
    %c0_i32_0 = arith.constant 0 : i32
    %c0_i32_1 = arith.constant 0 : i32
    %c0_i32_2 = arith.constant 0 : i32
    return %c0_i32, %c0_i32_0, %c0_i32_1 : i32, i32, i32
  }
  func.func @transform_9(%arg0: i32) -> (i32, i32, i32) {
    %c0_i32 = arith.constant 0 : i32
    %c0_i32_0 = arith.constant 0 : i32
    %c0_i32_1 = arith.constant 0 : i32
    %c0_i32_2 = arith.constant 0 : i32
    return %c0_i32, %c0_i32_0, %c0_i32_1 : i32, i32, i32
  }
  func.func @transform_10(%arg0: i32) -> (i32, i32, i32) {
    %c0_i32 = arith.constant 0 : i32
    %c0_i32_0 = arith.constant 0 : i32
    %c0_i32_1 = arith.constant 0 : i32
    %c0_i32_2 = arith.constant 0 : i32
    return %c0_i32, %c0_i32_0, %c0_i32_1 : i32, i32, i32
  }
  func.func @transform_11(%arg0: i32) -> (i32, i32, i32) {
    %c0_i32 = arith.constant 0 : i32
    %c0_i32_0 = arith.constant 0 : i32
    %c0_i32_1 = arith.constant 0 : i32
    %c0_i32_2 = arith.constant 0 : i32
    return %c0_i32, %c0_i32_0, %c0_i32_1 : i32, i32, i32
  }
  func.func @transform_12(%arg0: i32) -> (i32, i32, i32) {
    %c0_i32 = arith.constant 0 : i32
    %c0_i32_0 = arith.constant 0 : i32
    %c0_i32_1 = arith.constant 0 : i32
    %c0_i32_2 = arith.constant 0 : i32
    return %c0_i32, %c0_i32_0, %c0_i32_1 : i32, i32, i32
  }
  func.func @transform_13(%arg0: i32) -> (i32, i32, i32) {
    %c0_i32 = arith.constant 0 : i32
    %c0_i32_0 = arith.constant 0 : i32
    %c0_i32_1 = arith.constant 0 : i32
    %c0_i32_2 = arith.constant 0 : i32
    return %c0_i32, %c0_i32_0, %c0_i32_1 : i32, i32, i32
  }
  func.func @transform_14(%arg0: i32) -> (i32, i32, i32) {
    %c0_i32 = arith.constant 0 : i32
    %c0_i32_0 = arith.constant 0 : i32
    %c0_i32_1 = arith.constant 0 : i32
    %c0_i32_2 = arith.constant 0 : i32
    return %c0_i32, %c0_i32_0, %c0_i32_1 : i32, i32, i32
  }
  func.func @transform_15(%arg0: i32) -> (i32, i32, i32) {
    %c0_i32 = arith.constant 0 : i32
    %c0_i32_0 = arith.constant 0 : i32
    %c0_i32_1 = arith.constant 0 : i32
    %c0_i32_2 = arith.constant 0 : i32
    return %c0_i32, %c0_i32_0, %c0_i32_1 : i32, i32, i32
  }
  func.func @transform_16(%arg0: i32) -> (i32, i32, i32) {
    %c0_i32 = arith.constant 0 : i32
    %c0_i32_0 = arith.constant 0 : i32
    %c0_i32_1 = arith.constant 0 : i32
    %c0_i32_2 = arith.constant 0 : i32
    return %c0_i32, %c0_i32_0, %c0_i32_1 : i32, i32, i32
  }
  func.func @transform_17(%arg0: i32) -> (i32, i32, i32) {
    %c0_i32 = arith.constant 0 : i32
    %c0_i32_0 = arith.constant 0 : i32
    %c0_i32_1 = arith.constant 0 : i32
    %c0_i32_2 = arith.constant 0 : i32
    return %c0_i32, %c0_i32_0, %c0_i32_1 : i32, i32, i32
  }
  func.func @transform_18(%arg0: i32) -> (i32, i32, i32) {
    %c0_i32 = arith.constant 0 : i32
    %c0_i32_0 = arith.constant 0 : i32
    %c0_i32_1 = arith.constant 0 : i32
    %c0_i32_2 = arith.constant 0 : i32
    return %c0_i32, %c0_i32_0, %c0_i32_1 : i32, i32, i32
  }
  func.func @transform_19(%arg0: i32) -> (i32, i32, i32) {
    %c0_i32 = arith.constant 0 : i32
    %c0_i32_0 = arith.constant 0 : i32
    %c0_i32_1 = arith.constant 0 : i32
    %c0_i32_2 = arith.constant 0 : i32
    return %c0_i32, %c0_i32_0, %c0_i32_1 : i32, i32, i32
  }
  func.func @transform_20(%arg0: i32) -> (i32, i32, i32) {
    %c0_i32 = arith.constant 0 : i32
    %c0_i32_0 = arith.constant 0 : i32
    %c0_i32_1 = arith.constant 0 : i32
    %c0_i32_2 = arith.constant 0 : i32
    return %c0_i32, %c0_i32_0, %c0_i32_1 : i32, i32, i32
  }
  func.func @transform_21(%arg0: i32) -> (i32, i32, i32) {
    %c0_i32 = arith.constant 0 : i32
    %c0_i32_0 = arith.constant 0 : i32
    %c0_i32_1 = arith.constant 0 : i32
    %c0_i32_2 = arith.constant 0 : i32
    return %c0_i32, %c0_i32_0, %c0_i32_1 : i32, i32, i32
  }
  func.func @transform_22(%arg0: i32) -> (i32, i32, i32) {
    %c0_i32 = arith.constant 0 : i32
    %c0_i32_0 = arith.constant 0 : i32
    %c0_i32_1 = arith.constant 0 : i32
    %c0_i32_2 = arith.constant 0 : i32
    return %c0_i32, %c0_i32_0, %c0_i32_1 : i32, i32, i32
  }
  func.func @transform_23(%arg0: i32) -> (i32, i32, i32) {
    %c0_i32 = arith.constant 0 : i32
    %c0_i32_0 = arith.constant 0 : i32
    %c0_i32_1 = arith.constant 0 : i32
    %c0_i32_2 = arith.constant 0 : i32
    return %c0_i32, %c0_i32_0, %c0_i32_1 : i32, i32, i32
  }
  func.func @transform_24(%arg0: i32) -> (i32, i32, i32) {
    %c0_i32 = arith.constant 0 : i32
    %c0_i32_0 = arith.constant 0 : i32
    %c0_i32_1 = arith.constant 0 : i32
    %c0_i32_2 = arith.constant 0 : i32
    return %c0_i32, %c0_i32_0, %c0_i32_1 : i32, i32, i32
  }
  func.func @transform_25(%arg0: i32) -> (i32, i32) {
    %c0_i32 = arith.constant 0 : i32
    %c0_i32_0 = arith.constant 0 : i32
    %c0_i32_1 = arith.constant 0 : i32
    return %c0_i32, %c0_i32_0 : i32, i32
  }
  func.func @transform_26(%arg0: i32) -> (i32, i32) {
    %c0_i32 = arith.constant 0 : i32
    %c0_i32_0 = arith.constant 0 : i32
    %c0_i32_1 = arith.constant 0 : i32
    return %c0_i32, %c0_i32_0 : i32, i32
  }
  func.func @transform_27(%arg0: i32) -> (i32, i32) {
    %c0_i32 = arith.constant 0 : i32
    %c0_i32_0 = arith.constant 0 : i32
    %c0_i32_1 = arith.constant 0 : i32
    return %c0_i32, %c0_i32_0 : i32, i32
  }
  func.func @transform_28(%arg0: i32) -> (i32, i32) {
    %c0_i32 = arith.constant 0 : i32
    %c0_i32_0 = arith.constant 0 : i32
    %c0_i32_1 = arith.constant 0 : i32
    return %c0_i32, %c0_i32_0 : i32, i32
  }
  func.func @transform_29(%arg0: i32) -> (i32, i32, i32) {
    %c0_i32 = arith.constant 0 : i32
    %c0_i32_0 = arith.constant 0 : i32
    %c0_i32_1 = arith.constant 0 : i32
    return %arg0, %c0_i32, %c0_i32_0 : i32, i32, i32
  }
}

</mosaic_0001>

<bundles_post_ra>
// kernel: seq2seq_transformer_forward.2
= control target key start
LH: loop header
LB: loop body
LE: loop exit
PB: predicated region body
PF: predicated region fallthrough
CT: control target
= control target key end

     0   :  { %s3199_s24 = smov 0   ;;  %s3649_s0 = inlined_call_operand.vmem [shape: f32[2,8,32], index: 0, kind: input, shape index: {}]   ;;  %s3650_s1 = inlined_call_operand.vmem [shape: f32[8,8], index: 1, kind: input, shape index: {}]   ;;  %s3651_s2 = inlined_call_operand.vmem [shape: f32[2,1,8], index: 2, kind: input, shape index: {}]   ;;  %s3652_s3 = inlined_call_operand.vmem [shape: bf16[2,32,96], index: 3, kind: input, shape index: {}]   ;;  %s3653_s4 = inlined_call_operand.vmem [shape: f32[2,1,96], index: 4, kind: input, shape index: {}]   ;;  %s3654_s5 = inlined_call_operand.vmem [shape: bf16[2,32,32], index: 5, kind: input, shape index: {}]   ;;  %s3655_s6 = inlined_call_operand.vmem [shape: f32[2,1,32], index: 6, kind: input, shape index: {}]   ;;  %s3656_s7 = inlined_call_operand.vmem [shape: f32[2,1,32], index: 7, kind: input, shape index: {}]   ;;  %s3657_s8 = inlined_call_operand.vmem [shape: f32[2,1,32], index: 8, kind: input, shape index: {}]   ;;  %s3658_s9 = inlined_call_operand.vmem [shape: bf16[2,32,128], index: 9, kind: input, shape index: {}]   ;;  %s3659_s10 = inlined_call_operand.vmem [shape: f32[2,1,128], index: 10, kind: input, shape index: {}]   ;;  %s3660_s11 = inlined_call_operand.vmem [shape: bf16[2,128,32], index: 11, kind: input, shape index: {}]   ;;  %s3661_s12 = inlined_call_operand.vmem [shape: f32[2,1,32], index: 12, kind: input, shape index: {}]   ;;  %s3662_s13 = inlined_call_operand.vmem [shape: f32[2,1,32], index: 13, kind: input, shape index: {}]   ;;  %s3663_s14 = inlined_call_operand.vmem [shape: f32[2,1,32], index: 14, kind: input, shape index: {}]   ;;  %s3664_s15 = inlined_call_operand.vmem [shape: f32[1,32], index: 15, kind: input, shape index: {}]   ;;  %s3665_s16 = inlined_call_operand.vmem [shape: f32[1,32], index: 16, kind: input, shape index: {}]   ;;  %s3666_s17 = inlined_call_operand.vmem [shape: f32[2,8,32], index: 17, kind: output, shape index: {}]  }
   0x1   :  { %3674 = sst [smem:[#allocation2_spill]] %s3649_s0 }
   0x2   :  { %3675 = sst [smem:[#allocation3_spill]] %s3650_s1 }
   0x3 LB: > { %s2591_s25 = sadd.s32 4294967295, %s3094_s24   ;;  %p2595_p0 = scmp.ge.s32.totalorder %s3094_s24, 1  ;;  %s3094_s24 = sphi %s3199_s24, %s27_s24  }
   0x4   : > { %p494_p1 = scmp.lt.s32.totalorder %s3094_s24, 3 }
   0x6   : > { %p495_p2 = pnand %p2595_p0, %p494_p1 }
   0x7   : > { %p547_p3 = scmp.lt.s32.totalorder (!%p495_p2), %s2591_s25, 1  ;;  %s3676_s19 = sld [smem:[#allocation2_spill]] (!%p495_p2) }
   0x8   : > { %498 = sbr.rel (%p495_p2) target bundleno = 8315 (0x207b), region = 88  ;;  %s3098_s22 = smov (!%p495_p2), 64  }
   0x9   : > { %s3099_s23 = smov (!%p495_p2), 96   ;;  %s3677_s18 = sld [smem:[#allocation3_spill]] (!%p495_p2) }
   0xa   : > { %s3102_s20 = smov (!%p495_p2), 56   ;;  %s3673_s21 = smov (!%p495_p2), 80  }
   0xb   : > { %s3672_s26 = smov (!%p495_p2), 112   ;;  %s3670_s27 = smov (!%p495_p2), 72  }
   0xc   : > { %s3668_s29 = smov (!%p495_p2), 40  }
   0xd   : > { %v3022_v0 = vld [vmem:[%s3652_s3 + $0x8] sm:$0xff]   ;;  %v3096_v1 = vmov 0.0   ;;  %v3023_v2 = vld [vmem:[%s3652_s3] sm:$0xff]   ;;  %vm3097_vm0 = vmmov 0   ;;  %s3686_s25 = smov (!%p547_p3, %s2591_s25), 1  ;;  %vm593_vm1 = vcmask 261120  }
   0xe   : > { %2785 = vmatprep.subr.bf16.mxu1 %v3096_v1  ;;  %2811 = vmatprep.subr.bf16.mxu0 %v3096_v1  ;;  %s3667_s0 = sshll.u32 %s3686_s25, 3  ;;  %v2599_v5 = vld [vmem:[%s3653_s4] ss:$0 sm:$0xff]  ;;  %vm646_vm2 = vcmask 64512   ;;  %vm712_vm3 = vcmask 1043456   ;;  %s553_s28 = scalar_lea.vmem %s3651_s2, %s3686_s25 }
   0xf   : > { %2786 = vmatpush3.bf16.msra.mxu1 %v3022_v0  ;;  %2789 = vmatprep.mubr.msk.bf16.mxu1 %vm3097_vm0, %v3096_v1  ;;  %s550_s1 = scalar_lea.vmem %s3676_s19, %s3667_s0  ;;  %v560_v16 = vld [vmem:[%s3677_s18] sm:$0xff]  ;;  %s3100_s19 = smov 88  }
  0x10   : > { %2787 = vmatprep.subr.bf16.mxu1 %v3096_v1  ;;  %2813 = vmatprep.mubr.msk.bf16.mxu0 %vm3097_vm0, %v3096_v1  ;;  %v3229_v3 = vld [vmem:[%s550_s1] sm:$0xff]  ;;  %s3101_s1 = smov 120   ;;  %s3671_s18 = smov 48  }
  0x11   : > { %v574_v4 = vpack.c.bf16 %v3229_v3, %v3229_v3  ;;  %v2598_v17 = vld [vmem:[%s553_s28] ss:$0 sm:$0xff]  ;;  %v638_v54 = vld [vmem:[%s3654_s5 + $0x4] sm:$0xf]  ;;  %s3669_s28 = smov 104   ;;  %s3681_s0 = smov 72  }
  0x12   : > { %v3260_v18 = vadd.f32 %v2598_v17, %v560_v16  ;;  %v874_v55 = vsel %vm712_vm3, %v638_v54, 0  ;;  %v637_v60 = vld [vmem:[%s3654_s5] sm:$0xf] }
  0x13   : > { %2788 = vmatpush3.bf16.msra.mxu1 %v3023_v2  ;;  %v920_v63 = vsel %vm712_vm3, %v637_v60, 0 }
  0x14   : > { %2793 = vmatprep.subr.bf16.mxu1 %v3096_v1 }
  0x16   : > { %2790 = vmatmul.mubr.msk.bf16.vlgmr.msra.gmra.mxu1 %vm593_vm1, %v574_v4 }
  0x17   : > { %2795 = vmatprep.mubr.msk.bf16.mxu1 %vm3097_vm0, %v3096_v1 }
  0xd6   : > { %v631_v6 = vpop.f32.mrf.mxu1 }
  0xd7   : > { %v632_v7 = vadd.f32 %v2599_v5, %v631_v6 }
  0xd8   : > { %v2791_v8 = vpop.f32.mrf.mxu1 }
  0xd9   : > { %v3239_v9 = vpack.c.bf16 %v632_v7, %v632_v7 }
  0xda   : > { %v634_v10 = vpop.f32.mrf.mxu1 }
  0xdb   : > { %707 = vrot.lane.b32.xlu1 %v3239_v9, %s3098_s22  ;;  %644 = vrot.lane.b32.xlu0 %v3239_v9, %s3099_s23 }
  0xdc   : > { %v2792_v11 = vpop.f32.mrf.mxu1 }
 0x14d   : > { %v645_v12 = vpop.permute.xlu0 %644  ;;  %v708_v14 = vpop.permute.xlu1 %707 }
 0x14e   : > { %v651_v13 = vsel %vm646_vm2, %v645_v12, 0  ;;  %v714_v15 = vsel %vm712_vm3, %v708_v14, 0 }
 0x14f   : > { %2794 = vmatpush3.bf16.xpose.msra.mxu1 %v651_v13 }
 0x150   : > { %2799 = vmatprep.subr.bf16.mxu1 %v3096_v1 }
 0x156   : > { %2796 = vmatmul.mubr.msk.bf16.vlgmr.msra.gmra.mxu1 %vm646_vm2, %v3239_v9 }
 0x157   : > { %2800 = vmatpush3.bf16.msra.mxu1 %v714_v15  ;;  %2801 = vmatprep.mubr.msk.bf16.mxu1 %vm3097_vm0, %v3096_v1 }
 0x158   : > { %2805 = vmatprep.subr.bf16.mxu1 %v3096_v1 }
 0x216   : > { %v687_v19 = vpop.f32.mrf.mxu1 }
 0x217   : > { %v693_v20 = vmul.f32 0.35355338, %v687_v19 }
 0x218   : > { %v2797_v21 = vpop.f32.mrf.mxu1 }
 0x219   : > { %v694_v22 = vadd.f32 %v693_v20, %v3260_v18 }
 0x21a   : > { %v690_v23 = vpop.f32.mrf.mxu1 }
 0x21b   : > { %v695_v24 = vsel %vm646_vm2, %v694_v22, -inf }
 0x21c   : > { %696 = vmax.xlane.f32.xlu0 %v695_v24  ;;  %v2798_v25 = vpop.f32.mrf.mxu1 }
 0x2a5   : > { %v697_v26 = vpop.xlane.xlu0 %696 }
 0x2a6   : > { %v698_v27 = vsub.f32 %v694_v22, %v697_v26 }
 0x2a8   : > { %v699_v28 = vmul.f32 1.442695, %v698_v27 }
 0x2aa   : > { %3046 = vpow2.f32 %v699_v28 }
 0x2b7   : > { %v3047_v29 = vpop.eup %3046 }
 0x2b8   : > { %v701_v30 = vsel %vm646_vm2, %v3047_v29, 0.0 }
 0x2b9   : > { %702 = vadd.xlane.f32.xlu1 %v701_v30 }
 0x2ca   : > { %759 = vrot.lane.b32.xlu1 %v3239_v9, %s3100_s19 }
 0x2ce   : > { %757 = vrot.lane.b32.xlu1 %v3239_v9, %s3101_s1 }
 0x342   : > { %v703_v31 = vpop.xlane.xlu1 %702 }
 0x343   : > { %3048 = vrcp.f32 %v703_v31 }
 0x346   : > { %v760_v34 = vpop.permute.xlu1 %759 }
 0x347   : > { %v765_v36 = vsel %vm646_vm2, %v760_v34, 0 }
 0x34a   : > { %v758_v37 = vpop.permute.xlu1 %757 }
 0x350   : > { %v3049_v32 = vpop.eup %3048 }
 0x351   : > { %v705_v33 = vmul.f32 %v3049_v32, %v3047_v29 }
 0x353   : > { %v706_v35 = vpack.c.bf16 %v705_v33, %v705_v33 }
 0x355   : > { %2802 = vmatmul.mubr.msk.bf16.vlgmr.msra.gmra.mxu1 %vm646_vm2, %v706_v35 }
 0x356   : > { %2806 = vmatpush3.bf16.xpose.msra.mxu1 %v765_v36  ;;  %2807 = vmatprep.mubr.msk.bf16.mxu1 %vm3097_vm0, %v3096_v1 }
 0x357   : > { %2817 = vmatprep.subr.bf16.mxu1 %v3096_v1 }
 0x35d   : > { %2808 = vmatmul.mubr.msk.bf16.vlgmr.msra.gmra.mxu1 %vm646_vm2, %v758_v37 }
 0x35e   : > { %2819 = vmatprep.mubr.msk.bf16.mxu1 %vm3097_vm0, %v3096_v1  ;;  %2818 = vmatpush3.bf16.msra.mxu1 %v874_v55 }
 0x35f   : > { %2829 = vmatprep.subr.bf16.mxu1 %v3096_v1 }
 0x415   : > { %v750_v38 = vpop.f32.mrf.mxu1 }
 0x416   : > { %v756_v0 = vpack.c.bf16 %v750_v38, %v750_v38 }
 0x417   : > { %v2803_v39 = vpop.f32.mrf.mxu1 }
 0x419   : > { %v753_v40 = vpop.f32.mrf.mxu1 }
 0x41b   : > { %v2804_v41 = vpop.f32.mrf.mxu1 }
 0x41d   : > { %v801_v42 = vpop.f32.mrf.mxu1 }
 0x41e   : > { %v807_v43 = vmul.f32 0.35355338, %v801_v42  ;;  %v639_v42 = vld [vmem:[%s3654_s5 + $0x8] sm:$0xf] }
 0x41f   : > { %v2809_v44 = vpop.f32.mrf.mxu1 }
 0x420   : > { %v808_v45 = vadd.f32 %v807_v43, %v3260_v18  ;;  %v1079_v43 = vsel %vm712_vm3, %v639_v42, 0 }
 0x421   : > { %v804_v46 = vpop.f32.mrf.mxu1 }
 0x422   : > { %v809_v47 = vsel %vm646_vm2, %v808_v45, -inf }
 0x423   : > { %810 = vmax.xlane.f32.xlu1 %v809_v47  ;;  %v2810_v48 = vpop.f32.mrf.mxu1 }
 0x4ac   : > { %v811_v49 = vpop.xlane.xlu1 %810 }
 0x4ad   : > { %v812_v50 = vsub.f32 %v808_v45, %v811_v49 }
 0x4af   : > { %v813_v51 = vmul.f32 1.442695, %v812_v50 }
 0x4b1   : > { %3050 = vpow2.f32 %v813_v51 }
 0x4be   : > { %v3051_v52 = vpop.eup %3050 }
 0x4bf   : > { %v815_v53 = vsel %vm646_vm2, %v3051_v52, 0.0 }
 0x4c0   : > { %816 = vadd.xlane.f32.xlu0 %v815_v53 }
 0x4d6   : > { %821 = vrot.lane.b32.xlu0 %v3239_v9, %s3102_s20 }
 0x4da   : > { %964 = vrot.lane.b32.xlu0 %v3239_v9, %s3673_s21 }
 0x4de   : > { %962 = vrot.lane.b32.xlu0 %v3239_v9, %s3672_s26 }
 0x549   : > { %v817_v56 = vpop.xlane.xlu0 %816 }
 0x54a   : > { %3052 = vrcp.f32 %v817_v56 }
 0x54d   : > { %v822_v57 = vpop.permute.xlu0 %821 }
 0x54e   : > { %v827_v58 = vsel %vm712_vm3, %v822_v57, 0 }
 0x54f   : > { %2812 = vmatpush3.bf16.msra.mxu0 %v827_v58 }
 0x550   : > { %2823 = vmatprep.subr.bf16.mxu0 %v3096_v1 }
 0x551   : > { %v965_v2 = vpop.permute.xlu0 %964 }
 0x552   : > { %v970_v7 = vsel %vm646_vm2, %v965_v2, 0 }
 0x555   : > { %v963_v12 = vpop.permute.xlu0 %962 }
 0x557   : > { %v3053_v59 = vpop.eup %3052 }
 0x558   : > { %v819_v61 = vmul.f32 %v3053_v59, %v3051_v52 }
 0x55a   : > { %v820_v62 = vpack.c.bf16 %v819_v61, %v819_v61 }
 0x55c   : > { %2814 = vmatmul.mubr.msk.bf16.vlgmr.msra.gmra.mxu0 %vm646_vm2, %v820_v62 }
 0x55d   : > { %2824 = vmatpush3.bf16.msra.mxu0 %v920_v63  ;;  %2825 = vmatprep.mubr.msk.bf16.mxu0 %vm3097_vm0, %v3096_v1 }
 0x55e   : > { %2835 = vmatprep.subr.bf16.mxu0 %v3096_v1 }
 0x564   : > { %2826 = vmatmul.mubr.msk.bf16.vlgmr.msra.gmra.mxu0 %vm646_vm2, %v756_v0 }
 0x565   : > { %2837 = vmatprep.mubr.msk.bf16.mxu0 %vm3097_vm0, %v3096_v1 }
 0x61c   : > { %v863_v4 = vpop.f32.mrf.mxu0 }
 0x61d   : > { %v869_v5 = vpack.c.bf16 %v863_v4, %v863_v4  ;;  %v640_v4 = vld [vmem:[%s3654_s5 + $0xc] sm:$0xf] }
 0x61e   : > { %v2815_v6 = vpop.f32.mrf.mxu0 }
 0x61f   : > { %2820 = vmatmul.mubr.msk.bf16.vlgmr.msra.gmra.mxu1 %vm646_vm2, %v869_v5  ;;  %v1239_v5 = vsel %vm712_vm3, %v640_v4, 0 }
 0x620   : > { %2830 = vmatpush3.bf16.xpose.msra.mxu1 %v970_v7  ;;  %v866_v8 = vpop.f32.mrf.mxu0  ;;  %2831 = vmatprep.mubr.msk.bf16.mxu1 %vm3097_vm0, %v3096_v1 }
 0x621   : > { %2841 = vmatprep.subr.bf16.mxu1 %v3096_v1 }
 0x622   : > { %v2816_v10 = vpop.f32.mrf.mxu0 }
 0x624   : > { %v3309_v11 = vpop.f32.mrf.mxu0 }
 0x626   : > { %v2827_v13 = vpop.f32.mrf.mxu0 }
 0x627   : > { %2832 = vmatmul.mubr.msk.bf16.vlgmr.msra.gmra.mxu1 %vm646_vm2, %v963_v12 }
 0x628   : > { %v959_v14 = vpop.f32.mrf.mxu0  ;;  %2843 = vmatprep.mubr.msk.bf16.mxu1 %vm3097_vm0, %v3096_v1  ;;  %2842 = vmatpush3.bf16.msra.mxu1 %v1079_v43 }
 0x629   : > { %2853 = vmatprep.subr.bf16.mxu1 %v3096_v1 }
 0x62a   : > { %v2828_v15 = vpop.f32.mrf.mxu0 }
 0x6df   : > { %v3314_v16 = vpop.f32.mrf.mxu1 }
 0x6e0   : > { %v957_v61 = vadd.f32 %v3309_v11, %v3314_v16 }
 0x6e1   : > { %v2821_v17 = vpop.f32.mrf.mxu1 }
 0x6e3   : > { %v913_v19 = vpop.f32.mrf.mxu1 }
 0x6e4   : > { %v2615_v19 = vld [vmem:[%s3655_s6] ss:$0 sm:$0xff] }
 0x6e5   : > { %v2822_v20 = vpop.f32.mrf.mxu1 }
 0x6e7   : > { %v1006_v21 = vpop.f32.mrf.mxu1 }
 0x6e8   : > { %v1012_v22 = vmul.f32 0.35355338, %v1006_v21 }
 0x6e9   : > { %v2833_v23 = vpop.f32.mrf.mxu1 }
 0x6ea   : > { %v1013_v24 = vadd.f32 %v1012_v22, %v3260_v18 }
 0x6eb   : > { %v1009_v25 = vpop.f32.mrf.mxu1 }
 0x6ec   : > { %v1014_v26 = vsel %vm646_vm2, %v1013_v24, -inf }
 0x6ed   : > { %1015 = vmax.xlane.f32.xlu1 %v1014_v26  ;;  %v2834_v27 = vpop.f32.mrf.mxu1 }
 0x6fe   : > { %1026 = vrot.lane.b32.xlu1 %v3239_v9, %s3671_s18  ;;  %s3683_s18 = smov 40  }
 0x702   : > { %1124 = vrot.lane.b32.xlu1 %v3239_v9, %s3670_s27  ;;  %s3680_s27 = smov 48  }
 0x706   : > { %1122 = vrot.lane.b32.xlu1 %v3239_v9, %s3669_s28  ;;  %s3682_s28 = smov 104  }
 0x776   : > { %v1016_v28 = vpop.xlane.xlu1 %1015 }
 0x777   : > { %v1017_v29 = vsub.f32 %v1013_v24, %v1016_v28 }
 0x779   : > { %v1018_v30 = vmul.f32 1.442695, %v1017_v29 }
 0x77a   : > { %v1027_v31 = vpop.permute.xlu1 %1026 }
 0x77b   : > { %3054 = vpow2.f32 %v1018_v30  ;;  %v1032_v32 = vsel %vm712_vm3, %v1027_v31, 0 }
 0x77c   : > { %2836 = vmatpush3.bf16.msra.mxu0 %v1032_v32 }
 0x77d   : > { %2847 = vmatprep.subr.bf16.mxu0 %v3096_v1 }
 0x77e   : > { %v1125_v38 = vpop.permute.xlu1 %1124 }
 0x77f   : > { %v1130_v40 = vsel %vm646_vm2, %v1125_v38, 0  ;;  %v3030_v38 = vld [vmem:[%s3660_s11 + $0x18] sm:$0xff]  }
 0x782   : > { %v1123_v41 = vpop.permute.xlu1 %1122 }
 0x788   : > { %v3055_v33 = vpop.eup %3054 }
 0x789   : > { %v1020_v34 = vsel %vm646_vm2, %v3055_v33, 0.0 }
 0x78a   : > { %1021 = vadd.xlane.f32.xlu0 %v1020_v34  ;;  %v3026_v34 = vld [vmem:[%s3660_s11 + $0x38] sm:$0xff]  }
 0x813   : > { %v1022_v35 = vpop.xlane.xlu0 %1021 }
 0x814   : > { %3056 = vrcp.f32 %v1022_v35  ;;  %v3027_v35 = vld [vmem:[%s3660_s11 + $0x30] sm:$0xff]  }
 0x821   : > { %v3057_v36 = vpop.eup %3056 }
 0x822   : > { %v1024_v37 = vmul.f32 %v3057_v36, %v3055_v33  ;;  %v3024_v33 = vld [vmem:[%s3658_s9 + $0x8] sm:$0xff]  }
 0x823   : > { %v3028_v36 = vld [vmem:[%s3660_s11 + $0x28] sm:$0xff]  }
 0x824   : > { %v1025_v39 = vpack.c.bf16 %v1024_v37, %v1024_v37  ;;  %v3029_v37 = vld [vmem:[%s3660_s11 + $0x20] sm:$0xff]  }
 0x826   : > { %2838 = vmatmul.mubr.msk.bf16.vlgmr.msra.gmra.mxu0 %vm646_vm2, %v1025_v39  ;;  %v3031_v39 = vld [vmem:[%s3660_s11 + $0x10] sm:$0xff]  }
 0x827   : > { %2848 = vmatpush3.bf16.xpose.msra.mxu0 %v1130_v40  ;;  %2849 = vmatprep.mubr.msk.bf16.mxu0 %vm3097_vm0, %v3096_v1 }
 0x828   : > { %2859 = vmatprep.subr.bf16.mxu0 %v3096_v1 }
 0x82e   : > { %2850 = vmatmul.mubr.msk.bf16.vlgmr.msra.gmra.mxu0 %vm646_vm2, %v1123_v41 }
 0x82f   : > { %2861 = vmatprep.mubr.msk.bf16.mxu0 %vm3097_vm0, %v3096_v1  ;;  %2860 = vmatpush3.bf16.msra.mxu0 %v1239_v5 }
 0x830   : > { %2873 = vmatprep.subr.bf16.mxu0 %v3096_v1 }
 0x8e6   : > { %v1068_v44 = vpop.f32.mrf.mxu0 }
 0x8e7   : > { %v1074_v45 = vpack.c.bf16 %v1068_v44, %v1068_v44  ;;  %v2616_v44 = vld [vmem:[%s3656_s7] ss:$0 sm:$0xff] }
 0x8e8   : > { %v2839_v46 = vpop.f32.mrf.mxu0 }
 0x8e9   : > { %2844 = vmatmul.mubr.msk.bf16.vlgmr.msra.gmra.mxu1 %vm646_vm2, %v1074_v45  ;;  %v2617_v46 = vld [vmem:[%s3657_s8] ss:$0 sm:$0xff] }
 0x8ea   : > { %v1071_v47 = vpop.f32.mrf.mxu0  ;;  %2855 = vmatprep.mubr.msk.bf16.mxu1 %vm3097_vm0, %v3096_v1 }
 0x8ec   : > { %v2840_v48 = vpop.f32.mrf.mxu0 }
 0x8ee   : > { %v1166_v49 = vpop.f32.mrf.mxu0 }
 0x8ef   : > { %v1172_v50 = vmul.f32 0.35355338, %v1166_v49 }
 0x8f0   : > { %v2851_v51 = vpop.f32.mrf.mxu0 }
 0x8f1   : > { %v1173_v52 = vadd.f32 %v1172_v50, %v3260_v18  ;;  %v3032_v50 = vld [vmem:[%s3660_s11 + $0x8] sm:$0xff]   ;;  %v3033_v51 = vld [vmem:[%s3660_s11] sm:$0xff]  }
 0x8f2   : > { %v1169_v53 = vpop.f32.mrf.mxu0 }
 0x8f3   : > { %v1174_v54 = vsel %vm646_vm2, %v1173_v52, -inf }
 0x8f4   : > { %1175 = vmax.xlane.f32.xlu1 %v1174_v54  ;;  %v2852_v55 = vpop.f32.mrf.mxu0 }
 0x97d   : > { %v1176_v56 = vpop.xlane.xlu1 %1175 }
 0x97e   : > { %v1177_v57 = vsub.f32 %v1173_v52, %v1176_v56  ;;  %v2618_v52 = vld [vmem:[%s3659_s10] ss:$0 sm:$0xff] }
 0x980   : > { %v1178_v58 = vmul.f32 1.442695, %v1177_v57 }
 0x982   : > { %3058 = vpow2.f32 %v1178_v58 }
 0x98f   : > { %v3059_v59 = vpop.eup %3058 }
 0x990   : > { %v1180_v60 = vsel %vm646_vm2, %v3059_v59, 0.0 }
 0x991   : > { %1181 = vadd.xlane.f32.xlu0 %v1180_v60  ;;  %v2622_v60 = vld [vmem:[%s3661_s12] ss:$0 sm:$0xff] }
 0x9a7   : > { %1186 = vrot.lane.b32.xlu0 %v3239_v9, %s3668_s29 }
 0x9a9   : > { %v1115_v62 = vpop.f32.mrf.mxu1 }
 0x9aa   : > { %v1121_v63 = vadd.f32 %v1115_v62, %v957_v61 }
 0x9ab   : > { %v2845_v0 = vpop.f32.mrf.mxu1 }
 0x9ad   : > { %v1118_v2 = vpop.f32.mrf.mxu1 }
 0x9af   : > { %v2846_v6 = vpop.f32.mrf.mxu1 }
 0xa1a   : > { %v1182_v7 = vpop.xlane.xlu0 %1181 }
 0xa1b   : > { %3060 = vrcp.f32 %v1182_v7 }
 0xa1e   : > { %v1187_v9 = vpop.permute.xlu0 %1186 }
 0xa1f   : > { %v1192_v8 = vsel %vm712_vm3, %v1187_v9, 0 }
 0xa20   : > { %2854 = vmatpush3.bf16.msra.mxu1 %v1192_v8 }
 0xa21   : > { %2865 = vmatprep.subr.bf16.mxu1 %v3096_v1 }
 0xa28   : > { %v3061_v10 = vpop.eup %3060 }
 0xa29   : > { %v1184_v11 = vmul.f32 %v3061_v10, %v3059_v59 }
 0xa2b   : > { %v1185_v12 = vpack.c.bf16 %v1184_v11, %v1184_v11  ;;  %v3034_v11 = vld [vmem:[%s3652_s3 + $0x18] sm:$0xff]  }
 0xa2d   : > { %2856 = vmatmul.mubr.msk.bf16.vlgmr.msra.gmra.mxu1 %vm646_vm2, %v1185_v12  ;;  %v3035_v12 = vld [vmem:[%s3652_s3 + $0x10] sm:$0xff]  }
 0xa2e   : > { %2869 = vmatprep.mubr.msk.bf16.mxu1 %vm3097_vm0, %v3096_v1  ;;  %2866 = vmatpush3.bf16.msra.mxu1 %v3024_v33 }
 0xa2f   : > { %2867 = vmatprep.subr.bf16.mxu1 %v3096_v1 }
 0xaed   : > { %v1228_v13 = vpop.f32.mrf.mxu1 }
 0xaee   : > { %v1234_v14 = vpack.c.bf16 %v1228_v13, %v1228_v13 }
 0xaef   : > { %v2857_v15 = vpop.f32.mrf.mxu1 }
 0xaf0   : > { %2862 = vmatmul.mubr.msk.bf16.vlgmr.msra.gmra.mxu0 %vm646_vm2, %v1234_v14 }
 0xaf1   : > { %v1231_v16 = vpop.f32.mrf.mxu1  ;;  %2889 = vmatprep.mubr.msk.bf16.mxu0 %vm3097_vm0, %v3096_v1  ;;  %2874 = vmatpush3.bf16.msra.mxu0 %v3026_v34 }
 0xaf2   : > { %2875 = vmatprep.subr.bf16.mxu0 %v3096_v1 }
 0xaf3   : > { %v2858_v17 = vpop.f32.mrf.mxu1 }
 0xaf4   : > { %v2631_v17 = vld [vmem:[%s3662_s13] ss:$0 sm:$0xff] }
 0xaf5   : > { %2876 = vmatpush3.bf16.msra.mxu0 %v3027_v35 }
 0xaf6   : > { %2877 = vmatprep.subr.bf16.mxu0 %v3096_v1 }
 0xaf9   : > { %2878 = vmatpush3.bf16.msra.mxu0 %v3028_v36 }
 0xafa   : > { %2879 = vmatprep.subr.bf16.mxu0 %v3096_v1 }
 0xafd   : > { %2880 = vmatpush3.bf16.msra.mxu0 %v3029_v37 }
 0xafe   : > { %2881 = vmatprep.subr.bf16.mxu0 %v3096_v1 }
 0xb01   : > { %2882 = vmatpush3.bf16.msra.mxu0 %v3030_v38 }
 0xb02   : > { %2883 = vmatprep.subr.bf16.mxu0 %v3096_v1 }
 0xb05   : > { %2884 = vmatpush3.bf16.msra.mxu0 %v3031_v39 }
 0xb06   : > { %2885 = vmatprep.subr.bf16.mxu0 %v3096_v1 }
 0xb09   : > { %2886 = vmatpush3.bf16.msra.mxu0 %v3032_v50 }
 0xb0a   : > { %2887 = vmatprep.subr.bf16.mxu0 %v3096_v1 }
 0xb0d   : > { %2888 = vmatpush3.bf16.msra.mxu0 %v3033_v51 }
 0xb0e   : > { %2919 = vmatprep.subr.bf16.mxu0 %v3096_v1 }
 0xbb0   : > { %v1275_v20 = vpop.f32.mrf.mxu0 }
 0xbb1   : > { %v1281_v21 = vadd.f32 %v1275_v20, %v1121_v63  ;;  %v2632_v20 = vld [vmem:[%s3663_s14] ss:$0 sm:$0xff] }
 0xbb2   : > { %v2863_v22 = vpop.f32.mrf.mxu0 }
 0xbb3   : > { %v1288_v23 = vadd.f32 %v2615_v19, %v1281_v21 }
 0xbb4   : > { %v1278_v24 = vpop.f32.mrf.mxu0 }
 0xbb5   : > { %v1289_v25 = vadd.f32 %v1288_v23, %v3229_v3  ;;  %v3025_v3 = vld [vmem:[%s3658_s9] sm:$0xff]  }
 0xbb6   : > { %v2864_v26 = vpop.f32.mrf.mxu0  ;;  %2868 = vmatpush3.bf16.msra.mxu1 %v3025_v3  ;;  %v2638_v24 = vld [vmem:[%s3653_s4 + $0x1] ss:$0 sm:$0xff] }
 0xbb7   : > { %v1292_v27 = vsel %vm593_vm1, %v1289_v25, 0.0  ;;  %2893 = vmatprep.subr.bf16.mxu1 %v3096_v1 }
 0xbb8   : > { %1293 = vadd.xlane.f32.xlu0 %v1292_v27 }
 0xc41   : > { %v1294_v28 = vpop.xlane.xlu0 %1293 }
 0xc42   : > { %v1296_v29 = vmul.f32 0.03125, %v1294_v28 }
 0xc44   : > { %v1297_v30 = vsub.f32 %v1289_v25, %v1296_v29 }
 0xc46   : > { %v1298_v31 = vmul.f32 %v1297_v30, %v1297_v30 }
 0xc48   : > { %v1299_v32 = vsel %vm593_vm1, %v1298_v31, 0.0 }
 0xc49   : > { %1300 = vadd.xlane.f32.xlu1 %v1299_v32 }
 0xcd2   : > { %v1301_v40 = vpop.xlane.xlu1 %1300 }
 0xcd3   : > { %v1302_v41 = vmul.f32 0.03125, %v1301_v40 }
 0xcd5   : > { %v1303_v42 = vadd.f32 1e-05, %v1302_v41 }
 0xcd7   : > { %3062 = vrsqrt.f32 %v1303_v42 }
 0xce4   : > { %v3063_v43 = vpop.eup %3062 }
 0xce5   : > { %v1305_v45 = vmul.f32 %v3063_v43, %v1297_v30 }
 0xce7   : > { %v1312_v47 = vmul.f32 %v2616_v44, %v1305_v45 }
 0xce9   : > { %v1319_v48 = vadd.f32 %v2617_v46, %v1312_v47 }
 0xceb   : > { %v1325_v49 = vpack.c.bf16 %v1319_v48, %v1319_v48 }
 0xced   : > { %2870 = vmatmul.mubr.msk.bf16.vlgmr.msra.gmra.mxu1 %vm593_vm1, %v1325_v49 }
 0xcee   : > { %2897 = vmatprep.mubr.msk.bf16.mxu1 %vm3097_vm0, %v3096_v1  ;;  %2894 = vmatpush3.bf16.msra.mxu1 %v3034_v11 }
 0xcef   : > { %2895 = vmatprep.subr.bf16.mxu1 %v3096_v1 }
 0xcf2   : > { %2896 = vmatpush3.bf16.msra.mxu1 %v3035_v12 }
 0xcf3   : > { %2901 = vmatprep.subr.bf16.mxu1 %v3096_v1 }
 0xdad   : > { %v1381_v53 = vpop.f32.mrf.mxu1 }
 0xdae   : > { %v1382_v54 = vadd.f32 %v2618_v52, %v1381_v53 }
 0xdaf   : > { %v2871_v55 = vpop.f32.mrf.mxu1 }
 0xdb0   : > { %v1387_v56 = vmax.f32 %v1382_v54, 0.0 }
 0xdb1   : > { %v1384_v57 = vpop.f32.mrf.mxu1 }
 0xdb2   : > { %v1405_v58 = vpack.c.bf16 %v1387_v56, %v1387_v56 }
 0xdb3   : > { %v2872_v59 = vpop.f32.mrf.mxu1 }
 0xdb4   : > { %2890 = vmatmul.mubr.bf16.vlgmr.msra.gmra.mxu0 %v1405_v58 }
 0xdb5   : > { %2921 = vmatprep.mubr.msk.bf16.mxu0 %vm3097_vm0, %v3096_v1 }
 0xe74   : > { %v1494_v61 = vpop.f32.mrf.mxu0 }
 0xe75   : > { %v1495_v62 = vadd.f32 %v2622_v60, %v1494_v61 }
 0xe76   : > { %v2891_v63 = vpop.f32.mrf.mxu0 }
 0xe77   : > { %v1500_v0 = vadd.f32 %v1495_v62, %v1319_v48 }
 0xe78   : > { %v1497_v2 = vpop.f32.mrf.mxu0 }
 0xe79   : > { %v1503_v4 = vsel %vm593_vm1, %v1500_v0, 0.0 }
 0xe7a   : > { %1504 = vadd.xlane.f32.xlu1 %v1503_v4  ;;  %v2892_v5 = vpop.f32.mrf.mxu0 }
 0xf03   : > { %v1505_v6 = vpop.xlane.xlu1 %1504 }
 0xf04   : > { %v1506_v7 = vmul.f32 0.03125, %v1505_v6 }
 0xf06   : > { %v1507_v9 = vsub.f32 %v1500_v0, %v1506_v7  ;;  %v2643_v7 = vld [vmem:[%s3654_s5 + $0x14] sm:$0xf] }
 0xf08   : > { %v1508_v8 = vmul.f32 %v1507_v9, %v1507_v9 }
 0xf0a   : > { %v1509_v10 = vsel %vm593_vm1, %v1508_v8, 0.0 }
 0xf0b   : > { %1510 = vadd.xlane.f32.xlu1 %v1509_v10 }
 0xf94   : > { %v1511_v13 = vpop.xlane.xlu1 %1510 }
 0xf95   : > { %v1512_v14 = vmul.f32 0.03125, %v1511_v13  ;;  %v2642_v13 = vld [vmem:[%s3654_s5 + $0x10] sm:$0xf] }
 0xf97   : > { %v1513_v15 = vadd.f32 1e-05, %v1512_v14 }
 0xf99   : > { %3064 = vrsqrt.f32 %v1513_v15 }
 0xfa6   : > { %v3065_v16 = vpop.eup %3064 }
 0xfa7   : > { %v1515_v19 = vmul.f32 %v3065_v16, %v1507_v9  ;;  %v1836_v9 = vsel %vm712_vm3, %v2643_v7, 0  ;;  %v1882_v16 = vsel %vm712_vm3, %v2642_v13, 0 }
 0xfa9   : > { %v1522_v21 = vmul.f32 %v2631_v17, %v1515_v19 }
 0xfab   : > { %v3442_v22 = vadd.f32 %v2632_v20, %v1522_v21 }
 0xfad   : > { %v1537_v23 = vpack.c.bf16 %v3442_v22, %v3442_v22 }
 0xfaf   : > { %2898 = vmatmul.mubr.msk.bf16.vlgmr.msra.gmra.mxu1 %vm593_vm1, %v1537_v23 }
 0xfb0   : > { %2903 = vmatprep.mubr.msk.bf16.mxu1 %vm3097_vm0, %v3096_v1 }
0x106f   : > { %v1593_v25 = vpop.f32.mrf.mxu1 }
0x1070   : > { %v1594_v26 = vadd.f32 %v2638_v24, %v1593_v25 }
0x1071   : > { %v2899_v27 = vpop.f32.mrf.mxu1 }
0x1072   : > { %v3452_v28 = vpack.c.bf16 %v1594_v26, %v1594_v26 }
0x1073   : > { %v1596_v29 = vpop.f32.mrf.mxu1 }
0x1074   : > { %1608 = vrot.lane.b32.xlu1 %v3452_v28, %s3099_s23  ;;  %s3679_s23 = smov 112  }
0x1075   : > { %v2900_v30 = vpop.f32.mrf.mxu1 }
0x10e6   : > { %v1609_v31 = vpop.permute.xlu1 %1608 }
0x10e7   : > { %v1614_v32 = vsel %vm646_vm2, %v1609_v31, 0 }
0x10e8   : > { %2902 = vmatpush3.bf16.xpose.msra.mxu1 %v1614_v32 }
0x10e9   : > { %2907 = vmatprep.subr.bf16.mxu1 %v3096_v1 }
0x10ef   : > { %2904 = vmatmul.mubr.msk.bf16.vlgmr.msra.gmra.mxu1 %vm646_vm2, %v3452_v28 }
0x10f0   : > { %2909 = vmatprep.mubr.msk.bf16.mxu1 %vm3097_vm0, %v3096_v1 }
0x11af   : > { %v1650_v33 = vpop.f32.mrf.mxu1 }
0x11b0   : > { %v1656_v3 = vmul.f32 0.35355338, %v1650_v33 }
0x11b1   : > { %v2905_v34 = vpop.f32.mrf.mxu1 }
0x11b2   : > { %v1657_v35 = vadd.f32 %v1656_v3, %v3260_v18 }
0x11b3   : > { %v1653_v36 = vpop.f32.mrf.mxu1 }
0x11b4   : > { %v1658_v37 = vsel %vm646_vm2, %v1657_v35, -inf }
0x11b5   : > { %1659 = vmax.xlane.f32.xlu0 %v1658_v37  ;;  %v2906_v38 = vpop.f32.mrf.mxu1 }
0x11cb   : > { %1670 = vrot.lane.b32.xlu0 %v3452_v28, %s3098_s22  ;;  %s3678_s22 = smov 80  }
0x11cf   : > { %1721 = vrot.lane.b32.xlu0 %v3452_v28, %s3100_s19 }
0x11d3   : > { %1719 = vrot.lane.b32.xlu0 %v3452_v28, %s3101_s1 }
0x123e   : > { %v1660_v39 = vpop.xlane.xlu0 %1659 }
0x123f   : > { %v1661_v40 = vsub.f32 %v1657_v35, %v1660_v39 }
0x1241   : > { %v1662_v41 = vmul.f32 1.442695, %v1661_v40 }
0x1242   : > { %v1671_v42 = vpop.permute.xlu0 %1670 }
0x1243   : > { %3066 = vpow2.f32 %v1662_v41  ;;  %v1676_v43 = vsel %vm712_vm3, %v1671_v42, 0 }
0x1244   : > { %2908 = vmatpush3.bf16.msra.mxu1 %v1676_v43 }
0x1245   : > { %2913 = vmatprep.subr.bf16.mxu1 %v3096_v1 }
0x1246   : > { %v1722_v49 = vpop.permute.xlu0 %1721 }
0x1247   : > { %v1727_v51 = vsel %vm646_vm2, %v1722_v49, 0 }
0x124a   : > { %v1720_v52 = vpop.permute.xlu0 %1719 }
0x1250   : > { %v3067_v44 = vpop.eup %3066 }
0x1251   : > { %v1664_v45 = vsel %vm646_vm2, %v3067_v44, 0.0 }
0x1252   : > { %1665 = vadd.xlane.f32.xlu1 %v1664_v45 }
0x12db   : > { %v1666_v46 = vpop.xlane.xlu1 %1665 }
0x12dc   : > { %3068 = vrcp.f32 %v1666_v46 }
0x12e9   : > { %v3069_v47 = vpop.eup %3068 }
0x12ea   : > { %v1668_v48 = vmul.f32 %v3069_v47, %v3067_v44 }
0x12ec   : > { %v1669_v50 = vpack.c.bf16 %v1668_v48, %v1668_v48 }
0x12ee   : > { %2910 = vmatmul.mubr.msk.bf16.vlgmr.msra.gmra.mxu1 %vm646_vm2, %v1669_v50 }
0x12ef   : > { %2914 = vmatpush3.bf16.xpose.msra.mxu1 %v1727_v51  ;;  %2915 = vmatprep.mubr.msk.bf16.mxu1 %vm3097_vm0, %v3096_v1 }
0x12f0   : > { %2925 = vmatprep.subr.bf16.mxu1 %v3096_v1 }
0x12f6   : > { %2916 = vmatmul.mubr.msk.bf16.vlgmr.msra.gmra.mxu1 %vm646_vm2, %v1720_v52 }
0x12f7   : > { %2927 = vmatprep.mubr.msk.bf16.mxu1 %vm3097_vm0, %v3096_v1  ;;  %2926 = vmatpush3.bf16.msra.mxu1 %v1836_v9 }
0x12f8   : > { %2937 = vmatprep.subr.bf16.mxu1 %v3096_v1 }
0x13ae   : > { %v1712_v53 = vpop.f32.mrf.mxu1 }
0x13af   : > { %v1718_v17 = vpack.c.bf16 %v1712_v53, %v1712_v53 }
0x13b0   : > { %v2911_v54 = vpop.f32.mrf.mxu1 }
0x13b2   : > { %v1715_v55 = vpop.f32.mrf.mxu1 }
0x13b4   : > { %v2912_v56 = vpop.f32.mrf.mxu1 }
0x13b6   : > { %v1763_v57 = vpop.f32.mrf.mxu1 }
0x13b7   : > { %v1769_v58 = vmul.f32 0.35355338, %v1763_v57  ;;  %v2644_v57 = vld [vmem:[%s3654_s5 + $0x18] sm:$0xf] }
0x13b8   : > { %v2917_v59 = vpop.f32.mrf.mxu1 }
0x13b9   : > { %v1770_v60 = vadd.f32 %v1769_v58, %v3260_v18  ;;  %v2041_v58 = vsel %vm712_vm3, %v2644_v57, 0 }
0x13ba   : > { %v1766_v61 = vpop.f32.mrf.mxu1 }
0x13bb   : > { %v1771_v62 = vsel %vm646_vm2, %v1770_v60, -inf }
0x13bc   : > { %1772 = vmax.xlane.f32.xlu0 %v1771_v62  ;;  %v2918_v63 = vpop.f32.mrf.mxu1 }
0x1445   : > { %v1773_v0 = vpop.xlane.xlu0 %1772 }
0x1446   : > { %v1774_v2 = vsub.f32 %v1770_v60, %v1773_v0 }
0x1448   : > { %v1775_v4 = vmul.f32 1.442695, %v1774_v2 }
0x144a   : > { %3070 = vpow2.f32 %v1775_v4 }
0x1457   : > { %v3071_v5 = vpop.eup %3070 }
0x1458   : > { %v1777_v6 = vsel %vm646_vm2, %v3071_v5, 0.0 }
0x1459   : > { %1778 = vadd.xlane.f32.xlu1 %v1777_v6 }
0x146a   : > { %1783 = vrot.lane.b32.xlu1 %v3452_v28, %s3102_s20 }
0x146e   : > { %1926 = vrot.lane.b32.xlu1 %v3452_v28, %s3678_s22  ;;  %s3684_s22 = sshll.u32 %s3686_s25, 3 }
0x146f   : > { %s557_s1 = scalar_lea.vmem %s3666_s17, %s3684_s22 }
0x1472   : > { %1924 = vrot.lane.b32.xlu1 %v3452_v28, %s3679_s23 }
0x14e2   : > { %v1779_v8 = vpop.xlane.xlu1 %1778 }
0x14e3   : > { %3072 = vrcp.f32 %v1779_v8 }
0x14e6   : > { %v1784_v10 = vpop.permute.xlu1 %1783 }
0x14e7   : > { %v1789_v11 = vsel %vm712_vm3, %v1784_v10, 0 }
0x14e8   : > { %2920 = vmatpush3.bf16.msra.mxu0 %v1789_v11 }
0x14e9   : > { %2931 = vmatprep.subr.bf16.mxu0 %v3096_v1 }
0x14ea   : > { %v1927_v19 = vpop.permute.xlu1 %1926 }
0x14eb   : > { %v1932_v24 = vsel %vm646_vm2, %v1927_v19, 0  ;;  %v2645_v19 = vld [vmem:[%s3654_s5 + $0x1c] sm:$0xf] }
0x14ee   : > { %v1925_v29 = vpop.permute.xlu1 %1924 }
0x14f0   : > { %v3073_v12 = vpop.eup %3072 }
0x14f1   : > { %v1781_v14 = vmul.f32 %v3073_v12, %v3071_v5 }
0x14f3   : > { %v1782_v15 = vpack.c.bf16 %v1781_v14, %v1781_v14 }
0x14f5   : > { %2922 = vmatmul.mubr.msk.bf16.vlgmr.msra.gmra.mxu0 %vm646_vm2, %v1782_v15 }
0x14f6   : > { %2932 = vmatpush3.bf16.msra.mxu0 %v1882_v16  ;;  %2933 = vmatprep.mubr.msk.bf16.mxu0 %vm3097_vm0, %v3096_v1 }
0x14f7   : > { %2943 = vmatprep.subr.bf16.mxu0 %v3096_v1 }
0x14fd   : > { %2934 = vmatmul.mubr.msk.bf16.vlgmr.msra.gmra.mxu0 %vm646_vm2, %v1718_v17 }
0x14fe   : > { %2945 = vmatprep.mubr.msk.bf16.mxu0 %vm3097_vm0, %v3096_v1 }
0x15b5   : > { %v1825_v20 = vpop.f32.mrf.mxu0 }
0x15b6   : > { %v1831_v21 = vpack.c.bf16 %v1825_v20, %v1825_v20  ;;  %v2201_v20 = vsel %vm712_vm3, %v2645_v19, 0 }
0x15b7   : > { %v2923_v23 = vpop.f32.mrf.mxu0 }
0x15b8   : > { %2928 = vmatmul.mubr.msk.bf16.vlgmr.msra.gmra.mxu1 %vm646_vm2, %v1831_v21 }
0x15b9   : > { %2938 = vmatpush3.bf16.xpose.msra.mxu1 %v1932_v24  ;;  %v1828_v25 = vpop.f32.mrf.mxu0  ;;  %2939 = vmatprep.mubr.msk.bf16.mxu1 %vm3097_vm0, %v3096_v1 }
0x15ba   : > { %2949 = vmatprep.subr.bf16.mxu1 %v3096_v1 }
0x15bb   : > { %v2924_v26 = vpop.f32.mrf.mxu0 }
0x15bd   : > { %v3513_v27 = vpop.f32.mrf.mxu0 }
0x15bf   : > { %v2935_v30 = vpop.f32.mrf.mxu0 }
0x15c0   : > { %2940 = vmatmul.mubr.msk.bf16.vlgmr.msra.gmra.mxu1 %vm646_vm2, %v1925_v29 }
0x15c1   : > { %v1921_v31 = vpop.f32.mrf.mxu0  ;;  %2951 = vmatprep.mubr.msk.bf16.mxu1 %vm3097_vm0, %v3096_v1  ;;  %2950 = vmatpush3.bf16.msra.mxu1 %v2041_v58  ;;  %v2662_v58 = vld [vmem:[%s3656_s7 + $0x1] ss:$0 sm:$0xff] }
0x15c2   : > { %2961 = vmatprep.subr.bf16.mxu1 %v3096_v1 }
0x15c3   : > { %v2936_v32 = vpop.f32.mrf.mxu0 }
0x1678   : > { %v3518_v33 = vpop.f32.mrf.mxu1 }
0x1679   : > { %v1919_v14 = vadd.f32 %v3513_v27, %v3518_v33 }
0x167a   : > { %v2929_v3 = vpop.f32.mrf.mxu1 }
0x167b   : > { %v2659_v3 = vld [vmem:[%s3655_s6 + $0x1] ss:$0 sm:$0xff] }
0x167c   : > { %v1875_v34 = vpop.f32.mrf.mxu1 }
0x167e   : > { %v2930_v35 = vpop.f32.mrf.mxu1 }
0x1680   : > { %v1968_v36 = vpop.f32.mrf.mxu1 }
0x1681   : > { %v1974_v37 = vmul.f32 0.35355338, %v1968_v36 }
0x1682   : > { %v2941_v38 = vpop.f32.mrf.mxu1 }
0x1683   : > { %v1975_v39 = vadd.f32 %v1974_v37, %v3260_v18 }
0x1684   : > { %v1971_v40 = vpop.f32.mrf.mxu1 }
0x1685   : > { %v1976_v41 = vsel %vm646_vm2, %v1975_v39, -inf }
0x1686   : > { %1977 = vmax.xlane.f32.xlu0 %v1976_v41  ;;  %v2942_v42 = vpop.f32.mrf.mxu1 }
0x169c   : > { %1988 = vrot.lane.b32.xlu0 %v3452_v28, %s3680_s27 }
0x16a0   : > { %2086 = vrot.lane.b32.xlu0 %v3452_v28, %s3681_s0 }
0x16a4   : > { %2084 = vrot.lane.b32.xlu0 %v3452_v28, %s3682_s28 }
0x170f   : > { %v1978_v43 = vpop.xlane.xlu0 %1977 }
0x1710   : > { %v1979_v44 = vsub.f32 %v1975_v39, %v1978_v43 }
0x1712   : > { %v1980_v45 = vmul.f32 1.442695, %v1979_v44 }
0x1713   : > { %v1989_v46 = vpop.permute.xlu0 %1988 }
0x1714   : > { %3074 = vpow2.f32 %v1980_v45  ;;  %v1994_v47 = vsel %vm712_vm3, %v1989_v46, 0 }
0x1715   : > { %2944 = vmatpush3.bf16.msra.mxu0 %v1994_v47  ;;  %v3036_v47 = vld [vmem:[%s3658_s9 + $0x18] sm:$0xff]  }
0x1716   : > { %2955 = vmatprep.subr.bf16.mxu0 %v3096_v1 }
0x1717   : > { %v2087_v53 = vpop.permute.xlu0 %2086 }
0x1718   : > { %v2092_v55 = vsel %vm646_vm2, %v2087_v53, 0  ;;  %v3043_v53 = vld [vmem:[%s3660_s11 + $0x50] sm:$0xff]  }
0x171b   : > { %v2085_v56 = vpop.permute.xlu0 %2084 }
0x1721   : > { %v3075_v48 = vpop.eup %3074 }
0x1722   : > { %v1982_v49 = vsel %vm646_vm2, %v3075_v48, 0.0 }
0x1723   : > { %1983 = vadd.xlane.f32.xlu1 %v1982_v49  ;;  %v3039_v49 = vld [vmem:[%s3660_s11 + $0x70] sm:$0xff]  }
0x17ac   : > { %v1984_v50 = vpop.xlane.xlu1 %1983 }
0x17ad   : > { %3076 = vrcp.f32 %v1984_v50  ;;  %v3040_v50 = vld [vmem:[%s3660_s11 + $0x68] sm:$0xff]  }
0x17ba   : > { %v3077_v51 = vpop.eup %3076 }
0x17bb   : > { %v1986_v52 = vmul.f32 %v3077_v51, %v3075_v48  ;;  %v3038_v48 = vld [vmem:[%s3660_s11 + $0x78] sm:$0xff]   ;;  %v3041_v51 = vld [vmem:[%s3660_s11 + $0x60] sm:$0xff]  }
0x17bd   : > { %v1987_v54 = vpack.c.bf16 %v1986_v52, %v1986_v52  ;;  %v3042_v52 = vld [vmem:[%s3660_s11 + $0x58] sm:$0xff]  }
0x17bf   : > { %2946 = vmatmul.mubr.msk.bf16.vlgmr.msra.gmra.mxu0 %vm646_vm2, %v1987_v54 }
0x17c0   : > { %2956 = vmatpush3.bf16.xpose.msra.mxu0 %v2092_v55  ;;  %2957 = vmatprep.mubr.msk.bf16.mxu0 %vm3097_vm0, %v3096_v1 }
0x17c1   : > { %2967 = vmatprep.subr.bf16.mxu0 %v3096_v1 }
0x17c7   : > { %2958 = vmatmul.mubr.msk.bf16.vlgmr.msra.gmra.mxu0 %vm646_vm2, %v2085_v56 }
0x17c8   : > { %2969 = vmatprep.mubr.msk.bf16.mxu0 %vm3097_vm0, %v3096_v1  ;;  %2968 = vmatpush3.bf16.msra.mxu0 %v2201_v20 }
0x17c9   : > { %2981 = vmatprep.subr.bf16.mxu0 %v3096_v1 }
0x187f   : > { %v2030_v59 = vpop.f32.mrf.mxu0 }
0x1880   : > { %v2036_v60 = vpack.c.bf16 %v2030_v59, %v2030_v59 }
0x1881   : > { %v2947_v61 = vpop.f32.mrf.mxu0 }
0x1882   : > { %2952 = vmatmul.mubr.msk.bf16.vlgmr.msra.gmra.mxu1 %vm646_vm2, %v2036_v60  ;;  %v2663_v60 = vld [vmem:[%s3657_s8 + $0x1] ss:$0 sm:$0xff] }
0x1883   : > { %v2033_v62 = vpop.f32.mrf.mxu0  ;;  %2963 = vmatprep.mubr.msk.bf16.mxu1 %vm3097_vm0, %v3096_v1 }
0x1885   : > { %v2948_v63 = vpop.f32.mrf.mxu0 }
0x1887   : > { %v2128_v0 = vpop.f32.mrf.mxu0 }
0x1888   : > { %v2134_v2 = vmul.f32 0.35355338, %v2128_v0  ;;  %v3044_v0 = vld [vmem:[%s3660_s11 + $0x48] sm:$0xff]  }
0x1889   : > { %v2959_v4 = vpop.f32.mrf.mxu0 }
0x188a   : > { %v2135_v5 = vadd.f32 %v2134_v2, %v3260_v18  ;;  %v3045_v2 = vld [vmem:[%s3660_s11 + $0x40] sm:$0xff]  }
0x188b   : > { %v2131_v6 = vpop.f32.mrf.mxu0  ;;  %v2669_v4 = vld [vmem:[%s3659_s10 + $0x1] ss:$0 sm:$0xff] }
0x188c   : > { %v2136_v7 = vsel %vm646_vm2, %v2135_v5, -inf }
0x188d   : > { %2137 = vmax.xlane.f32.xlu0 %v2136_v7  ;;  %v2960_v9 = vpop.f32.mrf.mxu0 }
0x1916   : > { %v2138_v8 = vpop.xlane.xlu0 %2137 }
0x1917   : > { %v2139_v10 = vsub.f32 %v2135_v5, %v2138_v8 }
0x1919   : > { %v2140_v11 = vmul.f32 1.442695, %v2139_v10 }
0x191b   : > { %3078 = vpow2.f32 %v2140_v11 }
0x1928   : > { %v3079_v12 = vpop.eup %3078 }
0x1929   : > { %v2142_v13 = vsel %vm646_vm2, %v3079_v12, 0.0 }
0x192a   : > { %2143 = vadd.xlane.f32.xlu1 %v2142_v13 }
0x193b   : > { %2148 = vrot.lane.b32.xlu1 %v3452_v28, %s3683_s18 }
0x1942   : > { %v2077_v18 = vpop.f32.mrf.mxu1 }
0x1943   : > { %v2083_v15 = vadd.f32 %v2077_v18, %v1919_v14 }
0x1944   : > { %v2953_v16 = vpop.f32.mrf.mxu1 }
0x1946   : > { %v2080_v17 = vpop.f32.mrf.mxu1 }
0x1948   : > { %v2954_v21 = vpop.f32.mrf.mxu1 }
0x19b3   : > { %v2144_v23 = vpop.xlane.xlu1 %2143 }
0x19b4   : > { %3080 = vrcp.f32 %v2144_v23 }
0x19b7   : > { %v2149_v28 = vpop.permute.xlu1 %2148 }
0x19b8   : > { %v2154_v24 = vsel %vm712_vm3, %v2149_v28, 0 }
0x19b9   : > { %2962 = vmatpush3.bf16.msra.mxu1 %v2154_v24 }
0x19ba   : > { %2973 = vmatprep.subr.bf16.mxu1 %v3096_v1 }
0x19c1   : > { %v3081_v25 = vpop.eup %3080 }
0x19c2   : > { %v2146_v26 = vmul.f32 %v3081_v25, %v3079_v12 }
0x19c4   : > { %v2147_v27 = vpack.c.bf16 %v2146_v26, %v2146_v26 }
0x19c6   : > { %2964 = vmatmul.mubr.msk.bf16.vlgmr.msra.gmra.mxu1 %vm646_vm2, %v2147_v27 }
0x19c7   : > { %2977 = vmatprep.mubr.msk.bf16.mxu1 %vm3097_vm0, %v3096_v1  ;;  %2974 = vmatpush3.bf16.msra.mxu1 %v3036_v47 }
0x19c8   : > { %2975 = vmatprep.subr.bf16.mxu1 %v3096_v1 }
0x1a86   : > { %v2190_v29 = vpop.f32.mrf.mxu1 }
0x1a87   : > { %v2196_v30 = vpack.c.bf16 %v2190_v29, %v2190_v29  ;;  %v2701_v29 = vld [vmem:[%s3662_s13 + $0x1] ss:$0 sm:$0xff] }
0x1a88   : > { %v2965_v31 = vpop.f32.mrf.mxu1 }
0x1a89   : > { %2970 = vmatmul.mubr.msk.bf16.vlgmr.msra.gmra.mxu0 %vm646_vm2, %v2196_v30  ;;  %v2702_v31 = vld [vmem:[%s3663_s14 + $0x1] ss:$0 sm:$0xff] }
0x1a8a   : > { %v2193_v32 = vpop.f32.mrf.mxu1  ;;  %2997 = vmatprep.mubr.msk.bf16.mxu0 %vm3097_vm0, %v3096_v1  ;;  %2982 = vmatpush3.bf16.msra.mxu0 %v3038_v48 }
0x1a8b   : > { %2983 = vmatprep.subr.bf16.mxu0 %v3096_v1 }
0x1a8c   : > { %v2966_v33 = vpop.f32.mrf.mxu1 }
0x1a8e   : > { %2984 = vmatpush3.bf16.msra.mxu0 %v3039_v49 }
0x1a8f   : > { %2985 = vmatprep.subr.bf16.mxu0 %v3096_v1 }
0x1a92   : > { %2986 = vmatpush3.bf16.msra.mxu0 %v3040_v50 }
0x1a93   : > { %2987 = vmatprep.subr.bf16.mxu0 %v3096_v1 }
0x1a96   : > { %2988 = vmatpush3.bf16.msra.mxu0 %v3041_v51 }
0x1a97   : > { %2989 = vmatprep.subr.bf16.mxu0 %v3096_v1 }
0x1a9a   : > { %2990 = vmatpush3.bf16.msra.mxu0 %v3042_v52 }
0x1a9b   : > { %2991 = vmatprep.subr.bf16.mxu0 %v3096_v1 }
0x1a9e   : > { %2992 = vmatpush3.bf16.msra.mxu0 %v3043_v53 }
0x1a9f   : > { %2993 = vmatprep.subr.bf16.mxu0 %v3096_v1 }
0x1aa2   : > { %2994 = vmatpush3.bf16.msra.mxu0 %v3044_v0 }
0x1aa3   : > { %2995 = vmatprep.subr.bf16.mxu0 %v3096_v1  ;;  %v2690_v1 = vld [vmem:[%s3661_s12 + $0x1] ss:$0 sm:$0xff] }
0x1aa6   : > { %2996 = vmatpush3.bf16.msra.mxu0 %v3045_v2 }
0x1b49   : > { %v2237_v34 = vpop.f32.mrf.mxu0 }
0x1b4a   : > { %v2243_v35 = vadd.f32 %v2237_v34, %v2083_v15 }
0x1b4b   : > { %v2971_v36 = vpop.f32.mrf.mxu0 }
0x1b4c   : > { %v2250_v37 = vadd.f32 %v2659_v3, %v2243_v35 }
0x1b4d   : > { %v2240_v38 = vpop.f32.mrf.mxu0 }
0x1b4e   : > { %v2251_v39 = vadd.f32 %v2250_v37, %v3442_v22  ;;  %v3037_v22 = vld [vmem:[%s3658_s9 + $0x10] sm:$0xff]  }
0x1b4f   : > { %v2972_v40 = vpop.f32.mrf.mxu0  ;;  %2976 = vmatpush3.bf16.msra.mxu1 %v3037_v22 }
0x1b50   : > { %v2256_v41 = vsel %vm593_vm1, %v2251_v39, 0.0 }
0x1b51   : > { %2257 = vadd.xlane.f32.xlu1 %v2256_v41 }
0x1bda   : > { %v2258_v42 = vpop.xlane.xlu1 %2257 }
0x1bdb   : > { %v2259_v43 = vmul.f32 0.03125, %v2258_v42 }
0x1bdd   : > { %v2260_v44 = vsub.f32 %v2251_v39, %v2259_v43  ;;  %v2703_v43 = vld [vmem:[%s3664_s15] ss:$0 sm:$0xff] }
0x1bdf   : > { %v2261_v45 = vmul.f32 %v2260_v44, %v2260_v44 }
0x1be1   : > { %v2262_v46 = vsel %vm593_vm1, %v2261_v45, 0.0  ;;  %v2704_v45 = vld [vmem:[%s3665_s16] ss:$0 sm:$0xff] }
0x1be2   : > { %2263 = vadd.xlane.f32.xlu0 %v2262_v46 }
0x1c6b   : > { %v2264_v54 = vpop.xlane.xlu0 %2263 }
0x1c6c   : > { %v2265_v55 = vmul.f32 0.03125, %v2264_v54 }
0x1c6e   : > { %v2266_v56 = vadd.f32 1e-05, %v2265_v55 }
0x1c70   : > { %3082 = vrsqrt.f32 %v2266_v56 }
0x1c7d   : > { %v3083_v57 = vpop.eup %3082 }
0x1c7e   : > { %v2268_v59 = vmul.f32 %v3083_v57, %v2260_v44 }
0x1c80   : > { %v2275_v61 = vmul.f32 %v2662_v58, %v2268_v59 }
0x1c82   : > { %v2282_v62 = vadd.f32 %v2663_v60, %v2275_v61 }
0x1c84   : > { %v2290_v63 = vpack.c.bf16 %v2282_v62, %v2282_v62 }
0x1c86   : > { %2978 = vmatmul.mubr.msk.bf16.vlgmr.msra.gmra.mxu1 %vm593_vm1, %v2290_v63 }
0x1d46   : > { %v2346_v5 = vpop.f32.mrf.mxu1 }
0x1d47   : > { %v2347_v6 = vadd.f32 %v2669_v4, %v2346_v5 }
0x1d48   : > { %v2979_v7 = vpop.f32.mrf.mxu1 }
0x1d49   : > { %v2352_v9 = vmax.f32 %v2347_v6, 0.0 }
0x1d4a   : > { %v2349_v8 = vpop.f32.mrf.mxu1 }
0x1d4b   : > { %v2372_v10 = vpack.c.bf16 %v2352_v9, %v2352_v9 }
0x1d4c   : > { %v2980_v11 = vpop.f32.mrf.mxu1 }
0x1d4d   : > { %2998 = vmatmul.mubr.bf16.vlgmr.msra.gmra.mxu0 %v2372_v10 }
0x1e0d   : > { %v2461_v12 = vpop.f32.mrf.mxu0 }
0x1e0e   : > { %v2462_v13 = vadd.f32 %v2690_v1, %v2461_v12 }
0x1e0f   : > { %v2999_v14 = vpop.f32.mrf.mxu0 }
0x1e10   : > { %v2467_v18 = vadd.f32 %v2462_v13, %v2282_v62 }
0x1e11   : > { %v2464_v15 = vpop.f32.mrf.mxu0 }
0x1e12   : > { %v2472_v16 = vsel %vm593_vm1, %v2467_v18, 0.0 }
0x1e13   : > { %2473 = vadd.xlane.f32.xlu0 %v2472_v16  ;;  %v3000_v17 = vpop.f32.mrf.mxu0 }
0x1e9c   : > { %v2474_v19 = vpop.xlane.xlu0 %2473 }
0x1e9d   : > { %v2475_v20 = vmul.f32 0.03125, %v2474_v19 }
0x1e9f   : > { %v2476_v21 = vsub.f32 %v2467_v18, %v2475_v20 }
0x1ea1   : > { %v2477_v23 = vmul.f32 %v2476_v21, %v2476_v21 }
0x1ea3   : > { %v2478_v28 = vsel %vm593_vm1, %v2477_v23, 0.0 }
0x1ea4   : > { %2479 = vadd.xlane.f32.xlu0 %v2478_v28 }
0x1f2d   : > { %v2480_v24 = vpop.xlane.xlu0 %2479 }
0x1f2e   : > { %v2481_v25 = vmul.f32 0.03125, %v2480_v24 }
0x1f30   : > { %v2482_v26 = vadd.f32 1e-05, %v2481_v25 }
0x1f32   : > { %3084 = vrsqrt.f32 %v2482_v26 }
0x1f3f   : > { %v3085_v27 = vpop.eup %3084 }
0x1f40   : > { %v2484_v30 = vmul.f32 %v3085_v27, %v2476_v21 }
0x1f42   : > { %v2491_v32 = vmul.f32 %v2701_v29, %v2484_v30 }
0x1f44   : > { %v2498_v33 = vadd.f32 %v2702_v31, %v2491_v32 }
0x1f46   : > { %v2501_v3 = vsel %vm593_vm1, %v2498_v33, 0.0 }
0x1f47   : > { %2502 = vadd.xlane.f32.xlu0 %v2501_v3 }
0x1fd0   : > { %v2503_v34 = vpop.xlane.xlu0 %2502 }
0x1fd1   : > { %v2504_v35 = vmul.f32 0.03125, %v2503_v34 }
0x1fd3   : > { %v2505_v36 = vsub.f32 %v2498_v33, %v2504_v35 }
0x1fd5   : > { %v2506_v37 = vmul.f32 %v2505_v36, %v2505_v36 }
0x1fd7   : > { %v2507_v38 = vsel %vm593_vm1, %v2506_v37, 0.0 }
0x1fd8   : > { %2508 = vadd.xlane.f32.xlu0 %v2507_v38 }
0x2061   : > { %v2509_v39 = vpop.xlane.xlu0 %2508 }
0x2062   : > { %v2510_v40 = vmul.f32 0.03125, %v2509_v39 }
0x2064   : > { %v2511_v41 = vadd.f32 1e-05, %v2510_v40 }
0x2066   : > { %3086 = vrsqrt.f32 %v2511_v41 }
0x2073   : > { %v3087_v42 = vpop.eup %3086 }
0x2074   : > { %v2513_v44 = vmul.f32 %v3087_v42, %v2505_v36 }
0x2076   : > { %v2520_v46 = vmul.f32 %v2703_v43, %v2513_v44 }
0x2078   : > { %v2527_v47 = vadd.f32 %v2704_v45, %v2520_v46 }
0x207a   : > { %2528 = vst.msk [vmem:[%s557_s1] sm:$0xff] %vm593_vm1, %v2527_v47 }
0x207b PF: > { %s27_s24 = sadd.s32 1, %s3094_s24  }
0x207c   : > { %p24_p4 = scmp.ge.s32.totalorder %s27_s24, 4  }
0x207e   :  { %26 = sbr.rel (!%p24_p4) target bundleno = 3 (0x3), region = 133 }

// kernel: seq2seq_transformer_forward.3
= control target key start
LH: loop header
LB: loop body
LE: loop exit
PB: predicated region body
PF: predicated region fallthrough
CT: control target
= control target key end

     0   :  { %s5736_s6 = smov 1   ;;  %s5737_s10 = smov 2   ;;  %s6635_s0 = inlined_call_operand.smem [shape: u32[30], index: -1, kind: input, shape index: {}] }
   0x1   :  { %s5787_s5 = sld [smem:[%s6635_s0]]   ;;  %s5738_s14 = smov 3  }
   0x2   :  { %s5792_s9 = sld [smem:[%s6635_s0 + %s5736_s6]]   ;;  %s5739_s18 = smov 4  }
   0x3   :  { %s5797_s13 = sld [smem:[%s6635_s0 + %s5737_s10]]   ;;  %s5740_s22 = smov 5  }
   0x4   :  { %s5802_s17 = sld [smem:[%s6635_s0 + %s5738_s14]]   ;;  %s5741_s26 = smov 6  }
   0x5   :  { %s5807_s21 = sld [smem:[%s6635_s0 + %s5739_s18]]   ;;  %s5742_s30 = smov 7  }
   0x6   :  { %s5812_s25 = sld [smem:[%s6635_s0 + %s5740_s22]]   ;;  %s5743_s4 = smov 8  }
   0x7   :  { %6679 = sst [smem:[#allocation5_spill]] %s5787_s5  ;;  %s5744_s10 = smov 9  }
   0x8   :  { %6680 = sst [smem:[#allocation6_spill]] %s5792_s9  ;;  %s5745_s15 = smov 10  }
   0x9   :  { %6681 = sst [smem:[#allocation7_spill]] %s5797_s13  ;;  %s5746_s20 = smov 11  }
   0xa   :  { %6682 = sst [smem:[#allocation8_spill]] %s5802_s17  ;;  %s5748_s1 = smov 13  }
   0xb   :  { %6683 = sst [smem:[#allocation9_spill]] %s5807_s21  ;;  %s5749_s7 = smov 14  }
   0xc   :  { %s5817_s29 = sld [smem:[%s6635_s0 + %s5741_s26]]   ;;  %s5747_s26 = smov 12  }
   0xd   :  { %s5822_s3 = sld [smem:[%s6635_s0 + %s5742_s30]]   ;;  %s5751_s22 = smov 16  }
   0xe   :  { %s5827_s8 = sld [smem:[%s6635_s0 + %s5743_s4]]   ;;  %s5752_s28 = smov 17  }
   0xf   :  { %s5832_s14 = sld [smem:[%s6635_s0 + %s5744_s10]]  }
  0x10   :  { %s5837_s19 = sld [smem:[%s6635_s0 + %s5745_s15]]   ;;  %s5750_s15 = smov 15  }
  0x11   :  { %s5842_s24 = sld [smem:[%s6635_s0 + %s5746_s20]]  }
  0x12   :  { %s5847_s30 = sld [smem:[%s6635_s0 + %s5747_s26]]  }
  0x13   :  { %6684 = sst [smem:[#allocation10_spill]] %s5822_s3 }
  0x14   :  { %s5852_s6 = sld [smem:[%s6635_s0 + %s5748_s1]]  }
  0x15   :  { %s5857_s12 = sld [smem:[%s6635_s0 + %s5749_s7]]   ;;  %s5753_s7 = smov 18  }
  0x16   :  { %s5862_s20 = sld [smem:[%s6635_s0 + %s5750_s15]]   ;;  %s5754_s15 = smov 19  }
  0x17   :  { %s5867_s27 = sld [smem:[%s6635_s0 + %s5751_s22]]   ;;  %s5755_s22 = smov 20  }
  0x18   :  { %s5872_s4 = sld [smem:[%s6635_s0 + %s5752_s28]]   ;;  %s5756_s28 = smov 21  }
  0x19   :  { %s5877_s21 = sld [smem:[%s6635_s0 + %s5753_s7]]   ;;  %s5757_s7 = smov 22  }
  0x1c   :  { %6685 = sst [smem:[#allocation11_spill]] %s5862_s20 }
  0x1d   :  { %6686 = sst [smem:[#allocation12_spill]] %s5867_s27 }
  0x1e   :  { %6687 = sst [smem:[#allocation13_spill]] %s5872_s4 }
  0x1f   :  { %6688 = sst [smem:[#allocation14_spill]] %s5877_s21 }
  0x20   :  { %s5882_s20 = sld [smem:[%s6635_s0 + %s5754_s15]]   ;;  %s5758_s15 = smov 23  }
  0x21   :  { %s5887_s27 = sld [smem:[%s6635_s0 + %s5755_s22]]   ;;  %s5759_s22 = smov 24  }
  0x22   :  { %s5892_s4 = sld [smem:[%s6635_s0 + %s5756_s28]]   ;;  %s5760_s28 = smov 25  }
  0x23   :  { %s5897_s21 = sld [smem:[%s6635_s0 + %s5757_s7]]   ;;  %s5761_s7 = smov 26  }
  0x26   :  { %6689 = sst [smem:[#allocation15_spill]] %s5882_s20 }
  0x27   :  { %6690 = sst [smem:[#allocation16_spill]] %s5887_s27 }
  0x28   :  { %6691 = sst [smem:[#allocation17_spill]] %s5892_s4 }
  0x29   :  { %6692 = sst [smem:[#allocation18_spill]] %s5897_s21 }
  0x2a   :  { %s5902_s20 = sld [smem:[%s6635_s0 + %s5758_s15]]   ;;  %s5762_s15 = smov 27  }
  0x2b   :  { %s5907_s27 = sld [smem:[%s6635_s0 + %s5759_s22]]   ;;  %s5763_s22 = smov 28  }
  0x2c   :  { %s5912_s4 = sld [smem:[%s6635_s0 + %s5760_s28]]   ;;  %s5764_s28 = smov 29  }
  0x2d   :  { %s5917_s21 = sld [smem:[%s6635_s0 + %s5761_s7]]  }
  0x30   :  { %6693 = sst [smem:[#allocation19_spill]] %s5902_s20 }
  0x31   :  { %6694 = sst [smem:[#allocation20_spill]] %s5907_s27 }
  0x32   :  { %6695 = sst [smem:[#allocation21_spill]] %s5912_s4 }
  0x33   :  { %6696 = sst [smem:[#allocation22_spill]] %s5917_s21 }
  0x34   :  { %s5922_s20 = sld [smem:[%s6635_s0 + %s5762_s15]]  }
  0x35   :  { %s5927_s27 = sld [smem:[%s6635_s0 + %s5763_s22]]  }
  0x36   :  { %s5932_s4 = sld [smem:[%s6635_s0 + %s5764_s28]]  }
  0x3a   :  { %6697 = sst [smem:[#allocation23_spill]] %s5922_s20 }
  0x3b   :  { %6698 = sst [smem:[#allocation24_spill]] %s5927_s27 }
  0x3c   :  { %6699 = sst [smem:[#allocation25_spill]] %s5932_s4 }
  0x3d   :  { %64 = vsyncpa [#allocation3], 0 }
  0x3e   :  { %66 = vsyncpa [#allocation3 + $0x1], 0  ;;  %s5934_s7 = smov 0   ;;  %s5936_s10 = smov 0  }
  0x3f   :  { %s5938_s11 = smov 0   ;;  %s5940_s15 = smov 0  }
  0x40 LB: > { %s6700_s3 = sld [smem:[#allocation10_spill]]  ;;  %s5955_s0 = sadd.s32 4294967295, %s5734_s15   ;;  %s5722_s7 = sphi %s5934_s7, %s6757_s7   ;;  %s5734_s15 = sphi %s5940_s15, %s6754_s15   ;;  %s5730_s11 = sphi %s5938_s11, %s6756_s11   ;;  %s5726_s10 = sphi %s5936_s10, %s6758_s10  }
  0x41   : > { %6701 = sst [smem:[#allocation26_spill]] %s5722_s7  ;;  %s4753_s16 = sadd.s32 4294967294, %s5734_s15  }
  0x42   : > { %6702 = sst [smem:[#allocation27_spill]] %s5730_s11  ;;  %s5959_s18 = sadd.s32 1, %s5734_s15  }
  0x43   : > { %6703 = sst [smem:[#allocation28_spill]] %s5734_s15  ;;  %s708_s22 = sadd.s32 1, %s5730_s11 }
  0x44   : > { %6704 = sst [smem:[#allocation29_spill]] %s5955_s0  ;;  %s705_s23 = ssub.s32 %s5734_s15, %s5959_s18 }
  0x45   : > { %6705 = sst [smem:[#allocation30_spill]] %s5959_s18  ;;  %p718_p0 = scmp.ne.s32.totalorder %s5730_s11, %s5726_s10 }
  0x46   : > { %p706_p1 = scmp.eq.s32.totalorder %s705_s23, 0  ;;  %p719_p2 = scmp.eq.s32.totalorder %s5955_s0, 1 }
  0x47   : > { %p724_p3 = scmp.ne.s32.totalorder %s5726_s10, %s5722_s7  ;;  %p725_p4 = scmp.eq.s32.totalorder %s4753_s16, 1 }
  0x48   : > { %s5970_s26 = scalar_select %p706_p1, %s5730_s11, %s708_s22  }
  0x49   : > { %p5972_p5 = por %p719_p2, %p718_p0  ;;  %p5976_p6 = por %p725_p4, %p724_p3 }
  0x4a   : > { %6706 = sst [smem:[#allocation31_spill]] %s5970_s26  ;;  %p4756_p7 = scmp.ge.s32.totalorder %s5734_s15, 1 }
  0x4b   : > { %s6707_s28 = scalar_select %p5972_p5, 1, 0 }
  0x4c   : > { %s6709_s1 = scalar_select %p5976_p6, 1, 0 }
  0x4d   : > { %6708 = sst [smem:[#allocation32_spill]] %s6707_s28  ;;  %p844_p8 = scmp.lt.s32.totalorder %s5734_s15, 3 }
  0x4e   : > { %6710 = sst [smem:[#allocation33_spill]] %s6709_s1 }
  0x4f   : > { %p845_p9 = pnand %p4756_p7, %p844_p8 }
  0x50   : > { %s6711_s5 = sld [smem:[#allocation5_spill]] (!%p845_p9)  ;;  %p929_p10 = scmp.lt.s32.totalorder (!%p845_p9), %s5955_s0, 1 }
  0x51   : > { %848 = sbr.rel (%p845_p9) target bundleno = 13607 (0x3527), region = 136  ;;  %s6651_s23 = smov (!%p845_p9), 120  }
  0x52   : > { %s6712_s17 = sld [smem:[#allocation8_spill]] (!%p845_p9) }
  0x53   : > { %s6713_s13 = sld [smem:[#allocation7_spill]] (!%p845_p9) }
  0x54   : > { %s6714_s9 = sld [smem:[#allocation6_spill]] (!%p845_p9) }
  0x55   : > { %s6724_s26 = sld [smem:[#allocation12_spill]] (!%p845_p9) }
  0x56   : > { %v5561_v0 = vld [vmem:[%s5812_s25 + $0x8] sm:$0xff]   ;;  %v5765_v1 = vmov 0.0   ;;  %v5562_v2 = vld [vmem:[%s5812_s25] sm:$0xff]   ;;  %vm5766_vm0 = vmmov 0   ;;  %s5993_s2 = scalar_select %p929_p10, %s5955_s0, 1  ;;  %vm980_vm1 = vcmask 261120  }
  0x57   : > { %5080 = vmatprep.subr.bf16.mxu1 %v5765_v1  ;;  %5094 = vmatprep.subr.bf16.mxu0 %v5765_v1  ;;  %v4761_v5 = vld [vmem:[%s5817_s29] ss:$0 sm:$0xff]  ;;  %vm1033_vm2 = vcmask 64512   ;;  %vm1099_vm3 = vcmask 1043456   ;;  %v1025_v58 = vld [vmem:[%s6700_s3 + $0x4] sm:$0xf] }
  0x58   : > { %5081 = vmatpush3.bf16.msra.mxu1 %v5561_v0  ;;  %5084 = vmatprep.mubr.msk.bf16.mxu1 %vm5766_vm0, %v5765_v1  ;;  %s6646_s16 = sshll.u32 %s5993_s2, 3  ;;  %v1024_v56 = vld [vmem:[%s6700_s3] sm:$0xf]  ;;  %v1261_v59 = vsel %vm1099_vm3, %v1025_v58, 0  ;;  %s6725_s11 = sld [smem:[#allocation15_spill]] }
  0x59   : > { %5082 = vmatprep.subr.bf16.mxu1 %v5765_v1  ;;  %5096 = vmatprep.mubr.msk.bf16.mxu0 %vm5766_vm0, %v5765_v1  ;;  %s932_s22 = scalar_lea.vmem %s6711_s5, %s6646_s16  ;;  %s6649_s16 = smov 88   ;;  %v946_v17 = vld [vmem:[%s6713_s13] sm:$0xff]  ;;  %v1307_v57 = vsel %vm1099_vm3, %v1024_v56, 0 }
  0x5a   : > { %v6000_v3 = vld [vmem:[%s932_s22] sm:$0xff]  ;;  %s6647_s22 = smov 96   ;;  %s6655_s5 = smov 80  }
  0x5b   : > { %v961_v4 = vpack.c.bf16 %v6000_v3, %v6000_v3  ;;  %s6722_s13 = smov 80   ;;  %s6727_s1 = sld [smem:[#allocation17_spill]] }
  0x5c   : > { %5083 = vmatpush3.bf16.msra.mxu1 %v5562_v2  ;;  %s6730_s7 = sld [smem:[#allocation14_spill]] }
  0x5d   : > { %5088 = vmatprep.subr.bf16.mxu1 %v5765_v1  ;;  %s6732_s15 = sld [smem:[#allocation16_spill]] }
  0x5e   : > { %s6726_s18 = smov %s6725_s11  ;;  %s6734_s27 = sld [smem:[#allocation18_spill]] }
  0x5f   : > { %5085 = vmatmul.mubr.msk.bf16.vlgmr.msra.gmra.mxu1 %vm980_vm1, %v961_v4 }
  0x60   : > { %5090 = vmatprep.mubr.msk.bf16.mxu1 %vm5766_vm0, %v5765_v1 }
  0x62   : > { %s6731_s4 = smov %s6730_s7 }
  0x63   : > { %s6733_s0 = smov %s6732_s15 }
 0x11f   : > { %v1018_v6 = vpop.f32.mrf.mxu1 }
 0x120   : > { %v1019_v7 = vadd.f32 %v4761_v5, %v1018_v6 }
 0x121   : > { %v5086_v8 = vpop.f32.mrf.mxu1 }
 0x122   : > { %v6008_v9 = vpack.c.bf16 %v1019_v7, %v1019_v7 }
 0x123   : > { %v1021_v10 = vpop.f32.mrf.mxu1 }
 0x124   : > { %1144 = vrot.lane.b32.xlu1 %v6008_v9, %s6651_s23  ;;  %1031 = vrot.lane.b32.xlu0 %v6008_v9, %s6647_s22  ;;  %s939_s22 = scalar_lea.vmem %s6712_s17, %s5993_s2  ;;  %s6663_s23 = smov 112  }
 0x125   : > { %v5087_v11 = vpop.f32.mrf.mxu1  ;;  %v4760_v18 = vld [vmem:[%s939_s22] ss:$0 sm:$0xff]  ;;  %s6654_s22 = smov 64   ;;  %s6723_s17 = smov 72  }
 0x126   : > { %v6030_v19 = vadd.f32 %v4760_v18, %v946_v17 }
 0x128   : > { %1146 = vrot.lane.b32.xlu0 %v6008_v9, %s6649_s16  ;;  %s6653_s16 = smov 56  }
 0x196   : > { %v1032_v12 = vpop.permute.xlu0 %1031  ;;  %v1145_v16 = vpop.permute.xlu1 %1144 }
 0x197   : > { %v1038_v13 = vsel %vm1033_vm2, %v1032_v12, 0 }
 0x198   : > { %5089 = vmatpush3.bf16.xpose.msra.mxu1 %v1038_v13 }
 0x199   : > { %5100 = vmatprep.subr.bf16.mxu1 %v5765_v1 }
 0x19a   : > { %v1147_v14 = vpop.permute.xlu0 %1146 }
 0x19b   : > { %v1152_v15 = vsel %vm1033_vm2, %v1147_v14, 0 }
 0x19f   : > { %5091 = vmatmul.mubr.msk.bf16.vlgmr.msra.gmra.mxu1 %vm1033_vm2, %v6008_v9 }
 0x1a0   : > { %5101 = vmatpush3.bf16.xpose.msra.mxu1 %v1152_v15  ;;  %5102 = vmatprep.mubr.msk.bf16.mxu1 %vm5766_vm0, %v5765_v1 }
 0x1a1   : > { %5112 = vmatprep.subr.bf16.mxu1 %v5765_v1 }
 0x1a7   : > { %5103 = vmatmul.mubr.msk.bf16.vlgmr.msra.gmra.mxu1 %vm1033_vm2, %v1145_v16 }
 0x1a8   : > { %5114 = vmatprep.mubr.msk.bf16.mxu1 %vm5766_vm0, %v5765_v1  ;;  %5113 = vmatpush3.bf16.msra.mxu1 %v1261_v59 }
 0x1a9   : > { %5124 = vmatprep.subr.bf16.mxu1 %v5765_v1 }
 0x25f   : > { %v1074_v20 = vpop.f32.mrf.mxu1 }
 0x260   : > { %v1080_v21 = vmul.f32 0.35355338, %v1074_v20 }
 0x261   : > { %v5092_v22 = vpop.f32.mrf.mxu1 }
 0x262   : > { %v1081_v23 = vadd.f32 %v1080_v21, %v6030_v19 }
 0x263   : > { %v1077_v24 = vpop.f32.mrf.mxu1 }
 0x264   : > { %v1082_v25 = vsel %vm1033_vm2, %v1081_v23, -inf }
 0x265   : > { %1083 = vmax.xlane.f32.xlu1 %v1082_v25  ;;  %v5093_v26 = vpop.f32.mrf.mxu1 }
 0x267   : > { %v1188_v27 = vpop.f32.mrf.mxu1 }
 0x268   : > { %v1194_v28 = vmul.f32 0.35355338, %v1188_v27 }
 0x269   : > { %v5104_v29 = vpop.f32.mrf.mxu1 }
 0x26a   : > { %v1195_v30 = vadd.f32 %v1194_v28, %v6030_v19 }
 0x26b   : > { %v1191_v31 = vpop.f32.mrf.mxu1 }
 0x26c   : > { %v1196_v32 = vsel %vm1033_vm2, %v1195_v30, -inf }
 0x26d   : > { %1197 = vmax.xlane.f32.xlu0 %v1196_v32  ;;  %v5105_v33 = vpop.f32.mrf.mxu1 }
 0x2ee   : > { %v1084_v34 = vpop.xlane.xlu1 %1083 }
 0x2ef   : > { %v1085_v35 = vsub.f32 %v1081_v23, %v1084_v34 }
 0x2f1   : > { %v1086_v36 = vmul.f32 1.442695, %v1085_v35 }
 0x2f3   : > { %5595 = vpow2.f32 %v1086_v36 }
 0x2f6   : > { %v1198_v37 = vpop.xlane.xlu0 %1197 }
 0x2f7   : > { %v1199_v38 = vsub.f32 %v1195_v30, %v1198_v37 }
 0x2f9   : > { %v1200_v39 = vmul.f32 1.442695, %v1199_v38 }
 0x2fb   : > { %5597 = vpow2.f32 %v1200_v39 }
 0x300   : > { %v5596_v40 = vpop.eup %5595 }
 0x301   : > { %v1088_v41 = vsel %vm1033_vm2, %v5596_v40, 0.0 }
 0x302   : > { %1089 = vadd.xlane.f32.xlu0 %v1088_v41 }
 0x308   : > { %v5598_v42 = vpop.eup %5597 }
 0x309   : > { %v1202_v43 = vsel %vm1033_vm2, %v5598_v42, 0.0 }
 0x30a   : > { %1203 = vadd.xlane.f32.xlu1 %v1202_v43  ;;  %v1026_v43 = vld [vmem:[%s6700_s3 + $0x8] sm:$0xf] }
 0x318   : > { %1094 = vrot.lane.b32.xlu0 %v6008_v9, %s6654_s22  ;;  %s6661_s22 = smov 104  }
 0x31b   : > { %1208 = vrot.lane.b32.xlu1 %v6008_v9, %s6653_s16  ;;  %s6659_s16 = smov 72  }
 0x31c   : > { %1349 = vrot.lane.b32.xlu0 %v6008_v9, %s6663_s23 }
 0x31f   : > { %1351 = vrot.lane.b32.xlu1 %v6008_v9, %s6655_s5  ;;  %s6657_s5 = smov 48  }
 0x38b   : > { %v1090_v44 = vpop.xlane.xlu0 %1089 }
 0x38c   : > { %5599 = vrcp.f32 %v1090_v44  ;;  %v1466_v44 = vsel %vm1099_vm3, %v1026_v43, 0 }
 0x38f   : > { %v1095_v45 = vpop.permute.xlu0 %1094 }
 0x390   : > { %v1101_v46 = vsel %vm1099_vm3, %v1095_v45, 0 }
 0x391   : > { %5095 = vmatpush3.bf16.msra.mxu0 %v1101_v46 }
 0x392   : > { %5106 = vmatprep.subr.bf16.mxu0 %v5765_v1 }
 0x393   : > { %v1204_v47 = vpop.xlane.xlu1 %1203  ;;  %v1350_v11 = vpop.permute.xlu0 %1349 }
 0x394   : > { %5601 = vrcp.f32 %v1204_v47 }
 0x397   : > { %v1209_v50 = vpop.permute.xlu1 %1208 }
 0x398   : > { %v1214_v52 = vsel %vm1099_vm3, %v1209_v50, 0 }
 0x399   : > { %v5600_v48 = vpop.eup %5599 }
 0x39a   : > { %v1092_v49 = vmul.f32 %v5600_v48, %v5596_v40 }
 0x39b   : > { %v1352_v2 = vpop.permute.xlu1 %1351 }
 0x39c   : > { %v1093_v51 = vpack.c.bf16 %v1092_v49, %v1092_v49  ;;  %v1357_v7 = vsel %vm1033_vm2, %v1352_v2, 0 }
 0x39e   : > { %5097 = vmatmul.mubr.msk.bf16.vlgmr.msra.gmra.mxu0 %vm1033_vm2, %v1093_v51 }
 0x39f   : > { %5107 = vmatpush3.bf16.msra.mxu0 %v1214_v52  ;;  %5108 = vmatprep.mubr.msk.bf16.mxu0 %vm5766_vm0, %v5765_v1 }
 0x3a0   : > { %5118 = vmatprep.subr.bf16.mxu0 %v5765_v1 }
 0x3a1   : > { %v5602_v53 = vpop.eup %5601 }
 0x3a2   : > { %v1206_v54 = vmul.f32 %v5602_v53, %v5598_v42 }
 0x3a4   : > { %v1207_v55 = vpack.c.bf16 %v1206_v54, %v1206_v54 }
 0x3a6   : > { %5109 = vmatmul.mubr.msk.bf16.vlgmr.msra.gmra.mxu0 %vm1033_vm2, %v1207_v55 }
 0x3a7   : > { %5120 = vmatprep.mubr.msk.bf16.mxu0 %vm5766_vm0, %v5765_v1  ;;  %5119 = vmatpush3.bf16.msra.mxu0 %v1307_v57 }
 0x3a8   : > { %5130 = vmatprep.subr.bf16.mxu0 %v5765_v1 }
 0x45e   : > { %v1137_v60 = vpop.f32.mrf.mxu0 }
 0x45f   : > { %v1143_v61 = vpack.c.bf16 %v1137_v60, %v1137_v60 }
 0x460   : > { %v5098_v62 = vpop.f32.mrf.mxu0 }
 0x461   : > { %5121 = vmatmul.mubr.msk.bf16.vlgmr.msra.gmra.mxu0 %vm1033_vm2, %v1143_v61 }
 0x462   : > { %v1140_v63 = vpop.f32.mrf.mxu0  ;;  %5132 = vmatprep.mubr.msk.bf16.mxu0 %vm5766_vm0, %v5765_v1 }
 0x464   : > { %v5099_v0 = vpop.f32.mrf.mxu0 }
 0x466   : > { %v1250_v4 = vpop.f32.mrf.mxu0 }
 0x467   : > { %v1256_v5 = vpack.c.bf16 %v1250_v4, %v1250_v4 }
 0x468   : > { %v5110_v6 = vpop.f32.mrf.mxu0 }
 0x469   : > { %5115 = vmatmul.mubr.msk.bf16.vlgmr.msra.gmra.mxu1 %vm1033_vm2, %v1256_v5  ;;  %v1027_v5 = vld [vmem:[%s6700_s3 + $0xc] sm:$0xf] }
 0x46a   : > { %5125 = vmatpush3.bf16.xpose.msra.mxu1 %v1357_v7  ;;  %v1253_v8 = vpop.f32.mrf.mxu0  ;;  %5126 = vmatprep.mubr.msk.bf16.mxu1 %vm5766_vm0, %v5765_v1  ;;  %v1626_v6 = vsel %vm1099_vm3, %v1027_v5, 0 }
 0x46b   : > { %5136 = vmatprep.subr.bf16.mxu1 %v5765_v1 }
 0x46c   : > { %v5111_v10 = vpop.f32.mrf.mxu0 }
 0x471   : > { %5127 = vmatmul.mubr.msk.bf16.vlgmr.msra.gmra.mxu1 %vm1033_vm2, %v1350_v11 }
 0x472   : > { %5138 = vmatprep.mubr.msk.bf16.mxu1 %vm5766_vm0, %v5765_v1  ;;  %5137 = vmatpush3.bf16.msra.mxu1 %v1466_v44  ;;  %v4779_v44 = vld [vmem:[%s5837_s19] ss:$0 sm:$0xff] }
 0x473   : > { %5148 = vmatprep.subr.bf16.mxu1 %v5765_v1 }
 0x521   : > { %v1343_v12 = vpop.f32.mrf.mxu0 }
 0x523   : > { %v5122_v13 = vpop.f32.mrf.mxu0 }
 0x525   : > { %v1346_v14 = vpop.f32.mrf.mxu0 }
 0x527   : > { %v5123_v15 = vpop.f32.mrf.mxu0 }
 0x529   : > { %v1297_v16 = vpop.f32.mrf.mxu1 }
 0x52a   : > { %v6073_v17 = vadd.f32 %v1343_v12, %v1297_v16 }
 0x52b   : > { %v5116_v18 = vpop.f32.mrf.mxu1 }
 0x52c   : > { %v4777_v18 = vld [vmem:[%s5827_s8] ss:$0 sm:$0xff] }
 0x52d   : > { %v1300_v20 = vpop.f32.mrf.mxu1 }
 0x52f   : > { %v5117_v21 = vpop.f32.mrf.mxu1 }
 0x531   : > { %v1393_v22 = vpop.f32.mrf.mxu1 }
 0x532   : > { %v1399_v23 = vmul.f32 0.35355338, %v1393_v22 }
 0x533   : > { %v5128_v24 = vpop.f32.mrf.mxu1 }
 0x534   : > { %v1400_v25 = vadd.f32 %v1399_v23, %v6030_v19 }
 0x535   : > { %v1396_v26 = vpop.f32.mrf.mxu1 }
 0x536   : > { %v1401_v27 = vsel %vm1033_vm2, %v1400_v25, -inf }
 0x537   : > { %1402 = vmax.xlane.f32.xlu1 %v1401_v27  ;;  %v5129_v28 = vpop.f32.mrf.mxu1 }
 0x548   : > { %1511 = vrot.lane.b32.xlu1 %v6008_v9, %s6659_s16 }
 0x54c   : > { %1509 = vrot.lane.b32.xlu1 %v6008_v9, %s6661_s22 }
 0x5c0   : > { %v1403_v29 = vpop.xlane.xlu1 %1402 }
 0x5c1   : > { %v1404_v30 = vsub.f32 %v1400_v25, %v1403_v29 }
 0x5c3   : > { %v1405_v31 = vmul.f32 1.442695, %v1404_v30 }
 0x5c4   : > { %v1512_v39 = vpop.permute.xlu1 %1511 }
 0x5c5   : > { %5603 = vpow2.f32 %v1405_v31  ;;  %v1517_v41 = vsel %vm1033_vm2, %v1512_v39, 0 }
 0x5c8   : > { %v1510_v42 = vpop.permute.xlu1 %1509 }
 0x5d2   : > { %v5604_v32 = vpop.eup %5603 }
 0x5d3   : > { %v1407_v33 = vsel %vm1033_vm2, %v5604_v32, 0.0 }
 0x5d4   : > { %1408 = vadd.xlane.f32.xlu0 %v1407_v33  ;;  %v5563_v33 = vld [vmem:[%s5852_s6 + $0x8] sm:$0xff]  }
 0x5ea   : > { %1413 = vrot.lane.b32.xlu0 %v6008_v9, %s6657_s5  ;;  %s6658_s5 = smov 40  }
 0x65d   : > { %v1409_v34 = vpop.xlane.xlu0 %1408 }
 0x65e   : > { %5605 = vrcp.f32 %v1409_v34 }
 0x661   : > { %v1414_v35 = vpop.permute.xlu0 %1413 }
 0x662   : > { %v1419_v36 = vsel %vm1099_vm3, %v1414_v35, 0 }
 0x663   : > { %5131 = vmatpush3.bf16.msra.mxu0 %v1419_v36  ;;  %v5565_v36 = vld [vmem:[%s5842_s24 + $0x8] sm:$0xff]  }
 0x664   : > { %5142 = vmatprep.subr.bf16.mxu0 %v5765_v1 }
 0x66b   : > { %v5606_v37 = vpop.eup %5605 }
 0x66c   : > { %v1411_v38 = vmul.f32 %v5606_v37, %v5604_v32  ;;  %v5566_v37 = vld [vmem:[%s5842_s24] sm:$0xff]  }
 0x66e   : > { %v1412_v40 = vpack.c.bf16 %v1411_v38, %v1411_v38 }
 0x670   : > { %5133 = vmatmul.mubr.msk.bf16.vlgmr.msra.gmra.mxu0 %vm1033_vm2, %v1412_v40 }
 0x671   : > { %5143 = vmatpush3.bf16.xpose.msra.mxu0 %v1517_v41  ;;  %5144 = vmatprep.mubr.msk.bf16.mxu0 %vm5766_vm0, %v5765_v1 }
 0x672   : > { %5154 = vmatprep.subr.bf16.mxu0 %v5765_v1 }
 0x678   : > { %5145 = vmatmul.mubr.msk.bf16.vlgmr.msra.gmra.mxu0 %vm1033_vm2, %v1510_v42  ;;  %v4778_v42 = vld [vmem:[%s5832_s14] ss:$0 sm:$0xff] }
 0x679   : > { %5156 = vmatprep.mubr.msk.bf16.mxu0 %vm5766_vm0, %v5765_v1  ;;  %5155 = vmatpush3.bf16.msra.mxu0 %v1626_v6 }
 0x67a   : > { %5168 = vmatprep.subr.bf16.mxu0 %v5765_v1 }
 0x730   : > { %v1455_v45 = vpop.f32.mrf.mxu0 }
 0x731   : > { %v1461_v46 = vpack.c.bf16 %v1455_v45, %v1455_v45 }
 0x732   : > { %v5134_v47 = vpop.f32.mrf.mxu0 }
 0x733   : > { %5139 = vmatmul.mubr.msk.bf16.vlgmr.msra.gmra.mxu1 %vm1033_vm2, %v1461_v46 }
 0x734   : > { %v1458_v48 = vpop.f32.mrf.mxu0  ;;  %5150 = vmatprep.mubr.msk.bf16.mxu1 %vm5766_vm0, %v5765_v1 }
 0x735   : > { %v4784_v48 = vld [vmem:[%s5857_s12] ss:$0 sm:$0xff] }
 0x736   : > { %v5135_v49 = vpop.f32.mrf.mxu0 }
 0x738   : > { %v1553_v50 = vpop.f32.mrf.mxu0 }
 0x739   : > { %v1559_v51 = vmul.f32 0.35355338, %v1553_v50 }
 0x73a   : > { %v5146_v52 = vpop.f32.mrf.mxu0 }
 0x73b   : > { %v1560_v53 = vadd.f32 %v1559_v51, %v6030_v19 }
 0x73c   : > { %v1556_v54 = vpop.f32.mrf.mxu0 }
 0x73d   : > { %v1561_v55 = vsel %vm1033_vm2, %v1560_v53, -inf }
 0x73e   : > { %1562 = vmax.xlane.f32.xlu0 %v1561_v55  ;;  %v5147_v56 = vpop.f32.mrf.mxu0 }
 0x73f   : > { %v4780_v56 = vld [vmem:[%s5847_s30] ss:$0 sm:$0xff] }
 0x754   : > { %1573 = vrot.lane.b32.xlu0 %v6008_v9, %s6658_s5  ;;  %s6715_s5 = sshll.u32 %s5993_s2, 3 }
 0x755   : > { %s936_s16 = scalar_lea.vmem %s6714_s9, %s6715_s5  ;;  %s6716_s5 = smov 120  }
 0x756   : > { %v945_v34 = vld [vmem:[%s936_s16] sm:$0xff]  ;;  %s6717_s16 = sld [smem:[#allocation9_spill]] }
 0x757   : > { %v6127_v35 = vpack.c.bf16 %v945_v34, %v945_v34  ;;  %s6720_s9 = sld [smem:[#allocation11_spill]] }
 0x75c   : > { %s6171_s22 = scalar_lea.vmem %s6717_s16, %s5993_s2  ;;  %s6718_s2 = smov 88  }
 0x75d   : > { %s6719_s16 = smov 96  }
 0x7c7   : > { %v1563_v57 = vpop.xlane.xlu0 %1562 }
 0x7c8   : > { %v1564_v58 = vsub.f32 %v1560_v53, %v1563_v57 }
 0x7ca   : > { %v1565_v59 = vmul.f32 1.442695, %v1564_v58 }
 0x7cb   : > { %v1574_v60 = vpop.permute.xlu0 %1573 }
 0x7cc   : > { %5607 = vpow2.f32 %v1565_v59  ;;  %v1579_v61 = vsel %vm1099_vm3, %v1574_v60, 0 }
 0x7cd   : > { %5149 = vmatpush3.bf16.msra.mxu1 %v1579_v61 }
 0x7ce   : > { %5160 = vmatprep.subr.bf16.mxu1 %v5765_v1 }
 0x7d9   : > { %v5608_v62 = vpop.eup %5607 }
 0x7da   : > { %v1567_v63 = vsel %vm1033_vm2, %v5608_v62, 0.0 }
 0x7db   : > { %1568 = vadd.xlane.f32.xlu1 %v1567_v63 }
 0x7f3   : > { %v1502_v0 = vpop.f32.mrf.mxu1 }
 0x7f4   : > { %v1508_v2 = vadd.f32 %v1502_v0, %v6073_v17 }
 0x7f5   : > { %v5140_v4 = vpop.f32.mrf.mxu1 }
 0x7f7   : > { %v1505_v9 = vpop.f32.mrf.mxu1 }
 0x7f8   : > { %v6174_v9 = vld [vmem:[%s6171_s22] ss:$0 sm:$0xff] }
 0x7f9   : > { %v5141_v7 = vpop.f32.mrf.mxu1 }
 0x864   : > { %v1569_v8 = vpop.xlane.xlu1 %1568 }
 0x865   : > { %5609 = vrcp.f32 %v1569_v8 }
 0x872   : > { %v5610_v10 = vpop.eup %5609 }
 0x873   : > { %v1571_v11 = vmul.f32 %v5610_v10, %v5608_v62 }
 0x875   : > { %v1572_v12 = vpack.c.bf16 %v1571_v11, %v1571_v11 }
 0x877   : > { %5151 = vmatmul.mubr.msk.bf16.vlgmr.msra.gmra.mxu1 %vm1033_vm2, %v1572_v12 }
 0x878   : > { %5164 = vmatprep.mubr.msk.bf16.mxu1 %vm5766_vm0, %v5765_v1  ;;  %5161 = vmatpush3.bf16.msra.mxu1 %v5565_v36 }
 0x879   : > { %5162 = vmatprep.subr.bf16.mxu1 %v5765_v1 }
 0x87c   : > { %5163 = vmatpush3.bf16.msra.mxu1 %v5566_v37 }
 0x87d   : > { %5176 = vmatprep.subr.bf16.mxu1 %v5765_v1 }
 0x937   : > { %v1615_v13 = vpop.f32.mrf.mxu1 }
 0x938   : > { %v1621_v14 = vpack.c.bf16 %v1615_v13, %v1615_v13 }
 0x939   : > { %v5152_v15 = vpop.f32.mrf.mxu1 }
 0x93a   : > { %5157 = vmatmul.mubr.msk.bf16.vlgmr.msra.gmra.mxu0 %vm1033_vm2, %v1621_v14 }
 0x93b   : > { %v1618_v16 = vpop.f32.mrf.mxu1  ;;  %5172 = vmatprep.mubr.msk.bf16.mxu0 %vm5766_vm0, %v5765_v1  ;;  %5169 = vmatpush3.bf16.msra.mxu0 %v5563_v33 }
 0x93c   : > { %5170 = vmatprep.subr.bf16.mxu0 %v5765_v1 }
 0x93d   : > { %v5153_v17 = vpop.f32.mrf.mxu1 }
 0x9fa   : > { %v1662_v20 = vpop.f32.mrf.mxu0 }
 0x9fb   : > { %v1668_v21 = vadd.f32 %v1662_v20, %v1508_v2 }
 0x9fc   : > { %v5158_v22 = vpop.f32.mrf.mxu0 }
 0x9fd   : > { %v1675_v23 = vadd.f32 %v4777_v18, %v1668_v21 }
 0x9fe   : > { %v1665_v24 = vpop.f32.mrf.mxu0 }
 0x9ff   : > { %v1676_v25 = vadd.f32 %v1675_v23, %v6000_v3  ;;  %v5564_v3 = vld [vmem:[%s5852_s6] sm:$0xff]  }
 0xa00   : > { %v5159_v26 = vpop.f32.mrf.mxu0  ;;  %5171 = vmatpush3.bf16.msra.mxu0 %v5564_v3 }
 0xa01   : > { %v1679_v27 = vsel %vm980_vm1, %v1676_v25, 0.0  ;;  %5182 = vmatprep.subr.bf16.mxu0 %v5765_v1 }
 0xa02   : > { %1680 = vadd.xlane.f32.xlu1 %v1679_v27 }
 0xa03   : > { %5173 = vmatmul.mubr.msk.bf16.vlgmr.msra.gmra.mxu0 %vm980_vm1, %v6127_v35 }
 0xa04   : > { %5184 = vmatprep.mubr.msk.bf16.mxu0 %vm5766_vm0, %v5765_v1 }
 0xa8b   : > { %v1681_v28 = vpop.xlane.xlu1 %1680 }
 0xa8c   : > { %v1683_v29 = vmul.f32 0.03125, %v1681_v28 }
 0xa8e   : > { %v1684_v30 = vsub.f32 %v1676_v25, %v1683_v29 }
 0xa90   : > { %v1685_v31 = vmul.f32 %v1684_v30, %v1684_v30 }
 0xa92   : > { %v1686_v32 = vsel %vm980_vm1, %v1685_v31, 0.0 }
 0xa93   : > { %1687 = vadd.xlane.f32.xlu1 %v1686_v32 }
 0xac3   : > { %v1835_v49 = vpop.f32.mrf.mxu0 }
 0xac4   : > { %v1836_v50 = vadd.f32 %v4784_v48, %v1835_v49 }
 0xac5   : > { %v5174_v51 = vpop.f32.mrf.mxu0 }
 0xac6   : > { %v6148_v52 = vpack.c.bf16 %v1836_v50, %v1836_v50 }
 0xac7   : > { %v1838_v53 = vpop.f32.mrf.mxu0 }
 0xac8   : > { %1967 = vrot.lane.b32.xlu1 %v6148_v52, %s6716_s5  ;;  %v1852_v54 = vsel %vm1033_vm2, %v6148_v52, 0 }
 0xac9   : > { %v5175_v55 = vpop.f32.mrf.mxu0 }
 0xb1c   : > { %v1688_v38 = vpop.xlane.xlu1 %1687 }
 0xb1d   : > { %v1689_v39 = vmul.f32 0.03125, %v1688_v38 }
 0xb1f   : > { %v1690_v40 = vadd.f32 1e-05, %v1689_v39 }
 0xb21   : > { %5611 = vrsqrt.f32 %v1690_v40 }
 0xb2e   : > { %v5612_v41 = vpop.eup %5611 }
 0xb2f   : > { %v1692_v43 = vmul.f32 %v5612_v41, %v1684_v30 }
 0xb31   : > { %v1699_v45 = vmul.f32 %v4778_v42, %v1692_v43  ;;  %v1841_v42 = vld [vmem:[%s6720_s9] sm:$0xf] }
 0xb32   : > { %v2128_v43 = vsel %vm1099_vm3, %v1841_v42, 0 }
 0xb33   : > { %v6140_v46 = vadd.f32 %v4779_v44, %v1699_v45  ;;  %v1842_v44 = vld [vmem:[%s6720_s9 + $0x4] sm:$0xf] }
 0xb34   : > { %v2082_v45 = vsel %vm1099_vm3, %v1842_v44, 0 }
 0xb35   : > { %v1712_v47 = vpack.c.bf16 %v6140_v46, %v6140_v46 }
 0xb37   : > { %5165 = vmatmul.mubr.msk.bf16.vlgmr.msra.gmra.mxu1 %vm980_vm1, %v1712_v47 }
 0xb38   : > { %5178 = vmatprep.mubr.msk.bf16.mxu1 %vm5766_vm0, %v5765_v1  ;;  %5177 = vmatpush3.bf16.xpose.msra.mxu1 %v1852_v54 }
 0xb39   : > { %5188 = vmatprep.subr.bf16.mxu1 %v5765_v1 }
 0xb3a   : > { %v1968_v58 = vpop.permute.xlu1 %1967 }
 0xb3b   : > { %v1973_v62 = vsel %vm1033_vm2, %v1968_v58, 0 }
 0xbf7   : > { %v1768_v57 = vpop.f32.mrf.mxu1 }
 0xbf8   : > { %v1769_v59 = vadd.f32 %v4780_v56, %v1768_v57 }
 0xbf9   : > { %v5166_v60 = vpop.f32.mrf.mxu1 }
 0xbfa   : > { %v6156_v61 = vpack.c.bf16 %v1769_v59, %v1769_v59 }
 0xbfb   : > { %v1771_v63 = vpop.f32.mrf.mxu1 }
 0xbfc   : > { %1965 = vrot.lane.b32.xlu0 %v6156_v61, %s6716_s5  ;;  %5179 = vmatmul.mubr.msk.bf16.vlgmr.msra.gmra.mxu1 %vm1033_vm2, %v6156_v61 }
 0xbfd   : > { %v5167_v0 = vpop.f32.mrf.mxu1  ;;  %5189 = vmatpush3.bf16.xpose.msra.mxu1 %v1973_v62  ;;  %5190 = vmatprep.mubr.msk.bf16.mxu1 %vm5766_vm0, %v5765_v1 }
 0xbfe   : > { %5200 = vmatprep.subr.bf16.mxu1 %v5765_v1 }
 0xc6e   : > { %v1966_v2 = vpop.permute.xlu0 %1965 }
 0xc6f   : > { %5191 = vmatmul.mubr.msk.bf16.vlgmr.msra.gmra.mxu1 %vm1033_vm2, %v1966_v2 }
 0xc70   : > { %5202 = vmatprep.mubr.msk.bf16.mxu1 %vm5766_vm0, %v5765_v1  ;;  %5201 = vmatpush3.bf16.msra.mxu1 %v2082_v45 }
 0xc71   : > { %5212 = vmatprep.subr.bf16.mxu1 %v5765_v1 }
 0xcbc   : > { %v1888_v4 = vpop.f32.mrf.mxu1 }
 0xcbd   : > { %v1894_v5 = vmul.f32 0.35355338, %v1888_v4 }
 0xcbe   : > { %v5180_v6 = vpop.f32.mrf.mxu1 }
 0xcbf   : > { %v1901_v7 = vadd.f32 %v6174_v9, %v1894_v5 }
 0xcc0   : > { %v1891_v8 = vpop.f32.mrf.mxu1 }
 0xcc1   : > { %v1902_v10 = vsel %vm1033_vm2, %v1901_v7, -inf }
 0xcc2   : > { %1903 = vmax.xlane.f32.xlu0 %v1902_v10  ;;  %v5181_v11 = vpop.f32.mrf.mxu1 }
 0xd2f   : > { %v2009_v12 = vpop.f32.mrf.mxu1 }
 0xd30   : > { %v2015_v13 = vmul.f32 0.35355338, %v2009_v12 }
 0xd31   : > { %v5192_v14 = vpop.f32.mrf.mxu1 }
 0xd32   : > { %v2016_v15 = vadd.f32 %v6174_v9, %v2015_v13 }
 0xd33   : > { %v2012_v16 = vpop.f32.mrf.mxu1 }
 0xd34   : > { %v2017_v17 = vsel %vm1033_vm2, %v2016_v15, -inf }
 0xd35   : > { %2018 = vmax.xlane.f32.xlu1 %v2017_v17  ;;  %v5193_v18 = vpop.f32.mrf.mxu1 }
 0xd46   : > { %2029 = vrot.lane.b32.xlu1 %v6148_v52, %s6718_s2 }
 0xd4a   : > { %2172 = vrot.lane.b32.xlu1 %v6148_v52, %s6663_s23 }
 0xd4b   : > { %v1904_v20 = vpop.xlane.xlu0 %1903 }
 0xd4c   : > { %v1905_v21 = vsub.f32 %v1901_v7, %v1904_v20 }
 0xd4e   : > { %v1906_v22 = vmul.f32 1.442695, %v1905_v21 }
 0xd50   : > { %5613 = vpow2.f32 %v1906_v22 }
 0xd5d   : > { %v5614_v23 = vpop.eup %5613 }
 0xd5e   : > { %v1908_v24 = vsel %vm1033_vm2, %v5614_v23, 0.0 }
 0xd5f   : > { %1909 = vadd.xlane.f32.xlu0 %v1908_v24 }
 0xdbe   : > { %v2019_v25 = vpop.xlane.xlu1 %2018 }
 0xdbf   : > { %v2020_v26 = vsub.f32 %v2016_v15, %v2019_v25 }
 0xdc1   : > { %v2021_v27 = vmul.f32 1.442695, %v2020_v26 }
 0xdc2   : > { %v2030_v36 = vpop.permute.xlu1 %2029 }
 0xdc3   : > { %5615 = vpow2.f32 %v2021_v27  ;;  %v2035_v38 = vsel %vm1099_vm3, %v2030_v36, 0 }
 0xdc6   : > { %v2173_v53 = vpop.permute.xlu1 %2172 }
 0xdc7   : > { %v2178_v57 = vsel %vm1033_vm2, %v2173_v53, 0 }
 0xdd0   : > { %v5616_v28 = vpop.eup %5615 }
 0xdd1   : > { %v2023_v29 = vsel %vm1033_vm2, %v5616_v28, 0.0 }
 0xdd2   : > { %2024 = vadd.xlane.f32.xlu0 %v2023_v29 }
 0xde8   : > { %1915 = vrot.lane.b32.xlu0 %v6148_v52, %s6719_s16  ;;  %v1910_v30 = vpop.xlane.xlu0 %1909 }
 0xde9   : > { %5617 = vrcp.f32 %v1910_v30 }
 0xdec   : > { %2170 = vrot.lane.b32.xlu0 %v6156_v61, %s6663_s23  ;;  %s6721_s23 = smov 104  }
 0xdf6   : > { %v5618_v31 = vpop.eup %5617 }
 0xdf7   : > { %v1912_v33 = vmul.f32 %v5618_v31, %v5614_v23  ;;  %v1843_v31 = vld [vmem:[%s6720_s9 + $0x8] sm:$0xf] }
 0xdf9   : > { %v1913_v37 = vpack.c.bf16 %v1912_v33, %v1912_v33 }
 0xe5b   : > { %v2025_v32 = vpop.xlane.xlu0 %2024 }
 0xe5c   : > { %5619 = vrcp.f32 %v2025_v32  ;;  %v2287_v32 = vsel %vm1099_vm3, %v1843_v31, 0 }
 0xe5f   : > { %v1916_v34 = vpop.permute.xlu0 %1915 }
 0xe60   : > { %v1921_v3 = vsel %vm1099_vm3, %v1916_v34, 0 }
 0xe61   : > { %5183 = vmatpush3.bf16.msra.mxu0 %v1921_v3 }
 0xe62   : > { %5194 = vmatprep.subr.bf16.mxu0 %v5765_v1 }
 0xe63   : > { %v2171_v60 = vpop.permute.xlu0 %2170 }
 0xe64   : > { %5185 = vmatmul.mubr.msk.bf16.vlgmr.msra.gmra.mxu0 %vm1033_vm2, %v1913_v37 }
 0xe65   : > { %5195 = vmatpush3.bf16.msra.mxu0 %v2035_v38  ;;  %5196 = vmatprep.mubr.msk.bf16.mxu0 %vm5766_vm0, %v5765_v1 }
 0xe66   : > { %5206 = vmatprep.subr.bf16.mxu0 %v5765_v1 }
 0xe69   : > { %v5620_v39 = vpop.eup %5619 }
 0xe6a   : > { %v2027_v40 = vmul.f32 %v5620_v39, %v5616_v28 }
 0xe6c   : > { %v2028_v41 = vpack.c.bf16 %v2027_v40, %v2027_v40 }
 0xe6e   : > { %5197 = vmatmul.mubr.msk.bf16.vlgmr.msra.gmra.mxu0 %vm1033_vm2, %v2028_v41 }
 0xe6f   : > { %5208 = vmatprep.mubr.msk.bf16.mxu0 %vm5766_vm0, %v5765_v1  ;;  %5207 = vmatpush3.bf16.msra.mxu0 %v2128_v43 }
 0xe70   : > { %5218 = vmatprep.subr.bf16.mxu0 %v5765_v1 }
 0xf24   : > { %v1957_v47 = vpop.f32.mrf.mxu0 }
 0xf25   : > { %v1963_v48 = vpack.c.bf16 %v1957_v47, %v1957_v47 }
 0xf26   : > { %v5186_v49 = vpop.f32.mrf.mxu0 }
 0xf27   : > { %5209 = vmatmul.mubr.msk.bf16.vlgmr.msra.gmra.mxu0 %vm1033_vm2, %v1963_v48 }
 0xf28   : > { %v1960_v50 = vpop.f32.mrf.mxu0  ;;  %5220 = vmatprep.mubr.msk.bf16.mxu0 %vm5766_vm0, %v5765_v1 }
 0xf2a   : > { %v5187_v51 = vpop.f32.mrf.mxu0 }
 0xf2e   : > { %v2071_v54 = vpop.f32.mrf.mxu0 }
 0xf2f   : > { %v2077_v55 = vpack.c.bf16 %v2071_v54, %v2071_v54 }
 0xf30   : > { %v5198_v56 = vpop.f32.mrf.mxu0 }
 0xf31   : > { %5203 = vmatmul.mubr.msk.bf16.vlgmr.msra.gmra.mxu1 %vm1033_vm2, %v2077_v55  ;;  %v1844_v56 = vld [vmem:[%s6720_s9 + $0xc] sm:$0xf] }
 0xf32   : > { %5213 = vmatpush3.bf16.xpose.msra.mxu1 %v2178_v57  ;;  %v2074_v58 = vpop.f32.mrf.mxu0  ;;  %5214 = vmatprep.mubr.msk.bf16.mxu1 %vm5766_vm0, %v5765_v1  ;;  %v2447_v57 = vsel %vm1099_vm3, %v1844_v56, 0 }
 0xf33   : > { %5224 = vmatprep.subr.bf16.mxu1 %v5765_v1 }
 0xf34   : > { %v5199_v59 = vpop.f32.mrf.mxu0 }
 0xf39   : > { %5215 = vmatmul.mubr.msk.bf16.vlgmr.msra.gmra.mxu1 %vm1033_vm2, %v2171_v60 }
 0xf3a   : > { %5226 = vmatprep.mubr.msk.bf16.mxu1 %vm5766_vm0, %v5765_v1  ;;  %5225 = vmatpush3.bf16.msra.mxu1 %v2287_v32 }
 0xf3b   : > { %5236 = vmatprep.subr.bf16.mxu1 %v5765_v1 }
 0xfe7   : > { %v2164_v62 = vpop.f32.mrf.mxu0 }
 0xfe9   : > { %v5210_v63 = vpop.f32.mrf.mxu0 }
 0xfeb   : > { %v2167_v0 = vpop.f32.mrf.mxu0 }
 0xfed   : > { %v5211_v2 = vpop.f32.mrf.mxu0 }
 0xff1   : > { %v2118_v4 = vpop.f32.mrf.mxu1 }
 0xff2   : > { %v6217_v5 = vadd.f32 %v2164_v62, %v2118_v4 }
 0xff3   : > { %v5204_v6 = vpop.f32.mrf.mxu1 }
 0xff5   : > { %v2121_v7 = vpop.f32.mrf.mxu1 }
 0xff6   : > { %v4801_v7 = vld [vmem:[%s6724_s26] ss:$0 sm:$0xff] }
 0xff7   : > { %v5205_v8 = vpop.f32.mrf.mxu1 }
 0xff9   : > { %v2214_v10 = vpop.f32.mrf.mxu1 }
 0xffa   : > { %v2220_v11 = vmul.f32 0.35355338, %v2214_v10 }
 0xffb   : > { %v5216_v12 = vpop.f32.mrf.mxu1 }
 0xffc   : > { %v2221_v13 = vadd.f32 %v6174_v9, %v2220_v11 }
 0xffd   : > { %v2217_v14 = vpop.f32.mrf.mxu1 }
 0xffe   : > { %v2222_v15 = vsel %vm1033_vm2, %v2221_v13, -inf }
 0xfff   : > { %2223 = vmax.xlane.f32.xlu1 %v2222_v15  ;;  %v5217_v16 = vpop.f32.mrf.mxu1 }
0x1010   : > { %2332 = vrot.lane.b32.xlu1 %v6148_v52, %s6721_s23 }
0x1014   : > { %2330 = vrot.lane.b32.xlu1 %v6156_v61, %s6721_s23 }
0x1088   : > { %v2224_v17 = vpop.xlane.xlu1 %2223 }
0x1089   : > { %v2225_v18 = vsub.f32 %v2221_v13, %v2224_v17 }
0x108b   : > { %v2226_v20 = vmul.f32 1.442695, %v2225_v18 }
0x108c   : > { %v2333_v27 = vpop.permute.xlu1 %2332 }
0x108d   : > { %5621 = vpow2.f32 %v2226_v20  ;;  %v2338_v29 = vsel %vm1033_vm2, %v2333_v27, 0  ;;  %v5573_v27 = vld [vmem:[%s6727_s1 + $0x18] sm:$0xff]  }
0x1090   : > { %v2331_v30 = vpop.permute.xlu1 %2330 }
0x109a   : > { %v5622_v21 = vpop.eup %5621 }
0x109b   : > { %v2228_v22 = vsel %vm1033_vm2, %v5622_v21, 0.0 }
0x109c   : > { %2229 = vadd.xlane.f32.xlu0 %v2228_v22 }
0x10b2   : > { %2234 = vrot.lane.b32.xlu0 %v6148_v52, %s6722_s13 }
0x1125   : > { %v2230_v23 = vpop.xlane.xlu0 %2229 }
0x1126   : > { %5623 = vrcp.f32 %v2230_v23  ;;  %v5567_v23 = vld [vmem:[%s6725_s11 + $0x8] sm:$0xff]   ;;  %s6728_s11 = sld [smem:[#allocation13_spill]] }
0x1129   : > { %v2235_v24 = vpop.permute.xlu0 %2234 }
0x112a   : > { %v2240_v25 = vsel %vm1099_vm3, %v2235_v24, 0  ;;  %v5568_v24 = vld [vmem:[%s6726_s18] sm:$0xff]  }
0x112b   : > { %5219 = vmatpush3.bf16.msra.mxu0 %v2240_v25  ;;  %v5570_v25 = vld [vmem:[%s6727_s1 + $0x30] sm:$0xff]  }
0x112c   : > { %5230 = vmatprep.subr.bf16.mxu0 %v5765_v1  ;;  %s6729_s28 = smov %s6728_s11 }
0x1133   : > { %v5624_v61 = vpop.eup %5623 }
0x1134   : > { %v2232_v26 = vmul.f32 %v5624_v61, %v5622_v21  ;;  %v5571_v61 = vld [vmem:[%s6727_s1 + $0x28] sm:$0xff]  }
0x1136   : > { %v2233_v28 = vpack.c.bf16 %v2232_v26, %v2232_v26  ;;  %v5572_v26 = vld [vmem:[%s6727_s1 + $0x20] sm:$0xff]  }
0x1138   : > { %5221 = vmatmul.mubr.msk.bf16.vlgmr.msra.gmra.mxu0 %vm1033_vm2, %v2233_v28  ;;  %v5574_v28 = vld [vmem:[%s6727_s1 + $0x10] sm:$0xff]  }
0x1139   : > { %5231 = vmatpush3.bf16.xpose.msra.mxu0 %v2338_v29  ;;  %5232 = vmatprep.mubr.msk.bf16.mxu0 %vm5766_vm0, %v5765_v1 }
0x113a   : > { %5242 = vmatprep.subr.bf16.mxu0 %v5765_v1 }
0x1140   : > { %5233 = vmatmul.mubr.msk.bf16.vlgmr.msra.gmra.mxu0 %vm1033_vm2, %v2331_v30 }
0x1141   : > { %5244 = vmatprep.mubr.msk.bf16.mxu0 %vm5766_vm0, %v5765_v1  ;;  %5243 = vmatpush3.bf16.msra.mxu0 %v2447_v57 }
0x1142   : > { %5256 = vmatprep.subr.bf16.mxu0 %v5765_v1 }
0x11f8   : > { %v2276_v33 = vpop.f32.mrf.mxu0 }
0x11f9   : > { %v2282_v34 = vpack.c.bf16 %v2276_v33, %v2276_v33  ;;  %v4802_v33 = vld [vmem:[%s6728_s11] ss:$0 sm:$0xff]  ;;  %s6739_s11 = smov 64  }
0x11fa   : > { %v5222_v3 = vpop.f32.mrf.mxu0 }
0x11fb   : > { %5227 = vmatmul.mubr.msk.bf16.vlgmr.msra.gmra.mxu1 %vm1033_vm2, %v2282_v34  ;;  %v4803_v3 = vld [vmem:[%s6730_s7] ss:$0 sm:$0xff]  ;;  %s6735_s7 = sld [smem:[#allocation19_spill]] }
0x11fc   : > { %v2279_v36 = vpop.f32.mrf.mxu0  ;;  %5238 = vmatprep.mubr.msk.bf16.mxu1 %vm5766_vm0, %v5765_v1 }
0x11fe   : > { %v5223_v37 = vpop.f32.mrf.mxu0 }
0x1200   : > { %v2374_v38 = vpop.f32.mrf.mxu0 }
0x1201   : > { %v2380_v39 = vmul.f32 0.35355338, %v2374_v38  ;;  %s6736_s21 = smov %s6735_s7 }
0x1202   : > { %v5234_v40 = vpop.f32.mrf.mxu0 }
0x1203   : > { %v2381_v41 = vadd.f32 %v6174_v9, %v2380_v39  ;;  %v5575_v39 = vld [vmem:[%s6727_s1 + $0x8] sm:$0xff]   ;;  %v5576_v40 = vld [vmem:[%s6727_s1] sm:$0xff]  }
0x1204   : > { %v2377_v42 = vpop.f32.mrf.mxu0 }
0x1205   : > { %v2382_v43 = vsel %vm1033_vm2, %v2381_v41, -inf }
0x1206   : > { %2383 = vmax.xlane.f32.xlu0 %v2382_v43  ;;  %v5235_v44 = vpop.f32.mrf.mxu0 }
0x121c   : > { %2394 = vrot.lane.b32.xlu0 %v6148_v52, %s6723_s17 }
0x128f   : > { %v2384_v45 = vpop.xlane.xlu0 %2383 }
0x1290   : > { %v2385_v47 = vsub.f32 %v2381_v41, %v2384_v45  ;;  %v4804_v41 = vld [vmem:[%s6732_s15] ss:$0 sm:$0xff]  ;;  %s6737_s15 = sld [smem:[#allocation20_spill]] }
0x1292   : > { %v2386_v48 = vmul.f32 1.442695, %v2385_v47 }
0x1293   : > { %v2395_v49 = vpop.permute.xlu0 %2394 }
0x1294   : > { %5625 = vpow2.f32 %v2386_v48  ;;  %v2400_v50 = vsel %vm1099_vm3, %v2395_v49, 0 }
0x1295   : > { %5237 = vmatpush3.bf16.msra.mxu1 %v2400_v50  ;;  %v4808_v50 = vld [vmem:[%s6734_s27] ss:$0 sm:$0xff] }
0x1296   : > { %5248 = vmatprep.subr.bf16.mxu1 %v5765_v1  ;;  %s6738_s20 = smov %s6737_s15 }
0x12a1   : > { %v5626_v9 = vpop.eup %5625 }
0x12a2   : > { %v2388_v51 = vsel %vm1033_vm2, %v5626_v9, 0.0 }
0x12a3   : > { %2389 = vadd.xlane.f32.xlu1 %v2388_v51 }
0x12bb   : > { %v2323_v53 = vpop.f32.mrf.mxu1 }
0x12bc   : > { %v2329_v54 = vadd.f32 %v2323_v53, %v6217_v5 }
0x12bd   : > { %v5228_v55 = vpop.f32.mrf.mxu1 }
0x12bf   : > { %v2326_v52 = vpop.f32.mrf.mxu1 }
0x12c1   : > { %v5229_v58 = vpop.f32.mrf.mxu1 }
0x132c   : > { %v2390_v59 = vpop.xlane.xlu1 %2389 }
0x132d   : > { %5627 = vrcp.f32 %v2390_v59 }
0x133a   : > { %v5628_v60 = vpop.eup %5627 }
0x133b   : > { %v2392_v62 = vmul.f32 %v5628_v60, %v5626_v9 }
0x133d   : > { %v2393_v63 = vpack.c.bf16 %v2392_v62, %v2392_v62 }
0x133f   : > { %5239 = vmatmul.mubr.msk.bf16.vlgmr.msra.gmra.mxu1 %vm1033_vm2, %v2393_v63  ;;  %v5577_v63 = vld [vmem:[%s5812_s25 + $0x18] sm:$0xff]  }
0x1340   : > { %5252 = vmatprep.mubr.msk.bf16.mxu1 %vm5766_vm0, %v5765_v1  ;;  %5249 = vmatpush3.bf16.msra.mxu1 %v5567_v23 }
0x1341   : > { %5250 = vmatprep.subr.bf16.mxu1 %v5765_v1 }
0x1344   : > { %5251 = vmatpush3.bf16.msra.mxu1 %v5568_v24 }
0x1345   : > { %5276 = vmatprep.subr.bf16.mxu1 %v5765_v1 }
0x13ff   : > { %v2436_v0 = vpop.f32.mrf.mxu1 }
0x1400   : > { %v2442_v2 = vpack.c.bf16 %v2436_v0, %v2436_v0  ;;  %v5578_v0 = vld [vmem:[%s5812_s25 + $0x10] sm:$0xff]  }
0x1401   : > { %v5240_v4 = vpop.f32.mrf.mxu1 }
0x1402   : > { %5245 = vmatmul.mubr.msk.bf16.vlgmr.msra.gmra.mxu0 %vm1033_vm2, %v2442_v2 }
0x1403   : > { %v2439_v5 = vpop.f32.mrf.mxu1  ;;  %5272 = vmatprep.mubr.msk.bf16.mxu0 %vm5766_vm0, %v5765_v1 }
0x1405   : > { %v5241_v6 = vpop.f32.mrf.mxu1 }
0x14c2   : > { %v2483_v8 = vpop.f32.mrf.mxu0 }
0x14c3   : > { %v2489_v10 = vadd.f32 %v2483_v8, %v2329_v54 }
0x14c4   : > { %v5246_v11 = vpop.f32.mrf.mxu0 }
0x14c5   : > { %v2496_v12 = vadd.f32 %v4801_v7, %v2489_v10  ;;  %v4817_v7 = vld [vmem:[%s6735_s7] ss:$0 sm:$0xff]  ;;  %s6740_s7 = smov 56  }
0x14c6   : > { %v2486_v13 = vpop.f32.mrf.mxu0  ;;  %v4818_v10 = vld [vmem:[%s6737_s15] ss:$0 sm:$0xff]  ;;  %s6741_s15 = smov 112  }
0x14c7   : > { %v2497_v14 = vadd.f32 %v2496_v12, %v6140_v46  ;;  %v5569_v46 = vld [vmem:[%s6727_s1 + $0x38] sm:$0xff]  }
0x14c8   : > { %v5247_v15 = vpop.f32.mrf.mxu0  ;;  %5257 = vmatpush3.bf16.msra.mxu0 %v5569_v46 }
0x14c9   : > { %v2500_v16 = vsel %vm980_vm1, %v2497_v14, 0.0  ;;  %5258 = vmatprep.subr.bf16.mxu0 %v5765_v1 }
0x14ca   : > { %2501 = vadd.xlane.f32.xlu1 %v2500_v16 }
0x14cc   : > { %5259 = vmatpush3.bf16.msra.mxu0 %v5570_v25 }
0x14cd   : > { %5260 = vmatprep.subr.bf16.mxu0 %v5765_v1 }
0x14d0   : > { %5261 = vmatpush3.bf16.msra.mxu0 %v5571_v61 }
0x14d1   : > { %5262 = vmatprep.subr.bf16.mxu0 %v5765_v1 }
0x14d4   : > { %5263 = vmatpush3.bf16.msra.mxu0 %v5572_v26 }
0x14d5   : > { %5264 = vmatprep.subr.bf16.mxu0 %v5765_v1 }
0x14d8   : > { %5265 = vmatpush3.bf16.msra.mxu0 %v5573_v27 }
0x14d9   : > { %5266 = vmatprep.subr.bf16.mxu0 %v5765_v1 }
0x14dc   : > { %5267 = vmatpush3.bf16.msra.mxu0 %v5574_v28 }
0x14dd   : > { %5268 = vmatprep.subr.bf16.mxu0 %v5765_v1 }
0x14e0   : > { %5269 = vmatpush3.bf16.msra.mxu0 %v5575_v39 }
0x14e1   : > { %5270 = vmatprep.subr.bf16.mxu0 %v5765_v1 }
0x14e4   : > { %5271 = vmatpush3.bf16.msra.mxu0 %v5576_v40 }
0x14e5   : > { %5302 = vmatprep.subr.bf16.mxu0 %v5765_v1 }
0x1553   : > { %v2502_v17 = vpop.xlane.xlu1 %2501 }
0x1554   : > { %v2503_v18 = vmul.f32 0.03125, %v2502_v17 }
0x1556   : > { %v2504_v20 = vsub.f32 %v2497_v14, %v2503_v18  ;;  %v4824_v14 = vld [vmem:[%s5817_s29 + $0x1] ss:$0 sm:$0xff] }
0x1558   : > { %v2505_v21 = vmul.f32 %v2504_v20, %v2504_v20 }
0x155a   : > { %v2506_v22 = vsel %vm980_vm1, %v2505_v21, 0.0 }
0x155b   : > { %2507 = vadd.xlane.f32.xlu1 %v2506_v22 }
0x15e4   : > { %v2508_v29 = vpop.xlane.xlu1 %2507 }
0x15e5   : > { %v2509_v30 = vmul.f32 0.03125, %v2508_v29 }
0x15e7   : > { %v2510_v31 = vadd.f32 1e-05, %v2509_v30 }
0x15e9   : > { %5629 = vrsqrt.f32 %v2510_v31 }
0x15f6   : > { %v5630_v32 = vpop.eup %5629 }
0x15f7   : > { %v2512_v34 = vmul.f32 %v5630_v32, %v2504_v20 }
0x15f9   : > { %v2519_v36 = vmul.f32 %v4802_v33, %v2512_v34 }
0x15fb   : > { %v2526_v37 = vadd.f32 %v4803_v3, %v2519_v36 }
0x15fd   : > { %v2532_v38 = vpack.c.bf16 %v2526_v37, %v2526_v37 }
0x15ff   : > { %5253 = vmatmul.mubr.msk.bf16.vlgmr.msra.gmra.mxu1 %vm980_vm1, %v2532_v38 }
0x1600   : > { %5280 = vmatprep.mubr.msk.bf16.mxu1 %vm5766_vm0, %v5765_v1  ;;  %5277 = vmatpush3.bf16.msra.mxu1 %v5577_v63 }
0x1601   : > { %5278 = vmatprep.subr.bf16.mxu1 %v5765_v1 }
0x1604   : > { %5279 = vmatpush3.bf16.msra.mxu1 %v5578_v0 }
0x1605   : > { %5284 = vmatprep.subr.bf16.mxu1 %v5765_v1 }
0x16bf   : > { %v2588_v42 = vpop.f32.mrf.mxu1 }
0x16c0   : > { %v2589_v43 = vadd.f32 %v4804_v41, %v2588_v42 }
0x16c1   : > { %v5254_v44 = vpop.f32.mrf.mxu1 }
0x16c2   : > { %v2594_v45 = vmax.f32 %v2589_v43, 0.0 }
0x16c3   : > { %v2591_v47 = vpop.f32.mrf.mxu1 }
0x16c4   : > { %v2612_v48 = vpack.c.bf16 %v2594_v45, %v2594_v45 }
0x16c5   : > { %v5255_v49 = vpop.f32.mrf.mxu1 }
0x16c6   : > { %5273 = vmatmul.mubr.bf16.vlgmr.msra.gmra.mxu0 %v2612_v48 }
0x16c7   : > { %5304 = vmatprep.mubr.msk.bf16.mxu0 %vm5766_vm0, %v5765_v1 }
0x1786   : > { %v2701_v9 = vpop.f32.mrf.mxu0 }
0x1787   : > { %v2702_v51 = vadd.f32 %v4808_v50, %v2701_v9 }
0x1788   : > { %v5274_v53 = vpop.f32.mrf.mxu0 }
0x1789   : > { %v2707_v54 = vadd.f32 %v2702_v51, %v2526_v37 }
0x178a   : > { %v2704_v55 = vpop.f32.mrf.mxu0 }
0x178b   : > { %v2710_v52 = vsel %vm980_vm1, %v2707_v54, 0.0 }
0x178c   : > { %2711 = vadd.xlane.f32.xlu1 %v2710_v52  ;;  %v5275_v56 = vpop.f32.mrf.mxu0 }
0x1815   : > { %v2712_v57 = vpop.xlane.xlu1 %2711 }
0x1816   : > { %v2713_v58 = vmul.f32 0.03125, %v2712_v57 }
0x1818   : > { %v2714_v59 = vsub.f32 %v2707_v54, %v2713_v58 }
0x181a   : > { %v2715_v60 = vmul.f32 %v2714_v59, %v2714_v59 }
0x181c   : > { %v2716_v62 = vsel %vm980_vm1, %v2715_v60, 0.0 }
0x181d   : > { %2717 = vadd.xlane.f32.xlu1 %v2716_v62  ;;  %v4829_v62 = vld [vmem:[%s6700_s3 + $0x14] sm:$0xf] }
0x181e   : > { %v3043_v63 = vsel %vm1099_vm3, %v4829_v62, 0 }
0x18a6   : > { %v2718_v2 = vpop.xlane.xlu1 %2717 }
0x18a7   : > { %v2719_v4 = vmul.f32 0.03125, %v2718_v2 }
0x18a9   : > { %v2720_v5 = vadd.f32 1e-05, %v2719_v4  ;;  %v4828_v4 = vld [vmem:[%s6700_s3 + $0x10] sm:$0xf] }
0x18ab   : > { %5631 = vrsqrt.f32 %v2720_v5 }
0x18b8   : > { %v5632_v6 = vpop.eup %5631 }
0x18b9   : > { %v2722_v8 = vmul.f32 %v5632_v6, %v2714_v59 }
0x18bb   : > { %v2729_v11 = vmul.f32 %v4817_v7, %v2722_v8  ;;  %v3089_v7 = vsel %vm1099_vm3, %v4828_v4, 0 }
0x18bd   : > { %v6302_v12 = vadd.f32 %v4818_v10, %v2729_v11 }
0x18bf   : > { %v2744_v13 = vpack.c.bf16 %v6302_v12, %v6302_v12 }
0x18c1   : > { %5281 = vmatmul.mubr.msk.bf16.vlgmr.msra.gmra.mxu1 %vm980_vm1, %v2744_v13 }
0x18c2   : > { %5286 = vmatprep.mubr.msk.bf16.mxu1 %vm5766_vm0, %v5765_v1 }
0x1981   : > { %v2800_v15 = vpop.f32.mrf.mxu1 }
0x1982   : > { %v2801_v16 = vadd.f32 %v4824_v14, %v2800_v15 }
0x1983   : > { %v5282_v17 = vpop.f32.mrf.mxu1 }
0x1984   : > { %v6310_v18 = vpack.c.bf16 %v2801_v16, %v2801_v16 }
0x1985   : > { %v2803_v20 = vpop.f32.mrf.mxu1 }
0x1986   : > { %2815 = vrot.lane.b32.xlu1 %v6310_v18, %s6719_s16 }
0x1987   : > { %v5283_v21 = vpop.f32.mrf.mxu1 }
0x19f8   : > { %v2816_v22 = vpop.permute.xlu1 %2815 }
0x19f9   : > { %v2821_v23 = vsel %vm1033_vm2, %v2816_v22, 0 }
0x19fa   : > { %5285 = vmatpush3.bf16.xpose.msra.mxu1 %v2821_v23 }
0x19fb   : > { %5290 = vmatprep.subr.bf16.mxu1 %v5765_v1 }
0x1a01   : > { %5287 = vmatmul.mubr.msk.bf16.vlgmr.msra.gmra.mxu1 %vm1033_vm2, %v6310_v18 }
0x1a02   : > { %5292 = vmatprep.mubr.msk.bf16.mxu1 %vm5766_vm0, %v5765_v1 }
0x1ac1   : > { %v2857_v24 = vpop.f32.mrf.mxu1 }
0x1ac2   : > { %v2863_v46 = vmul.f32 0.35355338, %v2857_v24 }
0x1ac3   : > { %v5288_v25 = vpop.f32.mrf.mxu1 }
0x1ac4   : > { %v2864_v61 = vadd.f32 %v2863_v46, %v6030_v19 }
0x1ac5   : > { %v2860_v26 = vpop.f32.mrf.mxu1 }
0x1ac6   : > { %v2865_v27 = vsel %vm1033_vm2, %v2864_v61, -inf }
0x1ac7   : > { %2866 = vmax.xlane.f32.xlu0 %v2865_v27  ;;  %v5289_v28 = vpop.f32.mrf.mxu1 }
0x1add   : > { %2877 = vrot.lane.b32.xlu0 %v6310_v18, %s6739_s11  ;;  %s6742_s11 = smov 48  }
0x1ae1   : > { %2926 = vrot.lane.b32.xlu0 %v6310_v18, %s6716_s5 }
0x1b50   : > { %v2867_v29 = vpop.xlane.xlu0 %2866 }
0x1b51   : > { %v2868_v30 = vsub.f32 %v2864_v61, %v2867_v29 }
0x1b53   : > { %v2869_v31 = vmul.f32 1.442695, %v2868_v30 }
0x1b54   : > { %v2878_v32 = vpop.permute.xlu0 %2877 }
0x1b55   : > { %5633 = vpow2.f32 %v2869_v31  ;;  %v2883_v33 = vsel %vm1099_vm3, %v2878_v32, 0 }
0x1b56   : > { %5291 = vmatpush3.bf16.msra.mxu1 %v2883_v33 }
0x1b57   : > { %5296 = vmatprep.subr.bf16.mxu1 %v5765_v1 }
0x1b58   : > { %v2927_v42 = vpop.permute.xlu0 %2926 }
0x1b62   : > { %v5634_v34 = vpop.eup %5633 }
0x1b63   : > { %v2871_v3 = vsel %vm1033_vm2, %v5634_v34, 0.0 }
0x1b64   : > { %2872 = vadd.xlane.f32.xlu1 %v2871_v3 }
0x1b75   : > { %2928 = vrot.lane.b32.xlu1 %v6310_v18, %s6718_s2 }
0x1bed   : > { %v2873_v36 = vpop.xlane.xlu1 %2872 }
0x1bee   : > { %5635 = vrcp.f32 %v2873_v36 }
0x1bf1   : > { %v2929_v39 = vpop.permute.xlu1 %2928 }
0x1bf2   : > { %v2934_v41 = vsel %vm1033_vm2, %v2929_v39, 0 }
0x1bfb   : > { %v5636_v37 = vpop.eup %5635 }
0x1bfc   : > { %v2875_v38 = vmul.f32 %v5636_v37, %v5634_v34 }
0x1bfe   : > { %v2876_v40 = vpack.c.bf16 %v2875_v38, %v2875_v38 }
0x1c00   : > { %5293 = vmatmul.mubr.msk.bf16.vlgmr.msra.gmra.mxu1 %vm1033_vm2, %v2876_v40 }
0x1c01   : > { %5297 = vmatpush3.bf16.xpose.msra.mxu1 %v2934_v41  ;;  %5298 = vmatprep.mubr.msk.bf16.mxu1 %vm5766_vm0, %v5765_v1 }
0x1c02   : > { %5308 = vmatprep.subr.bf16.mxu1 %v5765_v1 }
0x1c08   : > { %5299 = vmatmul.mubr.msk.bf16.vlgmr.msra.gmra.mxu1 %vm1033_vm2, %v2927_v42 }
0x1c09   : > { %5310 = vmatprep.mubr.msk.bf16.mxu1 %vm5766_vm0, %v5765_v1  ;;  %5309 = vmatpush3.bf16.msra.mxu1 %v3043_v63 }
0x1c0a   : > { %5320 = vmatprep.subr.bf16.mxu1 %v5765_v1 }
0x1cc0   : > { %v2919_v43 = vpop.f32.mrf.mxu1 }
0x1cc1   : > { %v2925_v8 = vpack.c.bf16 %v2919_v43, %v2919_v43 }
0x1cc2   : > { %v5294_v44 = vpop.f32.mrf.mxu1 }
0x1cc4   : > { %v2922_v45 = vpop.f32.mrf.mxu1 }
0x1cc6   : > { %v5295_v47 = vpop.f32.mrf.mxu1 }
0x1cc8   : > { %v2970_v48 = vpop.f32.mrf.mxu1 }
0x1cc9   : > { %v2976_v49 = vmul.f32 0.35355338, %v2970_v48 }
0x1cca   : > { %v5300_v50 = vpop.f32.mrf.mxu1 }
0x1ccb   : > { %v2977_v9 = vadd.f32 %v2976_v49, %v6030_v19  ;;  %v4830_v49 = vld [vmem:[%s6700_s3 + $0x18] sm:$0xf] }
0x1ccc   : > { %v2973_v51 = vpop.f32.mrf.mxu1  ;;  %v3248_v50 = vsel %vm1099_vm3, %v4830_v49, 0 }
0x1ccd   : > { %v2978_v53 = vsel %vm1033_vm2, %v2977_v9, -inf }
0x1cce   : > { %2979 = vmax.xlane.f32.xlu0 %v2978_v53  ;;  %v5301_v54 = vpop.f32.mrf.mxu1 }
0x1ce4   : > { %2990 = vrot.lane.b32.xlu0 %v6310_v18, %s6740_s7  ;;  %s6743_s7 = smov 40  }
0x1ce8   : > { %3131 = vrot.lane.b32.xlu0 %v6310_v18, %s6741_s15 }
0x1d57   : > { %v2980_v55 = vpop.xlane.xlu0 %2979 }
0x1d58   : > { %v2981_v52 = vsub.f32 %v2977_v9, %v2980_v55 }
0x1d5a   : > { %v2982_v56 = vmul.f32 1.442695, %v2981_v52 }
0x1d5b   : > { %v2991_v57 = vpop.permute.xlu0 %2990 }
0x1d5c   : > { %5637 = vpow2.f32 %v2982_v56  ;;  %v2996_v58 = vsel %vm1099_vm3, %v2991_v57, 0 }
0x1d5d   : > { %5303 = vmatpush3.bf16.msra.mxu0 %v2996_v58 }
0x1d5e   : > { %5314 = vmatprep.subr.bf16.mxu0 %v5765_v1 }
0x1d5f   : > { %v3132_v21 = vpop.permute.xlu0 %3131 }
0x1d69   : > { %v5638_v59 = vpop.eup %5637 }
0x1d6a   : > { %v2984_v60 = vsel %vm1033_vm2, %v5638_v59, 0.0 }
0x1d6b   : > { %2985 = vadd.xlane.f32.xlu1 %v2984_v60 }
0x1d7c   : > { %3133 = vrot.lane.b32.xlu1 %v6310_v18, %s6722_s13 }
0x1df4   : > { %v2986_v0 = vpop.xlane.xlu1 %2985 }
0x1df5   : > { %5639 = vrcp.f32 %v2986_v0 }
0x1df8   : > { %v3134_v10 = vpop.permute.xlu1 %3133 }
0x1df9   : > { %v3139_v15 = vsel %vm1033_vm2, %v3134_v10, 0 }
0x1e02   : > { %v5640_v2 = vpop.eup %5639 }
0x1e03   : > { %v2988_v5 = vmul.f32 %v5640_v2, %v5638_v59 }
0x1e05   : > { %v2989_v6 = vpack.c.bf16 %v2988_v5, %v2988_v5 }
0x1e07   : > { %5305 = vmatmul.mubr.msk.bf16.vlgmr.msra.gmra.mxu0 %vm1033_vm2, %v2989_v6 }
0x1e08   : > { %5315 = vmatpush3.bf16.msra.mxu0 %v3089_v7  ;;  %5316 = vmatprep.mubr.msk.bf16.mxu0 %vm5766_vm0, %v5765_v1 }
0x1e09   : > { %5326 = vmatprep.subr.bf16.mxu0 %v5765_v1 }
0x1e0f   : > { %5317 = vmatmul.mubr.msk.bf16.vlgmr.msra.gmra.mxu0 %vm1033_vm2, %v2925_v8 }
0x1e10   : > { %5328 = vmatprep.mubr.msk.bf16.mxu0 %vm5766_vm0, %v5765_v1 }
0x1ec7   : > { %v3032_v11 = vpop.f32.mrf.mxu0 }
0x1ec8   : > { %v3038_v13 = vpack.c.bf16 %v3032_v11, %v3032_v11 }
0x1ec9   : > { %v5306_v14 = vpop.f32.mrf.mxu0 }
0x1eca   : > { %5311 = vmatmul.mubr.msk.bf16.vlgmr.msra.gmra.mxu1 %vm1033_vm2, %v3038_v13  ;;  %v4831_v13 = vld [vmem:[%s6700_s3 + $0x1c] sm:$0xf] }
0x1ecb   : > { %5321 = vmatpush3.bf16.xpose.msra.mxu1 %v3139_v15  ;;  %v3035_v16 = vpop.f32.mrf.mxu0  ;;  %5322 = vmatprep.mubr.msk.bf16.mxu1 %vm5766_vm0, %v5765_v1  ;;  %v3408_v14 = vsel %vm1099_vm3, %v4831_v13, 0 }
0x1ecc   : > { %5332 = vmatprep.subr.bf16.mxu1 %v5765_v1 }
0x1ecd   : > { %v5307_v17 = vpop.f32.mrf.mxu0 }
0x1ecf   : > { %v6367_v20 = vpop.f32.mrf.mxu0 }
0x1ed1   : > { %v5318_v22 = vpop.f32.mrf.mxu0 }
0x1ed2   : > { %5323 = vmatmul.mubr.msk.bf16.vlgmr.msra.gmra.mxu1 %vm1033_vm2, %v3132_v21 }
0x1ed3   : > { %v3128_v23 = vpop.f32.mrf.mxu0  ;;  %5334 = vmatprep.mubr.msk.bf16.mxu1 %vm5766_vm0, %v5765_v1  ;;  %5333 = vmatpush3.bf16.msra.mxu1 %v3248_v50 }
0x1ed4   : > { %5344 = vmatprep.subr.bf16.mxu1 %v5765_v1 }
0x1ed5   : > { %v5319_v24 = vpop.f32.mrf.mxu0 }
0x1f8a   : > { %v6372_v46 = vpop.f32.mrf.mxu1 }
0x1f8b   : > { %v3126_v7 = vadd.f32 %v6367_v20, %v6372_v46 }
0x1f8c   : > { %v5312_v25 = vpop.f32.mrf.mxu1 }
0x1f8e   : > { %v3082_v61 = vpop.f32.mrf.mxu1 }
0x1f8f   : > { %v4845_v61 = vld [vmem:[%s5827_s8 + $0x1] ss:$0 sm:$0xff] }
0x1f90   : > { %v5313_v26 = vpop.f32.mrf.mxu1 }
0x1f92   : > { %v3175_v27 = vpop.f32.mrf.mxu1 }
0x1f93   : > { %v3181_v28 = vmul.f32 0.35355338, %v3175_v27 }
0x1f94   : > { %v5324_v29 = vpop.f32.mrf.mxu1 }
0x1f95   : > { %v3182_v30 = vadd.f32 %v3181_v28, %v6030_v19 }
0x1f96   : > { %v3178_v31 = vpop.f32.mrf.mxu1 }
0x1f97   : > { %v3183_v32 = vsel %vm1033_vm2, %v3182_v30, -inf }
0x1f98   : > { %3184 = vmax.xlane.f32.xlu0 %v3183_v32  ;;  %v5325_v33 = vpop.f32.mrf.mxu1 }
0x1fae   : > { %3195 = vrot.lane.b32.xlu0 %v6310_v18, %s6742_s11 }
0x1fb2   : > { %3291 = vrot.lane.b32.xlu0 %v6310_v18, %s6721_s23 }
0x2021   : > { %v3185_v34 = vpop.xlane.xlu0 %3184 }
0x2022   : > { %v3186_v3 = vsub.f32 %v3182_v30, %v3185_v34 }
0x2024   : > { %v3187_v36 = vmul.f32 1.442695, %v3186_v3 }
0x2025   : > { %v3196_v37 = vpop.permute.xlu0 %3195 }
0x2026   : > { %5641 = vpow2.f32 %v3187_v36  ;;  %v3201_v38 = vsel %vm1099_vm3, %v3196_v37, 0 }
0x2027   : > { %5327 = vmatpush3.bf16.msra.mxu0 %v3201_v38 }
0x2028   : > { %5338 = vmatprep.subr.bf16.mxu0 %v5765_v1 }
0x2029   : > { %v3292_v48 = vpop.permute.xlu0 %3291 }
0x2033   : > { %v5642_v39 = vpop.eup %5641 }
0x2034   : > { %v3189_v40 = vsel %vm1033_vm2, %v5642_v39, 0.0 }
0x2035   : > { %3190 = vadd.xlane.f32.xlu1 %v3189_v40  ;;  %v5580_v40 = vld [vmem:[%s5852_s6 + $0x10] sm:$0xff]  }
0x2046   : > { %3293 = vrot.lane.b32.xlu1 %v6310_v18, %s6723_s17 }
0x20be   : > { %v3191_v41 = vpop.xlane.xlu1 %3190 }
0x20bf   : > { %5643 = vrcp.f32 %v3191_v41  ;;  %v5582_v41 = vld [vmem:[%s5842_s24 + $0x10] sm:$0xff]  }
0x20c2   : > { %v3294_v44 = vpop.permute.xlu1 %3293 }
0x20c3   : > { %v3299_v47 = vsel %vm1033_vm2, %v3294_v44, 0 }
0x20cc   : > { %v5644_v42 = vpop.eup %5643 }
0x20cd   : > { %v3193_v43 = vmul.f32 %v5644_v42, %v5642_v39  ;;  %v5579_v39 = vld [vmem:[%s5852_s6 + $0x18] sm:$0xff]  }
0x20cf   : > { %v3194_v45 = vpack.c.bf16 %v3193_v43, %v3193_v43 }
0x20d1   : > { %5329 = vmatmul.mubr.msk.bf16.vlgmr.msra.gmra.mxu0 %vm1033_vm2, %v3194_v45 }
0x20d2   : > { %5339 = vmatpush3.bf16.xpose.msra.mxu0 %v3299_v47  ;;  %5340 = vmatprep.mubr.msk.bf16.mxu0 %vm5766_vm0, %v5765_v1  ;;  %v4848_v47 = vld [vmem:[%s5832_s14 + $0x1] ss:$0 sm:$0xff] }
0x20d3   : > { %5350 = vmatprep.subr.bf16.mxu0 %v5765_v1 }
0x20d9   : > { %5341 = vmatmul.mubr.msk.bf16.vlgmr.msra.gmra.mxu0 %vm1033_vm2, %v3292_v48 }
0x20da   : > { %5352 = vmatprep.mubr.msk.bf16.mxu0 %vm5766_vm0, %v5765_v1  ;;  %5351 = vmatpush3.bf16.msra.mxu0 %v3408_v14 }
0x20db   : > { %5364 = vmatprep.subr.bf16.mxu0 %v5765_v1 }
0x2191   : > { %v3237_v9 = vpop.f32.mrf.mxu0 }
0x2192   : > { %v3243_v51 = vpack.c.bf16 %v3237_v9, %v3237_v9 }
0x2193   : > { %v5330_v53 = vpop.f32.mrf.mxu0 }
0x2194   : > { %5335 = vmatmul.mubr.msk.bf16.vlgmr.msra.gmra.mxu1 %vm1033_vm2, %v3243_v51  ;;  %v4864_v51 = vld [vmem:[%s5857_s12 + $0x1] ss:$0 sm:$0xff] }
0x2195   : > { %v3240_v54 = vpop.f32.mrf.mxu0  ;;  %5346 = vmatprep.mubr.msk.bf16.mxu1 %vm5766_vm0, %v5765_v1 }
0x2197   : > { %v5331_v55 = vpop.f32.mrf.mxu0 }
0x2199   : > { %v3335_v52 = vpop.f32.mrf.mxu0 }
0x219a   : > { %v3341_v56 = vmul.f32 0.35355338, %v3335_v52 }
0x219b   : > { %v5342_v57 = vpop.f32.mrf.mxu0 }
0x219c   : > { %v3342_v58 = vadd.f32 %v3341_v56, %v6030_v19 }
0x219d   : > { %v3338_v59 = vpop.f32.mrf.mxu0 }
0x219e   : > { %v3343_v60 = vsel %vm1033_vm2, %v3342_v58, -inf  ;;  %v4855_v59 = vld [vmem:[%s5847_s30 + $0x1] ss:$0 sm:$0xff] }
0x219f   : > { %3344 = vmax.xlane.f32.xlu0 %v3343_v60  ;;  %v5343_v62 = vpop.f32.mrf.mxu0 }
0x21b5   : > { %3355 = vrot.lane.b32.xlu0 %v6310_v18, %s6743_s7 }
0x2228   : > { %v3345_v63 = vpop.xlane.xlu0 %3344 }
0x2229   : > { %v3346_v0 = vsub.f32 %v3342_v58, %v3345_v63 }
0x222b   : > { %v3347_v2 = vmul.f32 1.442695, %v3346_v0 }
0x222c   : > { %v3356_v4 = vpop.permute.xlu0 %3355 }
0x222d   : > { %5645 = vpow2.f32 %v3347_v2  ;;  %v3361_v5 = vsel %vm1099_vm3, %v3356_v4, 0 }
0x222e   : > { %5345 = vmatpush3.bf16.msra.mxu1 %v3361_v5 }
0x222f   : > { %5356 = vmatprep.subr.bf16.mxu1 %v5765_v1 }
0x223a   : > { %v5646_v19 = vpop.eup %5645 }
0x223b   : > { %v3349_v6 = vsel %vm1033_vm2, %v5646_v19, 0.0 }
0x223c   : > { %3350 = vadd.xlane.f32.xlu1 %v3349_v6 }
0x2254   : > { %v3284_v8 = vpop.f32.mrf.mxu1 }
0x2255   : > { %v3290_v18 = vadd.f32 %v3284_v8, %v3126_v7 }
0x2256   : > { %v5336_v10 = vpop.f32.mrf.mxu1 }
0x2257   : > { %v6465_v10 = vld [vmem:[%s6171_s22] ss:$0 sm:$0xff]  ;;  %s6747_s22 = sld [smem:[#allocation24_spill]] }
0x2258   : > { %v3287_v11 = vpop.f32.mrf.mxu1 }
0x225a   : > { %v5337_v15 = vpop.f32.mrf.mxu1 }
0x22c5   : > { %v3351_v16 = vpop.xlane.xlu1 %3350 }
0x22c6   : > { %5647 = vrcp.f32 %v3351_v16 }
0x22d3   : > { %v5648_v17 = vpop.eup %5647 }
0x22d4   : > { %v3353_v21 = vmul.f32 %v5648_v17, %v5646_v19 }
0x22d6   : > { %v3354_v22 = vpack.c.bf16 %v3353_v21, %v3353_v21 }
0x22d8   : > { %5347 = vmatmul.mubr.msk.bf16.vlgmr.msra.gmra.mxu1 %vm1033_vm2, %v3354_v22 }
0x22d9   : > { %5360 = vmatprep.mubr.msk.bf16.mxu1 %vm5766_vm0, %v5765_v1 }
0x2398   : > { %v3397_v20 = vpop.f32.mrf.mxu1 }
0x2399   : > { %v3403_v23 = vpack.c.bf16 %v3397_v20, %v3397_v20 }
0x239a   : > { %v5348_v24 = vpop.f32.mrf.mxu1 }
0x239b   : > { %5353 = vmatmul.mubr.msk.bf16.vlgmr.msra.gmra.mxu0 %vm1033_vm2, %v3403_v23 }
0x239c   : > { %v3400_v46 = vpop.f32.mrf.mxu1  ;;  %5368 = vmatprep.mubr.msk.bf16.mxu0 %vm5766_vm0, %v5765_v1  ;;  %5365 = vmatpush3.bf16.msra.mxu0 %v5579_v39 }
0x239d   : > { %5366 = vmatprep.subr.bf16.mxu0 %v5765_v1 }
0x239e   : > { %v5349_v25 = vpop.f32.mrf.mxu1 }
0x23a0   : > { %5367 = vmatpush3.bf16.msra.mxu0 %v5580_v40 }
0x23a1   : > { %5378 = vmatprep.subr.bf16.mxu0 %v5765_v1 }
0x23a3   : > { %5369 = vmatmul.mubr.msk.bf16.vlgmr.msra.gmra.mxu0 %vm980_vm1, %v6127_v35  ;;  %v4849_v35 = vld [vmem:[%s5837_s19 + $0x1] ss:$0 sm:$0xff] }
0x23a4   : > { %5380 = vmatprep.mubr.msk.bf16.mxu0 %vm5766_vm0, %v5765_v1 }
0x245b   : > { %v3444_v26 = vpop.f32.mrf.mxu0 }
0x245c   : > { %v3450_v27 = vadd.f32 %v3444_v26, %v3290_v18 }
0x245d   : > { %v5354_v28 = vpop.f32.mrf.mxu0 }
0x245e   : > { %v3457_v29 = vadd.f32 %v4845_v61, %v3450_v27 }
0x245f   : > { %v3447_v30 = vpop.f32.mrf.mxu0 }
0x2460   : > { %v3458_v31 = vadd.f32 %v3457_v29, %v6302_v12  ;;  %v5581_v12 = vld [vmem:[%s5842_s24 + $0x18] sm:$0xff]  }
0x2461   : > { %v5355_v32 = vpop.f32.mrf.mxu0  ;;  %5357 = vmatpush3.bf16.msra.mxu1 %v5581_v12 }
0x2462   : > { %v3463_v33 = vsel %vm980_vm1, %v3458_v31, 0.0  ;;  %5358 = vmatprep.subr.bf16.mxu1 %v5765_v1 }
0x2463   : > { %3464 = vadd.xlane.f32.xlu1 %v3463_v33  ;;  %v3618_v53 = vpop.f32.mrf.mxu0 }
0x2464   : > { %v3619_v54 = vadd.f32 %v4864_v51, %v3618_v53 }
0x2465   : > { %5359 = vmatpush3.bf16.msra.mxu1 %v5582_v41  ;;  %v5370_v55 = vpop.f32.mrf.mxu0 }
0x2466   : > { %5372 = vmatprep.subr.bf16.mxu1 %v5765_v1  ;;  %v6443_v52 = vpack.c.bf16 %v3619_v54, %v3619_v54 }
0x2467   : > { %v3621_v56 = vpop.f32.mrf.mxu0 }
0x2468   : > { %v3637_v57 = vsel %vm1033_vm2, %v6443_v52, 0 }
0x2469   : > { %v5371_v58 = vpop.f32.mrf.mxu0 }
0x24ec   : > { %v3465_v34 = vpop.xlane.xlu1 %3464 }
0x24ed   : > { %v3466_v3 = vmul.f32 0.03125, %v3465_v34 }
0x24ef   : > { %v3467_v36 = vsub.f32 %v3458_v31, %v3466_v3 }
0x24f1   : > { %v3468_v37 = vmul.f32 %v3467_v36, %v3467_v36 }
0x24f3   : > { %v3469_v38 = vsel %vm980_vm1, %v3468_v37, 0.0 }
0x24f4   : > { %3470 = vadd.xlane.f32.xlu1 %v3469_v38 }
0x2505   : > { %3746 = vrot.lane.b32.xlu1 %v6443_v52, %s6716_s5 }
0x257d   : > { %v3471_v42 = vpop.xlane.xlu1 %3470 }
0x257e   : > { %v3472_v43 = vmul.f32 0.03125, %v3471_v42 }
0x2580   : > { %v3473_v44 = vadd.f32 1e-05, %v3472_v43 }
0x2581   : > { %v3747_v62 = vpop.permute.xlu1 %3746 }
0x2582   : > { %5649 = vrsqrt.f32 %v3473_v44  ;;  %v3752_v4 = vsel %vm1033_vm2, %v3747_v62, 0  ;;  %v4868_v44 = vld [vmem:[%s6720_s9 + $0x10] sm:$0xf] }
0x258f   : > { %v5650_v45 = vpop.eup %5649 }
0x2590   : > { %v3475_v48 = vmul.f32 %v5650_v45, %v3467_v36  ;;  %v3907_v45 = vsel %vm1099_vm3, %v4868_v44, 0 }
0x2592   : > { %v3482_v49 = vmul.f32 %v4848_v47, %v3475_v48  ;;  %v4869_v47 = vld [vmem:[%s6720_s9 + $0x14] sm:$0xf] }
0x2593   : > { %v3861_v48 = vsel %vm1099_vm3, %v4869_v47, 0 }
0x2594   : > { %v6435_v50 = vadd.f32 %v4849_v35, %v3482_v49 }
0x2596   : > { %v3497_v9 = vpack.c.bf16 %v6435_v50, %v6435_v50 }
0x2598   : > { %5361 = vmatmul.mubr.msk.bf16.vlgmr.msra.gmra.mxu1 %vm980_vm1, %v3497_v9 }
0x2599   : > { %5374 = vmatprep.mubr.msk.bf16.mxu1 %vm5766_vm0, %v5765_v1  ;;  %5373 = vmatpush3.bf16.xpose.msra.mxu1 %v3637_v57 }
0x259a   : > { %5384 = vmatprep.subr.bf16.mxu1 %v5765_v1 }
0x2658   : > { %v3553_v60 = vpop.f32.mrf.mxu1 }
0x2659   : > { %v3554_v63 = vadd.f32 %v4855_v59, %v3553_v60 }
0x265a   : > { %v5362_v0 = vpop.f32.mrf.mxu1 }
0x265b   : > { %v6451_v2 = vpack.c.bf16 %v3554_v63, %v3554_v63 }
0x265c   : > { %v3556_v5 = vpop.f32.mrf.mxu1 }
0x265d   : > { %3744 = vrot.lane.b32.xlu0 %v6451_v2, %s6716_s5  ;;  %5375 = vmatmul.mubr.msk.bf16.vlgmr.msra.gmra.mxu1 %vm1033_vm2, %v6451_v2  ;;  %s6748_s5 = sld [smem:[#allocation29_spill]] }
0x265e   : > { %v5363_v19 = vpop.f32.mrf.mxu1  ;;  %5385 = vmatpush3.bf16.xpose.msra.mxu1 %v3752_v4  ;;  %5386 = vmatprep.mubr.msk.bf16.mxu1 %vm5766_vm0, %v5765_v1 }
0x265f   : > { %5396 = vmatprep.subr.bf16.mxu1 %v5765_v1 }
0x2663   : > { %s4936_s7 = sshll.u32 %s6748_s5, 7 }
0x26cf   : > { %v3745_v6 = vpop.permute.xlu0 %3744 }
0x26d0   : > { %5387 = vmatmul.mubr.msk.bf16.vlgmr.msra.gmra.mxu1 %vm1033_vm2, %v3745_v6 }
0x26d1   : > { %5398 = vmatprep.mubr.msk.bf16.mxu1 %vm5766_vm0, %v5765_v1  ;;  %5397 = vmatpush3.bf16.msra.mxu1 %v3861_v48 }
0x26d2   : > { %5408 = vmatprep.subr.bf16.mxu1 %v5765_v1 }
0x271d   : > { %v3673_v7 = vpop.f32.mrf.mxu1 }
0x271e   : > { %v3679_v8 = vmul.f32 0.35355338, %v3673_v7 }
0x271f   : > { %v5376_v18 = vpop.f32.mrf.mxu1 }
0x2720   : > { %v3680_v11 = vadd.f32 %v6465_v10, %v3679_v8 }
0x2721   : > { %v3676_v13 = vpop.f32.mrf.mxu1 }
0x2722   : > { %v3681_v14 = vsel %vm1033_vm2, %v3680_v11, -inf }
0x2723   : > { %3682 = vmax.xlane.f32.xlu0 %v3681_v14  ;;  %v5377_v15 = vpop.f32.mrf.mxu1 }
0x2790   : > { %v3788_v16 = vpop.f32.mrf.mxu1 }
0x2791   : > { %v3794_v17 = vmul.f32 0.35355338, %v3788_v16 }
0x2792   : > { %v5388_v21 = vpop.f32.mrf.mxu1 }
0x2793   : > { %v3795_v22 = vadd.f32 %v6465_v10, %v3794_v17 }
0x2794   : > { %v3791_v20 = vpop.f32.mrf.mxu1 }
0x2795   : > { %v3796_v23 = vsel %vm1033_vm2, %v3795_v22, -inf }
0x2796   : > { %3797 = vmax.xlane.f32.xlu1 %v3796_v23  ;;  %v5389_v24 = vpop.f32.mrf.mxu1 }
0x27a7   : > { %3808 = vrot.lane.b32.xlu1 %v6443_v52, %s6718_s2  ;;  %s6749_s2 = sld [smem:[#allocation25_spill]] }
0x27ab   : > { %3949 = vrot.lane.b32.xlu1 %v6451_v2, %s6741_s15 }
0x27ac   : > { %v3683_v46 = vpop.xlane.xlu0 %3682 }
0x27ad   : > { %v3684_v25 = vsub.f32 %v3680_v11, %v3683_v46  ;;  %s6598_s3 = scalar_lea.hbm %s6749_s2, %s4936_s7 }
0x27af   : > { %v3685_v61 = vmul.f32 1.442695, %v3684_v25 }
0x27b1   : > { %5651 = vpow2.f32 %v3685_v61 }
0x27be   : > { %v5652_v26 = vpop.eup %5651 }
0x27bf   : > { %v3687_v27 = vsel %vm1033_vm2, %v5652_v26, 0.0 }
0x27c0   : > { %3688 = vadd.xlane.f32.xlu0 %v3687_v27 }
0x281f   : > { %v3798_v28 = vpop.xlane.xlu1 %3797 }
0x2820   : > { %v3799_v29 = vsub.f32 %v3795_v22, %v3798_v28 }
0x2822   : > { %v3800_v30 = vmul.f32 1.442695, %v3799_v29 }
0x2823   : > { %v3809_v39 = vpop.permute.xlu1 %3808 }
0x2824   : > { %5653 = vpow2.f32 %v3800_v30  ;;  %v3814_v12 = vsel %vm1099_vm3, %v3809_v39, 0 }
0x2827   : > { %v3950_v62 = vpop.permute.xlu1 %3949 }
0x2831   : > { %v5654_v31 = vpop.eup %5653 }
0x2832   : > { %v3802_v32 = vsel %vm1033_vm2, %v5654_v31, 0.0 }
0x2833   : > { %3803 = vadd.xlane.f32.xlu0 %v3802_v32  ;;  %v4870_v32 = vld [vmem:[%s6720_s9 + $0x18] sm:$0xf] }
0x2849   : > { %3694 = vrot.lane.b32.xlu0 %v6443_v52, %s6719_s16  ;;  %v3689_v33 = vpop.xlane.xlu0 %3688  ;;  %s926_s16 = sand.u32 1, %s5726_s10  }
0x284a   : > { %5655 = vrcp.f32 %v3689_v33  ;;  %v4066_v33 = vsel %vm1099_vm3, %v4870_v32, 0  ;;  %v4888_v32 = vld [vmem:[%s6729_s28 + $0x1] ss:$0 sm:$0xff]  ;;  %s4757_s11 = sshll.u32 %s926_s16, 3 }
0x284d   : > { %3951 = vrot.lane.b32.xlu0 %v6443_v52, %s6741_s15 }
0x2857   : > { %v5656_v34 = vpop.eup %5655 }
0x2858   : > { %v3691_v36 = vmul.f32 %v5656_v34, %v5652_v26 }
0x285a   : > { %v3692_v40 = vpack.c.bf16 %v3691_v36, %v3691_v36 }
0x28bc   : > { %v3804_v3 = vpop.xlane.xlu0 %3803 }
0x28bd   : > { %5657 = vrcp.f32 %v3804_v3 }
0x28c0   : > { %v3695_v37 = vpop.permute.xlu0 %3694 }
0x28c1   : > { %v3700_v38 = vsel %vm1099_vm3, %v3695_v37, 0 }
0x28c2   : > { %5379 = vmatpush3.bf16.msra.mxu0 %v3700_v38 }
0x28c3   : > { %5390 = vmatprep.subr.bf16.mxu0 %v5765_v1 }
0x28c4   : > { %v3952_v54 = vpop.permute.xlu0 %3951 }
0x28c5   : > { %5381 = vmatmul.mubr.msk.bf16.vlgmr.msra.gmra.mxu0 %vm1033_vm2, %v3692_v40  ;;  %v3957_v58 = vsel %vm1033_vm2, %v3952_v54, 0  ;;  %v4871_v54 = vld [vmem:[%s6720_s9 + $0x1c] sm:$0xf] }
0x28c6   : > { %5391 = vmatpush3.bf16.msra.mxu0 %v3814_v12  ;;  %5392 = vmatprep.mubr.msk.bf16.mxu0 %vm5766_vm0, %v5765_v1 }
0x28c7   : > { %5402 = vmatprep.subr.bf16.mxu0 %v5765_v1 }
0x28ca   : > { %v5658_v41 = vpop.eup %5657 }
0x28cb   : > { %v3806_v42 = vmul.f32 %v5658_v41, %v5654_v31 }
0x28cd   : > { %v3807_v43 = vpack.c.bf16 %v3806_v42, %v3806_v42 }
0x28cf   : > { %5393 = vmatmul.mubr.msk.bf16.vlgmr.msra.gmra.mxu0 %vm1033_vm2, %v3807_v43 }
0x28d0   : > { %5404 = vmatprep.mubr.msk.bf16.mxu0 %vm5766_vm0, %v5765_v1  ;;  %5403 = vmatpush3.bf16.msra.mxu0 %v3907_v45 }
0x28d1   : > { %5414 = vmatprep.subr.bf16.mxu0 %v5765_v1 }
0x2985   : > { %v3736_v35 = vpop.f32.mrf.mxu0 }
0x2986   : > { %v3742_v49 = vpack.c.bf16 %v3736_v35, %v3736_v35 }
0x2987   : > { %v5382_v9 = vpop.f32.mrf.mxu0 }
0x2988   : > { %5405 = vmatmul.mubr.msk.bf16.vlgmr.msra.gmra.mxu0 %vm1033_vm2, %v3742_v49 }
0x2989   : > { %v3739_v51 = vpop.f32.mrf.mxu0  ;;  %5416 = vmatprep.mubr.msk.bf16.mxu0 %vm5766_vm0, %v5765_v1 }
0x298b   : > { %v5383_v53 = vpop.f32.mrf.mxu0 }
0x298f   : > { %v3850_v55 = vpop.f32.mrf.mxu0 }
0x2990   : > { %v3856_v56 = vpack.c.bf16 %v3850_v55, %v3850_v55  ;;  %v4226_v55 = vsel %vm1099_vm3, %v4871_v54, 0 }
0x2991   : > { %v5394_v57 = vpop.f32.mrf.mxu0 }
0x2992   : > { %5399 = vmatmul.mubr.msk.bf16.vlgmr.msra.gmra.mxu1 %vm1033_vm2, %v3856_v56 }
0x2993   : > { %5409 = vmatpush3.bf16.xpose.msra.mxu1 %v3957_v58  ;;  %v3853_v59 = vpop.f32.mrf.mxu0  ;;  %5410 = vmatprep.mubr.msk.bf16.mxu1 %vm5766_vm0, %v5765_v1 }
0x2994   : > { %5420 = vmatprep.subr.bf16.mxu1 %v5765_v1 }
0x2995   : > { %v5395_v60 = vpop.f32.mrf.mxu0 }
0x299a   : > { %5411 = vmatmul.mubr.msk.bf16.vlgmr.msra.gmra.mxu1 %vm1033_vm2, %v3950_v62 }
0x299b   : > { %5422 = vmatprep.mubr.msk.bf16.mxu1 %vm5766_vm0, %v5765_v1  ;;  %5421 = vmatpush3.bf16.msra.mxu1 %v4066_v33 }
0x299c   : > { %5432 = vmatprep.subr.bf16.mxu1 %v5765_v1 }
0x2a48   : > { %v3943_v63 = vpop.f32.mrf.mxu0 }
0x2a4a   : > { %v5406_v0 = vpop.f32.mrf.mxu0 }
0x2a4c   : > { %v3946_v4 = vpop.f32.mrf.mxu0 }
0x2a4e   : > { %v5407_v5 = vpop.f32.mrf.mxu0 }
0x2a52   : > { %v3897_v19 = vpop.f32.mrf.mxu1 }
0x2a53   : > { %v6508_v6 = vadd.f32 %v3943_v63, %v3897_v19 }
0x2a54   : > { %v5400_v7 = vpop.f32.mrf.mxu1 }
0x2a56   : > { %v3900_v8 = vpop.f32.mrf.mxu1 }
0x2a58   : > { %v5401_v18 = vpop.f32.mrf.mxu1 }
0x2a5a   : > { %v3993_v11 = vpop.f32.mrf.mxu1 }
0x2a5b   : > { %v3999_v13 = vmul.f32 0.35355338, %v3993_v11 }
0x2a5c   : > { %v5412_v14 = vpop.f32.mrf.mxu1 }
0x2a5d   : > { %v4000_v15 = vadd.f32 %v6465_v10, %v3999_v13 }
0x2a5e   : > { %v3996_v16 = vpop.f32.mrf.mxu1 }
0x2a5f   : > { %v4001_v17 = vsel %vm1033_vm2, %v4000_v15, -inf }
0x2a60   : > { %4002 = vmax.xlane.f32.xlu0 %v4001_v17  ;;  %v5413_v21 = vpop.f32.mrf.mxu1 }
0x2a76   : > { %4013 = vrot.lane.b32.xlu0 %v6443_v52, %s6722_s13  ;;  %s6744_s13 = sld [smem:[#allocation23_spill]] }
0x2a7a   : > { %4109 = vrot.lane.b32.xlu0 %v6451_v2, %s6721_s23 }
0x2ae9   : > { %v4003_v22 = vpop.xlane.xlu0 %4002 }
0x2aea   : > { %v4004_v20 = vsub.f32 %v4000_v15, %v4003_v22 }
0x2aec   : > { %v4005_v23 = vmul.f32 1.442695, %v4004_v20 }
0x2aed   : > { %v4014_v24 = vpop.permute.xlu0 %4013 }
0x2aee   : > { %5659 = vpow2.f32 %v4005_v23  ;;  %v4019_v46 = vsel %vm1099_vm3, %v4014_v24, 0  ;;  %v5583_v24 = vld [vmem:[%s6726_s18 + $0x18] sm:$0xff]  }
0x2aef   : > { %5415 = vmatpush3.bf16.msra.mxu0 %v4019_v46  ;;  %v5584_v46 = vld [vmem:[%s6726_s18 + $0x10] sm:$0xff]  }
0x2af0   : > { %5426 = vmatprep.subr.bf16.mxu0 %v5765_v1 }
0x2af1   : > { %v4110_v31 = vpop.permute.xlu0 %4109 }
0x2afb   : > { %v5660_v25 = vpop.eup %5659 }
0x2afc   : > { %v4007_v61 = vsel %vm1033_vm2, %v5660_v25, 0.0 }
0x2afd   : > { %4008 = vadd.xlane.f32.xlu1 %v4007_v61  ;;  %v5587_v61 = vld [vmem:[%s6727_s1 + $0x68] sm:$0xff]  }
0x2b0e   : > { %4111 = vrot.lane.b32.xlu1 %v6443_v52, %s6721_s23  ;;  %s6746_s23 = sld [smem:[#allocation22_spill]] }
0x2b86   : > { %v4009_v26 = vpop.xlane.xlu1 %4008 }
0x2b87   : > { %5661 = vrcp.f32 %v4009_v26  ;;  %v5588_v26 = vld [vmem:[%s6727_s1 + $0x60] sm:$0xff]  }
0x2b8a   : > { %v4112_v28 = vpop.permute.xlu1 %4111 }
0x2b8b   : > { %v4117_v30 = vsel %vm1033_vm2, %v4112_v28, 0 }
0x2b94   : > { %v5662_v2 = vpop.eup %5661 }
0x2b95   : > { %v4011_v27 = vmul.f32 %v5662_v2, %v5660_v25  ;;  %v5586_v25 = vld [vmem:[%s6727_s1 + $0x70] sm:$0xff]   ;;  %v5589_v2 = vld [vmem:[%s6727_s1 + $0x58] sm:$0xff]  }
0x2b97   : > { %v4012_v29 = vpack.c.bf16 %v4011_v27, %v4011_v27  ;;  %v5590_v27 = vld [vmem:[%s6727_s1 + $0x50] sm:$0xff]  }
0x2b99   : > { %5417 = vmatmul.mubr.msk.bf16.vlgmr.msra.gmra.mxu0 %vm1033_vm2, %v4012_v29 }
0x2b9a   : > { %5427 = vmatpush3.bf16.xpose.msra.mxu0 %v4117_v30  ;;  %5428 = vmatprep.mubr.msk.bf16.mxu0 %vm5766_vm0, %v5765_v1 }
0x2b9b   : > { %5438 = vmatprep.subr.bf16.mxu0 %v5765_v1 }
0x2ba1   : > { %5429 = vmatmul.mubr.msk.bf16.vlgmr.msra.gmra.mxu0 %vm1033_vm2, %v4110_v31 }
0x2ba2   : > { %5440 = vmatprep.mubr.msk.bf16.mxu0 %vm5766_vm0, %v5765_v1  ;;  %5439 = vmatpush3.bf16.msra.mxu0 %v4226_v55 }
0x2ba3   : > { %5452 = vmatprep.subr.bf16.mxu0 %v5765_v1 }
0x2c59   : > { %v4055_v34 = vpop.f32.mrf.mxu0 }
0x2c5a   : > { %v4061_v3 = vpack.c.bf16 %v4055_v34, %v4055_v34  ;;  %v4889_v34 = vld [vmem:[%s6731_s4 + $0x1] ss:$0 sm:$0xff] }
0x2c5b   : > { %v5418_v36 = vpop.f32.mrf.mxu0 }
0x2c5c   : > { %5423 = vmatmul.mubr.msk.bf16.vlgmr.msra.gmra.mxu1 %vm1033_vm2, %v4061_v3 }
0x2c5d   : > { %v4058_v37 = vpop.f32.mrf.mxu0  ;;  %5434 = vmatprep.mubr.msk.bf16.mxu1 %vm5766_vm0, %v5765_v1 }
0x2c5f   : > { %v5419_v38 = vpop.f32.mrf.mxu0 }
0x2c60   : > { %v5591_v38 = vld [vmem:[%s6727_s1 + $0x48] sm:$0xff]  }
0x2c61   : > { %v4153_v39 = vpop.f32.mrf.mxu0 }
0x2c62   : > { %v4159_v40 = vmul.f32 0.35355338, %v4153_v39  ;;  %v5592_v39 = vld [vmem:[%s6727_s1 + $0x40] sm:$0xff]  }
0x2c63   : > { %v5430_v12 = vpop.f32.mrf.mxu0 }
0x2c64   : > { %v4160_v41 = vadd.f32 %v6465_v10, %v4159_v40  ;;  %v4895_v40 = vld [vmem:[%s6733_s0 + $0x1] ss:$0 sm:$0xff]  ;;  %s928_s0 = scalar_lea.vmem [#allocation2], %s4757_s11 }
0x2c65   : > { %v4156_v42 = vpop.f32.mrf.mxu0 }
0x2c66   : > { %v4161_v43 = vsel %vm1033_vm2, %v4160_v41, -inf }
0x2c67   : > { %4162 = vmax.xlane.f32.xlu1 %v4161_v43  ;;  %v5431_v44 = vpop.f32.mrf.mxu0 }
0x2cf0   : > { %v4163_v45 = vpop.xlane.xlu1 %4162 }
0x2cf1   : > { %v4164_v47 = vsub.f32 %v4160_v41, %v4163_v45 }
0x2cf3   : > { %v4165_v48 = vmul.f32 1.442695, %v4164_v47 }
0x2cf5   : > { %5663 = vpow2.f32 %v4165_v48  ;;  %v4916_v48 = vld [vmem:[%s6734_s27 + $0x1] ss:$0 sm:$0xff] }
0x2d02   : > { %v5664_v35 = vpop.eup %5663 }
0x2d03   : > { %v4167_v49 = vsel %vm1033_vm2, %v5664_v35, 0.0 }
0x2d04   : > { %4168 = vadd.xlane.f32.xlu0 %v4167_v49 }
0x2d1a   : > { %4173 = vrot.lane.b32.xlu0 %v6443_v52, %s6723_s17  ;;  %s6745_s17 = sld [smem:[#allocation21_spill]] }
0x2d1c   : > { %v4102_v9 = vpop.f32.mrf.mxu1 }
0x2d1d   : > { %v4108_v10 = vadd.f32 %v4102_v9, %v6508_v6  ;;  %v4885_v6 = vld [vmem:[%s6724_s26 + $0x1] ss:$0 sm:$0xff] }
0x2d1e   : > { %v5424_v51 = vpop.f32.mrf.mxu1 }
0x2d20   : > { %v4105_v53 = vpop.f32.mrf.mxu1 }
0x2d22   : > { %v5425_v56 = vpop.f32.mrf.mxu1 }
0x2d8d   : > { %v4169_v57 = vpop.xlane.xlu0 %4168 }
0x2d8e   : > { %5665 = vrcp.f32 %v4169_v57 }
0x2d91   : > { %v4174_v58 = vpop.permute.xlu0 %4173 }
0x2d92   : > { %v4179_v59 = vsel %vm1099_vm3, %v4174_v58, 0 }
0x2d93   : > { %5433 = vmatpush3.bf16.msra.mxu1 %v4179_v59 }
0x2d94   : > { %5444 = vmatprep.subr.bf16.mxu1 %v5765_v1 }
0x2d9b   : > { %v5666_v52 = vpop.eup %5665 }
0x2d9c   : > { %v4171_v60 = vmul.f32 %v5666_v52, %v5664_v35 }
0x2d9e   : > { %v4172_v62 = vpack.c.bf16 %v4171_v60, %v4171_v60 }
0x2da0   : > { %5435 = vmatmul.mubr.msk.bf16.vlgmr.msra.gmra.mxu1 %vm1033_vm2, %v4172_v62 }
0x2da1   : > { %5448 = vmatprep.mubr.msk.bf16.mxu1 %vm5766_vm0, %v5765_v1  ;;  %5445 = vmatpush3.bf16.msra.mxu1 %v5583_v24 }
0x2da2   : > { %5446 = vmatprep.subr.bf16.mxu1 %v5765_v1 }
0x2da5   : > { %5447 = vmatpush3.bf16.msra.mxu1 %v5584_v46  ;;  %v4930_v46 = vld [vmem:[%s6746_s23] ss:$0 sm:$0xff] }
0x2da6   : > { %5472 = vmatprep.subr.bf16.mxu1 %v5765_v1 }
0x2e60   : > { %v4215_v63 = vpop.f32.mrf.mxu1 }
0x2e61   : > { %v4221_v0 = vpack.c.bf16 %v4215_v63, %v4215_v63 }
0x2e62   : > { %v5436_v4 = vpop.f32.mrf.mxu1 }
0x2e63   : > { %5441 = vmatmul.mubr.msk.bf16.vlgmr.msra.gmra.mxu0 %vm1033_vm2, %v4221_v0  ;;  %v4927_v0 = vld [vmem:[%s6736_s21 + $0x1] ss:$0 sm:$0xff] }
0x2e64   : > { %v4218_v5 = vpop.f32.mrf.mxu1  ;;  %5468 = vmatprep.mubr.msk.bf16.mxu0 %vm5766_vm0, %v5765_v1 }
0x2e65   : > { %v4928_v5 = vld [vmem:[%s6738_s20 + $0x1] ss:$0 sm:$0xff] }
0x2e66   : > { %v5437_v19 = vpop.f32.mrf.mxu1 }
0x2f23   : > { %v4262_v7 = vpop.f32.mrf.mxu0 }
0x2f24   : > { %v4268_v8 = vadd.f32 %v4262_v7, %v4108_v10 }
0x2f25   : > { %v5442_v18 = vpop.f32.mrf.mxu0 }
0x2f26   : > { %v4275_v11 = vadd.f32 %v4885_v6, %v4268_v8 }
0x2f27   : > { %v4265_v13 = vpop.f32.mrf.mxu0 }
0x2f28   : > { %v4276_v14 = vadd.f32 %v4275_v11, %v6435_v50  ;;  %v5585_v50 = vld [vmem:[%s6727_s1 + $0x78] sm:$0xff]   ;;  %s4635_s1 = sshll.u32 %s928_s0, 4  ;;  %s6600_s1 = int_to_ptr.vmem [resolvable:$true] %s4635_s1 }
0x2f29   : > { %v5443_v15 = vpop.f32.mrf.mxu0  ;;  %5453 = vmatpush3.bf16.msra.mxu0 %v5585_v50  ;;  %s5674_s23 = scalar_lea.vmem %s6600_s1, 128 }
0x2f2a   : > { %v4281_v16 = vsel %vm980_vm1, %v4276_v14, 0.0  ;;  %5454 = vmatprep.subr.bf16.mxu0 %v5765_v1  ;;  %v5593_v15 = vld [vmem:[%s6744_s13 + $0x8] sm:$0xff]   ;;  %p5675_p11 = scmp.ne.s32.totalorder %s6600_s1, %s5674_s23 }
0x2f2b   : > { %4282 = vadd.xlane.f32.xlu1 %v4281_v16  ;;  %v5594_v16 = vld [vmem:[%s6744_s13] sm:$0xff]  }
0x2f2c   : > { %p5676_p12 = pnand %p5675_p11, %p5972_p5 }
0x2f2d   : > { %5455 = vmatpush3.bf16.msra.mxu0 %v5586_v25 }
0x2f2e   : > { %5456 = vmatprep.subr.bf16.mxu0 %v5765_v1  ;;  %p5677_p13 = pneg %p5676_p12 }
0x2f31   : > { %5457 = vmatpush3.bf16.msra.mxu0 %v5587_v61 }
0x2f32   : > { %5458 = vmatprep.subr.bf16.mxu0 %v5765_v1 }
0x2f35   : > { %5459 = vmatpush3.bf16.msra.mxu0 %v5588_v26 }
0x2f36   : > { %5460 = vmatprep.subr.bf16.mxu0 %v5765_v1 }
0x2f39   : > { %5461 = vmatpush3.bf16.msra.mxu0 %v5589_v2 }
0x2f3a   : > { %5462 = vmatprep.subr.bf16.mxu0 %v5765_v1 }
0x2f3d   : > { %5463 = vmatpush3.bf16.msra.mxu0 %v5590_v27 }
0x2f3e   : > { %5464 = vmatprep.subr.bf16.mxu0 %v5765_v1 }
0x2f41   : > { %5465 = vmatpush3.bf16.msra.mxu0 %v5591_v38 }
0x2f42   : > { %5466 = vmatprep.subr.bf16.mxu0 %v5765_v1 }
0x2f45   : > { %5467 = vmatpush3.bf16.msra.mxu0 %v5592_v39 }
0x2fb4   : > { %v4283_v17 = vpop.xlane.xlu1 %4282 }
0x2fb5   : > { %v4284_v21 = vmul.f32 0.03125, %v4283_v17 }
0x2fb7   : > { %v4285_v22 = vsub.f32 %v4276_v14, %v4284_v21 }
0x2fb9   : > { %v4286_v20 = vmul.f32 %v4285_v22, %v4285_v22 }
0x2fbb   : > { %v4287_v23 = vsel %vm980_vm1, %v4286_v20, 0.0 }
0x2fbc   : > { %4288 = vadd.xlane.f32.xlu1 %v4287_v23  ;;  %v4929_v23 = vld [vmem:[%s6745_s17] ss:$0 sm:$0xff]  ;;  %s4622_s17 = scalar_lea.sflag [#allocation3], %s926_s16 }
0x3045   : > { %v4289_v28 = vpop.xlane.xlu1 %4288 }
0x3046   : > { %v4290_v29 = vmul.f32 0.03125, %v4289_v28 }
0x3048   : > { %v4291_v30 = vadd.f32 1e-05, %v4290_v29 }
0x304a   : > { %5667 = vrsqrt.f32 %v4291_v30 }
0x3057   : > { %v5668_v31 = vpop.eup %5667 }
0x3058   : > { %v4293_v33 = vmul.f32 %v5668_v31, %v4285_v22 }
0x305a   : > { %v4300_v3 = vmul.f32 %v4888_v32, %v4293_v33 }
0x305c   : > { %v4307_v36 = vadd.f32 %v4889_v34, %v4300_v3 }
0x305e   : > { %v4315_v37 = vpack.c.bf16 %v4307_v36, %v4307_v36 }
0x3060   : > { %5449 = vmatmul.mubr.msk.bf16.vlgmr.msra.gmra.mxu1 %vm980_vm1, %v4315_v37 }
0x3061   : > { %5476 = vmatprep.mubr.msk.bf16.mxu1 %vm5766_vm0, %v5765_v1  ;;  %5473 = vmatpush3.bf16.msra.mxu1 %v5593_v15 }
0x3062   : > { %5474 = vmatprep.subr.bf16.mxu1 %v5765_v1  ;;  %v4931_v1 = vld [vmem:[%s6747_s22] ss:$0 sm:$0xff]  ;;  %s5778_s22 = smov [#allocation2]  }
0x3063   : > { %s5678_s5 = sshll.u32 %s5778_s22, 4  ;;  %s5679_s5 = int_to_ptr.vmem [resolvable:$false] %s5678_s5 }
0x3064   : > { %s5680_s11 = scalar_lea.vmem %s5679_s5, 256  ;;  %p5681_p0 = scmp.lt.s32.totalorder %s6600_s1, %s5679_s5 }
0x3065   : > { %5475 = vmatpush3.bf16.msra.mxu1 %v5594_v16  ;;  %p5682_p1 = scmp.lt.s32.totalorder %s5680_s11, %s5674_s23 }
0x3067   : > { %p5683_p2 = por %p5682_p1, %p5681_p0 }
0x3069   : > { %p5684_p3 = pnand %p5683_p2, %p5677_p13 }
0x3120   : > { %v4371_v12 = vpop.f32.mrf.mxu1 }
0x3121   : > { %v4372_v41 = vadd.f32 %v4895_v40, %v4371_v12 }
0x3122   : > { %v5450_v42 = vpop.f32.mrf.mxu1 }
0x3123   : > { %v4377_v43 = vmax.f32 %v4372_v41, 0.0 }
0x3124   : > { %v4374_v44 = vpop.f32.mrf.mxu1 }
0x3125   : > { %v4397_v45 = vpack.c.bf16 %v4377_v43, %v4377_v43 }
0x3126   : > { %v5451_v47 = vpop.f32.mrf.mxu1 }
0x3127   : > { %5469 = vmatmul.mubr.bf16.vlgmr.msra.gmra.mxu0 %v4397_v45 }
0x31e7   : > { %v4486_v35 = vpop.f32.mrf.mxu0 }
0x31e8   : > { %v4487_v49 = vadd.f32 %v4916_v48, %v4486_v35 }
0x31e9   : > { %v5470_v9 = vpop.f32.mrf.mxu0 }
0x31ea   : > { %v4492_v10 = vadd.f32 %v4487_v49, %v4307_v36 }
0x31eb   : > { %v4489_v51 = vpop.f32.mrf.mxu0 }
0x31ec   : > { %v4497_v53 = vsel %vm980_vm1, %v4492_v10, 0.0 }
0x31ed   : > { %4498 = vadd.xlane.f32.xlu1 %v4497_v53  ;;  %v5471_v54 = vpop.f32.mrf.mxu0 }
0x3276   : > { %v4499_v55 = vpop.xlane.xlu1 %4498 }
0x3277   : > { %v4500_v56 = vmul.f32 0.03125, %v4499_v55 }
0x3279   : > { %v4501_v57 = vsub.f32 %v4492_v10, %v4500_v56 }
0x327b   : > { %v4502_v58 = vmul.f32 %v4501_v57, %v4501_v57 }
0x327d   : > { %v4503_v59 = vsel %vm980_vm1, %v4502_v58, 0.0 }
0x327e   : > { %4504 = vadd.xlane.f32.xlu1 %v4503_v59 }
0x3307   : > { %v4505_v52 = vpop.xlane.xlu1 %4504 }
0x3308   : > { %v4506_v60 = vmul.f32 0.03125, %v4505_v52 }
0x330a   : > { %v4507_v62 = vadd.f32 1e-05, %v4506_v60 }
0x330c   : > { %5669 = vrsqrt.f32 %v4507_v62 }
0x3319   : > { %v5670_v63 = vpop.eup %5669 }
0x331a   : > { %v4509_v4 = vmul.f32 %v5670_v63, %v4501_v57 }
0x331c   : > { %v4516_v19 = vmul.f32 %v4927_v0, %v4509_v4 }
0x331e   : > { %v4523_v6 = vadd.f32 %v4928_v5, %v4516_v19 }
0x3320   : > { %v4526_v7 = vsel %vm980_vm1, %v4523_v6, 0.0 }
0x3321   : > { %4527 = vadd.xlane.f32.xlu1 %v4526_v7 }
0x33aa   : > { %v4528_v8 = vpop.xlane.xlu1 %4527 }
0x33ab   : > { %v4529_v18 = vmul.f32 0.03125, %v4528_v8 }
0x33ad   : > { %v4530_v11 = vsub.f32 %v4523_v6, %v4529_v18 }
0x33af   : > { %v4531_v13 = vmul.f32 %v4530_v11, %v4530_v11 }
0x33b1   : > { %v4532_v14 = vsel %vm980_vm1, %v4531_v13, 0.0 }
0x33b2   : > { %4533 = vadd.xlane.f32.xlu1 %v4532_v14 }
0x343b   : > { %v4534_v17 = vpop.xlane.xlu1 %4533 }
0x343c   : > { %v4535_v21 = vmul.f32 0.03125, %v4534_v17 }
0x343e   : > { %v4536_v22 = vadd.f32 1e-05, %v4535_v21 }
0x3440   : > { %5671 = vrsqrt.f32 %v4536_v22 }
0x344d   : > { %v5672_v20 = vpop.eup %5671 }
0x344e   : > { %v4538_v24 = vmul.f32 %v5672_v20, %v4530_v11 }
0x3450   : > { %v4545_v50 = vmul.f32 %v4929_v23, %v4538_v24 }
0x3452   : > { %v4552_v25 = vadd.f32 %v4930_v46, %v4545_v50 }
0x3454   : > { %v4558_v61 = vpack.c.bf16 %v4552_v25, %v4552_v25 }
0x3456   : > { %5477 = vmatmul.mubr.msk.bf16.vlgmr.msra.gmra.mxu1 %vm980_vm1, %v4558_v61 }
0x3516   : > { %v4614_v26 = vpop.f32.mrf.mxu1 }
0x3517   : > { %v4615_v2 = vadd.f32 %v4931_v1, %v4614_v26 }
0x3518   : > { %v5478_v27 = vpop.f32.mrf.mxu1 }
0x3519   : > { %4620 = vst [vmem:[%s928_s0] sm:$0xff] %v4615_v2 }
0x351a   : > { %v4617_v28 = vpop.f32.mrf.mxu1 }
0x351b   : > { %5687 = shalt.err (!%p5684_p3)
}
0x351c   : > { %s5688_s0 = scalar_lea.hbm %s6598_s3, 128  ;;  %s5692_s16 = scalar_lea.hbm %s6749_s2, 256 }
0x351d   : > { %p5689_p4 = scmp.ne.s32.totalorder %s6598_s3, %s5688_s0  ;;  %p5693_p9 = scmp.lt.s32.totalorder %s6598_s3, %s6749_s2 }
0x351e   : > { %p5694_p10 = scmp.lt.s32.totalorder %s5692_s16, %s5688_s0 }
0x351f   : > { %p5690_p7 = pnand %p5689_p4, %p5972_p5 }
0x3520   : > { %p5695_p11 = por %p5694_p10, %p5693_p9 }
0x3521   : > { %p5691_p8 = pneg %p5690_p7 }
0x3523   : > { %p5696_p12 = pnand %p5695_p11, %p5691_p8 }
0x3525   : > { %5699 = shalt.err (!%p5696_p12)
}
0x3526   : > { %5480 = dma.vmem_to_hbm [thread:$0]  (%p5972_p5), %s6600_s1, 128, %s6598_s3, %s4622_s17   ;;  %v5479_v29 = vpop.f32.mrf.mxu1 }
0x3527 PF: > { %s6751_s7 = sld [smem:[#allocation28_spill]] }
0x3528   : > { %s6752_s23 = sld [smem:[#allocation26_spill]] }
0x352d   : > { %p5486_p13 = scmp.ge.s32.totalorder %s6751_s7, 2 }
0x352e   : > { %s4647_s5 = sand.u32 1, %s6752_s23  }
0x352f   : > { %p5483_p0 = pnand %p5486_p13, %p5976_p6  ;;  %s4648_s11 = scalar_lea.sflag [#allocation3], %s4647_s5 }
0x3531   : > { %p5484_p1 = pneg %p5483_p0 }
0x3533   : > { %5717 = dma.done.wait (%p5484_p1), %s4648_s11, 128  }
0x3534   : > { %5719 = vsyncadd (%p5484_p1), %s4648_s11, 4294967168  ;;  %s6754_s15 = sld [smem:[#allocation30_spill]]  ;;  %s6757_s7 = smov %s5726_s10 }
0x3535   : > { %s6755_s0 = sld [smem:[#allocation27_spill]] }
0x3536   : > { %s6756_s11 = sld [smem:[#allocation31_spill]] }
0x353a   : > { %p69_p2 = scmp.ge.s32.totalorder %s6754_s15, 4  }
0x353b   : > { %s6758_s10 = smov %s6755_s0 }
0x353c   :  { %71 = sbr.rel (!%p69_p2) target bundleno = 64 (0x40), region = 229 }
0x3541   :  { %4653 = vsyncpa [#allocation3], 1 }
0x3542   :  { %4655 = vsyncpa [#allocation3 + $0x1], 1 }

</bundles_post_ra>
